<compile_context>
chip_gen: v7x
topology: tpu7x:2x2x1
jax: 0.10.0
libtpu: 0.0.40
codegen_flags: <defaults>
</compile_context>

<pallas_src>
import jax
import jax.numpy as jnp
from jax.experimental import pallas as pl
from jax.experimental.pallas import tpu as pltpu

EPS = 1e-5
LANE = 128
MATMUL_DTYPE = jnp.bfloat16           # MXU input / intermediate-activation dtype
VMEM_LIMIT = 32 * 1024 * 1024         # safe on v5e / v6e / v7x

_ARB = pltpu.CompilerParams(dimension_semantics=("arbitrary",),
                            vmem_limit_bytes=VMEM_LIMIT)
_PAR = pltpu.CompilerParams(dimension_semantics=("parallel",),
                            vmem_limit_bytes=VMEM_LIMIT)


# ------------------------------- helpers -----------------------------------

def _rup(x, m):
    return (x + m - 1) // m * m


def _pad2(a, rows, cols):
    return jnp.pad(a, ((0, rows - a.shape[0]), (0, cols - a.shape[1])))


def _row(v, cols, fill=0.0):
    v = v.reshape(1, -1).astype(jnp.float32)
    return jnp.pad(v, ((0, 0), (0, cols - v.shape[1])), constant_values=fill)


def _pick_tile(m, cap=512):
    """Row tile that exactly divides the 8-rounded row count (no pad copies)."""
    mr = _rup(m, 8)
    for t in (512, 256, 128, 64, 32, 16, 8):
        if t <= cap and mr % t == 0:
            return t, mr
    return 8, mr


def _bn_affine(s_ref, g_ref, b_ref, inv_m):
    """Per-channel (scale, shift) for training-mode BN from (sum, sumsq)."""
    mean = s_ref[0:1, :] * inv_m
    var = s_ref[1:2, :] * inv_m - mean * mean
    scale = jax.lax.rsqrt(var + EPS) * g_ref[...]
    shift = b_ref[...] - mean * scale
    return scale, shift


# ----------------------------- Pallas kernels -------------------------------

def _conv1_kernel(x_ref, w1_ref, y1_ref, s1_ref):
    """y1 = x @ w1 (1x1 conv), stored bf16; accumulate BN1 sum / sumsq."""
    @pl.when(pl.program_id(0) == 0)
    def _init():
        s1_ref[...] = jnp.zeros_like(s1_ref)

    y = jnp.dot(x_ref[...], w1_ref[...], preferred_element_type=jnp.float32)
    yb = y.astype(MATMUL_DTYPE)
    y1_ref[...] = yb
    # zero-padded rows of x give y == 0, so they do not perturb the stats
    yf = yb.astype(jnp.float32)
    s1_ref[0:1, :] += jnp.sum(yf, axis=0, keepdims=True)
    s1_ref[1:2, :] += jnp.sum(yf * yf, axis=0, keepdims=True)


def _make_conv2_kernel(H, W, Ho, Wo, stride, inv_m1):
    """Per-image: BN1+ReLU -> 3x3 conv as ONE im2col matmul -> y2 + BN2 stats."""
    Hs, Ws = stride * Ho, stride * Wo          # tap slice extent (>= H, W)

    def kernel(y1_ref, s1_ref, g1_ref, b1_ref, w2_ref,
               y2_ref, s2_ref, pad_ref, col_ref):
        C = pad_ref.shape[-1]

        @pl.when(pl.program_id(0) == 0)
        def _init():
            s2_ref[...] = jnp.zeros_like(s2_ref)
            pad_ref[...] = jnp.zeros_like(pad_ref)     # zero border == SAME pad

        # BN1 normalize + ReLU (fused; normalized activation never hits HBM).
        scale1, shift1 = _bn_affine(s1_ref, g1_ref, b1_ref, inv_m1)
        h = jnp.maximum(y1_ref[0].astype(jnp.float32) * scale1 + shift1, 0.0)
        pad_ref[pl.ds(1, H), pl.ds(1, W), :] = h.astype(MATMUL_DTYPE)

        # Build the (Ho*Wo, 9*C) bf16 im2col slab: one contiguous tap slice per
        # (di, dj); stride > 1 uses a reshape + static phase select (no strided
        # ref indexing).
        for di in range(3):
            for dj in range(3):
                t = 3 * di + dj
                tap = pad_ref[pl.ds(di, Hs), pl.ds(dj, Ws), :]
                if stride > 1:
                    tap = tap.reshape(Ho, stride, Wo, stride, C)[:, 0, :, 0, :]
                col_ref[:, pl.ds(t * C, C)] = tap.reshape(Ho * Wo, C)

        # Single large-K MXU matmul accumulates all 9 taps inside the MXU.
        acc = jnp.dot(col_ref[...], w2_ref[...],
                      preferred_element_type=jnp.float32)
        yb = acc.astype(MATMUL_DTYPE)
        y2_ref[...] = yb.reshape(1, Ho, Wo, C)
        yf = yb.astype(jnp.float32)
        s2_ref[0:1, :] += jnp.sum(yf, axis=0, keepdims=True)
        s2_ref[1:2, :] += jnp.sum(yf * yf, axis=0, keepdims=True)

    return kernel


def _make_conv3_kernel(tm, m_valid, inv_m2, has_proj):
    """Row-tiled: BN2+ReLU -> conv3 (1x1) + BN3 stats; fused projection
    shortcut 1x1 matmul + its BN stats when has_proj."""

    def kernel(*refs):
        if has_proj:
            (y2_ref, s2_ref, g2_ref, b2_ref, w3_ref, xs_ref, ws_ref,
             y3_ref, s3_ref, ys_ref, ss_ref) = refs
        else:
            (y2_ref, s2_ref, g2_ref, b2_ref, w3_ref, y3_ref, s3_ref) = refs
        i = pl.program_id(0)

        @pl.when(i == 0)
        def _init():
            s3_ref[...] = jnp.zeros_like(s3_ref)
            if has_proj:
                ss_ref[...] = jnp.zeros_like(ss_ref)

        scale2, shift2 = _bn_affine(s2_ref, g2_ref, b2_ref, inv_m2)
        h = jnp.maximum(y2_ref[...].astype(jnp.float32) * scale2 + shift2, 0.0)
        y = jnp.dot(h.astype(MATMUL_DTYPE), w3_ref[...],
                    preferred_element_type=jnp.float32)
        yb = y.astype(MATMUL_DTYPE)
        y3_ref[...] = yb

        # zero-padded rows are NOT zero after BN2 -> mask them out of the stats
        rows = i * tm + jax.lax.broadcasted_iota(jnp.int32, (tm, 1), 0)
        mask = rows < m_valid
        yf = jnp.where(mask, yb.astype(jnp.float32), 0.0)
        s3_ref[0:1, :] += jnp.sum(yf, axis=0, keepdims=True)
        s3_ref[1:2, :] += jnp.sum(yf * yf, axis=0, keepdims=True)

        if has_proj:
            sc = jnp.dot(xs_ref[...], ws_ref[...],
                         preferred_element_type=jnp.float32)
            scb = sc.astype(MATMUL_DTYPE)
            ys_ref[...] = scb
            sf = jnp.where(mask, scb.astype(jnp.float32), 0.0)
            ss_ref[0:1, :] += jnp.sum(sf, axis=0, keepdims=True)
            ss_ref[1:2, :] += jnp.sum(sf * sf, axis=0, keepdims=True)

    return kernel


def _make_final_proj_kernel(inv_m2):
    """out = relu(BN3(y3) + BN_s(ys)) — projection shortcut."""
    def kernel(y3_ref, s3_ref, g3_ref, b3_ref, ys_ref, ss_ref, gs_ref, bs_ref,
               o_ref):
        sc3, sh3 = _bn_affine(s3_ref, g3_ref, b3_ref, inv_m2)
        scs, shs = _bn_affine(ss_ref, gs_ref, bs_ref, inv_m2)
        o_ref[...] = jnp.maximum(
            (y3_ref[...].astype(jnp.float32) * sc3 + sh3)
            + (ys_ref[...].astype(jnp.float32) * scs + shs), 0.0)
    return kernel


def _make_final_id_kernel(inv_m2):
    """out = relu(BN3(y3) + x) — identity shortcut."""
    def kernel(y3_ref, s3_ref, g3_ref, b3_ref, x_ref, o_ref):
        sc3, sh3 = _bn_affine(s3_ref, g3_ref, b3_ref, inv_m2)
        o_ref[...] = jnp.maximum(
            y3_ref[...].astype(jnp.float32) * sc3 + sh3 + x_ref[...], 0.0)
    return kernel


# ------------------------------- JAX glue -----------------------------------

def bottleneck_forward_pallas(x_nchw, p, stride):
    x = jnp.transpose(x_nchw, (0, 2, 3, 1)).astype(jnp.float32)    # -> NHWC
    N, H, W, Cin = x.shape
    Cmid = p["w1"].shape[1]
    Cout = p["w3"].shape[1]
    Ho = (H - 1) // stride + 1
    Wo = (W - 1) // stride + 1
    M1, M2 = N * H * W, N * Ho * Wo
    Cinp, Cmidp, Coutp = _rup(Cin, LANE), _rup(Cmid, LANE), _rup(Cout, LANE)
    has_proj = (stride != 1) or (Cin != Cout)

    # Lane-dense (multiple-of-128) channel padding.  Conv biases dropped:
    # training-mode BN subtracts the batch mean, so a per-channel constant is
    # an exact no-op on the output.
    w1 = _pad2(p["w1"], Cinp, Cmidp).astype(MATMUL_DTYPE)
    w2 = jnp.pad(p["w2"],
                 ((0, 0), (0, 0), (0, Cmidp - Cmid), (0, Cmidp - Cmid)))
    w2col = w2.reshape(9 * Cmidp, Cmidp).astype(MATMUL_DTYPE)      # tap-major K
    w3 = _pad2(p["w3"], Cmidp, Coutp).astype(MATMUL_DTYPE)
    g1, be1 = _row(p["g1"], Cmidp, 1.0), _row(p["be1"], Cmidp)
    g2, be2 = _row(p["g2"], Cmidp, 1.0), _row(p["be2"], Cmidp)
    g3, be3 = _row(p["g3"], Coutp, 1.0), _row(p["be3"], Coutp)

    xp = jnp.pad(x, ((0, 0), (0, 0), (0, 0), (0, Cinp - Cin)))     # f32 NHWC
    x_bf = xp.astype(MATMUL_DTYPE)

    # -------------- pass 1: conv1 (1x1) + BN1 stats (row-tiled) --------------
    TM1, M1r = _pick_tile(M1)
    x1 = x_bf.reshape(M1, Cinp)
    if M1r != M1:
        x1 = jnp.pad(x1, ((0, M1r - M1), (0, 0)))
    y1, s1 = pl.pallas_call(
        _conv1_kernel,
        grid=(M1r // TM1,),
        in_specs=[pl.BlockSpec((TM1, Cinp), lambda i: (i, 0)),
                  pl.BlockSpec((Cinp, Cmidp), lambda i: (0, 0))],
        out_specs=[pl.BlockSpec((TM1, Cmidp), lambda i: (i, 0)),
                   pl.BlockSpec((2, Cmidp), lambda i: (0, 0))],
        out_shape=[jax.ShapeDtypeStruct((M1r, Cmidp), MATMUL_DTYPE),
                   jax.ShapeDtypeStruct((2, Cmidp), jnp.float32)],
        compiler_params=_ARB,
    )(x1, w1)

    # ---------- pass 2: BN1+ReLU -> 3x3 conv (im2col) + BN2 stats ------------
    y1_img = y1[:M1].reshape(N, H, W, Cmidp)
    Hs, Ws = stride * Ho, stride * Wo
    y2, s2 = pl.pallas_call(
        _make_conv2_kernel(H, W, Ho, Wo, stride, 1.0 / M1),
        grid=(N,),
        in_specs=[pl.BlockSpec((1, H, W, Cmidp), lambda n: (n, 0, 0, 0)),
                  pl.BlockSpec((2, Cmidp), lambda n: (0, 0)),
                  pl.BlockSpec((1, Cmidp), lambda n: (0, 0)),
                  pl.BlockSpec((1, Cmidp), lambda n: (0, 0)),
                  pl.BlockSpec((9 * Cmidp, Cmidp), lambda n: (0, 0))],
        out_specs=[pl.BlockSpec((1, Ho, Wo, Cmidp), lambda n: (n, 0, 0, 0)),
                   pl.BlockSpec((2, Cmidp), lambda n: (0, 0))],
        out_shape=[jax.ShapeDtypeStruct((N, Ho, Wo, Cmidp), MATMUL_DTYPE),
                   jax.ShapeDtypeStruct((2, Cmidp), jnp.float32)],
        scratch_shapes=[pltpu.VMEM((Hs + 2, Ws + 2, Cmidp), MATMUL_DTYPE),
                        pltpu.VMEM((Ho * Wo, 9 * Cmidp), MATMUL_DTYPE)],
        compiler_params=_ARB,
    )(y1_img, s1, g1, be1, w2col)

    # -- pass 3: BN2+ReLU -> conv3 (1x1) + BN3 stats (+ fused proj shortcut) --
    TM, M2r = _pick_tile(M2)
    y2f = y2.reshape(M2, Cmidp)
    if M2r != M2:
        y2f = jnp.pad(y2f, ((0, M2r - M2), (0, 0)))
    args = [y2f, s2, g2, be2, w3]
    in_specs = [pl.BlockSpec((TM, Cmidp), lambda i: (i, 0)),
                pl.BlockSpec((2, Cmidp), lambda i: (0, 0)),
                pl.BlockSpec((1, Cmidp), lambda i: (0, 0)),
                pl.BlockSpec((1, Cmidp), lambda i: (0, 0)),
                pl.BlockSpec((Cmidp, Coutp), lambda i: (0, 0))]
    out_specs = [pl.BlockSpec((TM, Coutp), lambda i: (i, 0)),
                 pl.BlockSpec((2, Coutp), lambda i: (0, 0))]
    out_shape = [jax.ShapeDtypeStruct((M2r, Coutp), MATMUL_DTYPE),
                 jax.ShapeDtypeStruct((2, Coutp), jnp.float32)]
    if has_proj:
        ws = _pad2(p["ws"], Cinp, Coutp).astype(MATMUL_DTYPE)
        xs = x_bf[:, ::stride, ::stride, :].reshape(M2, Cinp)
        if M2r != M2:
            xs = jnp.pad(xs, ((0, M2r - M2), (0, 0)))
        args += [xs, ws]
        in_specs += [pl.BlockSpec((TM, Cinp), lambda i: (i, 0)),
                     pl.BlockSpec((Cinp, Coutp), lambda i: (0, 0))]
        out_specs += [pl.BlockSpec((TM, Coutp), lambda i: (i, 0)),
                      pl.BlockSpec((2, Coutp), lambda i: (0, 0))]
        out_shape += [jax.ShapeDtypeStruct((M2r, Coutp), MATMUL_DTYPE),
                      jax.ShapeDtypeStruct((2, Coutp), jnp.float32)]
    outs = pl.pallas_call(
        _make_conv3_kernel(TM, M2, 1.0 / M2, has_proj),
        grid=(M2r // TM,),
        in_specs=in_specs, out_specs=out_specs, out_shape=out_shape,
        compiler_params=_ARB,
    )(*args)
    if has_proj:
        y3, s3, ys, ss = outs
    else:
        y3, s3 = outs

    # ------------ pass 4: BN3 (+ BN_s / + identity) + add + ReLU -------------
    if has_proj:
        gs, bes = _row(p["gs"], Coutp, 1.0), _row(p["bes"], Coutp)
        out = pl.pallas_call(
            _make_final_proj_kernel(1.0 / M2),
            grid=(M2r // TM,),
            in_specs=[pl.BlockSpec((TM, Coutp), lambda i: (i, 0)),
                      pl.BlockSpec((2, Coutp), lambda i: (0, 0)),
                      pl.BlockSpec((1, Coutp), lambda i: (0, 0)),
                      pl.BlockSpec((1, Coutp), lambda i: (0, 0)),
                      pl.BlockSpec((TM, Coutp), lambda i: (i, 0)),
                      pl.BlockSpec((2, Coutp), lambda i: (0, 0)),
                      pl.BlockSpec((1, Coutp), lambda i: (0, 0)),
                      pl.BlockSpec((1, Coutp), lambda i: (0, 0))],
            out_specs=pl.BlockSpec((TM, Coutp), lambda i: (i, 0)),
            out_shape=jax.ShapeDtypeStruct((M2r, Coutp), jnp.float32),
            compiler_params=_PAR,
        )(y3, s3, g3, be3, ys, ss, gs, bes)
    else:
        # identity shortcut: stride == 1 and Cin == Cout (=> M2 == M1,
        # Cinp == Coutp); add the raw f32 input.
        x_id = xp.reshape(M1, Cinp)
        if M2r != M2:
            x_id = jnp.pad(x_id, ((0, M2r - M2), (0, 0)))
        out = pl.pallas_call(
            _make_final_id_kernel(1.0 / M2),
            grid=(M2r // TM,),
            in_specs=[pl.BlockSpec((TM, Coutp), lambda i: (i, 0)),
                      pl.BlockSpec((2, Coutp), lambda i: (0, 0)),
                      pl.BlockSpec((1, Coutp), lambda i: (0, 0)),
                      pl.BlockSpec((1, Coutp), lambda i: (0, 0)),
                      pl.BlockSpec((TM, Coutp), lambda i: (i, 0))],
            out_specs=pl.BlockSpec((TM, Coutp), lambda i: (i, 0)),
            out_shape=jax.ShapeDtypeStruct((M2r, Coutp), jnp.float32),
            compiler_params=_PAR,
        )(y3, s3, g3, be3, x_id)

    out = out[:M2, :Cout].reshape(N, Ho, Wo, Cout)
    return jnp.transpose(out, (0, 3, 1, 2))                         # -> NCHW


# --------------------------- pure-JAX references ----------------------------

def bottleneck_forward_ref(x_nchw, p, stride, matmul_dtype=jnp.float32,
                           use_bias=True, round_io=False):
    x = jnp.transpose(x_nchw, (0, 2, 3, 1)).astype(jnp.float32)
    Cin = x.shape[-1]
    Cmid = p["w1"].shape[1]
    Cout = p["w3"].shape[1]

    def conv(h, w_hwio, b, s, pad):
        y = jax.lax.conv_general_dilated(
            h.astype(matmul_dtype), w_hwio.astype(matmul_dtype), (s, s),
            [(pad, pad), (pad, pad)],
            dimension_numbers=("NHWC", "HWIO", "NHWC"),
            preferred_element_type=jnp.float32)
        if use_bias:
            y = y + b
        if round_io:
            y = y.astype(jnp.bfloat16).astype(jnp.float32)
        return y

    def bn(y, g, b):
        m = jnp.mean(y, axis=(0, 1, 2), keepdims=True)
        v = jnp.mean((y - m) ** 2, axis=(0, 1, 2), keepdims=True)
        return (y - m) * jax.lax.rsqrt(v + EPS) * g + b

    h = jax.nn.relu(bn(conv(x, p["w1"].reshape(1, 1, Cin, Cmid), p["b1"], 1, 0),
                       p["g1"], p["be1"]))
    h = jax.nn.relu(bn(conv(h, p["w2"], p["b2"], stride, 1), p["g2"], p["be2"]))
    h = bn(conv(h, p["w3"].reshape(1, 1, Cmid, Cout), p["b3"], 1, 0),
           p["g3"], p["be3"])
    if stride != 1 or Cin != Cout:
        s = bn(conv(x, p["ws"].reshape(1, 1, Cin, Cout), p["bs"], stride, 0),
               p["gs"], p["bes"])
    else:
        s = x
    return jnp.transpose(jax.nn.relu(h + s), (0, 3, 1, 2))


# --------------------------------- params -----------------------------------

def init_params(key, cin, cmid, cout):
    ks = jax.random.split(key, 16)
    f32 = jnp.float32
    return {
        "w1": 0.2 * jax.random.normal(ks[0], (cin, cmid), f32),
        "b1": 0.1 * jax.random.normal(ks[1], (cmid,), f32),
        "g1": 1.0 + 0.1 * jax.random.normal(ks[2], (cmid,), f32),
        "be1": 0.1 * jax.random.normal(ks[3], (cmid,), f32),
        "w2": 0.2 * jax.random.normal(ks[4], (3, 3, cmid, cmid), f32),
        "b2": 0.1 * jax.random.normal(ks[5], (cmid,), f32),
        "g2": 1.0 + 0.1 * jax.random.normal(ks[6], (cmid,), f32),
        "be2": 0.1 * jax.random.normal(ks[7], (cmid,), f32),
        "w3": 0.2 * jax.random.normal(ks[8], (cmid, cout), f32),
        "b3": 0.1 * jax.random.normal(ks[9], (cout,), f32),
        "g3": 1.0 + 0.1 * jax.random.normal(ks[10], (cout,), f32),
        "be3": 0.1 * jax.random.normal(ks[11], (cout,), f32),
        "ws": 0.2 * jax.random.normal(ks[12], (cin, cout), f32),
        "bs": 0.1 * jax.random.normal(ks[13], (cout,), f32),
        "gs": 1.0 + 0.1 * jax.random.normal(ks[14], (cout,), f32),
        "bes": 0.1 * jax.random.normal(ks[15], (cout,), f32),
    }


if __name__ == "__main__":
    def check(x, params, stride, name):
        fwd = jax.jit(bottleneck_forward_pallas, static_argnums=2)
        out = jax.block_until_ready(fwd(x, params, stride))
        N, Cin, H, W = x.shape
        Cout = params["w3"].shape[1]
        Ho = (H - 1) // stride + 1
        Wo = (W - 1) // stride + 1
        assert out.shape == (N, Cout, Ho, Wo), (name, out.shape)

        # Tight check vs a reference with the SAME numeric policy (bf16 matmul
        # inputs, bf16-rounded conv outputs, biases dropped — exact no-op
        # under training-mode BN).
        ref_pol = bottleneck_forward_ref(x, params, stride,
                                         matmul_dtype=MATMUL_DTYPE,
                                         use_bias=False, round_io=True)
        if not jnp.allclose(out, ref_pol, rtol=1e-2, atol=1e-2):
            raise AssertionError(
                f"{name}: mismatch vs bf16-policy reference, max abs err = "
                f"{float(jnp.max(jnp.abs(out - ref_pol)))}")

        # Loose check vs the exact f32 PyTorch-semantics reference.
        ref_f32 = bottleneck_forward_ref(x, params, stride,
                                         matmul_dtype=jnp.float32,
                                         use_bias=True, round_io=False)
        if not jnp.allclose(out, ref_f32, rtol=1e-1, atol=1e-1):
            raise AssertionError(
                f"{name}: mismatch vs f32 reference, max abs err = "
                f"{float(jnp.max(jnp.abs(out - ref_f32)))}")

    key = jax.random.PRNGKey(0)
    k1, k2, k3, k4 = jax.random.split(key, 4)

    # projection-shortcut / stride-2 block (channel_expansion = 4)
    x_a = jax.random.normal(k1, (2, 4, 16, 16), jnp.float32)
    p_a = init_params(k2, 4, 4, 16)
    check(x_a, p_a, 2, "proj/stride2")

    # identity-shortcut / stride-1 block (Cin == Cout)
    x_b = jax.random.normal(k3, (2, 16, 8, 8), jnp.float32)
    p_b = init_params(k4, 16, 4, 16)
    check(x_b, p_b, 1, "identity/stride1")

    print("KERNEL_OK")
</pallas_src>

<mosaic_0001>
module attributes {stable_mosaic.version = 11 : i64} {
  func.func @_conv1_kernel(%arg0: i32, %arg1: memref<512x128xbf16, #tpu.memory_space<vmem>>, %arg2: memref<128x128xbf16, #tpu.memory_space<vmem>>, %arg3: memref<512x128xbf16, #tpu.memory_space<vmem>>, %arg4: memref<2x128xf32, #tpu.memory_space<vmem>>) attributes {dimension_semantics = [#tpu.dimension_semantics<arbitrary>], iteration_bounds = array<i64: 1>, scalar_prefetch = 0 : i64, scratch_operands = 0 : i64, tpu.core_type = #tpu.core_type<tc>, window_params = [{transform_indices = @transform_0, window_bounds = array<i64: 512, 128>}, {pipeline_mode = #tpu.pipeline_mode<synchronous>, transform_indices = @transform_1, window_bounds = array<i64: 128, 128>}, {transform_indices = @transform_2, window_bounds = array<i64: 512, 128>}, {pipeline_mode = #tpu.pipeline_mode<synchronous>, transform_indices = @transform_3, window_bounds = array<i64: 2, 128>}]} {
    %c0_i32 = arith.constant 0 : i32
    %0 = arith.cmpi eq, %arg0, %c0_i32 : i32
    %1 = arith.extui %0 : i1 to i32
    %c0_i32_0 = arith.constant 0 : i32
    %2 = arith.cmpi ne, %1, %c0_i32_0 : i32
    scf.if %2 {
      %cst_15 = arith.constant 0.000000e+00 : f32
      %20 = vector.broadcast %cst_15 : f32 to vector<2x128xf32>
      %c0_16 = arith.constant 0 : index
      %c0_17 = arith.constant 0 : index
      %21 = vector.load %arg4[%c0_16, %c0_17] : memref<2x128xf32, #tpu.memory_space<vmem>>, vector<2x128xf32>
      tpu.vector_store %arg4[%c0_16, %c0_17], %20 {strides = array<i32>} : memref<2x128xf32, #tpu.memory_space<vmem>>, vector<2x128xf32>,
    } else {
    }
    %c0 = arith.constant 0 : index
    %c0_1 = arith.constant 0 : index
    %3 = vector.load %arg1[%c0, %c0_1] : memref<512x128xbf16, #tpu.memory_space<vmem>>, vector<512x128xbf16>
    %c0_2 = arith.constant 0 : index
    %c0_3 = arith.constant 0 : index
    %4 = vector.load %arg2[%c0_2, %c0_3] : memref<128x128xbf16, #tpu.memory_space<vmem>>, vector<128x128xbf16>
    %cst = arith.constant dense<0.000000e+00> : vector<512x128xf32>
    %5 = tpu.matmul %3, %4, %cst {dimension_numbers = #tpu.dot_dimension_numbers<[1], [0], [0], [1], [0, 0, 1, 1], [], []>} : vector<512x128xbf16>, vector<128x128xbf16>, vector<512x128xf32> -> vector<512x128xf32>
    %6 = arith.truncf %5 : vector<512x128xf32> to vector<512x128xbf16>
    %c0_4 = arith.constant 0 : index
    %c0_5 = arith.constant 0 : index
    %7 = vector.load %arg3[%c0_4, %c0_5] : memref<512x128xbf16, #tpu.memory_space<vmem>>, vector<512x128xbf16>
    tpu.vector_store %arg3[%c0_4, %c0_5], %6 {strides = array<i32>} : memref<512x128xbf16, #tpu.memory_space<vmem>>, vector<512x128xbf16>,
    %8 = arith.extf %6 : vector<512x128xbf16> to vector<512x128xf32>
    %c0_6 = arith.constant 0 : index
    %c0_7 = arith.constant 0 : index
    %9 = vector.load %arg4[%c0_6, %c0_7] : memref<2x128xf32, #tpu.memory_space<vmem>>, vector<1x128xf32>
    %cst_8 = arith.constant dense<0.000000e+00> : vector<128xf32>
    %10 = vector.multi_reduction <add>, %8, %cst_8 [0] : vector<512x128xf32> to vector<128xf32>
    %11 = vector.shape_cast %10 : vector<128xf32> to vector<1x128xf32>
    %12 = arith.addf %9, %11 : vector<1x128xf32>
    %c0_9 = arith.constant 0 : index
    %c0_10 = arith.constant 0 : index
    %13 = vector.load %arg4[%c0_9, %c0_10] : memref<2x128xf32, #tpu.memory_space<vmem>>, vector<1x128xf32>
    tpu.vector_store %arg4[%c0_9, %c0_10], %12 {strides = array<i32>} : memref<2x128xf32, #tpu.memory_space<vmem>>, vector<1x128xf32>,
    %c1 = arith.constant 1 : index
    %c0_11 = arith.constant 0 : index
    %14 = vector.load %arg4[%c1, %c0_11] : memref<2x128xf32, #tpu.memory_space<vmem>>, vector<1x128xf32>
    %15 = arith.mulf %8, %8 : vector<512x128xf32>
    %cst_12 = arith.constant dense<0.000000e+00> : vector<128xf32>
    %16 = vector.multi_reduction <add>, %15, %cst_12 [0] : vector<512x128xf32> to vector<128xf32>
    %17 = vector.shape_cast %16 : vector<128xf32> to vector<1x128xf32>
    %18 = arith.addf %14, %17 : vector<1x128xf32>
    %c1_13 = arith.constant 1 : index
    %c0_14 = arith.constant 0 : index
    %19 = vector.load %arg4[%c1_13, %c0_14] : memref<2x128xf32, #tpu.memory_space<vmem>>, vector<1x128xf32>
    tpu.vector_store %arg4[%c1_13, %c0_14], %18 {strides = array<i32>} : memref<2x128xf32, #tpu.memory_space<vmem>>, vector<1x128xf32>,
    return
  }
  func.func @transform_0(%arg0: i32) -> (i32, i32) {
    %c0_i32 = arith.constant 0 : i32
    %c0_i32_0 = arith.constant 0 : i32
    return %arg0, %c0_i32 : i32, i32
  }
  func.func @transform_1(%arg0: i32) -> (i32, i32) {
    %c0_i32 = arith.constant 0 : i32
    %c0_i32_0 = arith.constant 0 : i32
    %c0_i32_1 = arith.constant 0 : i32
    return %c0_i32, %c0_i32_0 : i32, i32
  }
  func.func @transform_2(%arg0: i32) -> (i32, i32) {
    %c0_i32 = arith.constant 0 : i32
    %c0_i32_0 = arith.constant 0 : i32
    return %arg0, %c0_i32 : i32, i32
  }
  func.func @transform_3(%arg0: i32) -> (i32, i32) {
    %c0_i32 = arith.constant 0 : i32
    %c0_i32_0 = arith.constant 0 : i32
    %c0_i32_1 = arith.constant 0 : i32
    return %c0_i32, %c0_i32_0 : i32, i32
  }
}

module attributes {stable_mosaic.version = 11 : i64} {
  func.func @kernel(%arg0: i32, %arg1: memref<1x16x16x128xbf16, #tpu.memory_space<vmem>>, %arg2: memref<2x128xf32, #tpu.memory_space<vmem>>, %arg3: memref<1x128xf32, #tpu.memory_space<vmem>>, %arg4: memref<1x128xf32, #tpu.memory_space<vmem>>, %arg5: memref<1152x128xbf16, #tpu.memory_space<vmem>>, %arg6: memref<1x8x8x128xbf16, #tpu.memory_space<vmem>>, %arg7: memref<2x128xf32, #tpu.memory_space<vmem>>, %arg8: memref<18x18x128xbf16, #tpu.memory_space<vmem>>, %arg9: memref<64x1152xbf16, #tpu.memory_space<vmem>>) attributes {dimension_semantics = [#tpu.dimension_semantics<arbitrary>], iteration_bounds = array<i64: 2>, scalar_prefetch = 0 : i64, scratch_operands = 2 : i64, tpu.core_type = #tpu.core_type<tc>, window_params = [{transform_indices = @transform_0, window_bounds = array<i64: 1, 16, 16, 128>}, {pipeline_mode = #tpu.pipeline_mode<synchronous>, transform_indices = @transform_1, window_bounds = array<i64: 2, 128>}, {pipeline_mode = #tpu.pipeline_mode<synchronous>, transform_indices = @transform_2, window_bounds = array<i64: 1, 128>}, {pipeline_mode = #tpu.pipeline_mode<synchronous>, transform_indices = @transform_3, window_bounds = array<i64: 1, 128>}, {pipeline_mode = #tpu.pipeline_mode<synchronous>, transform_indices = @transform_4, window_bounds = array<i64: 1152, 128>}, {transform_indices = @transform_5, window_bounds = array<i64: 1, 8, 8, 128>}, {pipeline_mode = #tpu.pipeline_mode<synchronous>, transform_indices = @transform_6, window_bounds = array<i64: 2, 128>}]} {
    %c0_i32 = arith.constant 0 : i32
    %0 = arith.cmpi eq, %arg0, %c0_i32 : i32
    %1 = arith.extui %0 : i1 to i32
    %c0_i32_0 = arith.constant 0 : i32
    %2 = arith.cmpi ne, %1, %c0_i32_0 : i32
    scf.if %2 {
      %cst_72 = arith.constant 0.000000e+00 : f32
      %104 = vector.broadcast %cst_72 : f32 to vector<2x128xf32>
      %c0_73 = arith.constant 0 : index
      %c0_74 = arith.constant 0 : index
      %105 = vector.load %arg7[%c0_73, %c0_74] : memref<2x128xf32, #tpu.memory_space<vmem>>, vector<2x128xf32>
      tpu.vector_store %arg7[%c0_73, %c0_74], %104 {strides = array<i32>} : memref<2x128xf32, #tpu.memory_space<vmem>>, vector<2x128xf32>,
      %cst_75 = arith.constant 0.000000e+00 : bf16
      %106 = vector.broadcast %cst_75 : bf16 to vector<18x18x128xbf16>
      %c0_76 = arith.constant 0 : index
      %c0_77 = arith.constant 0 : index
      %c0_78 = arith.constant 0 : index
      %107 = vector.load %arg8[%c0_76, %c0_77, %c0_78] : memref<18x18x128xbf16, #tpu.memory_space<vmem>>, vector<18x18x128xbf16>
      tpu.vector_store %arg8[%c0_76, %c0_77, %c0_78], %106 {strides = array<i32>} : memref<18x18x128xbf16, #tpu.memory_space<vmem>>, vector<18x18x128xbf16>,
    } else {
    }
    %c0 = arith.constant 0 : index
    %c0_1 = arith.constant 0 : index
    %3 = vector.load %arg2[%c0, %c0_1] : memref<2x128xf32, #tpu.memory_space<vmem>>, vector<1x128xf32>
    %cst = arith.constant 0.001953125 : f32
    %4 = vector.broadcast %cst : f32 to vector<1x128xf32>
    %5 = arith.mulf %3, %4 : vector<1x128xf32>
    %c1 = arith.constant 1 : index
    %c0_2 = arith.constant 0 : index
    %6 = vector.load %arg2[%c1, %c0_2] : memref<2x128xf32, #tpu.memory_space<vmem>>, vector<1x128xf32>
    %cst_3 = arith.constant 0.001953125 : f32
    %7 = vector.broadcast %cst_3 : f32 to vector<1x128xf32>
    %8 = arith.mulf %6, %7 : vector<1x128xf32>
    %9 = arith.mulf %5, %5 : vector<1x128xf32>
    %10 = arith.subf %8, %9 : vector<1x128xf32>
    %cst_4 = arith.constant 9.99999974E-6 : f32
    %11 = vector.broadcast %cst_4 : f32 to vector<1x128xf32>
    %12 = arith.addf %10, %11 : vector<1x128xf32>
    %13 = math.rsqrt %12 : vector<1x128xf32>
    %c0_5 = arith.constant 0 : index
    %c0_6 = arith.constant 0 : index
    %14 = vector.load %arg3[%c0_5, %c0_6] : memref<1x128xf32, #tpu.memory_space<vmem>>, vector<1x128xf32>
    %15 = arith.mulf %13, %14 : vector<1x128xf32>
    %c0_7 = arith.constant 0 : index
    %c0_8 = arith.constant 0 : index
    %16 = vector.load %arg4[%c0_7, %c0_8] : memref<1x128xf32, #tpu.memory_space<vmem>>, vector<1x128xf32>
    %17 = arith.mulf %5, %15 : vector<1x128xf32>
    %18 = arith.subf %16, %17 : vector<1x128xf32>
    %c0_9 = arith.constant 0 : index
    %c0_10 = arith.constant 0 : index
    %c0_11 = arith.constant 0 : index
    %c0_12 = arith.constant 0 : index
    %19 = vector.load %arg1[%c0_9, %c0_10, %c0_11, %c0_12] : memref<1x16x16x128xbf16, #tpu.memory_space<vmem>>, vector<1x16x16x128xbf16>
    %20 = vector.shape_cast %19 : vector<1x16x16x128xbf16> to vector<16x16x128xbf16>
    %21 = arith.extf %20 : vector<16x16x128xbf16> to vector<16x16x128xf32>
    %22 = vector.shape_cast %15 : vector<1x128xf32> to vector<1x1x128xf32>
    %23 = vector.broadcast %22 : vector<1x1x128xf32> to vector<16x16x128xf32>
    %24 = arith.mulf %21, %23 : vector<16x16x128xf32>
    %25 = vector.shape_cast %18 : vector<1x128xf32> to vector<1x1x128xf32>
    %26 = vector.broadcast %25 : vector<1x1x128xf32> to vector<16x16x128xf32>
    %27 = arith.addf %24, %26 : vector<16x16x128xf32>
    %cst_13 = arith.constant 0.000000e+00 : f32
    %28 = vector.broadcast %cst_13 : f32 to vector<16x16x128xf32>
    %29 = arith.maximumf %27, %28 : vector<16x16x128xf32>
    %30 = arith.truncf %29 : vector<16x16x128xf32> to vector<16x16x128xbf16>
    %c1_14 = arith.constant 1 : index
    %c1_15 = arith.constant 1 : index
    %c0_16 = arith.constant 0 : index
    %31 = vector.load %arg8[%c1_14, %c1_15, %c0_16] : memref<18x18x128xbf16, #tpu.memory_space<vmem>>, vector<16x16x128xbf16>
    tpu.vector_store %arg8[%c1_14, %c1_15, %c0_16], %30 {strides = array<i32>} : memref<18x18x128xbf16, #tpu.memory_space<vmem>>, vector<16x16x128xbf16>,
    %c0_17 = arith.constant 0 : index
    %c0_18 = arith.constant 0 : index
    %c0_19 = arith.constant 0 : index
    %32 = vector.load %arg8[%c0_17, %c0_18, %c0_19] : memref<18x18x128xbf16, #tpu.memory_space<vmem>>, vector<16x16x128xbf16>
    %33 = vector.shape_cast %32 : vector<16x16x128xbf16> to vector<8x2x8x2x128xbf16>
    %34 = vector.extract_strided_slice %33 {offsets = [0, 0, 0, 0, 0], sizes = [8, 1, 8, 1, 128], strides = [1, 1, 1, 1, 1]} : vector<8x2x8x2x128xbf16> to vector<8x1x8x1x128xbf16>
    %35 = vector.shape_cast %34 : vector<8x1x8x1x128xbf16> to vector<8x8x128xbf16>
    %36 = vector.shape_cast %35 : vector<8x8x128xbf16> to vector<64x128xbf16>
    %c0_20 = arith.constant 0 : index
    %c0_21 = arith.constant 0 : index
    %37 = vector.load %arg9[%c0_20, %c0_21] : memref<64x1152xbf16, #tpu.memory_space<vmem>>, vector<64x128xbf16>
    tpu.vector_store %arg9[%c0_20, %c0_21], %36 {strides = array<i32>} : memref<64x1152xbf16, #tpu.memory_space<vmem>>, vector<64x128xbf16>,
    %c0_22 = arith.constant 0 : index
    %c1_23 = arith.constant 1 : index
    %c0_24 = arith.constant 0 : index
    %38 = vector.load %arg8[%c0_22, %c1_23, %c0_24] : memref<18x18x128xbf16, #tpu.memory_space<vmem>>, vector<16x16x128xbf16>
    %39 = vector.shape_cast %38 : vector<16x16x128xbf16> to vector<8x2x8x2x128xbf16>
    %40 = vector.extract_strided_slice %39 {offsets = [0, 0, 0, 0, 0], sizes = [8, 1, 8, 1, 128], strides = [1, 1, 1, 1, 1]} : vector<8x2x8x2x128xbf16> to vector<8x1x8x1x128xbf16>
    %41 = vector.shape_cast %40 : vector<8x1x8x1x128xbf16> to vector<8x8x128xbf16>
    %42 = vector.shape_cast %41 : vector<8x8x128xbf16> to vector<64x128xbf16>
    %c0_25 = arith.constant 0 : index
    %c128 = arith.constant 128 : index
    %43 = vector.load %arg9[%c0_25, %c128] : memref<64x1152xbf16, #tpu.memory_space<vmem>>, vector<64x128xbf16>
    tpu.vector_store %arg9[%c0_25, %c128], %42 {strides = array<i32>} : memref<64x1152xbf16, #tpu.memory_space<vmem>>, vector<64x128xbf16>,
    %c0_26 = arith.constant 0 : index
    %c2 = arith.constant 2 : index
    %c0_27 = arith.constant 0 : index
    %44 = vector.load %arg8[%c0_26, %c2, %c0_27] : memref<18x18x128xbf16, #tpu.memory_space<vmem>>, vector<16x16x128xbf16>
    %45 = vector.shape_cast %44 : vector<16x16x128xbf16> to vector<8x2x8x2x128xbf16>
    %46 = vector.extract_strided_slice %45 {offsets = [0, 0, 0, 0, 0], sizes = [8, 1, 8, 1, 128], strides = [1, 1, 1, 1, 1]} : vector<8x2x8x2x128xbf16> to vector<8x1x8x1x128xbf16>
    %47 = vector.shape_cast %46 : vector<8x1x8x1x128xbf16> to vector<8x8x128xbf16>
    %48 = vector.shape_cast %47 : vector<8x8x128xbf16> to vector<64x128xbf16>
    %c0_28 = arith.constant 0 : index
    %c256 = arith.constant 256 : index
    %49 = vector.load %arg9[%c0_28, %c256] : memref<64x1152xbf16, #tpu.memory_space<vmem>>, vector<64x128xbf16>
    tpu.vector_store %arg9[%c0_28, %c256], %48 {strides = array<i32>} : memref<64x1152xbf16, #tpu.memory_space<vmem>>, vector<64x128xbf16>,
    %c1_29 = arith.constant 1 : index
    %c0_30 = arith.constant 0 : index
    %c0_31 = arith.constant 0 : index
    %50 = vector.load %arg8[%c1_29, %c0_30, %c0_31] : memref<18x18x128xbf16, #tpu.memory_space<vmem>>, vector<16x16x128xbf16>
    %51 = vector.shape_cast %50 : vector<16x16x128xbf16> to vector<8x2x8x2x128xbf16>
    %52 = vector.extract_strided_slice %51 {offsets = [0, 0, 0, 0, 0], sizes = [8, 1, 8, 1, 128], strides = [1, 1, 1, 1, 1]} : vector<8x2x8x2x128xbf16> to vector<8x1x8x1x128xbf16>
    %53 = vector.shape_cast %52 : vector<8x1x8x1x128xbf16> to vector<8x8x128xbf16>
    %54 = vector.shape_cast %53 : vector<8x8x128xbf16> to vector<64x128xbf16>
    %c0_32 = arith.constant 0 : index
    %c384 = arith.constant 384 : index
    %55 = vector.load %arg9[%c0_32, %c384] : memref<64x1152xbf16, #tpu.memory_space<vmem>>, vector<64x128xbf16>
    tpu.vector_store %arg9[%c0_32, %c384], %54 {strides = array<i32>} : memref<64x1152xbf16, #tpu.memory_space<vmem>>, vector<64x128xbf16>,
    %c1_33 = arith.constant 1 : index
    %c1_34 = arith.constant 1 : index
    %c0_35 = arith.constant 0 : index
    %56 = vector.load %arg8[%c1_33, %c1_34, %c0_35] : memref<18x18x128xbf16, #tpu.memory_space<vmem>>, vector<16x16x128xbf16>
    %57 = vector.shape_cast %56 : vector<16x16x128xbf16> to vector<8x2x8x2x128xbf16>
    %58 = vector.extract_strided_slice %57 {offsets = [0, 0, 0, 0, 0], sizes = [8, 1, 8, 1, 128], strides = [1, 1, 1, 1, 1]} : vector<8x2x8x2x128xbf16> to vector<8x1x8x1x128xbf16>
    %59 = vector.shape_cast %58 : vector<8x1x8x1x128xbf16> to vector<8x8x128xbf16>
    %60 = vector.shape_cast %59 : vector<8x8x128xbf16> to vector<64x128xbf16>
    %c0_36 = arith.constant 0 : index
    %c512 = arith.constant 512 : index
    %61 = vector.load %arg9[%c0_36, %c512] : memref<64x1152xbf16, #tpu.memory_space<vmem>>, vector<64x128xbf16>
    tpu.vector_store %arg9[%c0_36, %c512], %60 {strides = array<i32>} : memref<64x1152xbf16, #tpu.memory_space<vmem>>, vector<64x128xbf16>,
    %c1_37 = arith.constant 1 : index
    %c2_38 = arith.constant 2 : index
    %c0_39 = arith.constant 0 : index
    %62 = vector.load %arg8[%c1_37, %c2_38, %c0_39] : memref<18x18x128xbf16, #tpu.memory_space<vmem>>, vector<16x16x128xbf16>
    %63 = vector.shape_cast %62 : vector<16x16x128xbf16> to vector<8x2x8x2x128xbf16>
    %64 = vector.extract_strided_slice %63 {offsets = [0, 0, 0, 0, 0], sizes = [8, 1, 8, 1, 128], strides = [1, 1, 1, 1, 1]} : vector<8x2x8x2x128xbf16> to vector<8x1x8x1x128xbf16>
    %65 = vector.shape_cast %64 : vector<8x1x8x1x128xbf16> to vector<8x8x128xbf16>
    %66 = vector.shape_cast %65 : vector<8x8x128xbf16> to vector<64x128xbf16>
    %c0_40 = arith.constant 0 : index
    %c640 = arith.constant 640 : index
    %67 = vector.load %arg9[%c0_40, %c640] : memref<64x1152xbf16, #tpu.memory_space<vmem>>, vector<64x128xbf16>
    tpu.vector_store %arg9[%c0_40, %c640], %66 {strides = array<i32>} : memref<64x1152xbf16, #tpu.memory_space<vmem>>, vector<64x128xbf16>,
    %c2_41 = arith.constant 2 : index
    %c0_42 = arith.constant 0 : index
    %c0_43 = arith.constant 0 : index
    %68 = vector.load %arg8[%c2_41, %c0_42, %c0_43] : memref<18x18x128xbf16, #tpu.memory_space<vmem>>, vector<16x16x128xbf16>
    %69 = vector.shape_cast %68 : vector<16x16x128xbf16> to vector<8x2x8x2x128xbf16>
    %70 = vector.extract_strided_slice %69 {offsets = [0, 0, 0, 0, 0], sizes = [8, 1, 8, 1, 128], strides = [1, 1, 1, 1, 1]} : vector<8x2x8x2x128xbf16> to vector<8x1x8x1x128xbf16>
    %71 = vector.shape_cast %70 : vector<8x1x8x1x128xbf16> to vector<8x8x128xbf16>
    %72 = vector.shape_cast %71 : vector<8x8x128xbf16> to vector<64x128xbf16>
    %c0_44 = arith.constant 0 : index
    %c768 = arith.constant 768 : index
    %73 = vector.load %arg9[%c0_44, %c768] : memref<64x1152xbf16, #tpu.memory_space<vmem>>, vector<64x128xbf16>
    tpu.vector_store %arg9[%c0_44, %c768], %72 {strides = array<i32>} : memref<64x1152xbf16, #tpu.memory_space<vmem>>, vector<64x128xbf16>,
    %c2_45 = arith.constant 2 : index
    %c1_46 = arith.constant 1 : index
    %c0_47 = arith.constant 0 : index
    %74 = vector.load %arg8[%c2_45, %c1_46, %c0_47] : memref<18x18x128xbf16, #tpu.memory_space<vmem>>, vector<16x16x128xbf16>
    %75 = vector.shape_cast %74 : vector<16x16x128xbf16> to vector<8x2x8x2x128xbf16>
    %76 = vector.extract_strided_slice %75 {offsets = [0, 0, 0, 0, 0], sizes = [8, 1, 8, 1, 128], strides = [1, 1, 1, 1, 1]} : vector<8x2x8x2x128xbf16> to vector<8x1x8x1x128xbf16>
    %77 = vector.shape_cast %76 : vector<8x1x8x1x128xbf16> to vector<8x8x128xbf16>
    %78 = vector.shape_cast %77 : vector<8x8x128xbf16> to vector<64x128xbf16>
    %c0_48 = arith.constant 0 : index
    %c896 = arith.constant 896 : index
    %79 = vector.load %arg9[%c0_48, %c896] : memref<64x1152xbf16, #tpu.memory_space<vmem>>, vector<64x128xbf16>
    tpu.vector_store %arg9[%c0_48, %c896], %78 {strides = array<i32>} : memref<64x1152xbf16, #tpu.memory_space<vmem>>, vector<64x128xbf16>,
    %c2_49 = arith.constant 2 : index
    %c2_50 = arith.constant 2 : index
    %c0_51 = arith.constant 0 : index
    %80 = vector.load %arg8[%c2_49, %c2_50, %c0_51] : memref<18x18x128xbf16, #tpu.memory_space<vmem>>, vector<16x16x128xbf16>
    %81 = vector.shape_cast %80 : vector<16x16x128xbf16> to vector<8x2x8x2x128xbf16>
    %82 = vector.extract_strided_slice %81 {offsets = [0, 0, 0, 0, 0], sizes = [8, 1, 8, 1, 128], strides = [1, 1, 1, 1, 1]} : vector<8x2x8x2x128xbf16> to vector<8x1x8x1x128xbf16>
    %83 = vector.shape_cast %82 : vector<8x1x8x1x128xbf16> to vector<8x8x128xbf16>
    %84 = vector.shape_cast %83 : vector<8x8x128xbf16> to vector<64x128xbf16>
    %c0_52 = arith.constant 0 : index
    %c1024 = arith.constant 1024 : index
    %85 = vector.load %arg9[%c0_52, %c1024] : memref<64x1152xbf16, #tpu.memory_space<vmem>>, vector<64x128xbf16>
    tpu.vector_store %arg9[%c0_52, %c1024], %84 {strides = array<i32>} : memref<64x1152xbf16, #tpu.memory_space<vmem>>, vector<64x128xbf16>,
    %c0_53 = arith.constant 0 : index
    %c0_54 = arith.constant 0 : index
    %86 = vector.load %arg9[%c0_53, %c0_54] : memref<64x1152xbf16, #tpu.memory_space<vmem>>, vector<64x1152xbf16>
    %c0_55 = arith.constant 0 : index
    %c0_56 = arith.constant 0 : index
    %87 = vector.load %arg5[%c0_55, %c0_56] : memref<1152x128xbf16, #tpu.memory_space<vmem>>, vector<1152x128xbf16>
    %cst_57 = arith.constant dense<0.000000e+00> : vector<64x128xf32>
    %88 = tpu.matmul %86, %87, %cst_57 {dimension_numbers = #tpu.dot_dimension_numbers<[1], [0], [0], [1], [0, 0, 1, 1], [], []>} : vector<64x1152xbf16>, vector<1152x128xbf16>, vector<64x128xf32> -> vector<64x128xf32>
    %89 = arith.truncf %88 : vector<64x128xf32> to vector<64x128xbf16>
    %90 = vector.shape_cast %89 : vector<64x128xbf16> to vector<1x8x8x128xbf16>
    %c0_58 = arith.constant 0 : index
    %c0_59 = arith.constant 0 : index
    %c0_60 = arith.constant 0 : index
    %c0_61 = arith.constant 0 : index
    %91 = vector.load %arg6[%c0_58, %c0_59, %c0_60, %c0_61] : memref<1x8x8x128xbf16, #tpu.memory_space<vmem>>, vector<1x8x8x128xbf16>
    tpu.vector_store %arg6[%c0_58, %c0_59, %c0_60, %c0_61], %90 {strides = array<i32>} : memref<1x8x8x128xbf16, #tpu.memory_space<vmem>>, vector<1x8x8x128xbf16>,
    %92 = arith.extf %89 : vector<64x128xbf16> to vector<64x128xf32>
    %c0_62 = arith.constant 0 : index
    %c0_63 = arith.constant 0 : index
    %93 = vector.load %arg7[%c0_62, %c0_63] : memref<2x128xf32, #tpu.memory_space<vmem>>, vector<1x128xf32>
    %cst_64 = arith.constant dense<0.000000e+00> : vector<128xf32>
    %94 = vector.multi_reduction <add>, %92, %cst_64 [0] : vector<64x128xf32> to vector<128xf32>
    %95 = vector.shape_cast %94 : vector<128xf32> to vector<1x128xf32>
    %96 = arith.addf %93, %95 : vector<1x128xf32>
    %c0_65 = arith.constant 0 : index
    %c0_66 = arith.constant 0 : index
    %97 = vector.load %arg7[%c0_65, %c0_66] : memref<2x128xf32, #tpu.memory_space<vmem>>, vector<1x128xf32>
    tpu.vector_store %arg7[%c0_65, %c0_66], %96 {strides = array<i32>} : memref<2x128xf32, #tpu.memory_space<vmem>>, vector<1x128xf32>,
    %c1_67 = arith.constant 1 : index
    %c0_68 = arith.constant 0 : index
    %98 = vector.load %arg7[%c1_67, %c0_68] : memref<2x128xf32, #tpu.memory_space<vmem>>, vector<1x128xf32>
    %99 = arith.mulf %92, %92 : vector<64x128xf32>
    %cst_69 = arith.constant dense<0.000000e+00> : vector<128xf32>
    %100 = vector.multi_reduction <add>, %99, %cst_69 [0] : vector<64x128xf32> to vector<128xf32>
    %101 = vector.shape_cast %100 : vector<128xf32> to vector<1x128xf32>
    %102 = arith.addf %98, %101 : vector<1x128xf32>
    %c1_70 = arith.constant 1 : index
    %c0_71 = arith.constant 0 : index
    %103 = vector.load %arg7[%c1_70, %c0_71] : memref<2x128xf32, #tpu.memory_space<vmem>>, vector<1x128xf32>
    tpu.vector_store %arg7[%c1_70, %c0_71], %102 {strides = array<i32>} : memref<2x128xf32, #tpu.memory_space<vmem>>, vector<1x128xf32>,
    return
  }
  func.func @transform_0(%arg0: i32) -> (i32, i32, i32, i32) {
    %c0_i32 = arith.constant 0 : i32
    %c0_i32_0 = arith.constant 0 : i32
    %c0_i32_1 = arith.constant 0 : i32
    %c0_i32_2 = arith.constant 0 : i32
    return %arg0, %c0_i32, %c0_i32_0, %c0_i32_1 : i32, i32, i32, i32
  }
  func.func @transform_1(%arg0: i32) -> (i32, i32) {
    %c0_i32 = arith.constant 0 : i32
    %c0_i32_0 = arith.constant 0 : i32
    %c0_i32_1 = arith.constant 0 : i32
    return %c0_i32, %c0_i32_0 : i32, i32
  }
  func.func @transform_2(%arg0: i32) -> (i32, i32) {
    %c0_i32 = arith.constant 0 : i32
    %c0_i32_0 = arith.constant 0 : i32
    %c0_i32_1 = arith.constant 0 : i32
    return %c0_i32, %c0_i32_0 : i32, i32
  }
  func.func @transform_3(%arg0: i32) -> (i32, i32) {
    %c0_i32 = arith.constant 0 : i32
    %c0_i32_0 = arith.constant 0 : i32
    %c0_i32_1 = arith.constant 0 : i32
    return %c0_i32, %c0_i32_0 : i32, i32
  }
  func.func @transform_4(%arg0: i32) -> (i32, i32) {
    %c0_i32 = arith.constant 0 : i32
    %c0_i32_0 = arith.constant 0 : i32
    %c0_i32_1 = arith.constant 0 : i32
    return %c0_i32, %c0_i32_0 : i32, i32
  }
  func.func @transform_5(%arg0: i32) -> (i32, i32, i32, i32) {
    %c0_i32 = arith.constant 0 : i32
    %c0_i32_0 = arith.constant 0 : i32
    %c0_i32_1 = arith.constant 0 : i32
    %c0_i32_2 = arith.constant 0 : i32
    return %arg0, %c0_i32, %c0_i32_0, %c0_i32_1 : i32, i32, i32, i32
  }
  func.func @transform_6(%arg0: i32) -> (i32, i32) {
    %c0_i32 = arith.constant 0 : i32
    %c0_i32_0 = arith.constant 0 : i32
    %c0_i32_1 = arith.constant 0 : i32
    return %c0_i32, %c0_i32_0 : i32, i32
  }
}

module attributes {stable_mosaic.version = 11 : i64} {
  func.func @kernel(%arg0: i32, %arg1: memref<128x128xbf16, #tpu.memory_space<vmem>>, %arg2: memref<2x128xf32, #tpu.memory_space<vmem>>, %arg3: memref<1x128xf32, #tpu.memory_space<vmem>>, %arg4: memref<1x128xf32, #tpu.memory_space<vmem>>, %arg5: memref<128x128xbf16, #tpu.memory_space<vmem>>, %arg6: memref<128x128xbf16, #tpu.memory_space<vmem>>, %arg7: memref<128x128xbf16, #tpu.memory_space<vmem>>, %arg8: memref<128x128xbf16, #tpu.memory_space<vmem>>, %arg9: memref<2x128xf32, #tpu.memory_space<vmem>>, %arg10: memref<128x128xbf16, #tpu.memory_space<vmem>>, %arg11: memref<2x128xf32, #tpu.memory_space<vmem>>) attributes {dimension_semantics = [#tpu.dimension_semantics<arbitrary>], iteration_bounds = array<i64: 1>, scalar_prefetch = 0 : i64, scratch_operands = 0 : i64, tpu.core_type = #tpu.core_type<tc>, window_params = [{transform_indices = @transform_0, window_bounds = array<i64: 128, 128>}, {pipeline_mode = #tpu.pipeline_mode<synchronous>, transform_indices = @transform_1, window_bounds = array<i64: 2, 128>}, {pipeline_mode = #tpu.pipeline_mode<synchronous>, transform_indices = @transform_2, window_bounds = array<i64: 1, 128>}, {pipeline_mode = #tpu.pipeline_mode<synchronous>, transform_indices = @transform_3, window_bounds = array<i64: 1, 128>}, {pipeline_mode = #tpu.pipeline_mode<synchronous>, transform_indices = @transform_4, window_bounds = array<i64: 128, 128>}, {transform_indices = @transform_5, window_bounds = array<i64: 128, 128>}, {pipeline_mode = #tpu.pipeline_mode<synchronous>, transform_indices = @transform_6, window_bounds = array<i64: 128, 128>}, {transform_indices = @transform_7, window_bounds = array<i64: 128, 128>}, {pipeline_mode = #tpu.pipeline_mode<synchronous>, transform_indices = @transform_8, window_bounds = array<i64: 2, 128>}, {transform_indices = @transform_9, window_bounds = array<i64: 128, 128>}, {pipeline_mode = #tpu.pipeline_mode<synchronous>, transform_indices = @transform_10, window_bounds = array<i64: 2, 128>}]} {
    %c0_i32 = arith.constant 0 : i32
    %0 = arith.cmpi eq, %arg0, %c0_i32 : i32
    %1 = arith.extui %0 : i1 to i32
    %c0_i32_0 = arith.constant 0 : i32
    %2 = arith.cmpi ne, %1, %c0_i32_0 : i32
    scf.if %2 {
      %cst_47 = arith.constant 0.000000e+00 : f32
      %75 = vector.broadcast %cst_47 : f32 to vector<2x128xf32>
      %c0_48 = arith.constant 0 : index
      %c0_49 = arith.constant 0 : index
      %76 = vector.load %arg9[%c0_48, %c0_49] : memref<2x128xf32, #tpu.memory_space<vmem>>, vector<2x128xf32>
      tpu.vector_store %arg9[%c0_48, %c0_49], %75 {strides = array<i32>} : memref<2x128xf32, #tpu.memory_space<vmem>>, vector<2x128xf32>,
      %cst_50 = arith.constant 0.000000e+00 : f32
      %77 = vector.broadcast %cst_50 : f32 to vector<2x128xf32>
      %c0_51 = arith.constant 0 : index
      %c0_52 = arith.constant 0 : index
      %78 = vector.load %arg11[%c0_51, %c0_52] : memref<2x128xf32, #tpu.memory_space<vmem>>, vector<2x128xf32>
      tpu.vector_store %arg11[%c0_51, %c0_52], %77 {strides = array<i32>} : memref<2x128xf32, #tpu.memory_space<vmem>>, vector<2x128xf32>,
    } else {
    }
    %c0 = arith.constant 0 : index
    %c0_1 = arith.constant 0 : index
    %3 = vector.load %arg2[%c0, %c0_1] : memref<2x128xf32, #tpu.memory_space<vmem>>, vector<1x128xf32>
    %cst = arith.constant 7.812500e-03 : f32
    %4 = vector.broadcast %cst : f32 to vector<1x128xf32>
    %5 = arith.mulf %3, %4 : vector<1x128xf32>
    %c1 = arith.constant 1 : index
    %c0_2 = arith.constant 0 : index
    %6 = vector.load %arg2[%c1, %c0_2] : memref<2x128xf32, #tpu.memory_space<vmem>>, vector<1x128xf32>
    %cst_3 = arith.constant 7.812500e-03 : f32
    %7 = vector.broadcast %cst_3 : f32 to vector<1x128xf32>
    %8 = arith.mulf %6, %7 : vector<1x128xf32>
    %9 = arith.mulf %5, %5 : vector<1x128xf32>
    %10 = arith.subf %8, %9 : vector<1x128xf32>
    %cst_4 = arith.constant 9.99999974E-6 : f32
    %11 = vector.broadcast %cst_4 : f32 to vector<1x128xf32>
    %12 = arith.addf %10, %11 : vector<1x128xf32>
    %13 = math.rsqrt %12 : vector<1x128xf32>
    %c0_5 = arith.constant 0 : index
    %c0_6 = arith.constant 0 : index
    %14 = vector.load %arg3[%c0_5, %c0_6] : memref<1x128xf32, #tpu.memory_space<vmem>>, vector<1x128xf32>
    %15 = arith.mulf %13, %14 : vector<1x128xf32>
    %c0_7 = arith.constant 0 : index
    %c0_8 = arith.constant 0 : index
    %16 = vector.load %arg4[%c0_7, %c0_8] : memref<1x128xf32, #tpu.memory_space<vmem>>, vector<1x128xf32>
    %17 = arith.mulf %5, %15 : vector<1x128xf32>
    %18 = arith.subf %16, %17 : vector<1x128xf32>
    %c0_9 = arith.constant 0 : index
    %c0_10 = arith.constant 0 : index
    %19 = vector.load %arg1[%c0_9, %c0_10] : memref<128x128xbf16, #tpu.memory_space<vmem>>, vector<128x128xbf16>
    %20 = arith.extf %19 : vector<128x128xbf16> to vector<128x128xf32>
    %21 = vector.broadcast %15 : vector<1x128xf32> to vector<128x128xf32>
    %22 = arith.mulf %20, %21 : vector<128x128xf32>
    %23 = vector.broadcast %18 : vector<1x128xf32> to vector<128x128xf32>
    %24 = arith.addf %22, %23 : vector<128x128xf32>
    %cst_11 = arith.constant 0.000000e+00 : f32
    %25 = vector.broadcast %cst_11 : f32 to vector<128x128xf32>
    %26 = arith.maximumf %24, %25 : vector<128x128xf32>
    %27 = arith.truncf %26 : vector<128x128xf32> to vector<128x128xbf16>
    %c0_12 = arith.constant 0 : index
    %c0_13 = arith.constant 0 : index
    %28 = vector.load %arg5[%c0_12, %c0_13] : memref<128x128xbf16, #tpu.memory_space<vmem>>, vector<128x128xbf16>
    %cst_14 = arith.constant dense<0.000000e+00> : vector<128x128xf32>
    %29 = tpu.matmul %27, %28, %cst_14 {dimension_numbers = #tpu.dot_dimension_numbers<[1], [0], [0], [1], [0, 0, 1, 1], [], []>} : vector<128x128xbf16>, vector<128x128xbf16>, vector<128x128xf32> -> vector<128x128xf32>
    %30 = arith.truncf %29 : vector<128x128xf32> to vector<128x128xbf16>
    %c0_15 = arith.constant 0 : index
    %c0_16 = arith.constant 0 : index
    %31 = vector.load %arg8[%c0_15, %c0_16] : memref<128x128xbf16, #tpu.memory_space<vmem>>, vector<128x128xbf16>
    tpu.vector_store %arg8[%c0_15, %c0_16], %30 {strides = array<i32>} : memref<128x128xbf16, #tpu.memory_space<vmem>>, vector<128x128xbf16>,
    %c128_i32 = arith.constant 128 : i32
    %32 = arith.muli %arg0, %c128_i32 : i32
    %33 = tpu.iota {dimensions = array<i32: 0>} : vector<128x1xi32>
    %34 = vector.broadcast %32 : i32 to vector<128x1xi32>
    %35 = arith.addi %34, %33 : vector<128x1xi32>
    %c128_i32_17 = arith.constant 128 : i32
    %36 = vector.broadcast %c128_i32_17 : i32 to vector<128x1xi32>
    %37 = arith.cmpi slt, %35, %36 : vector<128x1xi32>
    %38 = arith.extf %30 : vector<128x128xbf16> to vector<128x128xf32>
    %cst_18 = arith.constant 0.000000e+00 : f32
    %39 = vector.shape_cast %37 : vector<128x1xi1> to vector<128x1xi1>
    %40 = vector.broadcast %39 : vector<128x1xi1> to vector<128x128xi1>
    %41 = vector.broadcast %cst_18 : f32 to vector<128x128xf32>
    %42 = arith.select %40, %38, %41 : vector<128x128xi1>, vector<128x128xf32>
    %c0_19 = arith.constant 0 : index
    %c0_20 = arith.constant 0 : index
    %43 = vector.load %arg9[%c0_19, %c0_20] : memref<2x128xf32, #tpu.memory_space<vmem>>, vector<1x128xf32>
    %cst_21 = arith.constant dense<0.000000e+00> : vector<128xf32>
    %44 = vector.multi_reduction <add>, %42, %cst_21 [0] : vector<128x128xf32> to vector<128xf32>
    %45 = vector.shape_cast %44 : vector<128xf32> to vector<1x128xf32>
    %46 = arith.addf %43, %45 : vector<1x128xf32>
    %c0_22 = arith.constant 0 : index
    %c0_23 = arith.constant 0 : index
    %47 = vector.load %arg9[%c0_22, %c0_23] : memref<2x128xf32, #tpu.memory_space<vmem>>, vector<1x128xf32>
    tpu.vector_store %arg9[%c0_22, %c0_23], %46 {strides = array<i32>} : memref<2x128xf32, #tpu.memory_space<vmem>>, vector<1x128xf32>,
    %c1_24 = arith.constant 1 : index
    %c0_25 = arith.constant 0 : index
    %48 = vector.load %arg9[%c1_24, %c0_25] : memref<2x128xf32, #tpu.memory_space<vmem>>, vector<1x128xf32>
    %49 = arith.mulf %42, %42 : vector<128x128xf32>
    %cst_26 = arith.constant dense<0.000000e+00> : vector<128xf32>
    %50 = vector.multi_reduction <add>, %49, %cst_26 [0] : vector<128x128xf32> to vector<128xf32>
    %51 = vector.shape_cast %50 : vector<128xf32> to vector<1x128xf32>
    %52 = arith.addf %48, %51 : vector<1x128xf32>
    %c1_27 = arith.constant 1 : index
    %c0_28 = arith.constant 0 : index
    %53 = vector.load %arg9[%c1_27, %c0_28] : memref<2x128xf32, #tpu.memory_space<vmem>>, vector<1x128xf32>
    tpu.vector_store %arg9[%c1_27, %c0_28], %52 {strides = array<i32>} : memref<2x128xf32, #tpu.memory_space<vmem>>, vector<1x128xf32>,
    %c0_29 = arith.constant 0 : index
    %c0_30 = arith.constant 0 : index
    %54 = vector.load %arg6[%c0_29, %c0_30] : memref<128x128xbf16, #tpu.memory_space<vmem>>, vector<128x128xbf16>
    %c0_31 = arith.constant 0 : index
    %c0_32 = arith.constant 0 : index
    %55 = vector.load %arg7[%c0_31, %c0_32] : memref<128x128xbf16, #tpu.memory_space<vmem>>, vector<128x128xbf16>
    %cst_33 = arith.constant dense<0.000000e+00> : vector<128x128xf32>
    %56 = tpu.matmul %54, %55, %cst_33 {dimension_numbers = #tpu.dot_dimension_numbers<[1], [0], [0], [1], [0, 0, 1, 1], [], []>} : vector<128x128xbf16>, vector<128x128xbf16>, vector<128x128xf32> -> vector<128x128xf32>
    %57 = arith.truncf %56 : vector<128x128xf32> to vector<128x128xbf16>
    %c0_34 = arith.constant 0 : index
    %c0_35 = arith.constant 0 : index
    %58 = vector.load %arg10[%c0_34, %c0_35] : memref<128x128xbf16, #tpu.memory_space<vmem>>, vector<128x128xbf16>
    tpu.vector_store %arg10[%c0_34, %c0_35], %57 {strides = array<i32>} : memref<128x128xbf16, #tpu.memory_space<vmem>>, vector<128x128xbf16>,
    %59 = arith.extf %57 : vector<128x128xbf16> to vector<128x128xf32>
    %cst_36 = arith.constant 0.000000e+00 : f32
    %60 = vector.shape_cast %37 : vector<128x1xi1> to vector<128x1xi1>
    %61 = vector.broadcast %60 : vector<128x1xi1> to vector<128x128xi1>
    %62 = vector.broadcast %cst_36 : f32 to vector<128x128xf32>
    %63 = arith.select %61, %59, %62 : vector<128x128xi1>, vector<128x128xf32>
    %c0_37 = arith.constant 0 : index
    %c0_38 = arith.constant 0 : index
    %64 = vector.load %arg11[%c0_37, %c0_38] : memref<2x128xf32, #tpu.memory_space<vmem>>, vector<1x128xf32>
    %cst_39 = arith.constant dense<0.000000e+00> : vector<128xf32>
    %65 = vector.multi_reduction <add>, %63, %cst_39 [0] : vector<128x128xf32> to vector<128xf32>
    %66 = vector.shape_cast %65 : vector<128xf32> to vector<1x128xf32>
    %67 = arith.addf %64, %66 : vector<1x128xf32>
    %c0_40 = arith.constant 0 : index
    %c0_41 = arith.constant 0 : index
    %68 = vector.load %arg11[%c0_40, %c0_41] : memref<2x128xf32, #tpu.memory_space<vmem>>, vector<1x128xf32>
    tpu.vector_store %arg11[%c0_40, %c0_41], %67 {strides = array<i32>} : memref<2x128xf32, #tpu.memory_space<vmem>>, vector<1x128xf32>,
    %c1_42 = arith.constant 1 : index
    %c0_43 = arith.constant 0 : index
    %69 = vector.load %arg11[%c1_42, %c0_43] : memref<2x128xf32, #tpu.memory_space<vmem>>, vector<1x128xf32>
    %70 = arith.mulf %63, %63 : vector<128x128xf32>
    %cst_44 = arith.constant dense<0.000000e+00> : vector<128xf32>
    %71 = vector.multi_reduction <add>, %70, %cst_44 [0] : vector<128x128xf32> to vector<128xf32>
    %72 = vector.shape_cast %71 : vector<128xf32> to vector<1x128xf32>
    %73 = arith.addf %69, %72 : vector<1x128xf32>
    %c1_45 = arith.constant 1 : index
    %c0_46 = arith.constant 0 : index
    %74 = vector.load %arg11[%c1_45, %c0_46] : memref<2x128xf32, #tpu.memory_space<vmem>>, vector<1x128xf32>
    tpu.vector_store %arg11[%c1_45, %c0_46], %73 {strides = array<i32>} : memref<2x128xf32, #tpu.memory_space<vmem>>, vector<1x128xf32>,
    return
  }
  func.func @transform_0(%arg0: i32) -> (i32, i32) {
    %c0_i32 = arith.constant 0 : i32
    %c0_i32_0 = arith.constant 0 : i32
    return %arg0, %c0_i32 : i32, i32
  }
  func.func @transform_1(%arg0: i32) -> (i32, i32) {
    %c0_i32 = arith.constant 0 : i32
    %c0_i32_0 = arith.constant 0 : i32
    %c0_i32_1 = arith.constant 0 : i32
    return %c0_i32, %c0_i32_0 : i32, i32
  }
  func.func @transform_2(%arg0: i32) -> (i32, i32) {
    %c0_i32 = arith.constant 0 : i32
    %c0_i32_0 = arith.constant 0 : i32
    %c0_i32_1 = arith.constant 0 : i32
    return %c0_i32, %c0_i32_0 : i32, i32
  }
  func.func @transform_3(%arg0: i32) -> (i32, i32) {
    %c0_i32 = arith.constant 0 : i32
    %c0_i32_0 = arith.constant 0 : i32
    %c0_i32_1 = arith.constant 0 : i32
    return %c0_i32, %c0_i32_0 : i32, i32
  }
  func.func @transform_4(%arg0: i32) -> (i32, i32) {
    %c0_i32 = arith.constant 0 : i32
    %c0_i32_0 = arith.constant 0 : i32
    %c0_i32_1 = arith.constant 0 : i32
    return %c0_i32, %c0_i32_0 : i32, i32
  }
  func.func @transform_5(%arg0: i32) -> (i32, i32) {
    %c0_i32 = arith.constant 0 : i32
    %c0_i32_0 = arith.constant 0 : i32
    return %arg0, %c0_i32 : i32, i32
  }
  func.func @transform_6(%arg0: i32) -> (i32, i32) {
    %c0_i32 = arith.constant 0 : i32
    %c0_i32_0 = arith.constant 0 : i32
    %c0_i32_1 = arith.constant 0 : i32
    return %c0_i32, %c0_i32_0 : i32, i32
  }
  func.func @transform_7(%arg0: i32) -> (i32, i32) {
    %c0_i32 = arith.constant 0 : i32
    %c0_i32_0 = arith.constant 0 : i32
    return %arg0, %c0_i32 : i32, i32
  }
  func.func @transform_8(%arg0: i32) -> (i32, i32) {
    %c0_i32 = arith.constant 0 : i32
    %c0_i32_0 = arith.constant 0 : i32
    %c0_i32_1 = arith.constant 0 : i32
    return %c0_i32, %c0_i32_0 : i32, i32
  }
  func.func @transform_9(%arg0: i32) -> (i32, i32) {
    %c0_i32 = arith.constant 0 : i32
    %c0_i32_0 = arith.constant 0 : i32
    return %arg0, %c0_i32 : i32, i32
  }
  func.func @transform_10(%arg0: i32) -> (i32, i32) {
    %c0_i32 = arith.constant 0 : i32
    %c0_i32_0 = arith.constant 0 : i32
    %c0_i32_1 = arith.constant 0 : i32
    return %c0_i32, %c0_i32_0 : i32, i32
  }
}

module attributes {stable_mosaic.version = 11 : i64} {
  func.func @kernel(%arg0: i32, %arg1: memref<128x128xbf16, #tpu.memory_space<vmem>>, %arg2: memref<2x128xf32, #tpu.memory_space<vmem>>, %arg3: memref<1x128xf32, #tpu.memory_space<vmem>>, %arg4: memref<1x128xf32, #tpu.memory_space<vmem>>, %arg5: memref<128x128xbf16, #tpu.memory_space<vmem>>, %arg6: memref<2x128xf32, #tpu.memory_space<vmem>>, %arg7: memref<1x128xf32, #tpu.memory_space<vmem>>, %arg8: memref<1x128xf32, #tpu.memory_space<vmem>>, %arg9: memref<128x128xf32, #tpu.memory_space<vmem>>) attributes {dimension_semantics = [#tpu.dimension_semantics<parallel>], iteration_bounds = array<i64: 1>, scalar_prefetch = 0 : i64, scratch_operands = 0 : i64, tpu.core_type = #tpu.core_type<tc>, window_params = [{transform_indices = @transform_0, window_bounds = array<i64: 128, 128>}, {pipeline_mode = #tpu.pipeline_mode<synchronous>, transform_indices = @transform_1, window_bounds = array<i64: 2, 128>}, {pipeline_mode = #tpu.pipeline_mode<synchronous>, transform_indices = @transform_2, window_bounds = array<i64: 1, 128>}, {pipeline_mode = #tpu.pipeline_mode<synchronous>, transform_indices = @transform_3, window_bounds = array<i64: 1, 128>}, {transform_indices = @transform_4, window_bounds = array<i64: 128, 128>}, {pipeline_mode = #tpu.pipeline_mode<synchronous>, transform_indices = @transform_5, window_bounds = array<i64: 2, 128>}, {pipeline_mode = #tpu.pipeline_mode<synchronous>, transform_indices = @transform_6, window_bounds = array<i64: 1, 128>}, {pipeline_mode = #tpu.pipeline_mode<synchronous>, transform_indices = @transform_7, window_bounds = array<i64: 1, 128>}, {transform_indices = @transform_8, window_bounds = array<i64: 128, 128>}]} {
    %c0 = arith.constant 0 : index
    %c0_0 = arith.constant 0 : index
    %0 = vector.load %arg2[%c0, %c0_0] : memref<2x128xf32, #tpu.memory_space<vmem>>, vector<1x128xf32>
    %cst = arith.constant 7.812500e-03 : f32
    %1 = vector.broadcast %cst : f32 to vector<1x128xf32>
    %2 = arith.mulf %0, %1 : vector<1x128xf32>
    %c1 = arith.constant 1 : index
    %c0_1 = arith.constant 0 : index
    %3 = vector.load %arg2[%c1, %c0_1] : memref<2x128xf32, #tpu.memory_space<vmem>>, vector<1x128xf32>
    %cst_2 = arith.constant 7.812500e-03 : f32
    %4 = vector.broadcast %cst_2 : f32 to vector<1x128xf32>
    %5 = arith.mulf %3, %4 : vector<1x128xf32>
    %6 = arith.mulf %2, %2 : vector<1x128xf32>
    %7 = arith.subf %5, %6 : vector<1x128xf32>
    %cst_3 = arith.constant 9.99999974E-6 : f32
    %8 = vector.broadcast %cst_3 : f32 to vector<1x128xf32>
    %9 = arith.addf %7, %8 : vector<1x128xf32>
    %10 = math.rsqrt %9 : vector<1x128xf32>
    %c0_4 = arith.constant 0 : index
    %c0_5 = arith.constant 0 : index
    %11 = vector.load %arg3[%c0_4, %c0_5] : memref<1x128xf32, #tpu.memory_space<vmem>>, vector<1x128xf32>
    %12 = arith.mulf %10, %11 : vector<1x128xf32>
    %c0_6 = arith.constant 0 : index
    %c0_7 = arith.constant 0 : index
    %13 = vector.load %arg4[%c0_6, %c0_7] : memref<1x128xf32, #tpu.memory_space<vmem>>, vector<1x128xf32>
    %14 = arith.mulf %2, %12 : vector<1x128xf32>
    %15 = arith.subf %13, %14 : vector<1x128xf32>
    %c0_8 = arith.constant 0 : index
    %c0_9 = arith.constant 0 : index
    %16 = vector.load %arg6[%c0_8, %c0_9] : memref<2x128xf32, #tpu.memory_space<vmem>>, vector<1x128xf32>
    %cst_10 = arith.constant 7.812500e-03 : f32
    %17 = vector.broadcast %cst_10 : f32 to vector<1x128xf32>
    %18 = arith.mulf %16, %17 : vector<1x128xf32>
    %c1_11 = arith.constant 1 : index
    %c0_12 = arith.constant 0 : index
    %19 = vector.load %arg6[%c1_11, %c0_12] : memref<2x128xf32, #tpu.memory_space<vmem>>, vector<1x128xf32>
    %cst_13 = arith.constant 7.812500e-03 : f32
    %20 = vector.broadcast %cst_13 : f32 to vector<1x128xf32>
    %21 = arith.mulf %19, %20 : vector<1x128xf32>
    %22 = arith.mulf %18, %18 : vector<1x128xf32>
    %23 = arith.subf %21, %22 : vector<1x128xf32>
    %cst_14 = arith.constant 9.99999974E-6 : f32
    %24 = vector.broadcast %cst_14 : f32 to vector<1x128xf32>
    %25 = arith.addf %23, %24 : vector<1x128xf32>
    %26 = math.rsqrt %25 : vector<1x128xf32>
    %c0_15 = arith.constant 0 : index
    %c0_16 = arith.constant 0 : index
    %27 = vector.load %arg7[%c0_15, %c0_16] : memref<1x128xf32, #tpu.memory_space<vmem>>, vector<1x128xf32>
    %28 = arith.mulf %26, %27 : vector<1x128xf32>
    %c0_17 = arith.constant 0 : index
    %c0_18 = arith.constant 0 : index
    %29 = vector.load %arg8[%c0_17, %c0_18] : memref<1x128xf32, #tpu.memory_space<vmem>>, vector<1x128xf32>
    %30 = arith.mulf %18, %28 : vector<1x128xf32>
    %31 = arith.subf %29, %30 : vector<1x128xf32>
    %c0_19 = arith.constant 0 : index
    %c0_20 = arith.constant 0 : index
    %32 = vector.load %arg1[%c0_19, %c0_20] : memref<128x128xbf16, #tpu.memory_space<vmem>>, vector<128x128xbf16>
    %33 = arith.extf %32 : vector<128x128xbf16> to vector<128x128xf32>
    %34 = vector.broadcast %12 : vector<1x128xf32> to vector<128x128xf32>
    %35 = arith.mulf %33, %34 : vector<128x128xf32>
    %36 = vector.broadcast %15 : vector<1x128xf32> to vector<128x128xf32>
    %37 = arith.addf %35, %36 : vector<128x128xf32>
    %c0_21 = arith.constant 0 : index
    %c0_22 = arith.constant 0 : index
    %38 = vector.load %arg5[%c0_21, %c0_22] : memref<128x128xbf16, #tpu.memory_space<vmem>>, vector<128x128xbf16>
    %39 = arith.extf %38 : vector<128x128xbf16> to vector<128x128xf32>
    %40 = vector.broadcast %28 : vector<1x128xf32> to vector<128x128xf32>
    %41 = arith.mulf %39, %40 : vector<128x128xf32>
    %42 = vector.broadcast %31 : vector<1x128xf32> to vector<128x128xf32>
    %43 = arith.addf %41, %42 : vector<128x128xf32>
    %44 = arith.addf %37, %43 : vector<128x128xf32>
    %cst_23 = arith.constant 0.000000e+00 : f32
    %45 = vector.broadcast %cst_23 : f32 to vector<128x128xf32>
    %46 = arith.maximumf %44, %45 : vector<128x128xf32>
    %c0_24 = arith.constant 0 : index
    %c0_25 = arith.constant 0 : index
    %47 = vector.load %arg9[%c0_24, %c0_25] : memref<128x128xf32, #tpu.memory_space<vmem>>, vector<128x128xf32>
    tpu.vector_store %arg9[%c0_24, %c0_25], %46 {strides = array<i32>} : memref<128x128xf32, #tpu.memory_space<vmem>>, vector<128x128xf32>,
    return
  }
  func.func @transform_0(%arg0: i32) -> (i32, i32) {
    %c0_i32 = arith.constant 0 : i32
    %c0_i32_0 = arith.constant 0 : i32
    return %arg0, %c0_i32 : i32, i32
  }
  func.func @transform_1(%arg0: i32) -> (i32, i32) {
    %c0_i32 = arith.constant 0 : i32
    %c0_i32_0 = arith.constant 0 : i32
    %c0_i32_1 = arith.constant 0 : i32
    return %c0_i32, %c0_i32_0 : i32, i32
  }
  func.func @transform_2(%arg0: i32) -> (i32, i32) {
    %c0_i32 = arith.constant 0 : i32
    %c0_i32_0 = arith.constant 0 : i32
    %c0_i32_1 = arith.constant 0 : i32
    return %c0_i32, %c0_i32_0 : i32, i32
  }
  func.func @transform_3(%arg0: i32) -> (i32, i32) {
    %c0_i32 = arith.constant 0 : i32
    %c0_i32_0 = arith.constant 0 : i32
    %c0_i32_1 = arith.constant 0 : i32
    return %c0_i32, %c0_i32_0 : i32, i32
  }
  func.func @transform_4(%arg0: i32) -> (i32, i32) {
    %c0_i32 = arith.constant 0 : i32
    %c0_i32_0 = arith.constant 0 : i32
    return %arg0, %c0_i32 : i32, i32
  }
  func.func @transform_5(%arg0: i32) -> (i32, i32) {
    %c0_i32 = arith.constant 0 : i32
    %c0_i32_0 = arith.constant 0 : i32
    %c0_i32_1 = arith.constant 0 : i32
    return %c0_i32, %c0_i32_0 : i32, i32
  }
  func.func @transform_6(%arg0: i32) -> (i32, i32) {
    %c0_i32 = arith.constant 0 : i32
    %c0_i32_0 = arith.constant 0 : i32
    %c0_i32_1 = arith.constant 0 : i32
    return %c0_i32, %c0_i32_0 : i32, i32
  }
  func.func @transform_7(%arg0: i32) -> (i32, i32) {
    %c0_i32 = arith.constant 0 : i32
    %c0_i32_0 = arith.constant 0 : i32
    %c0_i32_1 = arith.constant 0 : i32
    return %c0_i32, %c0_i32_0 : i32, i32
  }
  func.func @transform_8(%arg0: i32) -> (i32, i32) {
    %c0_i32 = arith.constant 0 : i32
    %c0_i32_0 = arith.constant 0 : i32
    return %arg0, %c0_i32 : i32, i32
  }
}

</mosaic_0001>

<bundles_post_ra>
// kernel: bottleneck_forward_pallas.4
= control target key start
LH: loop header
LB: loop body
LE: loop exit
PB: predicated region body
PF: predicated region fallthrough
CT: control target
= control target key end

     0   :  { %v1764_v40 = vmov 0.0   ;;  %s2096_s1 = inlined_call_operand.vmem [shape: bf16[128,128], index: 1, kind: input, shape index: {}]   ;;  %s2097_s0 = inlined_call_operand.vmem [shape: bf16[512,128], index: 0, kind: input, shape index: {}]   ;;  %s2098_s3 = inlined_call_operand.vmem [shape: f32[2,128], index: 3, kind: output, shape index: {1}]   ;;  %s2099_s2 = inlined_call_operand.vmem [shape: bf16[512,128], index: 2, kind: output, shape index: {0}]  }
   0x1   :  { %v1724_v0 = vld [vmem:[%s2096_s1] sm:$0xff]   ;;  %v1725_v1 = vld [vmem:[%s2096_s1 + $0x8] sm:$0xff]   ;;  %v1726_v2 = vld [vmem:[%s2096_s1 + $0x10] sm:$0xff]   ;;  %18 = vst [vmem:[%s2098_s3] sm:$0x3] %v1764_v40 }
   0x2   :  { %1627 = vmatprep.subr.bf16.mxu0 %v1724_v0  ;;  %1707 = vmatprep.subr.bf16.mxu1 %v1724_v0  ;;  %v1727_v3 = vld [vmem:[%s2096_s1 + $0x18] sm:$0xff]   ;;  %v1732_v4 = vld [vmem:[%s2097_s0] sm:$0xff]   ;;  %v1729_v6 = vld [vmem:[%s2096_s1 + $0x28] sm:$0xff]  }
   0x3   :  { %1628 = vmatpush3.bf16.msra.mxu0 %v1724_v0  ;;  %1715 = vmatpush3.bf16.msra.mxu1 %v1724_v0  ;;  %v1728_v5 = vld [vmem:[%s2096_s1 + $0x20] sm:$0xff]   ;;  %v1730_v7 = vld [vmem:[%s2096_s1 + $0x30] sm:$0xff]   ;;  %v1731_v8 = vld [vmem:[%s2096_s1 + $0x38] sm:$0xff]  }
   0x4   :  { %1629 = vmatprep.subr.bf16.mxu0 %v1725_v1  ;;  %1708 = vmatprep.subr.bf16.mxu1 %v1725_v1  ;;  %v1748_v9 = vld [vmem:[%s2097_s0 + $0x80] sm:$0xff]   ;;  %v1733_v10 = vld [vmem:[%s2097_s0 + $0x8] sm:$0xff]   ;;  %v1734_v11 = vld [vmem:[%s2097_s0 + $0x10] sm:$0xff]  }
   0x5   :  { %1643 = vmatprep.mubr.bf16.mxu0 %v1732_v4  ;;  %1675 = vmatprep.mubr.bf16.mxu1 %v1748_v9  ;;  %v1749_v12 = vld [vmem:[%s2097_s0 + $0x88] sm:$0xff]   ;;  %v1750_v13 = vld [vmem:[%s2097_s0 + $0x90] sm:$0xff]   ;;  %v1735_v14 = vld [vmem:[%s2097_s0 + $0x18] sm:$0xff]  }
   0x6   :  { %v1736_v15 = vld [vmem:[%s2097_s0 + $0x20] sm:$0xff]   ;;  %v1751_v16 = vld [vmem:[%s2097_s0 + $0x98] sm:$0xff]   ;;  %v1737_v18 = vld [vmem:[%s2097_s0 + $0x28] sm:$0xff]  }
   0x7   :  { %1630 = vmatpush3.bf16.msra.mxu0 %v1725_v1  ;;  %1716 = vmatpush3.bf16.msra.mxu1 %v1725_v1  ;;  %v1752_v17 = vld [vmem:[%s2097_s0 + $0xa0] sm:$0xff]   ;;  %v1753_v19 = vld [vmem:[%s2097_s0 + $0xa8] sm:$0xff]   ;;  %v1738_v20 = vld [vmem:[%s2097_s0 + $0x30] sm:$0xff]  }
   0x8   :  { %1631 = vmatprep.subr.bf16.mxu0 %v1726_v2  ;;  %1709 = vmatprep.subr.bf16.mxu1 %v1726_v2  ;;  %v1754_v21 = vld [vmem:[%s2097_s0 + $0xb0] sm:$0xff]   ;;  %v1739_v22 = vld [vmem:[%s2097_s0 + $0x38] sm:$0xff]   ;;  %v1740_v24 = vld [vmem:[%s2097_s0 + $0x40] sm:$0xff]  }
   0x9   :  { %v1755_v23 = vld [vmem:[%s2097_s0 + $0xb8] sm:$0xff]   ;;  %v1756_v25 = vld [vmem:[%s2097_s0 + $0xc0] sm:$0xff]   ;;  %v1741_v26 = vld [vmem:[%s2097_s0 + $0x48] sm:$0xff]  }
   0xa   :  { %v1757_v27 = vld [vmem:[%s2097_s0 + $0xc8] sm:$0xff]   ;;  %v1742_v28 = vld [vmem:[%s2097_s0 + $0x50] sm:$0xff]   ;;  %v1743_v30 = vld [vmem:[%s2097_s0 + $0x58] sm:$0xff]  }
   0xb   :  { %1632 = vmatpush3.bf16.msra.mxu0 %v1726_v2  ;;  %1717 = vmatpush3.bf16.msra.mxu1 %v1726_v2  ;;  %v1758_v29 = vld [vmem:[%s2097_s0 + $0xd0] sm:$0xff]   ;;  %v1759_v31 = vld [vmem:[%s2097_s0 + $0xd8] sm:$0xff]   ;;  %v1744_v32 = vld [vmem:[%s2097_s0 + $0x60] sm:$0xff]  }
   0xc   :  { %1633 = vmatprep.subr.bf16.mxu0 %v1727_v3  ;;  %1710 = vmatprep.subr.bf16.mxu1 %v1727_v3  ;;  %v1760_v33 = vld [vmem:[%s2097_s0 + $0xe0] sm:$0xff]   ;;  %v1745_v34 = vld [vmem:[%s2097_s0 + $0x68] sm:$0xff]   ;;  %v1746_v36 = vld [vmem:[%s2097_s0 + $0x70] sm:$0xff]  }
   0xd   :  { %v1761_v35 = vld [vmem:[%s2097_s0 + $0xe8] sm:$0xff]   ;;  %v1762_v37 = vld [vmem:[%s2097_s0 + $0xf0] sm:$0xff]   ;;  %v1747_v38 = vld [vmem:[%s2097_s0 + $0x78] sm:$0xff]  }
   0xe   :  { %v1763_v39 = vld [vmem:[%s2097_s0 + $0xf8] sm:$0xff]  }
   0xf   :  { %1634 = vmatpush3.bf16.msra.mxu0 %v1727_v3  ;;  %1718 = vmatpush3.bf16.msra.mxu1 %v1727_v3 }
  0x10   :  { %1635 = vmatprep.subr.bf16.mxu0 %v1728_v5  ;;  %1711 = vmatprep.subr.bf16.mxu1 %v1728_v5 }
  0x13   :  { %1636 = vmatpush3.bf16.msra.mxu0 %v1728_v5  ;;  %1719 = vmatpush3.bf16.msra.mxu1 %v1728_v5 }
  0x14   :  { %1637 = vmatprep.subr.bf16.mxu0 %v1729_v6  ;;  %1712 = vmatprep.subr.bf16.mxu1 %v1729_v6 }
  0x17   :  { %1638 = vmatpush3.bf16.msra.mxu0 %v1729_v6  ;;  %1720 = vmatpush3.bf16.msra.mxu1 %v1729_v6 }
  0x18   :  { %1639 = vmatprep.subr.bf16.mxu0 %v1730_v7  ;;  %1713 = vmatprep.subr.bf16.mxu1 %v1730_v7 }
  0x1b   :  { %1640 = vmatpush3.bf16.msra.mxu0 %v1730_v7  ;;  %1721 = vmatpush3.bf16.msra.mxu1 %v1730_v7 }
  0x1c   :  { %1641 = vmatprep.subr.bf16.mxu0 %v1731_v8  ;;  %1714 = vmatprep.subr.bf16.mxu1 %v1731_v8 }
  0x1f   :  { %1642 = vmatpush3.bf16.msra.mxu0 %v1731_v8  ;;  %1722 = vmatpush3.bf16.msra.mxu1 %v1731_v8 }
  0x22   :  { %1644 = vmatmul.mubr.bf16.vlgmr.msra.gmra.mrb[0].mxu0 %v1733_v10  ;;  %1676 = vmatmul.mubr.bf16.vlgmr.msra.gmra.mrb[0].mxu1 %v1749_v12 }
  0x23   :  { %1647 = vmatprep.mubr.bf16.mxu0 %v1734_v11  ;;  %1679 = vmatprep.mubr.bf16.mxu1 %v1750_v13 }
  0x2a   :  { %1648 = vmatmul.mubr.bf16.gmra.mrb[4].mxu0 %v1735_v14  ;;  %1680 = vmatmul.mubr.bf16.gmra.mrb[4].mxu1 %v1751_v16 }
  0x2b   :  { %1651 = vmatprep.mubr.bf16.mxu0 %v1736_v15  ;;  %1683 = vmatprep.mubr.bf16.mxu1 %v1752_v17 }
  0x32   :  { %1652 = vmatmul.mubr.bf16.gmra.mrb[8].mxu0 %v1737_v18  ;;  %1684 = vmatmul.mubr.bf16.gmra.mrb[8].mxu1 %v1753_v19 }
  0x33   :  { %1655 = vmatprep.mubr.bf16.mxu0 %v1738_v20  ;;  %1687 = vmatprep.mubr.bf16.mxu1 %v1754_v21 }
  0x3a   :  { %1656 = vmatmul.mubr.bf16.gmra.mrb[12].mxu0 %v1739_v22  ;;  %1688 = vmatmul.mubr.bf16.gmra.mrb[12].mxu1 %v1755_v23 }
  0x3b   :  { %1659 = vmatprep.mubr.bf16.mxu0 %v1740_v24  ;;  %1691 = vmatprep.mubr.bf16.mxu1 %v1756_v25 }
  0x42   :  { %1660 = vmatmul.mubr.bf16.gmra.mrb[16].mxu0 %v1741_v26  ;;  %1692 = vmatmul.mubr.bf16.gmra.mrb[16].mxu1 %v1757_v27 }
  0x43   :  { %1663 = vmatprep.mubr.bf16.mxu0 %v1742_v28  ;;  %1695 = vmatprep.mubr.bf16.mxu1 %v1758_v29 }
  0x4a   :  { %1664 = vmatmul.mubr.bf16.gmra.mrb[20].mxu0 %v1743_v30  ;;  %1696 = vmatmul.mubr.bf16.gmra.mrb[20].mxu1 %v1759_v31 }
  0x4b   :  { %1667 = vmatprep.mubr.bf16.mxu0 %v1744_v32  ;;  %1699 = vmatprep.mubr.bf16.mxu1 %v1760_v33 }
  0x52   :  { %1668 = vmatmul.mubr.bf16.gmra.mrb[24].mxu0 %v1745_v34  ;;  %1700 = vmatmul.mubr.bf16.gmra.mrb[24].mxu1 %v1761_v35 }
  0x53   :  { %1671 = vmatprep.mubr.bf16.mxu0 %v1746_v36  ;;  %1703 = vmatprep.mubr.bf16.mxu1 %v1762_v37 }
  0x5a   :  { %1672 = vmatmul.mubr.bf16.gmra.mrb[28].mxu0 %v1747_v38  ;;  %1704 = vmatmul.mubr.bf16.gmra.mrb[28].mxu1 %v1763_v39 }
  0xf5   :  { %v1645_v41 = vpop.f32.mrb[0].mxu0  ;;  %v1677_v42 = vpop.f32.mrb[0].mxu1 }
  0xf6   :  { %v373_v43 = vpop.f32.mrb[1].mxu0  ;;  %v501_v44 = vpop.f32.mrb[1].mxu1 }
  0xf7   :  { %v1646_v45 = vpop.f32.mrb[2].mxu0  ;;  %v1678_v46 = vpop.f32.mrb[2].mxu1 }
  0xf8   :  { %v629_v47 = vpack.c.bf16 %v1646_v45, %v1645_v41  ;;  %v376_v48 = vpop.f32.mrb[3].mxu0  ;;  %v1908_v49 = vpack.c.bf16 %v1678_v46, %v1677_v42  ;;  %v504_v50 = vpop.f32.mrb[3].mxu1 }
  0xf9   :  { %v628_v51 = vpack.c.bf16 %v376_v48, %v373_v43  ;;  %v1910_v52 = vpack.c.bf16 %v504_v50, %v501_v44 }
  0xfa   :  { %1556 = vst [vmem:[%s2099_s2 + $0x8] sm:$0xff] %v629_v47   ;;  %1572 = vst [vmem:[%s2099_s2 + $0x88] sm:$0xff] %v1908_v49   ;;  %v950_v53 = vunpack.c.l.bf16 %v629_v47  ;;  %v951_v56 = vunpack.c.h.bf16 %v629_v47 }
  0xfb   :  { %1400 = vst [vmem:[%s2099_s2] sm:$0xff] %v628_v51   ;;  %v948_v54 = vunpack.c.l.bf16 %v628_v51  ;;  %v949_v55 = vunpack.c.h.bf16 %v628_v51  ;;  %1571 = vst [vmem:[%s2099_s2 + $0x80] sm:$0xff] %v1910_v52  }
  0xfc   :  { %v1087_v0 = vmul.f32 %v950_v53, %v950_v53  ;;  %v1088_v5 = vmul.f32 %v951_v56, %v951_v56 }
  0xfd   :  { %v1013_v57 = vadd.f32 %v949_v55, %v948_v54  ;;  %v1085_v58 = vmul.f32 %v948_v54, %v948_v54  ;;  %v1086_v59 = vmul.f32 %v949_v55, %v949_v55  ;;  %v1649_v60 = vpop.f32.mrb[4].mxu0  ;;  %v1681_v61 = vpop.f32.mrb[4].mxu1 }
  0xfe   :  { %v389_v62 = vpop.f32.mrb[5].mxu0  ;;  %v517_v63 = vpop.f32.mrb[5].mxu1 }
  0xff   :  { %v1014_v1 = vadd.f32 %v1013_v57, %v950_v53  ;;  %v1149_v2 = vadd.f32 %v1086_v59, %v1085_v58  ;;  %v1650_v3 = vpop.f32.mrb[6].mxu0  ;;  %v1682_v4 = vpop.f32.mrb[6].mxu1 }
 0x100   :  { %v631_v6 = vpack.c.bf16 %v1650_v3, %v1649_v60  ;;  %v392_v7 = vpop.f32.mrb[7].mxu0  ;;  %v1926_v8 = vpack.c.bf16 %v1682_v4, %v1681_v61  ;;  %v520_v9 = vpop.f32.mrb[7].mxu1 }
 0x101   :  { %v1150_v10 = vadd.f32 %v1149_v2, %v1087_v0  ;;  %v630_v11 = vpack.c.bf16 %v392_v7, %v389_v62  ;;  %v1015_v12 = vadd.f32 %v1014_v1, %v951_v56  ;;  %v1928_v13 = vpack.c.bf16 %v520_v9, %v517_v63 }
 0x102   :  { %1558 = vst [vmem:[%s2099_s2 + $0x18] sm:$0xff] %v631_v6   ;;  %1574 = vst [vmem:[%s2099_s2 + $0x98] sm:$0xff] %v1926_v8   ;;  %v954_v17 = vunpack.c.l.bf16 %v631_v6  ;;  %v955_v22 = vunpack.c.h.bf16 %v631_v6 }
 0x103   :  { %1557 = vst [vmem:[%s2099_s2 + $0x10] sm:$0xff] %v630_v11   ;;  %v952_v14 = vunpack.c.l.bf16 %v630_v11  ;;  %v953_v15 = vunpack.c.h.bf16 %v630_v11  ;;  %v1151_v16 = vadd.f32 %v1150_v10, %v1088_v5  ;;  %1573 = vst [vmem:[%s2099_s2 + $0x90] sm:$0xff] %v1928_v13  }
 0x104   :  { %v1091_v30 = vmul.f32 %v954_v17, %v954_v17  ;;  %v1092_v39 = vmul.f32 %v955_v22, %v955_v22 }
 0x105   :  { %v1016_v18 = vadd.f32 %v1015_v12, %v952_v14  ;;  %v1089_v19 = vmul.f32 %v952_v14, %v952_v14  ;;  %v1653_v20 = vpop.f32.mrb[8].mxu0  ;;  %v1685_v21 = vpop.f32.mrb[8].mxu1  ;;  %v1090_v26 = vmul.f32 %v953_v15, %v953_v15 }
 0x106   :  { %v405_v23 = vpop.f32.mrb[9].mxu0  ;;  %v533_v24 = vpop.f32.mrb[9].mxu1 }
 0x107   :  { %v1017_v25 = vadd.f32 %v1016_v18, %v953_v15  ;;  %v1152_v27 = vadd.f32 %v1151_v16, %v1089_v19  ;;  %v1654_v28 = vpop.f32.mrb[10].mxu0  ;;  %v1686_v29 = vpop.f32.mrb[10].mxu1 }
 0x108   :  { %v633_v31 = vpack.c.bf16 %v1654_v28, %v1653_v20  ;;  %v408_v32 = vpop.f32.mrb[11].mxu0  ;;  %v1944_v33 = vpack.c.bf16 %v1686_v29, %v1685_v21  ;;  %v536_v34 = vpop.f32.mrb[11].mxu1 }
 0x109   :  { %v1018_v35 = vadd.f32 %v1017_v25, %v954_v17  ;;  %v1153_v36 = vadd.f32 %v1152_v27, %v1090_v26  ;;  %v632_v37 = vpack.c.bf16 %v408_v32, %v405_v23  ;;  %v1946_v38 = vpack.c.bf16 %v536_v34, %v533_v24 }
 0x10a   :  { %1560 = vst [vmem:[%s2099_s2 + $0x28] sm:$0xff] %v633_v31   ;;  %1576 = vst [vmem:[%s2099_s2 + $0xa8] sm:$0xff] %v1944_v33   ;;  %v958_v44 = vunpack.c.l.bf16 %v633_v31  ;;  %v959_v51 = vunpack.c.h.bf16 %v633_v31 }
 0x10b   :  { %v1154_v40 = vadd.f32 %v1153_v36, %v1091_v30  ;;  %1559 = vst [vmem:[%s2099_s2 + $0x20] sm:$0xff] %v632_v37   ;;  %v956_v41 = vunpack.c.l.bf16 %v632_v37  ;;  %v957_v42 = vunpack.c.h.bf16 %v632_v37  ;;  %v1019_v43 = vadd.f32 %v1018_v35, %v955_v22  ;;  %1575 = vst [vmem:[%s2099_s2 + $0xa0] sm:$0xff] %v1946_v38  }
 0x10c   :  { %v1095_v60 = vmul.f32 %v958_v44, %v958_v44  ;;  %v1096_v5 = vmul.f32 %v959_v51, %v959_v51 }
 0x10d   :  { %v1020_v45 = vadd.f32 %v1019_v43, %v956_v41  ;;  %v1093_v46 = vmul.f32 %v956_v41, %v956_v41  ;;  %v1155_v47 = vadd.f32 %v1154_v40, %v1092_v39  ;;  %v1657_v48 = vpop.f32.mrb[12].mxu0  ;;  %v1689_v50 = vpop.f32.mrb[12].mxu1  ;;  %v1094_v56 = vmul.f32 %v957_v42, %v957_v42 }
 0x10e   :  { %v421_v53 = vpop.f32.mrb[13].mxu0  ;;  %v549_v54 = vpop.f32.mrb[13].mxu1 }
 0x10f   :  { %v1021_v55 = vadd.f32 %v1020_v45, %v957_v42  ;;  %v1156_v57 = vadd.f32 %v1155_v47, %v1093_v46  ;;  %v1658_v58 = vpop.f32.mrb[14].mxu0  ;;  %v1690_v59 = vpop.f32.mrb[14].mxu1 }
 0x110   :  { %v635_v61 = vpack.c.bf16 %v1658_v58, %v1657_v48  ;;  %v424_v62 = vpop.f32.mrb[15].mxu0  ;;  %v1962_v63 = vpack.c.bf16 %v1690_v59, %v1689_v50  ;;  %v552_v0 = vpop.f32.mrb[15].mxu1 }
 0x111   :  { %v1022_v1 = vadd.f32 %v1021_v55, %v958_v44  ;;  %v1157_v2 = vadd.f32 %v1156_v57, %v1094_v56  ;;  %v634_v3 = vpack.c.bf16 %v424_v62, %v421_v53  ;;  %v1964_v4 = vpack.c.bf16 %v552_v0, %v549_v54 }
 0x112   :  { %1562 = vst [vmem:[%s2099_s2 + $0x38] sm:$0xff] %v635_v61   ;;  %1578 = vst [vmem:[%s2099_s2 + $0xb8] sm:$0xff] %v1962_v63   ;;  %v962_v11 = vunpack.c.l.bf16 %v635_v61  ;;  %v963_v18 = vunpack.c.h.bf16 %v635_v61 }
 0x113   :  { %v1158_v6 = vadd.f32 %v1157_v2, %v1095_v60  ;;  %1561 = vst [vmem:[%s2099_s2 + $0x30] sm:$0xff] %v634_v3   ;;  %v960_v7 = vunpack.c.l.bf16 %v634_v3  ;;  %v961_v9 = vunpack.c.h.bf16 %v634_v3  ;;  %v1023_v10 = vadd.f32 %v1022_v1, %v959_v51  ;;  %1577 = vst [vmem:[%s2099_s2 + $0xb0] sm:$0xff] %v1964_v4  }
 0x114   :  { %v1099_v26 = vmul.f32 %v962_v11, %v962_v11  ;;  %v1100_v36 = vmul.f32 %v963_v18, %v963_v18 }
 0x115   :  { %v1024_v12 = vadd.f32 %v1023_v10, %v960_v7  ;;  %v1097_v14 = vmul.f32 %v960_v7, %v960_v7  ;;  %v1159_v15 = vadd.f32 %v1158_v6, %v1096_v5  ;;  %v1661_v16 = vpop.f32.mrb[16].mxu0  ;;  %v1693_v17 = vpop.f32.mrb[16].mxu1  ;;  %v1098_v22 = vmul.f32 %v961_v9, %v961_v9 }
 0x116   :  { %v437_v19 = vpop.f32.mrb[17].mxu0  ;;  %v565_v20 = vpop.f32.mrb[17].mxu1 }
 0x117   :  { %v1025_v21 = vadd.f32 %v1024_v12, %v961_v9  ;;  %v1160_v23 = vadd.f32 %v1159_v15, %v1097_v14  ;;  %v1662_v24 = vpop.f32.mrb[18].mxu0  ;;  %v1694_v25 = vpop.f32.mrb[18].mxu1 }
 0x118   :  { %v637_v27 = vpack.c.bf16 %v1662_v24, %v1661_v16  ;;  %v440_v28 = vpop.f32.mrb[19].mxu0  ;;  %v1980_v29 = vpack.c.bf16 %v1694_v25, %v1693_v17  ;;  %v568_v30 = vpop.f32.mrb[19].mxu1 }
 0x119   :  { %v1026_v31 = vadd.f32 %v1025_v21, %v962_v11  ;;  %v1161_v32 = vadd.f32 %v1160_v23, %v1098_v22  ;;  %v636_v34 = vpack.c.bf16 %v440_v28, %v437_v19  ;;  %v1982_v35 = vpack.c.bf16 %v568_v30, %v565_v20 }
 0x11a   :  { %1564 = vst [vmem:[%s2099_s2 + $0x48] sm:$0xff] %v637_v27   ;;  %1580 = vst [vmem:[%s2099_s2 + $0xc8] sm:$0xff] %v1980_v29   ;;  %v966_v42 = vunpack.c.l.bf16 %v637_v27  ;;  %v967_v48 = vunpack.c.h.bf16 %v637_v27 }
 0x11b   :  { %v1162_v37 = vadd.f32 %v1161_v32, %v1099_v26  ;;  %1563 = vst [vmem:[%s2099_s2 + $0x40] sm:$0xff] %v636_v34   ;;  %v964_v39 = vunpack.c.l.bf16 %v636_v34  ;;  %v965_v40 = vunpack.c.h.bf16 %v636_v34  ;;  %v1027_v41 = vadd.f32 %v1026_v31, %v963_v18  ;;  %1579 = vst [vmem:[%s2099_s2 + $0xc0] sm:$0xff] %v1982_v35  }
 0x11c   :  { %v1103_v58 = vmul.f32 %v966_v42, %v966_v42  ;;  %v1104_v5 = vmul.f32 %v967_v48, %v967_v48 }
 0x11d   :  { %v1028_v43 = vadd.f32 %v1027_v41, %v964_v39  ;;  %v1101_v44 = vmul.f32 %v964_v39, %v964_v39  ;;  %v1163_v45 = vadd.f32 %v1162_v37, %v1100_v36  ;;  %v1665_v46 = vpop.f32.mrb[20].mxu0  ;;  %v1697_v47 = vpop.f32.mrb[20].mxu1  ;;  %v1102_v54 = vmul.f32 %v965_v40, %v965_v40 }
 0x11e   :  { %v453_v50 = vpop.f32.mrb[21].mxu0  ;;  %v581_v51 = vpop.f32.mrb[21].mxu1 }
 0x11f   :  { %v1029_v53 = vadd.f32 %v1028_v43, %v965_v40  ;;  %v1164_v55 = vadd.f32 %v1163_v45, %v1101_v44  ;;  %v1666_v56 = vpop.f32.mrb[22].mxu0  ;;  %v1698_v57 = vpop.f32.mrb[22].mxu1 }
 0x120   :  { %v639_v59 = vpack.c.bf16 %v1666_v56, %v1665_v46  ;;  %v456_v60 = vpop.f32.mrb[23].mxu0  ;;  %v1998_v61 = vpack.c.bf16 %v1698_v57, %v1697_v47  ;;  %v584_v62 = vpop.f32.mrb[23].mxu1 }
 0x121   :  { %v1030_v0 = vadd.f32 %v1029_v53, %v966_v42  ;;  %v1165_v1 = vadd.f32 %v1164_v55, %v1102_v54  ;;  %v638_v2 = vpack.c.bf16 %v456_v60, %v453_v50  ;;  %v2000_v3 = vpack.c.bf16 %v584_v62, %v581_v51 }
 0x122   :  { %1566 = vst [vmem:[%s2099_s2 + $0x58] sm:$0xff] %v639_v59   ;;  %1582 = vst [vmem:[%s2099_s2 + $0xd8] sm:$0xff] %v1998_v61   ;;  %v970_v11 = vunpack.c.l.bf16 %v639_v59  ;;  %v971_v18 = vunpack.c.h.bf16 %v639_v59 }
 0x123   :  { %v1166_v6 = vadd.f32 %v1165_v1, %v1103_v58  ;;  %1565 = vst [vmem:[%s2099_s2 + $0x50] sm:$0xff] %v638_v2   ;;  %v968_v7 = vunpack.c.l.bf16 %v638_v2  ;;  %v969_v9 = vunpack.c.h.bf16 %v638_v2  ;;  %v1031_v10 = vadd.f32 %v1030_v0, %v967_v48  ;;  %1581 = vst [vmem:[%s2099_s2 + $0xd0] sm:$0xff] %v2000_v3  }
 0x124   :  { %v1107_v26 = vmul.f32 %v970_v11, %v970_v11  ;;  %v1108_v39 = vmul.f32 %v971_v18, %v971_v18 }
 0x125   :  { %v1032_v12 = vadd.f32 %v1031_v10, %v968_v7  ;;  %v1105_v14 = vmul.f32 %v968_v7, %v968_v7  ;;  %v1167_v15 = vadd.f32 %v1166_v6, %v1104_v5  ;;  %v1669_v16 = vpop.f32.mrb[24].mxu0  ;;  %v1701_v17 = vpop.f32.mrb[24].mxu1  ;;  %v1106_v22 = vmul.f32 %v969_v9, %v969_v9 }
 0x126   :  { %v469_v19 = vpop.f32.mrb[25].mxu0  ;;  %v597_v20 = vpop.f32.mrb[25].mxu1 }
 0x127   :  { %v1033_v21 = vadd.f32 %v1032_v12, %v969_v9  ;;  %v1168_v23 = vadd.f32 %v1167_v15, %v1105_v14  ;;  %v1670_v24 = vpop.f32.mrb[26].mxu0  ;;  %v1702_v25 = vpop.f32.mrb[26].mxu1 }
 0x128   :  { %v641_v27 = vpack.c.bf16 %v1670_v24, %v1669_v16  ;;  %v472_v28 = vpop.f32.mrb[27].mxu0  ;;  %v2016_v30 = vpack.c.bf16 %v1702_v25, %v1701_v17  ;;  %v600_v31 = vpop.f32.mrb[27].mxu1 }
 0x129   :  { %v1034_v32 = vadd.f32 %v1033_v21, %v970_v11  ;;  %v1169_v34 = vadd.f32 %v1168_v23, %v1106_v22  ;;  %v640_v36 = vpack.c.bf16 %v472_v28, %v469_v19  ;;  %v2018_v37 = vpack.c.bf16 %v600_v31, %v597_v20 }
 0x12a   :  { %1568 = vst [vmem:[%s2099_s2 + $0x68] sm:$0xff] %v641_v27   ;;  %1584 = vst [vmem:[%s2099_s2 + $0xe8] sm:$0xff] %v2016_v30   ;;  %v974_v44 = vunpack.c.l.bf16 %v641_v27  ;;  %v975_v51 = vunpack.c.h.bf16 %v641_v27  ;;  %v980_v27 = vunpack.c.l.bf16 %v1910_v52 }
 0x12b   :  { %v1170_v40 = vadd.f32 %v1169_v34, %v1107_v26  ;;  %1567 = vst [vmem:[%s2099_s2 + $0x60] sm:$0xff] %v640_v36   ;;  %v972_v41 = vunpack.c.l.bf16 %v640_v36  ;;  %v973_v42 = vunpack.c.h.bf16 %v640_v36  ;;  %v1035_v43 = vadd.f32 %v1034_v32, %v971_v18  ;;  %1583 = vst [vmem:[%s2099_s2 + $0xe0] sm:$0xff] %v2018_v37  }
 0x12c   :  { %v1111_v60 = vmul.f32 %v974_v44, %v974_v44  ;;  %v1112_v10 = vmul.f32 %v975_v51, %v975_v51  ;;  %v981_v32 = vunpack.c.h.bf16 %v1910_v52  ;;  %v982_v36 = vunpack.c.l.bf16 %v1908_v49 }
 0x12d   :  { %v1036_v45 = vadd.f32 %v1035_v43, %v972_v41  ;;  %v1109_v46 = vmul.f32 %v972_v41, %v972_v41  ;;  %v1171_v47 = vadd.f32 %v1170_v40, %v1108_v39  ;;  %v1673_v48 = vpop.f32.mrb[28].mxu0  ;;  %v1705_v50 = vpop.f32.mrb[28].mxu1  ;;  %v1110_v56 = vmul.f32 %v973_v42, %v973_v42 }
 0x12e   :  { %v485_v53 = vpop.f32.mrb[29].mxu0  ;;  %v613_v54 = vpop.f32.mrb[29].mxu1  ;;  %v1117_v40 = vmul.f32 %v980_v27, %v980_v27  ;;  %v985_v52 = vunpack.c.h.bf16 %v1928_v13 }
 0x12f   :  { %v1037_v55 = vadd.f32 %v1036_v45, %v973_v42  ;;  %v1172_v57 = vadd.f32 %v1171_v47, %v1109_v46  ;;  %v1674_v58 = vpop.f32.mrb[30].mxu0  ;;  %v1706_v59 = vpop.f32.mrb[30].mxu1  ;;  %v983_v42 = vunpack.c.h.bf16 %v1908_v49  ;;  %v1119_v46 = vmul.f32 %v982_v36, %v982_v36 }
 0x130   :  { %v643_v62 = vpack.c.bf16 %v1674_v58, %v1673_v48  ;;  %v488_v0 = vpop.f32.mrb[31].mxu0  ;;  %v2034_v1 = vpack.c.bf16 %v1706_v59, %v1705_v50  ;;  %v616_v2 = vpop.f32.mrb[31].mxu1  ;;  %v984_v50 = vunpack.c.l.bf16 %v1928_v13  ;;  %v987_v49 = vunpack.c.h.bf16 %v1926_v8 }
 0x131   :  { %v1038_v5 = vadd.f32 %v1037_v55, %v974_v44  ;;  %v1173_v6 = vadd.f32 %v1172_v57, %v1110_v56  ;;  %v642_v7 = vpack.c.bf16 %v488_v0, %v485_v53  ;;  %v2036_v9 = vpack.c.bf16 %v616_v2, %v613_v54 }
 0x132   :  { %1570 = vst [vmem:[%s2099_s2 + $0x78] sm:$0xff] %v643_v62   ;;  %1586 = vst [vmem:[%s2099_s2 + $0xf8] sm:$0xff] %v2034_v1   ;;  %v978_v16 = vunpack.c.l.bf16 %v643_v62  ;;  %v979_v20 = vunpack.c.h.bf16 %v643_v62  ;;  %v1118_v44 = vmul.f32 %v981_v32, %v981_v32  ;;  %v986_v55 = vunpack.c.l.bf16 %v1926_v8 }
 0x133   :  { %v1174_v11 = vadd.f32 %v1173_v6, %v1111_v60  ;;  %1569 = vst [vmem:[%s2099_s2 + $0x70] sm:$0xff] %v642_v7   ;;  %v976_v12 = vunpack.c.l.bf16 %v642_v7  ;;  %v977_v14 = vunpack.c.h.bf16 %v642_v7  ;;  %v1039_v15 = vadd.f32 %v1038_v5, %v975_v51  ;;  %1585 = vst [vmem:[%s2099_s2 + $0xf0] sm:$0xff] %v2036_v9  }
 0x134   :  { %v1115_v24 = vmul.f32 %v978_v16, %v978_v16  ;;  %v1116_v28 = vmul.f32 %v979_v20, %v979_v20  ;;  %v1120_v51 = vmul.f32 %v983_v42, %v983_v42  ;;  %v1121_v57 = vmul.f32 %v984_v50, %v984_v50 }
 0x135   :  { %v1040_v17 = vadd.f32 %v1039_v15, %v976_v12  ;;  %v1113_v18 = vmul.f32 %v976_v12, %v976_v12  ;;  %v1175_v19 = vadd.f32 %v1174_v11, %v1112_v10  ;;  %v1114_v22 = vmul.f32 %v977_v14, %v977_v14 }
 0x136   :  { %v1122_v60 = vmul.f32 %v985_v52, %v985_v52  ;;  %v1123_v0 = vmul.f32 %v986_v55, %v986_v55  ;;  %v988_v6 = vunpack.c.l.bf16 %v1946_v38  ;;  %v1124_v7 = vmul.f32 %v987_v49, %v987_v49 }
 0x137   :  { %v1041_v21 = vadd.f32 %v1040_v17, %v977_v14  ;;  %v1176_v23 = vadd.f32 %v1175_v19, %v1113_v18  ;;  %v989_v13 = vunpack.c.h.bf16 %v1946_v38  ;;  %v990_v12 = vunpack.c.l.bf16 %v1944_v33 }
 0x138   :  { %v1125_v15 = vmul.f32 %v988_v6, %v988_v6  ;;  %v991_v8 = vunpack.c.h.bf16 %v1944_v33  ;;  %v993_v38 = vunpack.c.h.bf16 %v1964_v4  ;;  %v995_v33 = vunpack.c.h.bf16 %v1962_v63 }
 0x139   :  { %v1042_v25 = vadd.f32 %v1041_v21, %v978_v16  ;;  %v1177_v26 = vadd.f32 %v1176_v23, %v1114_v22  ;;  %v1126_v18 = vmul.f32 %v989_v13, %v989_v13  ;;  %v992_v23 = vunpack.c.l.bf16 %v1964_v4 }
 0x13a   :  { %v997_v4 = vunpack.c.h.bf16 %v1982_v35 }
 0x13b   :  { %v1178_v31 = vadd.f32 %v1177_v26, %v1115_v24  ;;  %v1043_v34 = vadd.f32 %v1042_v25, %v979_v20  ;;  %v1127_v20 = vmul.f32 %v990_v12, %v990_v12  ;;  %v1128_v24 = vmul.f32 %v991_v8, %v991_v8 }
 0x13d   :  { %v1044_v39 = vadd.f32 %v1043_v34, %v980_v27  ;;  %v1179_v41 = vadd.f32 %v1178_v31, %v1116_v28  ;;  %v994_v27 = vunpack.c.l.bf16 %v1962_v63  ;;  %v1129_v31 = vmul.f32 %v992_v23, %v992_v23 }
 0x13e   :  { %v999_v63 = vunpack.c.h.bf16 %v1980_v29 }
 0x13f   :  { %v1045_v43 = vadd.f32 %v1044_v39, %v981_v32  ;;  %v1180_v45 = vadd.f32 %v1179_v41, %v1117_v40  ;;  %v1131_v40 = vmul.f32 %v994_v27, %v994_v27 }
 0x141   :  { %v1046_v47 = vadd.f32 %v1045_v43, %v982_v36  ;;  %v1181_v48 = vadd.f32 %v1180_v45, %v1118_v44  ;;  %v1130_v36 = vmul.f32 %v993_v38, %v993_v38  ;;  %v996_v43 = vunpack.c.l.bf16 %v1982_v35 }
 0x142   :  { %v1132_v44 = vmul.f32 %v995_v33, %v995_v33  ;;  %v1001_v35 = vunpack.c.h.bf16 %v2000_v3 }
 0x143   :  { %v1182_v53 = vadd.f32 %v1181_v48, %v1119_v46  ;;  %v1047_v54 = vadd.f32 %v1046_v47, %v983_v42  ;;  %v998_v47 = vunpack.c.l.bf16 %v1980_v29  ;;  %v1003_v29 = vunpack.c.h.bf16 %v1998_v61 }
 0x145   :  { %v1048_v56 = vadd.f32 %v1047_v54, %v984_v50  ;;  %v1183_v58 = vadd.f32 %v1182_v53, %v1120_v51  ;;  %v1133_v50 = vmul.f32 %v996_v43, %v996_v43 }
 0x147   :  { %v1049_v59 = vadd.f32 %v1048_v56, %v985_v52  ;;  %v1184_v62 = vadd.f32 %v1183_v58, %v1121_v57  ;;  %v1134_v52 = vmul.f32 %v997_v4, %v997_v4  ;;  %v1000_v58 = vunpack.c.l.bf16 %v2000_v3 }
 0x148   :  { %v1005_v3 = vunpack.c.h.bf16 %v2018_v37 }
 0x149   :  { %v1050_v2 = vadd.f32 %v1049_v59, %v986_v55  ;;  %v1185_v5 = vadd.f32 %v1184_v62, %v1122_v60  ;;  %v1135_v55 = vmul.f32 %v998_v47, %v998_v47  ;;  %v1002_v62 = vunpack.c.l.bf16 %v1998_v61 }
 0x14a   :  { %v1007_v61 = vunpack.c.h.bf16 %v2016_v30 }
 0x14b   :  { %v1186_v10 = vadd.f32 %v1185_v5, %v1123_v0  ;;  %v1051_v11 = vadd.f32 %v1050_v2, %v987_v49  ;;  %v1136_v49 = vmul.f32 %v999_v63, %v999_v63  ;;  %v1137_v2 = vmul.f32 %v1000_v58, %v1000_v58 }
 0x14d   :  { %v1052_v14 = vadd.f32 %v1051_v11, %v988_v6  ;;  %v1187_v16 = vadd.f32 %v1186_v10, %v1124_v7  ;;  %v1138_v7 = vmul.f32 %v1001_v35, %v1001_v35 }
 0x14f   :  { %v1053_v17 = vadd.f32 %v1052_v14, %v989_v13  ;;  %v1188_v19 = vadd.f32 %v1187_v16, %v1125_v15  ;;  %v1139_v13 = vmul.f32 %v1002_v62, %v1002_v62  ;;  %v1004_v14 = vunpack.c.l.bf16 %v2018_v37 }
 0x150   :  { %v1140_v15 = vmul.f32 %v1003_v29, %v1003_v29  ;;  %v1009_v37 = vunpack.c.h.bf16 %v2036_v9 }
 0x151   :  { %v1054_v21 = vadd.f32 %v1053_v17, %v990_v12  ;;  %v1189_v22 = vadd.f32 %v1188_v19, %v1126_v18  ;;  %v1006_v17 = vunpack.c.l.bf16 %v2016_v30  ;;  %v1141_v19 = vmul.f32 %v1004_v14, %v1004_v14 }
 0x152   :  { %v1011_v30 = vunpack.c.h.bf16 %v2034_v1 }
 0x153   :  { %v1190_v25 = vadd.f32 %v1189_v22, %v1127_v20  ;;  %v1055_v26 = vadd.f32 %v1054_v21, %v991_v8  ;;  %v1142_v22 = vmul.f32 %v1005_v3, %v1005_v3 }
 0x155   :  { %v1056_v28 = vadd.f32 %v1055_v26, %v992_v23  ;;  %v1191_v32 = vadd.f32 %v1190_v25, %v1128_v24  ;;  %v1143_v24 = vmul.f32 %v1006_v17, %v1006_v17  ;;  %v1008_v26 = vunpack.c.l.bf16 %v2036_v9 }
 0x157   :  { %v1057_v34 = vadd.f32 %v1056_v28, %v993_v38  ;;  %v1192_v39 = vadd.f32 %v1191_v32, %v1129_v31  ;;  %v1010_v32 = vunpack.c.l.bf16 %v2034_v1  ;;  %v1012_v1 = vld [vmem:[%s2098_s3] sm:$0x1] }
 0x159   :  { %v1058_v41 = vadd.f32 %v1057_v34, %v994_v27  ;;  %v1193_v42 = vadd.f32 %v1192_v39, %v1130_v36  ;;  %v1144_v27 = vmul.f32 %v1007_v61, %v1007_v61  ;;  %v1145_v34 = vmul.f32 %v1008_v26, %v1008_v26 }
 0x15b   :  { %v1194_v45 = vadd.f32 %v1193_v42, %v1131_v40  ;;  %v1059_v46 = vadd.f32 %v1058_v41, %v995_v33  ;;  %v1146_v40 = vmul.f32 %v1009_v37, %v1009_v37  ;;  %v1147_v42 = vmul.f32 %v1010_v32, %v1010_v32 }
 0x15d   :  { %v1060_v48 = vadd.f32 %v1059_v46, %v996_v43  ;;  %v1195_v51 = vadd.f32 %v1194_v45, %v1132_v44  ;;  %v1148_v45 = vmul.f32 %v1011_v30, %v1011_v30 }
 0x15f   :  { %v1061_v53 = vadd.f32 %v1060_v48, %v997_v4  ;;  %v1196_v54 = vadd.f32 %v1195_v51, %v1133_v50 }
 0x161   :  { %v1062_v56 = vadd.f32 %v1061_v53, %v998_v47  ;;  %v1197_v57 = vadd.f32 %v1196_v54, %v1134_v52 }
 0x163   :  { %v1198_v59 = vadd.f32 %v1197_v57, %v1135_v55  ;;  %v1063_v60 = vadd.f32 %v1062_v56, %v999_v63 }
 0x165   :  { %v1064_v0 = vadd.f32 %v1063_v60, %v1000_v58  ;;  %v1199_v5 = vadd.f32 %v1198_v59, %v1136_v49  ;;  %v1084_v58 = vld [vmem:[%s2098_s3 + $0x1] sm:$0x1] }
 0x167   :  { %v1065_v6 = vadd.f32 %v1064_v0, %v1001_v35  ;;  %v1200_v10 = vadd.f32 %v1199_v5, %v1137_v2 }
 0x169   :  { %v1066_v11 = vadd.f32 %v1065_v6, %v1002_v62  ;;  %v1201_v12 = vadd.f32 %v1200_v10, %v1138_v7 }
 0x16b   :  { %v1202_v16 = vadd.f32 %v1201_v12, %v1139_v13  ;;  %v1067_v8 = vadd.f32 %v1066_v11, %v1003_v29 }
 0x16d   :  { %v1068_v18 = vadd.f32 %v1067_v8, %v1004_v14  ;;  %v1203_v20 = vadd.f32 %v1202_v16, %v1140_v15 }
 0x16f   :  { %v1069_v21 = vadd.f32 %v1068_v18, %v1005_v3  ;;  %v1204_v23 = vadd.f32 %v1203_v20, %v1141_v19 }
 0x171   :  { %v1070_v25 = vadd.f32 %v1069_v21, %v1006_v17  ;;  %v1205_v38 = vadd.f32 %v1204_v23, %v1142_v22 }
 0x173   :  { %v1206_v28 = vadd.f32 %v1205_v38, %v1143_v24  ;;  %v1071_v31 = vadd.f32 %v1070_v25, %v1007_v61 }
 0x175   :  { %v1072_v33 = vadd.f32 %v1071_v31, %v1008_v26  ;;  %v1207_v36 = vadd.f32 %v1206_v28, %v1144_v27 }
 0x177   :  { %v1073_v39 = vadd.f32 %v1072_v33, %v1009_v37  ;;  %v1208_v41 = vadd.f32 %v1207_v36, %v1145_v34 }
 0x179   :  { %v1074_v43 = vadd.f32 %v1073_v39, %v1010_v32  ;;  %v1209_v44 = vadd.f32 %v1208_v41, %v1146_v40 }
 0x17b   :  { %v1075_v4 = vadd.f32 %v1074_v43, %v1011_v30  ;;  %v1210_v46 = vadd.f32 %v1209_v44, %v1147_v42 }
 0x17d   :  { %v1076_v47 = vrot.slane %v1075_v4, 4  ;;  %v1211_v48 = vadd.f32 %v1210_v46, %v1148_v45 }
 0x17f   :  { %v1077_v9 = vadd.f32 %v1076_v47, %v1075_v4  ;;  %v1212_v50 = vrot.slane %v1211_v48, 4 }
 0x181   :  { %v1078_v51 = vrot.slane %v1077_v9, 2  ;;  %v1213_v63 = vadd.f32 %v1212_v50, %v1211_v48 }
 0x183   :  { %v1079_v53 = vadd.f32 %v1078_v51, %v1077_v9  ;;  %v1214_v52 = vrot.slane %v1213_v63, 2 }
 0x185   :  { %v1080_v54 = vrot.slane %v1079_v53, 1  ;;  %v1215_v55 = vadd.f32 %v1214_v52, %v1213_v63 }
 0x187   :  { %v1081_v56 = vadd.f32 %v1080_v54, %v1079_v53  ;;  %v1216_v57 = vrot.slane %v1215_v55, 1 }
 0x189   :  { %v1082_v49 = vadd.f32 %v1081_v56, %v1012_v1  ;;  %v1217_v59 = vadd.f32 %v1216_v57, %v1215_v55 }
 0x18b   :  { %1083 = vst [vmem:[%s2098_s3] sm:$0x1] %v1082_v49  ;;  %v1218_v35 = vadd.f32 %v1217_v59, %v1084_v58 }
 0x18d   :  { %1219 = vst [vmem:[%s2098_s3 + $0x1] sm:$0x1] %v1218_v35 }

// kernel: bottleneck_forward_pallas.6
= control target key start
LH: loop header
LB: loop body
LE: loop exit
PB: predicated region body
PF: predicated region fallthrough
CT: control target
= control target key end

     0   :  { %v82_v24 = vlaneseq  ;;  %s1607_s4 = inlined_call_operand.vmem [shape: bf16[128,128], index: 4, kind: input, shape index: {}]   ;;  %s1608_s6 = inlined_call_operand.vmem [shape: bf16[128,128], index: 6, kind: input, shape index: {}]   ;;  %s1609_s1 = inlined_call_operand.vmem [shape: f32[2,128], index: 1, kind: input, shape index: {}]   ;;  %s1610_s5 = inlined_call_operand.vmem [shape: bf16[128,128], index: 5, kind: input, shape index: {}]   ;;  %s1611_s0 = inlined_call_operand.vmem [shape: bf16[128,128], index: 0, kind: input, shape index: {}]   ;;  %s1612_s2 = inlined_call_operand.vmem [shape: f32[1,128], index: 2, kind: input, shape index: {}]   ;;  %s1613_s3 = inlined_call_operand.vmem [shape: f32[1,128], index: 3, kind: input, shape index: {}]   ;;  %s1614_s8 = inlined_call_operand.vmem [shape: f32[2,128], index: 8, kind: output, shape index: {1}]   ;;  %s1615_s10 = inlined_call_operand.vmem [shape: f32[2,128], index: 10, kind: output, shape index: {3}]   ;;  %s1616_s9 = inlined_call_operand.vmem [shape: bf16[128,128], index: 9, kind: output, shape index: {2}]   ;;  %s1617_s7 = inlined_call_operand.vmem [shape: bf16[128,128], index: 7, kind: output, shape index: {0}]  }
   0x1   :  { %v1303_v0 = vld [vmem:[%s1607_s4] sm:$0xff]   ;;  %v1305_v2 = vld [vmem:[%s1607_s4 + $0x8] sm:$0xff]   ;;  %v1307_v4 = vld [vmem:[%s1607_s4 + $0x10] sm:$0xff]  }
   0x2   :  { %v1304_v1 = vld [vmem:[%s1608_s6] sm:$0xff]   ;;  %1238 = vmatprep.subr.bf16.mxu0 %v1303_v0  ;;  %v1306_v3 = vld [vmem:[%s1608_s6 + $0x8] sm:$0xff]   ;;  %v1308_v5 = vld [vmem:[%s1608_s6 + $0x10] sm:$0xff]   ;;  %v83_v25 = vshrl.u32 %v82_v24, 7 }
   0x3   :  { %1270 = vmatprep.subr.bf16.mxu1 %v1304_v1  ;;  %1239 = vmatpush3.bf16.msra.mxu0 %v1303_v0  ;;  %v1309_v6 = vld [vmem:[%s1607_s4 + $0x18] sm:$0xff]   ;;  %v1311_v8 = vld [vmem:[%s1607_s4 + $0x20] sm:$0xff]   ;;  %v1313_v10 = vld [vmem:[%s1607_s4 + $0x28] sm:$0xff]  }
   0x4   :  { %1271 = vmatpush3.bf16.msra.mxu1 %v1304_v1  ;;  %1240 = vmatprep.subr.bf16.mxu0 %v1305_v2  ;;  %v1310_v7 = vld [vmem:[%s1608_s6 + $0x18] sm:$0xff]   ;;  %v1312_v9 = vld [vmem:[%s1608_s6 + $0x20] sm:$0xff]   ;;  %v1314_v13 = vld [vmem:[%s1608_s6 + $0x28] sm:$0xff]   ;;  %v84_v31 = vsub.s32 0, %v83_v25 }
   0x5   :  { %1272 = vmatprep.subr.bf16.mxu1 %v1306_v3  ;;  %v37_v11 = vld [vmem:[%s1609_s1] sm:$0x1]  ;;  %v39_v12 = vld [vmem:[%s1609_s1 + $0x1] sm:$0x1]  ;;  %v1315_v18 = vld [vmem:[%s1607_s4 + $0x30] sm:$0xff]  }
   0x6   :  { %v38_v14 = vmul.f32 0.0078125, %v37_v11  ;;  %v40_v15 = vmul.f32 0.0078125, %v39_v12  ;;  %v1319_v16 = vld [vmem:[%s1610_s5] sm:$0xff]   ;;  %v1316_v19 = vld [vmem:[%s1608_s6 + $0x30] sm:$0xff]   ;;  %v1317_v22 = vld [vmem:[%s1607_s4 + $0x38] sm:$0xff]  }
   0x7   :  { %1241 = vmatpush3.bf16.msra.mxu0 %v1305_v2  ;;  %1286 = vmatprep.mubr.bf16.mxu1 %v1319_v16  ;;  %v1318_v23 = vld [vmem:[%s1608_s6 + $0x38] sm:$0xff]   ;;  %v1320_v26 = vld [vmem:[%s1610_s5 + $0x8] sm:$0xff]   ;;  %v1321_v27 = vld [vmem:[%s1610_s5 + $0x10] sm:$0xff]  }
   0x8   :  { %1273 = vmatpush3.bf16.msra.mxu1 %v1306_v3  ;;  %1242 = vmatprep.subr.bf16.mxu0 %v1307_v4  ;;  %v41_v17 = vmul.f32 %v38_v14, %v38_v14  ;;  %v45_v28 = vld [vmem:[%s1612_s2] sm:$0x1]  ;;  %v1185_v30 = vld [vmem:[%s1611_s0 + $0x8] sm:$0xff]   ;;  %v1186_v32 = vld [vmem:[%s1611_s0 + $0x10] sm:$0xff]  }
   0x9   :  { %1274 = vmatprep.subr.bf16.mxu1 %v1308_v5  ;;  %v1074_v29 = vld [vmem:[%s1611_s0] sm:$0xff]   ;;  %v1079_v37 = vunpack.c.l.bf16 %v1185_v30  ;;  %v1187_v38 = vld [vmem:[%s1611_s0 + $0x18] sm:$0xff]   ;;  %v1080_v41 = vunpack.c.h.bf16 %v1185_v30  ;;  %v1083_v42 = vunpack.c.l.bf16 %v1186_v32  ;;  %v1084_v43 = vunpack.c.h.bf16 %v1186_v32  ;;  %v1189_v51 = vld [vmem:[%s1611_s0 + $0x28] sm:$0xff]  }
   0xa   :  { %v42_v20 = vsub.f32 %v40_v15, %v41_v17  ;;  %v1075_v35 = vunpack.c.l.bf16 %v1074_v29  ;;  %v1076_v36 = vunpack.c.h.bf16 %v1074_v29  ;;  %v1188_v39 = vld [vmem:[%s1611_s0 + $0x20] sm:$0xff]   ;;  %v1087_v46 = vunpack.c.l.bf16 %v1187_v38  ;;  %v1322_v48 = vld [vmem:[%s1610_s5 + $0x18] sm:$0xff]   ;;  %v1190_v63 = vld [vmem:[%s1611_s0 + $0x30] sm:$0xff]  }
   0xb   :  { %1243 = vmatpush3.bf16.msra.mxu0 %v1307_v4  ;;  %v47_v40 = vld [vmem:[%s1613_s3] sm:$0x1]  ;;  %v1088_v47 = vunpack.c.h.bf16 %v1187_v38  ;;  %v1091_v49 = vunpack.c.l.bf16 %v1188_v39  ;;  %v1092_v50 = vunpack.c.h.bf16 %v1188_v39  ;;  %v1095_v61 = vunpack.c.l.bf16 %v1189_v51  ;;  %v1325_v25 = vld [vmem:[%s1610_s5 + $0x30] sm:$0xff]  }
   0xc   :  { %1275 = vmatpush3.bf16.msra.mxu1 %v1308_v5  ;;  %1244 = vmatprep.subr.bf16.mxu0 %v1309_v6  ;;  %v43_v21 = vadd.f32 1e-05, %v42_v20  ;;  %v1323_v56 = vld [vmem:[%s1610_s5 + $0x20] sm:$0xff]   ;;  %v1096_v62 = vunpack.c.h.bf16 %v1189_v51  ;;  %v1100_v11 = vunpack.c.h.bf16 %v1190_v63  ;;  %v1324_v20 = vld [vmem:[%s1610_s5 + $0x28] sm:$0xff]  }
   0xd   :  { %1276 = vmatprep.subr.bf16.mxu1 %v1310_v7 }
   0xe   :  { %1327 = vrsqrt.f32 %v43_v21 }
   0xf   :  { %1245 = vmatpush3.bf16.msra.mxu0 %v1309_v6 }
  0x10   :  { %1277 = vmatpush3.bf16.msra.mxu1 %v1310_v7  ;;  %1246 = vmatprep.subr.bf16.mxu0 %v1311_v8 }
  0x11   :  { %1278 = vmatprep.subr.bf16.mxu1 %v1312_v9 }
  0x13   :  { %1247 = vmatpush3.bf16.msra.mxu0 %v1311_v8 }
  0x14   :  { %1279 = vmatpush3.bf16.msra.mxu1 %v1312_v9  ;;  %1248 = vmatprep.subr.bf16.mxu0 %v1313_v10 }
  0x15   :  { %1280 = vmatprep.subr.bf16.mxu1 %v1314_v13 }
  0x17   :  { %1249 = vmatpush3.bf16.msra.mxu0 %v1313_v10  ;;  %v1099_v10 = vunpack.c.l.bf16 %v1190_v63 }
  0x18   :  { %1281 = vmatpush3.bf16.msra.mxu1 %v1314_v13  ;;  %1250 = vmatprep.subr.bf16.mxu0 %v1315_v18  ;;  %v1328_v33 = vpop.eup %1327 }
  0x19   :  { %1282 = vmatprep.subr.bf16.mxu1 %v1316_v19  ;;  %v46_v34 = vmul.f32 %v1328_v33, %v45_v28 }
  0x1b   :  { %1251 = vmatpush3.bf16.msra.mxu0 %v1315_v18  ;;  %v48_v44 = vmul.f32 %v46_v34, %v38_v14  ;;  %v1469_v45 = vrot.slane %v46_v34, %v84_v31 }
  0x1c   :  { %1283 = vmatpush3.bf16.msra.mxu1 %v1316_v19  ;;  %1252 = vmatprep.subr.bf16.mxu0 %v1317_v22 }
  0x1d   :  { %1284 = vmatprep.subr.bf16.mxu1 %v1318_v23  ;;  %v49_v52 = vsub.f32 %v47_v40, %v48_v44  ;;  %v86_v53 = vmul.f32 %v1075_v35, %v1469_v45  ;;  %v87_v54 = vmul.f32 %v1076_v36, %v1469_v45  ;;  %v88_v55 = vmul.f32 %v1079_v37, %v1469_v45 }
  0x1e   :  { %v89_v57 = vmul.f32 %v1080_v41, %v1469_v45  ;;  %v90_v58 = vmul.f32 %v1083_v42, %v1469_v45  ;;  %v91_v59 = vmul.f32 %v1084_v43, %v1469_v45  ;;  %v92_v0 = vmul.f32 %v1087_v46, %v1469_v45  ;;  %v1326_v41 = vld [vmem:[%s1610_s5 + $0x38] sm:$0xff]  }
  0x1f   :  { %1253 = vmatpush3.bf16.msra.mxu0 %v1317_v22  ;;  %v1486_v60 = vrot.slane %v49_v52, %v84_v31  ;;  %v93_v1 = vmul.f32 %v1088_v47, %v1469_v45  ;;  %v94_v2 = vmul.f32 %v1091_v49, %v1469_v45  ;;  %v95_v3 = vmul.f32 %v1092_v50, %v1469_v45  ;;  %v1191_v31 = vld [vmem:[%s1611_s0 + $0x38] sm:$0xff]  }
  0x20   :  { %1285 = vmatpush3.bf16.msra.mxu1 %v1318_v23  ;;  %v96_v29 = vmul.f32 %v1095_v61, %v1469_v45  ;;  %v97_v30 = vmul.f32 %v1096_v62, %v1469_v45  ;;  %v98_v34 = vmul.f32 %v1099_v10, %v1469_v45  ;;  %v99_v35 = vmul.f32 %v1100_v11, %v1469_v45 }
  0x21   :  { %v108_v4 = vadd.f32 %v1486_v60, %v86_v53  ;;  %v109_v5 = vadd.f32 %v1486_v60, %v87_v54  ;;  %v110_v6 = vadd.f32 %v1486_v60, %v88_v55  ;;  %v111_v7 = vadd.f32 %v1486_v60, %v89_v57 }
  0x22   :  { %v112_v8 = vadd.f32 %v1486_v60, %v90_v58  ;;  %v113_v9 = vadd.f32 %v1486_v60, %v91_v59  ;;  %v114_v18 = vadd.f32 %v1486_v60, %v92_v0  ;;  %v115_v19 = vadd.f32 %v1486_v60, %v93_v1 }
  0x23   :  { %1287 = vmatmul.mubr.bf16.vlgmr.msra.gmra.mrb[0].mxu1 %v1320_v26  ;;  %v124_v12 = vmax.f32 %v108_v4, 0.0  ;;  %v125_v13 = vmax.f32 %v109_v5, 0.0  ;;  %v126_v14 = vmax.f32 %v110_v6, 0.0  ;;  %v127_v15 = vmax.f32 %v111_v7, 0.0 }
  0x24   :  { %1290 = vmatprep.mubr.bf16.mxu1 %v1321_v27  ;;  %v128_v16 = vmax.f32 %v112_v8, 0.0  ;;  %v129_v17 = vmax.f32 %v113_v9, 0.0  ;;  %v116_v23 = vadd.f32 %v1486_v60, %v94_v2  ;;  %v117_v24 = vadd.f32 %v1486_v60, %v95_v3 }
  0x25   :  { %v140_v21 = vpack.c.bf16 %v125_v13, %v124_v12  ;;  %v141_v22 = vpack.c.bf16 %v127_v15, %v126_v14  ;;  %v130_v27 = vmax.f32 %v114_v18, 0.0  ;;  %v131_v28 = vmax.f32 %v115_v19, 0.0 }
  0x26   :  { %v142_v26 = vpack.c.bf16 %v129_v17, %v128_v16  ;;  %v132_v32 = vmax.f32 %v116_v23, 0.0  ;;  %v133_v33 = vmax.f32 %v117_v24, 0.0  ;;  %v1103_v36 = vunpack.c.l.bf16 %v1191_v31 }
  0x27   :  { %1254 = vmatprep.mubr.bf16.mxu0 %v140_v21  ;;  %v143_v37 = vpack.c.bf16 %v131_v28, %v130_v27  ;;  %v118_v38 = vadd.f32 %v1486_v60, %v96_v29  ;;  %v119_v39 = vadd.f32 %v1486_v60, %v97_v30  ;;  %v1104_v40 = vunpack.c.h.bf16 %v1191_v31 }
  0x28   :  { %1255 = vmatmul.mubr.bf16.vlgmr.msra.gmra.mrb[0].mxu0 %v141_v22  ;;  %v144_v42 = vpack.c.bf16 %v133_v33, %v132_v32  ;;  %v120_v43 = vadd.f32 %v1486_v60, %v98_v34  ;;  %v121_v44 = vadd.f32 %v1486_v60, %v99_v35  ;;  %v1329_v59 = vmov 0.0  }
  0x29   :  { %1258 = vmatprep.mubr.bf16.mxu0 %v142_v26  ;;  %v134_v46 = vmax.f32 %v118_v38, 0.0  ;;  %v135_v47 = vmax.f32 %v119_v39, 0.0  ;;  %v101_v49 = vmul.f32 %v1104_v40, %v1469_v45  ;;  %35 = vst [vmem:[%s1614_s8] sm:$0x3] %v1329_v59  ;;  %36 = vst [vmem:[%s1615_s10] sm:$0x3] %v1329_v59 }
  0x2a   :  { %v136_v50 = vmax.f32 %v120_v43, 0.0  ;;  %v137_v51 = vmax.f32 %v121_v44, 0.0 }
  0x2b   :  { %1291 = vmatmul.mubr.bf16.gmra.mrb[4].mxu1 %v1322_v48  ;;  %v100_v48 = vmul.f32 %v1103_v36, %v1469_v45  ;;  %v145_v52 = vpack.c.bf16 %v135_v47, %v134_v46  ;;  %v123_v54 = vadd.f32 %v1486_v60, %v101_v49 }
  0x2c   :  { %1294 = vmatprep.mubr.bf16.mxu1 %v1323_v56  ;;  %v146_v55 = vpack.c.bf16 %v137_v51, %v136_v50 }
  0x2d   :  { %v122_v53 = vadd.f32 %v1486_v60, %v100_v48  ;;  %v139_v57 = vmax.f32 %v123_v54, 0.0 }
  0x2f   :  { %v138_v56 = vmax.f32 %v122_v53, 0.0 }
  0x30   :  { %1259 = vmatmul.mubr.bf16.gmra.mrb[4].mxu0 %v143_v37 }
  0x31   :  { %1262 = vmatprep.mubr.bf16.mxu0 %v144_v42  ;;  %v147_v58 = vpack.c.bf16 %v139_v57, %v138_v56 }
  0x33   :  { %1295 = vmatmul.mubr.bf16.gmra.mrb[8].mxu1 %v1324_v20 }
  0x34   :  { %1298 = vmatprep.mubr.bf16.mxu1 %v1325_v25 }
  0x38   :  { %1263 = vmatmul.mubr.bf16.gmra.mrb[8].mxu0 %v145_v52 }
  0x39   :  { %1266 = vmatprep.mubr.bf16.mxu0 %v146_v55 }
  0x3b   :  { %1299 = vmatmul.mubr.bf16.gmra.mrb[12].mxu1 %v1326_v41 }
  0x40   :  { %1267 = vmatmul.mubr.bf16.gmra.mrb[12].mxu0 %v147_v58 }
  0xf6   :  { %v1288_v45 = vpop.f32.mrb[0].mxu1 }
  0xf7   :  { %v730_v61 = vpop.f32.mrb[1].mxu1 }
  0xf8   :  { %v1289_v62 = vpop.f32.mrb[2].mxu1 }
  0xf9   :  { %v794_v60 = vpack.c.bf16 %v1289_v62, %v1288_v45  ;;  %v733_v63 = vpop.f32.mrb[3].mxu1 }
  0xfa   :  { %v793_v0 = vpack.c.bf16 %v733_v63, %v730_v61 }
  0xfb   :  { %1199 = vst [vmem:[%s1616_s9 + $0x8] sm:$0xff] %v794_v60   ;;  %v875_v1 = vunpack.c.l.bf16 %v794_v60  ;;  %v876_v4 = vunpack.c.h.bf16 %v794_v60  ;;  %v1256_v24 = vpop.f32.mrb[0].mxu0 }
  0xfc   :  { %1149 = vst [vmem:[%s1616_s9] sm:$0xff] %v793_v0   ;;  %v873_v2 = vunpack.c.l.bf16 %v793_v0  ;;  %v874_v3 = vunpack.c.h.bf16 %v793_v0  ;;  %v246_v28 = vpop.f32.mrb[1].mxu0 }
  0xfd   :  { %v932_v10 = vmul.f32 %v875_v1, %v875_v1  ;;  %v933_v16 = vmul.f32 %v876_v4, %v876_v4  ;;  %v1257_v30 = vpop.f32.mrb[2].mxu0 }
  0xfe   :  { %v906_v5 = vadd.f32 %v874_v3, %v873_v2  ;;  %v930_v6 = vmul.f32 %v873_v2, %v873_v2  ;;  %v931_v7 = vmul.f32 %v874_v3, %v874_v3  ;;  %v1292_v8 = vpop.f32.mrb[4].mxu1  ;;  %v310_v35 = vpack.c.bf16 %v1257_v30, %v1256_v24  ;;  %v249_v36 = vpop.f32.mrb[3].mxu0 }
  0xff   :  { %v746_v9 = vpop.f32.mrb[5].mxu1  ;;  %v309_v41 = vpack.c.bf16 %v249_v36, %v246_v28 }
 0x100   :  { %v907_v11 = vadd.f32 %v906_v5, %v875_v1  ;;  %v946_v12 = vadd.f32 %v931_v7, %v930_v6  ;;  %v1293_v13 = vpop.f32.mrb[6].mxu1  ;;  %1192 = vst [vmem:[%s1617_s7 + $0x8] sm:$0xff] %v310_v35   ;;  %v442_v46 = vunpack.c.l.bf16 %v310_v35  ;;  %v443_v47 = vunpack.c.h.bf16 %v310_v35 }
 0x101   :  { %v796_v14 = vpack.c.bf16 %v1293_v13, %v1292_v8  ;;  %v749_v15 = vpop.f32.mrb[7].mxu1  ;;  %1109 = vst [vmem:[%s1617_s7] sm:$0xff] %v309_v41   ;;  %v440_v48 = vunpack.c.l.bf16 %v309_v41  ;;  %v441_v49 = vunpack.c.h.bf16 %v309_v41 }
 0x102   :  { %v947_v17 = vadd.f32 %v946_v12, %v932_v10  ;;  %v795_v18 = vpack.c.bf16 %v749_v15, %v746_v9  ;;  %v908_v19 = vadd.f32 %v907_v11, %v876_v4  ;;  %v531_v61 = vmul.f32 %v442_v46, %v442_v46 }
 0x103   :  { %1201 = vst [vmem:[%s1616_s9 + $0x18] sm:$0xff] %v796_v14   ;;  %v879_v23 = vunpack.c.l.bf16 %v796_v14  ;;  %v880_v37 = vunpack.c.h.bf16 %v796_v14  ;;  %v505_v55 = vadd.f32 %v441_v49, %v440_v48  ;;  %v529_v56 = vmul.f32 %v440_v48, %v440_v48  ;;  %v1260_v58 = vpop.f32.mrb[4].mxu0 }
 0x104   :  { %1200 = vst [vmem:[%s1616_s9 + $0x10] sm:$0xff] %v795_v18   ;;  %v877_v20 = vunpack.c.l.bf16 %v795_v18  ;;  %v878_v21 = vunpack.c.h.bf16 %v795_v18  ;;  %v948_v22 = vadd.f32 %v947_v17, %v933_v16  ;;  %v530_v57 = vmul.f32 %v441_v49, %v441_v49  ;;  %v262_v62 = vpop.f32.mrb[5].mxu0 }
 0x105   :  { %v936_v38 = vmul.f32 %v879_v23, %v879_v23  ;;  %v937_v52 = vmul.f32 %v880_v37, %v880_v37  ;;  %v532_v2 = vmul.f32 %v443_v47, %v443_v47  ;;  %v506_v3 = vadd.f32 %v505_v55, %v442_v46  ;;  %v1261_v5 = vpop.f32.mrb[6].mxu0 }
 0x106   :  { %v909_v25 = vadd.f32 %v908_v19, %v877_v20  ;;  %v934_v26 = vmul.f32 %v877_v20, %v877_v20  ;;  %v1296_v27 = vpop.f32.mrb[8].mxu1  ;;  %v935_v32 = vmul.f32 %v878_v21, %v878_v21  ;;  %v545_v4 = vadd.f32 %v530_v57, %v529_v56  ;;  %v265_v9 = vpop.f32.mrb[7].mxu0 }
 0x107   :  { %v762_v29 = vpop.f32.mrb[9].mxu1  ;;  %v312_v8 = vpack.c.bf16 %v1261_v5, %v1260_v58  ;;  %v311_v15 = vpack.c.bf16 %v265_v9, %v262_v62  ;;  %v507_v16 = vadd.f32 %v506_v3, %v443_v47 }
 0x108   :  { %v910_v31 = vadd.f32 %v909_v25, %v878_v21  ;;  %v949_v33 = vadd.f32 %v948_v22, %v934_v26  ;;  %v1297_v34 = vpop.f32.mrb[10].mxu1  ;;  %v546_v14 = vadd.f32 %v545_v4, %v531_v61 }
 0x109   :  { %v798_v39 = vpack.c.bf16 %v1297_v34, %v1296_v27  ;;  %v765_v40 = vpop.f32.mrb[11].mxu1  ;;  %1194 = vst [vmem:[%s1617_s7 + $0x18] sm:$0xff] %v312_v8   ;;  %1193 = vst [vmem:[%s1617_s7 + $0x10] sm:$0xff] %v311_v15   ;;  %v444_v21 = vunpack.c.l.bf16 %v311_v15  ;;  %v445_v22 = vunpack.c.h.bf16 %v311_v15  ;;  %v446_v24 = vunpack.c.l.bf16 %v312_v8 }
 0x10a   :  { %v911_v42 = vadd.f32 %v910_v31, %v879_v23  ;;  %v950_v43 = vadd.f32 %v949_v33, %v935_v32  ;;  %v797_v44 = vpack.c.bf16 %v765_v40, %v762_v29  ;;  %v547_v23 = vadd.f32 %v546_v14, %v532_v2 }
 0x10b   :  { %1203 = vst [vmem:[%s1616_s9 + $0x28] sm:$0xff] %v798_v39   ;;  %v883_v53 = vunpack.c.l.bf16 %v798_v39  ;;  %v884_v54 = vunpack.c.h.bf16 %v798_v39  ;;  %v447_v27 = vunpack.c.h.bf16 %v312_v8  ;;  %v508_v28 = vadd.f32 %v507_v16, %v444_v21  ;;  %v1264_v30 = vpop.f32.mrb[8].mxu0 }
 0x10c   :  { %v951_v50 = vadd.f32 %v950_v43, %v936_v38  ;;  %1202 = vst [vmem:[%s1616_s9 + $0x20] sm:$0xff] %v797_v44   ;;  %v881_v51 = vunpack.c.l.bf16 %v797_v44  ;;  %v882_v59 = vunpack.c.h.bf16 %v797_v44  ;;  %v912_v60 = vadd.f32 %v911_v42, %v880_v37  ;;  %v278_v32 = vpop.f32.mrb[9].mxu0 }
 0x10d   :  { %v940_v18 = vmul.f32 %v883_v53, %v883_v53  ;;  %v533_v29 = vmul.f32 %v444_v21, %v444_v21  ;;  %v941_v31 = vmul.f32 %v884_v54, %v884_v54  ;;  %v509_v37 = vadd.f32 %v508_v28, %v445_v22  ;;  %v1265_v40 = vpop.f32.mrb[10].mxu0 }
 0x10e   :  { %v1300_v45 = vpop.f32.mrb[12].mxu1  ;;  %v938_v63 = vmul.f32 %v881_v51, %v881_v51  ;;  %v952_v0 = vadd.f32 %v951_v50, %v937_v52  ;;  %v939_v6 = vmul.f32 %v882_v59, %v882_v59  ;;  %v913_v10 = vadd.f32 %v912_v60, %v881_v51  ;;  %v281_v44 = vpop.f32.mrb[11].mxu0 }
 0x10f   :  { %v778_v1 = vpop.f32.mrb[13].mxu1  ;;  %v534_v38 = vmul.f32 %v445_v22, %v445_v22  ;;  %v548_v39 = vadd.f32 %v547_v23, %v533_v29  ;;  %v535_v42 = vmul.f32 %v446_v24, %v446_v24  ;;  %v314_v43 = vpack.c.bf16 %v1265_v40, %v1264_v30 }
 0x110   :  { %v1301_v7 = vpop.f32.mrb[14].mxu1  ;;  %v953_v11 = vadd.f32 %v952_v0, %v938_v63  ;;  %v914_v19 = vadd.f32 %v913_v10, %v882_v59  ;;  %v536_v48 = vmul.f32 %v447_v27, %v447_v27  ;;  %v510_v49 = vadd.f32 %v509_v37, %v446_v24 }
 0x111   :  { %v800_v12 = vpack.c.bf16 %v1301_v7, %v1300_v45  ;;  %v781_v13 = vpop.f32.mrb[15].mxu1  ;;  %v549_v50 = vadd.f32 %v548_v39, %v534_v38  ;;  %v313_v51 = vpack.c.bf16 %v281_v44, %v278_v32  ;;  %1196 = vst [vmem:[%s1617_s7 + $0x28] sm:$0xff] %v314_v43   ;;  %v450_v60 = vunpack.c.l.bf16 %v314_v43  ;;  %v905_v44 = vld [vmem:[%s1615_s10] sm:$0x1] }
 0x112   :  { %v799_v17 = vpack.c.bf16 %v781_v13, %v778_v1  ;;  %v954_v20 = vadd.f32 %v953_v11, %v939_v6  ;;  %v915_v25 = vadd.f32 %v914_v19, %v883_v53  ;;  %v511_v59 = vadd.f32 %v510_v49, %v447_v27 }
 0x113   :  { %1205 = vst [vmem:[%s1616_s9 + $0x38] sm:$0xff] %v800_v12   ;;  %v887_v33 = vunpack.c.l.bf16 %v800_v12  ;;  %v888_v52 = vunpack.c.h.bf16 %v800_v12  ;;  %v550_v56 = vadd.f32 %v549_v50, %v535_v42  ;;  %1195 = vst [vmem:[%s1617_s7 + $0x20] sm:$0xff] %v313_v51   ;;  %v448_v57 = vunpack.c.l.bf16 %v313_v51  ;;  %v1268_v2 = vpop.f32.mrb[12].mxu0 }
 0x114   :  { %1204 = vst [vmem:[%s1616_s9 + $0x30] sm:$0xff] %v799_v17   ;;  %v955_v26 = vadd.f32 %v954_v20, %v940_v18  ;;  %v885_v34 = vunpack.c.l.bf16 %v799_v17  ;;  %v886_v35 = vunpack.c.h.bf16 %v799_v17  ;;  %v916_v36 = vadd.f32 %v915_v25, %v884_v54  ;;  %v294_v4 = vpop.f32.mrb[13].mxu0 }
 0x115   :  { %v449_v58 = vunpack.c.h.bf16 %v313_v51  ;;  %v944_v45 = vmul.f32 %v887_v33, %v887_v33  ;;  %v512_v63 = vadd.f32 %v511_v59, %v448_v57  ;;  %v537_v0 = vmul.f32 %v448_v57, %v448_v57  ;;  %v1269_v11 = vpop.f32.mrb[14].mxu0  ;;  %v929_v51 = vld [vmem:[%s1615_s10 + $0x1] sm:$0x1] }
 0x116   :  { %v956_v41 = vadd.f32 %v955_v26, %v941_v31  ;;  %v917_v46 = vadd.f32 %v916_v36, %v885_v34  ;;  %v942_v47 = vmul.f32 %v885_v34, %v885_v34  ;;  %v943_v54 = vmul.f32 %v886_v35, %v886_v35  ;;  %v297_v13 = vpop.f32.mrb[15].mxu0 }
 0x117   :  { %v551_v1 = vadd.f32 %v550_v56, %v536_v48  ;;  %v451_v3 = vunpack.c.h.bf16 %v314_v43  ;;  %v945_v5 = vmul.f32 %v888_v52, %v888_v52  ;;  %v513_v8 = vadd.f32 %v512_v63, %v449_v58 }
 0x118   :  { %v918_v53 = vadd.f32 %v917_v46, %v886_v35  ;;  %v957_v55 = vadd.f32 %v956_v41, %v942_v47  ;;  %v538_v9 = vmul.f32 %v449_v58, %v449_v58  ;;  %v316_v12 = vpack.c.bf16 %v1269_v11, %v1268_v2 }
 0x119   :  { %v552_v10 = vadd.f32 %v551_v1, %v537_v0  ;;  %v539_v16 = vmul.f32 %v450_v60, %v450_v60  ;;  %v514_v17 = vadd.f32 %v513_v8, %v450_v60  ;;  %v315_v19 = vpack.c.bf16 %v297_v13, %v294_v4  ;;  %v504_v0 = vld [vmem:[%s1614_s8] sm:$0x1] }
 0x11a   :  { %v919_v61 = vadd.f32 %v918_v53, %v887_v33  ;;  %v958_v62 = vadd.f32 %v957_v55, %v943_v54  ;;  %v540_v20 = vmul.f32 %v451_v3, %v451_v3  ;;  %1198 = vst [vmem:[%s1617_s7 + $0x38] sm:$0xff] %v316_v12   ;;  %v454_v29 = vunpack.c.l.bf16 %v316_v12 }
 0x11b   :  { %v553_v18 = vadd.f32 %v552_v10, %v538_v9  ;;  %1197 = vst [vmem:[%s1617_s7 + $0x30] sm:$0xff] %v315_v19   ;;  %v452_v24 = vunpack.c.l.bf16 %v315_v19  ;;  %v453_v25 = vunpack.c.h.bf16 %v315_v19  ;;  %v515_v26 = vadd.f32 %v514_v17, %v451_v3  ;;  %v528_v3 = vld [vmem:[%s1614_s8 + $0x1] sm:$0x1] }
 0x11c   :  { %v920_v6 = vadd.f32 %v919_v61, %v888_v52  ;;  %v959_v7 = vadd.f32 %v958_v62, %v944_v45  ;;  %v455_v35 = vunpack.c.h.bf16 %v316_v12  ;;  %v543_v41 = vmul.f32 %v454_v29, %v454_v29 }
 0x11d   :  { %v554_v23 = vadd.f32 %v553_v18, %v539_v16  ;;  %v516_v30 = vadd.f32 %v515_v26, %v452_v24  ;;  %v541_v31 = vmul.f32 %v452_v24, %v452_v24  ;;  %v542_v37 = vmul.f32 %v453_v25, %v453_v25 }
 0x11e   :  { %v921_v14 = vrot.slane %v920_v6, 4  ;;  %v960_v15 = vadd.f32 %v959_v7, %v945_v5  ;;  %v544_v48 = vmul.f32 %v455_v35, %v455_v35 }
 0x11f   :  { %v555_v32 = vadd.f32 %v554_v23, %v540_v20  ;;  %v517_v36 = vadd.f32 %v516_v30, %v453_v25 }
 0x120   :  { %v922_v21 = vadd.f32 %v921_v14, %v920_v6  ;;  %v961_v22 = vrot.slane %v960_v15, 4 }
 0x121   :  { %v556_v38 = vadd.f32 %v555_v32, %v541_v31  ;;  %v518_v42 = vadd.f32 %v517_v36, %v454_v29 }
 0x122   :  { %v923_v27 = vrot.slane %v922_v21, 2  ;;  %v962_v28 = vadd.f32 %v961_v22, %v960_v15 }
 0x123   :  { %v557_v43 = vadd.f32 %v556_v38, %v542_v37  ;;  %v519_v49 = vadd.f32 %v518_v42, %v455_v35 }
 0x124   :  { %v924_v33 = vadd.f32 %v923_v27, %v922_v21  ;;  %v963_v34 = vrot.slane %v962_v28, 2 }
 0x125   :  { %v558_v50 = vadd.f32 %v557_v43, %v543_v41  ;;  %v520_v54 = vrot.slane %v519_v49, 4 }
 0x126   :  { %v925_v39 = vrot.slane %v924_v33, 1  ;;  %v964_v40 = vadd.f32 %v963_v34, %v962_v28 }
 0x127   :  { %v559_v55 = vadd.f32 %v558_v50, %v544_v48  ;;  %v521_v57 = vadd.f32 %v520_v54, %v519_v49 }
 0x128   :  { %v926_v46 = vadd.f32 %v925_v39, %v924_v33  ;;  %v965_v47 = vrot.slane %v964_v40, 1 }
 0x129   :  { %v560_v58 = vrot.slane %v559_v55, 4  ;;  %v522_v59 = vrot.slane %v521_v57, 2 }
 0x12a   :  { %v927_v52 = vadd.f32 %v926_v46, %v905_v44  ;;  %v966_v53 = vadd.f32 %v965_v47, %v964_v40 }
 0x12b   :  { %v561_v45 = vadd.f32 %v560_v58, %v559_v55  ;;  %v523_v61 = vadd.f32 %v522_v59, %v521_v57 }
 0x12c   :  { %928 = vst [vmem:[%s1615_s10] sm:$0x1] %v927_v52  ;;  %v967_v56 = vadd.f32 %v966_v53, %v929_v51 }
 0x12d   :  { %v562_v62 = vrot.slane %v561_v45, 2  ;;  %v524_v60 = vrot.slane %v523_v61, 1 }
 0x12e   :  { %968 = vst [vmem:[%s1615_s10 + $0x1] sm:$0x1] %v967_v56 }
 0x12f   :  { %v563_v63 = vadd.f32 %v562_v62, %v561_v45  ;;  %v525_v1 = vadd.f32 %v524_v60, %v523_v61 }
 0x131   :  { %v564_v2 = vrot.slane %v563_v63, 1  ;;  %v526_v4 = vadd.f32 %v525_v1, %v504_v0 }
 0x133   :  { %v565_v5 = vadd.f32 %v564_v2, %v563_v63  ;;  %527 = vst [vmem:[%s1614_s8] sm:$0x1] %v526_v4 }
 0x135   :  { %v566_v6 = vadd.f32 %v565_v5, %v528_v3 }
 0x137   :  { %567 = vst [vmem:[%s1614_s8 + $0x1] sm:$0x1] %v566_v6 }

// kernel: bottleneck_forward_pallas.7
= control target key start
LH: loop header
LB: loop body
LE: loop exit
PB: predicated region body
PF: predicated region fallthrough
CT: control target
= control target key end

     0   :  { %v88_v13 = vlaneseq  ;;  %s695_s0 = inlined_call_operand.vmem [shape: bf16[128,128], index: 0, kind: input, shape index: {}]   ;;  %s696_s1 = inlined_call_operand.vmem [shape: f32[2,128], index: 1, kind: input, shape index: {}]   ;;  %s697_s2 = inlined_call_operand.vmem [shape: f32[1,128], index: 2, kind: input, shape index: {}]   ;;  %s698_s3 = inlined_call_operand.vmem [shape: f32[1,128], index: 3, kind: input, shape index: {}]   ;;  %s699_s4 = inlined_call_operand.vmem [shape: bf16[128,128], index: 4, kind: input, shape index: {}]   ;;  %s700_s5 = inlined_call_operand.vmem [shape: f32[2,128], index: 5, kind: input, shape index: {}]   ;;  %s701_s6 = inlined_call_operand.vmem [shape: f32[1,128], index: 6, kind: input, shape index: {}]   ;;  %s702_s7 = inlined_call_operand.vmem [shape: f32[1,128], index: 7, kind: input, shape index: {}]   ;;  %s703_s8 = inlined_call_operand.hbm [shape: f32[128,128], index: 8, kind: output, shape index: {}]  }
   0x1   :  { %v30_v0 = vld [vmem:[%s696_s1] sm:$0x1]  ;;  %v32_v1 = vld [vmem:[%s696_s1 + $0x1] sm:$0x1] }
   0x2   :  { %v431_v2 = vmul.f32 0.0078125, %v30_v0  ;;  %v33_v3 = vmul.f32 0.0078125, %v32_v1  ;;  %v43_v4 = vld [vmem:[%s700_s5] sm:$0x1]  ;;  %v45_v6 = vld [vmem:[%s700_s5 + $0x1] sm:$0x1] }
   0x3   :  { %v436_v5 = vmul.f32 0.0078125, %v43_v4  ;;  %v46_v8 = vmul.f32 0.0078125, %v45_v6 }
   0x4   :  { %v34_v7 = vmul.f32 %v431_v2, %v431_v2 }
   0x5   :  { %v47_v9 = vmul.f32 %v436_v5, %v436_v5 }
   0x6   :  { %v35_v10 = vsub.f32 %v33_v3, %v34_v7 }
   0x7   :  { %v48_v11 = vsub.f32 %v46_v8, %v47_v9 }
   0x8   :  { %v36_v12 = vadd.f32 1e-05, %v35_v10 }
   0x9   :  { %v49_v14 = vadd.f32 1e-05, %v48_v11 }
   0xa   :  { %13 = vsyncpa [#allocation3], 0  ;;  %349 = vrsqrt.f32 %v36_v12  ;;  %v448_v15 = vld [vmem:[%s695_s0] sm:$0xff]   ;;  %v89_v16 = vshrl.u32 %v88_v13, 7  ;;  %v458_v18 = vld [vmem:[%s695_s0 + $0x8] sm:$0xff]  }
   0xb   :  { %351 = vrsqrt.f32 %v49_v14  ;;  %v453_v17 = vld [vmem:[%s699_s4] sm:$0xff]   ;;  %v463_v19 = vld [vmem:[%s699_s4 + $0x8] sm:$0xff]   ;;  %v468_v20 = vld [vmem:[%s695_s0 + $0x10] sm:$0xff]   ;;  %v270_v22 = vunpack.c.l.bf16 %v448_v15  ;;  %v271_v24 = vunpack.c.h.bf16 %v448_v15  ;;  %v274_v29 = vunpack.c.l.bf16 %v458_v18 }
   0xc   :  { %v473_v21 = vld [vmem:[%s699_s4 + $0x10] sm:$0xff]   ;;  %v302_v23 = vunpack.c.l.bf16 %v453_v17  ;;  %v481_v25 = vld [vmem:[%s695_s0 + $0x18] sm:$0xff]   ;;  %v90_v27 = vsub.s32 0, %v89_v16  ;;  %v303_v28 = vunpack.c.h.bf16 %v453_v17  ;;  %v306_v30 = vunpack.c.l.bf16 %v463_v19  ;;  %v494_v31 = vld [vmem:[%s695_s0 + $0x20] sm:$0xff]  }
   0xd   :  { %v486_v26 = vld [vmem:[%s699_s4 + $0x18] sm:$0xff]   ;;  %v499_v32 = vld [vmem:[%s699_s4 + $0x20] sm:$0xff]   ;;  %v275_v33 = vunpack.c.h.bf16 %v458_v18  ;;  %v307_v34 = vunpack.c.h.bf16 %v463_v19  ;;  %v278_v35 = vunpack.c.l.bf16 %v468_v20  ;;  %v310_v36 = vunpack.c.l.bf16 %v473_v21  ;;  %v508_v37 = vld [vmem:[%s695_s0 + $0x28] sm:$0xff]  }
   0xe   :  { %v513_v38 = vld [vmem:[%s699_s4 + $0x28] sm:$0xff]   ;;  %v38_v39 = vld [vmem:[%s697_s2] sm:$0x1]  ;;  %v279_v40 = vunpack.c.h.bf16 %v468_v20  ;;  %v311_v41 = vunpack.c.h.bf16 %v473_v21  ;;  %v282_v42 = vunpack.c.l.bf16 %v481_v25  ;;  %v314_v43 = vunpack.c.l.bf16 %v486_v26  ;;  %v525_v44 = vld [vmem:[%s695_s0 + $0x30] sm:$0xff]  }
   0xf   :  { %v51_v45 = vld [vmem:[%s701_s6] sm:$0x1]  ;;  %v283_v46 = vunpack.c.h.bf16 %v481_v25  ;;  %v315_v47 = vunpack.c.h.bf16 %v486_v26  ;;  %v286_v48 = vunpack.c.l.bf16 %v494_v31  ;;  %v318_v49 = vunpack.c.l.bf16 %v499_v32  ;;  %v537_v50 = vld [vmem:[%s699_s4 + $0x30] sm:$0xff]   ;;  %v546_v56 = vld [vmem:[%s695_s0 + $0x38] sm:$0xff]  }
  0x10   :  { %v287_v52 = vunpack.c.h.bf16 %v494_v31  ;;  %v319_v53 = vunpack.c.h.bf16 %v499_v32  ;;  %v290_v54 = vunpack.c.l.bf16 %v508_v37  ;;  %v322_v55 = vunpack.c.l.bf16 %v513_v38  ;;  %v551_v57 = vld [vmem:[%s699_s4 + $0x38] sm:$0xff]   ;;  %v40_v63 = vld [vmem:[%s698_s3] sm:$0x1]  ;;  %s377_s3 = smov [#allocation2]  }
  0x11   :  { %v291_v60 = vunpack.c.h.bf16 %v508_v37  ;;  %v323_v61 = vunpack.c.h.bf16 %v513_v38  ;;  %v294_v62 = vunpack.c.l.bf16 %v525_v44  ;;  %v326_v1 = vunpack.c.l.bf16 %v537_v50  ;;  %v53_v7 = vld [vmem:[%s702_s7] sm:$0x1]  ;;  %s257_s7 = sshll.u32 %s377_s3, 4  ;;  %s258_s7 = int_to_ptr.vmem [resolvable:$true] %s257_s7 }
  0x12   :  { %v295_v3 = vunpack.c.h.bf16 %v525_v44  ;;  %v327_v4 = vunpack.c.h.bf16 %v537_v50  ;;  %v298_v9 = vunpack.c.l.bf16 %v546_v56  ;;  %v330_v10 = vunpack.c.l.bf16 %v551_v57  ;;  %s353_s23 = scalar_lea.vmem %s258_s7, 2048  ;;  %p358_p1 = scmp.lt.s32.totalorder %s258_s7, %s258_s7 }
  0x13   :  { %v299_v13 = vunpack.c.h.bf16 %v546_v56  ;;  %v331_v14 = vunpack.c.h.bf16 %v551_v57  ;;  %p354_p0 = scmp.ne.s32.totalorder %s258_s7, %s353_s23  ;;  %p359_p2 = scmp.lt.s32.totalorder %s353_s23, %s353_s23 }
  0x14   :  { %v350_v51 = vpop.eup %349 }
  0x15   :  { %v352_v58 = vpop.eup %351  ;;  %v39_v59 = vmul.f32 %v350_v51, %v38_v39  ;;  %p360_p3 = por %p359_p2, %p358_p1 }
  0x16   :  { %v52_v0 = vmul.f32 %v352_v58, %v51_v45 }
  0x17   :  { %v41_v6 = vmul.f32 %v39_v59, %v431_v2  ;;  %v566_v8 = vrot.slane %v39_v59, %v90_v27  ;;  %p361_p4 = pnand %p360_p3, %p354_p0 }
  0x18   :  { %v54_v11 = vmul.f32 %v52_v0, %v436_v5  ;;  %v571_v12 = vrot.slane %v52_v0, %v90_v27 }
  0x19   :  { %v42_v15 = vsub.f32 %v40_v63, %v41_v6  ;;  %v92_v2 = vmul.f32 %v270_v22, %v566_v8  ;;  %v93_v16 = vmul.f32 %v271_v24, %v566_v8  ;;  %v94_v17 = vmul.f32 %v274_v29, %v566_v8 }
  0x1a   :  { %v55_v18 = vsub.f32 %v53_v7, %v54_v11  ;;  %v166_v19 = vmul.f32 %v302_v23, %v571_v12  ;;  %v167_v20 = vmul.f32 %v303_v28, %v571_v12  ;;  %v168_v5 = vmul.f32 %v306_v30, %v571_v12 }
  0x1b   :  { %v581_v21 = vrot.slane %v42_v15, %v90_v27  ;;  %v95_v39 = vmul.f32 %v275_v33, %v566_v8  ;;  %v169_v45 = vmul.f32 %v307_v34, %v571_v12  ;;  %v96_v51 = vmul.f32 %v278_v35, %v566_v8 }
  0x1c   :  { %v586_v22 = vrot.slane %v55_v18, %v90_v27  ;;  %v170_v24 = vmul.f32 %v310_v36, %v571_v12  ;;  %v97_v29 = vmul.f32 %v279_v40, %v566_v8  ;;  %v171_v23 = vmul.f32 %v311_v41, %v571_v12 }
  0x1d   :  { %v114_v28 = vadd.f32 %v581_v21, %v92_v2  ;;  %v115_v30 = vadd.f32 %v581_v21, %v93_v16  ;;  %v116_v58 = vadd.f32 %v581_v21, %v94_v17  ;;  %v117_v33 = vadd.f32 %v581_v21, %v95_v39 }
  0x1e   :  { %v188_v34 = vadd.f32 %v586_v22, %v166_v19  ;;  %v189_v35 = vadd.f32 %v586_v22, %v167_v20  ;;  %v190_v27 = vadd.f32 %v586_v22, %v168_v5  ;;  %v191_v36 = vadd.f32 %v586_v22, %v169_v45 }
  0x1f   :  { %v118_v40 = vadd.f32 %v581_v21, %v96_v51  ;;  %v192_v41 = vadd.f32 %v586_v22, %v170_v24  ;;  %v119_v59 = vadd.f32 %v581_v21, %v97_v29  ;;  %v193_v63 = vadd.f32 %v586_v22, %v171_v23 }
  0x20   :  { %v204_v0 = vadd.f32 %v188_v34, %v114_v28  ;;  %v205_v6 = vadd.f32 %v189_v35, %v115_v30  ;;  %v206_v7 = vadd.f32 %v190_v27, %v116_v58  ;;  %v207_v11 = vadd.f32 %v191_v36, %v117_v33 }
  0x21   :  { %v208_v15 = vadd.f32 %v192_v41, %v118_v40  ;;  %v209_v2 = vadd.f32 %v193_v63, %v119_v59  ;;  %v98_v16 = vmul.f32 %v282_v42, %v566_v8  ;;  %v172_v17 = vmul.f32 %v314_v43, %v571_v12 }
  0x22   :  { %v220_v18 = vmax.f32 %v204_v0, 0.0  ;;  %v221_v19 = vmax.f32 %v205_v6, 0.0  ;;  %v222_v20 = vmax.f32 %v206_v7, 0.0  ;;  %v223_v5 = vmax.f32 %v207_v11, 0.0 }
  0x23   :  { %v224_v39 = vmax.f32 %v208_v15, 0.0  ;;  %v225_v45 = vmax.f32 %v209_v2, 0.0  ;;  %v120_v51 = vadd.f32 %v581_v21, %v98_v16  ;;  %v194_v24 = vadd.f32 %v586_v22, %v172_v17 }
  0x24   :  { %236 = vst [vmem:[#allocation2] sm:$0xff] %v220_v18  ;;  %237 = vst [vmem:[#allocation2 + $0x8] sm:$0xff] %v221_v19  ;;  %v99_v42 = vmul.f32 %v283_v46, %v566_v8  ;;  %v173_v43 = vmul.f32 %v315_v47, %v571_v12  ;;  %v100_v29 = vmul.f32 %v286_v48, %v566_v8 }
  0x25   :  { %238 = vst [vmem:[#allocation2 + $0x10] sm:$0xff] %v222_v20  ;;  %239 = vst [vmem:[#allocation2 + $0x18] sm:$0xff] %v223_v5  ;;  %v174_v23 = vmul.f32 %v318_v49, %v571_v12  ;;  %v210_v28 = vadd.f32 %v194_v24, %v120_v51  ;;  %v101_v25 = vmul.f32 %v287_v52, %v566_v8 }
  0x26   :  { %240 = vst [vmem:[#allocation2 + $0x20] sm:$0xff] %v224_v39  ;;  %241 = vst [vmem:[#allocation2 + $0x28] sm:$0xff] %v225_v45  ;;  %v175_v26 = vmul.f32 %v319_v53, %v571_v12  ;;  %v102_v46 = vmul.f32 %v290_v54, %v566_v8  ;;  %v121_v47 = vadd.f32 %v581_v21, %v99_v42 }
  0x27   :  { %v195_v48 = vadd.f32 %v586_v22, %v173_v43  ;;  %v122_v49 = vadd.f32 %v581_v21, %v100_v29  ;;  %v196_v30 = vadd.f32 %v586_v22, %v174_v23  ;;  %v226_v58 = vmax.f32 %v210_v28, 0.0 }
  0x28   :  { %v123_v31 = vadd.f32 %v581_v21, %v101_v25  ;;  %v197_v52 = vadd.f32 %v586_v22, %v175_v26  ;;  %v124_v32 = vadd.f32 %v581_v21, %v102_v46  ;;  %v176_v54 = vmul.f32 %v322_v55, %v571_v12 }
  0x29   :  { %v211_v53 = vadd.f32 %v195_v48, %v121_v47  ;;  %v212_v33 = vadd.f32 %v196_v30, %v122_v49  ;;  %v103_v34 = vmul.f32 %v291_v60, %v566_v8  ;;  %242 = vst [vmem:[#allocation2 + $0x30] sm:$0xff] %v226_v58  ;;  %v177_v27 = vmul.f32 %v323_v61, %v571_v12 }
  0x2a   :  { %v213_v35 = vadd.f32 %v197_v52, %v123_v31  ;;  %v104_v36 = vmul.f32 %v294_v62, %v566_v8  ;;  %v178_v40 = vmul.f32 %v326_v1, %v571_v12  ;;  %v198_v59 = vadd.f32 %v586_v22, %v176_v54 }
  0x2b   :  { %v227_v41 = vmax.f32 %v211_v53, 0.0  ;;  %v228_v55 = vmax.f32 %v212_v33, 0.0  ;;  %v125_v37 = vadd.f32 %v581_v21, %v103_v34  ;;  %v199_v63 = vadd.f32 %v586_v22, %v177_v27 }
  0x2c   :  { %v229_v60 = vmax.f32 %v213_v35, 0.0  ;;  %v126_v38 = vadd.f32 %v581_v21, %v104_v36  ;;  %v200_v61 = vadd.f32 %v586_v22, %v178_v40  ;;  %v214_v62 = vadd.f32 %v198_v59, %v124_v32 }
  0x2d   :  { %243 = vst [vmem:[#allocation2 + $0x38] sm:$0xff] %v227_v41  ;;  %244 = vst [vmem:[#allocation2 + $0x40] sm:$0xff] %v228_v55  ;;  %v105_v1 = vmul.f32 %v295_v3, %v566_v8  ;;  %v179_v0 = vmul.f32 %v327_v4, %v571_v12  ;;  %v106_v6 = vmul.f32 %v298_v9, %v566_v8 }
  0x2e   :  { %245 = vst [vmem:[#allocation2 + $0x48] sm:$0xff] %v229_v60  ;;  %v215_v7 = vadd.f32 %v199_v63, %v125_v37  ;;  %v216_v11 = vadd.f32 %v200_v61, %v126_v38  ;;  %v180_v15 = vmul.f32 %v330_v10, %v571_v12  ;;  %v107_v44 = vmul.f32 %v299_v13, %v566_v8 }
  0x2f   :  { %v230_v3 = vmax.f32 %v214_v62, 0.0  ;;  %v127_v2 = vadd.f32 %v581_v21, %v105_v1  ;;  %v201_v50 = vadd.f32 %v586_v22, %v179_v0  ;;  %v128_v4 = vadd.f32 %v581_v21, %v106_v6 }
  0x30   :  { %v231_v16 = vmax.f32 %v215_v7, 0.0  ;;  %v232_v9 = vmax.f32 %v216_v11, 0.0  ;;  %v202_v17 = vadd.f32 %v586_v22, %v180_v15  ;;  %v129_v19 = vadd.f32 %v581_v21, %v107_v44 }
  0x31   :  { %246 = vst [vmem:[#allocation2 + $0x50] sm:$0xff] %v230_v3  ;;  %v217_v18 = vadd.f32 %v201_v50, %v127_v2  ;;  %v181_v56 = vmul.f32 %v331_v14, %v571_v12 }
  0x32   :  { %247 = vst [vmem:[#allocation2 + $0x58] sm:$0xff] %v231_v16  ;;  %248 = vst [vmem:[#allocation2 + $0x60] sm:$0xff] %v232_v9  ;;  %v218_v8 = vadd.f32 %v202_v17, %v128_v4 }
  0x33   :  { %v233_v10 = vmax.f32 %v217_v18, 0.0  ;;  %v203_v13 = vadd.f32 %v586_v22, %v181_v56 }
  0x34   :  { %v234_v20 = vmax.f32 %v218_v8, 0.0 }
  0x35   :  { %249 = vst [vmem:[#allocation2 + $0x68] sm:$0xff] %v233_v10  ;;  %v219_v5 = vadd.f32 %v203_v13, %v129_v19 }
  0x36   :  { %250 = vst [vmem:[#allocation2 + $0x70] sm:$0xff] %v234_v20 }
  0x37   :  { %v235_v39 = vmax.f32 %v219_v5, 0.0 }
  0x39   :  { %251 = vst [vmem:[#allocation2 + $0x78] sm:$0xff] %v235_v39 }
  0x3a   :  { %364 = shalt.err (!%p361_p4)
}
  0x3b   :  { %s365_s26 = scalar_lea.hbm %s703_s8, 2048 }
  0x3c   :  { %p366_p5 = scmp.ne.s32.totalorder %s703_s8, %s365_s26  ;;  %p369_p6 = scmp.lt.u32.totalorder %s365_s26, %s703_s8 }
  0x3e   :  { %p371_p7 = pnand %p369_p6, %p366_p5 }
  0x40   :  { %374 = shalt.err (!%p371_p7)
}
  0x41   :  { %s378_s9 = smov 128   ;;  %s379_s10 = smov 8  }
  0x42   :  { %263 = dma.vmem_to_hbm [thread:$0]  %s258_s7, 2048, %s703_s8, [#allocation3], %s378_s9, %s378_s9, %s379_s10  }
  0x43   :  { %375 = dma.done.wait [#allocation3], 2048  }
  0x44   :  { %376 = vsyncadd [#allocation3], 4294965248 }
  0x45   :  { %267 = vsyncpa [#allocation3], 1 }

// kernel: bottleneck_forward_pallas.5
= control target key start
LH: loop header
LB: loop body
LE: loop exit
PB: predicated region body
PF: predicated region fallthrough
CT: control target
= control target key end

     0   :  { %s18961_s21 = smov 0   ;;  %s23415_s0 = inlined_call_operand.vmem [shape: bf16[2,16,16,128], index: 0, kind: input, shape index: {}]   ;;  %s23416_s1 = inlined_call_operand.vmem [shape: f32[2,128], index: 1, kind: input, shape index: {}]   ;;  %s23417_s2 = inlined_call_operand.vmem [shape: f32[1,128], index: 2, kind: input, shape index: {}]   ;;  %s23418_s3 = inlined_call_operand.vmem [shape: f32[1,128], index: 3, kind: input, shape index: {}]   ;;  %s23419_s4 = inlined_call_operand.vmem [shape: bf16[1152,128], index: 4, kind: input, shape index: {}]   ;;  %s23420_s5 = inlined_call_operand.vmem [shape: bf16[2,8,8,128], index: 5, kind: output, shape index: {0}]   ;;  %s23421_s6 = inlined_call_operand.vmem [shape: f32[2,128], index: 6, kind: output, shape index: {1}]  }
   0x1 LB: > { %s17965_s22 = sadd.s32 4294967295, %s18921_s21   ;;  %p17969_p0 = scmp.ge.s32.totalorder %s18921_s21, 1  ;;  %s18921_s21 = sphi %s18961_s21, %s17_s21  }
   0x2   : > { %p210_p1 = scmp.lt.s32.totalorder %s18921_s21, 3 }
   0x4   : > { %p211_p2 = pnand %p17969_p0, %p210_p1 }
   0x6   : > { %214 = sbr.rel (%p211_p2) target bundleno = 1366 (0x556), region = 40 }
   0xd   : > { %p240_p3 = scmp.lt.s32.totalorder %s17965_s22, 1  ;;  %p17974_p4 = scmp.ne.s32.totalorder %s17965_s22, 0 }
   0xe   : > { %v18923_v0 = vmov (!%p17974_p4), 0.0   ;;  %v18924_v1 = vmov (!%p17974_p4), 0  }
   0xf   : > { %s241_s23 = scalar_select %p240_p3, %s17965_s22, 1 }
  0x10   : > { %254 = sbr.rel (%p17974_p4) target bundleno = 42 (0x2a), region = 44  ;;  %255 = vst [vmem:[%s23421_s6] sm:$0x3] (!%p17974_p4), %v18923_v0  ;;  %256 = vst [vmem:[#allocation2] sm:$0xf] (!%p17974_p4), %v18924_v1 }
  0x11   : > { %s18473_s24 = sshll.u32 %s241_s23, 7  ;;  %s18474_s25 = sshll.u32 %s241_s23, 5  ;;  %257 = vst [vmem:[#allocation2 + $0x4] sm:$0xf] (!%p17974_p4), %v18924_v1  ;;  %258 = vst [vmem:[#allocation2 + $0x8] sm:$0x1] (!%p17974_p4), %v18924_v1 }
  0x12   : > { %s18972_s28 = scalar_lea.vmem %s23415_s0, %s18473_s24  ;;  %s18977_s7 = scalar_lea.vmem %s23420_s5, %s18474_s25  ;;  %259 = vst [vmem:[#allocation2 + $0xc] sm:$0xf] (!%p17974_p4), %v18924_v1  ;;  %260 = vst [vmem:[#allocation2 + $0x10] sm:$0xf] (!%p17974_p4), %v18924_v1 }
  0x13   : > { %261 = vst [vmem:[#allocation2 + $0x14] sm:$0x1] (!%p17974_p4), %v18924_v1  ;;  %262 = vst [vmem:[#allocation2 + $0x18] sm:$0xf] (!%p17974_p4), %v18924_v1 }
  0x14   : > { %263 = vst [vmem:[#allocation2 + $0x1c] sm:$0xf] (!%p17974_p4), %v18924_v1  ;;  %264 = vst [vmem:[#allocation2 + $0x20] sm:$0x1] (!%p17974_p4), %v18924_v1 }
  0x15   : > { %265 = vst [vmem:[#allocation2 + $0x24] sm:$0xf] (!%p17974_p4), %v18924_v1  ;;  %266 = vst [vmem:[#allocation2 + $0x28] sm:$0xf] (!%p17974_p4), %v18924_v1 }
  0x16   : > { %267 = vst [vmem:[#allocation2 + $0x2c] sm:$0x1] (!%p17974_p4), %v18924_v1  ;;  %268 = vst [vmem:[#allocation2 + $0x30] sm:$0xf] (!%p17974_p4), %v18924_v1 }
  0x17   : > { %269 = vst [vmem:[#allocation2 + $0x34] sm:$0xf] %v18924_v1  ;;  %270 = vst [vmem:[#allocation2 + $0x38] sm:$0x1] %v18924_v1 }
  0x18   : > { %271 = vst [vmem:[#allocation2 + $0x3c] sm:$0xf] %v18924_v1  ;;  %272 = vst [vmem:[#allocation2 + $0x40] sm:$0xf] %v18924_v1 }
  0x19   : > { %273 = vst [vmem:[#allocation2 + $0x44] sm:$0x1] %v18924_v1  ;;  %274 = vst [vmem:[#allocation2 + $0x48] sm:$0xf] %v18924_v1 }
  0x1a   : > { %275 = vst [vmem:[#allocation2 + $0x4c] sm:$0xf] %v18924_v1  ;;  %276 = vst [vmem:[#allocation2 + $0x50] sm:$0x1] %v18924_v1 }
  0x1b   : > { %277 = vst [vmem:[#allocation2 + $0x54] sm:$0xf] %v18924_v1  ;;  %278 = vst [vmem:[#allocation2 + $0x58] sm:$0xf] %v18924_v1 }
  0x1c   : > { %279 = vst [vmem:[#allocation2 + $0x5c] sm:$0x1] %v18924_v1  ;;  %280 = vst [vmem:[#allocation2 + $0x60] sm:$0xf] %v18924_v1 }
  0x1d   : > { %281 = vst [vmem:[#allocation2 + $0x64] sm:$0xf] %v18924_v1  ;;  %282 = vst [vmem:[#allocation2 + $0x68] sm:$0x1] %v18924_v1 }
  0x1e   : > { %283 = vst [vmem:[#allocation2 + $0x6c] sm:$0xf] %v18924_v1  ;;  %284 = vst [vmem:[#allocation2 + $0x70] sm:$0xf] %v18924_v1 }
  0x1f   : > { %285 = vst [vmem:[#allocation2 + $0x74] sm:$0x1] %v18924_v1  ;;  %286 = vst [vmem:[#allocation2 + $0x78] sm:$0xf] %v18924_v1 }
  0x20   : > { %287 = vst [vmem:[#allocation2 + $0x7c] sm:$0xf] %v18924_v1  ;;  %288 = vst [vmem:[#allocation2 + $0x80] sm:$0x1] %v18924_v1 }
  0x21   : > { %289 = vst [vmem:[#allocation2 + $0x84] sm:$0xf] %v18924_v1  ;;  %290 = vst [vmem:[#allocation2 + $0x88] sm:$0xf] %v18924_v1 }
  0x22   : > { %291 = vst [vmem:[#allocation2 + $0x8c] sm:$0x1] %v18924_v1  ;;  %292 = vst [vmem:[#allocation2 + $0x90] sm:$0xf] %v18924_v1 }
  0x23   : > { %293 = vst [vmem:[#allocation2 + $0x94] sm:$0xf] %v18924_v1  ;;  %294 = vst [vmem:[#allocation2 + $0x98] sm:$0x1] %v18924_v1 }
  0x24   : > { %295 = vst [vmem:[#allocation2 + $0x9c] sm:$0xf] %v18924_v1  ;;  %296 = vst [vmem:[#allocation2 + $0xa0] sm:$0xf] %v18924_v1 }
  0x25   : > { %297 = vst [vmem:[#allocation2 + $0xa4] sm:$0x1] %v18924_v1  ;;  %298 = vst [vmem:[#allocation2 + $0xa8] sm:$0xf] %v18924_v1 }
  0x26   : > { %299 = vst [vmem:[#allocation2 + $0xac] sm:$0xf] %v18924_v1  ;;  %300 = vst [vmem:[#allocation2 + $0xb0] sm:$0x1] %v18924_v1 }
  0x27   : > { %301 = vst [vmem:[#allocation2 + $0xb4] sm:$0xf] %v18924_v1  ;;  %302 = vst [vmem:[#allocation2 + $0xb8] sm:$0xf] %v18924_v1 }
  0x28   : > { %303 = vst [vmem:[#allocation2 + $0xbc] sm:$0x1] %v18924_v1  ;;  %304 = vst [vmem:[#allocation2 + $0xc0] sm:$0xf] %v18924_v1 }
  0x29   : > { %305 = vst [vmem:[#allocation2 + $0xc4] sm:$0xf] %v18924_v1  ;;  %306 = vst [vmem:[#allocation2 + $0xc8] sm:$0x1] %v18924_v1 }
  0x2a PF: > { %v18840_v2 = vld [vmem:[%s23419_s4 + $0xc0] sm:$0xff]   ;;  %v18844_v6 = vld [vmem:[%s23419_s4 + $0xc8] sm:$0xff]   ;;  %v18848_v10 = vld [vmem:[%s23419_s4 + $0xd0] sm:$0xff]   ;;  %v387_v31 = vlaneseq  ;;  %vm3081_vm0 = vsmask.f32 1284  ;;  %vm2407_vm8 = vcmask 1041409  }
  0x2b   : > { %v18841_v3 = vld [vmem:[%s23419_s4 + $0x80] sm:$0xff]   ;;  %18657 = vmatprep.subr.bf16.mxu1 %v18840_v2  ;;  %v18845_v7 = vld [vmem:[%s23419_s4 + $0x88] sm:$0xff]   ;;  %v18849_v11 = vld [vmem:[%s23419_s4 + $0x90] sm:$0xff]   ;;  %v18925_v42 = vmov 1966171168   ;;  %vm2410_vm11 = vcmask 1042434  }
  0x2c   : > { %v18842_v4 = vld [vmem:[%s23419_s4 + $0x40] sm:$0xff]   ;;  %18658 = vmatpush3.bf16.msra.mxu1 %v18841_v3  ;;  %v18846_v8 = vld [vmem:[%s23419_s4 + $0x48] sm:$0xff]   ;;  %v18850_v12 = vld [vmem:[%s23419_s4 + $0x50] sm:$0xff]   ;;  %v19083_v38 = vshrl.u32 %v387_v31, 7  ;;  %v1071_v43 = vunpack.c.l.s4 %v18925_v42  ;;  %vm589_vm1 = vsmask.f32 256 }
  0x2d   : > { %v18843_v5 = vld [vmem:[%s23419_s4] sm:$0xff]   ;;  %18617 = vmatprep.subr.bf16.mxu0 %v18842_v4  ;;  %18659 = vmatprep.subr.bf16.mxu1 %v18844_v6  ;;  %v18847_v9 = vld [vmem:[%s23419_s4 + $0x8] sm:$0xff]   ;;  %v18851_v13 = vld [vmem:[%s23419_s4 + $0x10] sm:$0xff]   ;;  %vm3083_vm2 = vsmask.f32 2312  ;;  %vm2413_vm12 = vcmask 1043459  }
  0x2e   : > { %18618 = vmatpush3.bf16.msra.mxu0 %v18843_v5  ;;  %v18852_v14 = vld [vmem:[%s23419_s4 + $0xd8] sm:$0xff]   ;;  %v18856_v18 = vld [vmem:[%s23419_s4 + $0xe0] sm:$0xff]   ;;  %v18860_v22 = vld [vmem:[%s23419_s4 + $0xe8] sm:$0xff]   ;;  %v389_v41 = vsub.s32 0, %v19083_v38  ;;  %v1072_v48 = vunpack.c.0.s8 %v1071_v43  ;;  %vm3085_vm4 = vsmask.f32 3340 }
  0x2f   : > { %18619 = vmatprep.subr.bf16.mxu0 %v18846_v8  ;;  %v18853_v15 = vld [vmem:[%s23419_s4 + $0x98] sm:$0xff]   ;;  %v18857_v19 = vld [vmem:[%s23419_s4 + $0xa0] sm:$0xff]   ;;  %v18861_v23 = vld [vmem:[%s23419_s4 + $0xa8] sm:$0xff]   ;;  %vm590_vm5 = vsmask.f32 4368  ;;  %vm2416_vm13 = vcmask 1044484  }
  0x30   : > { %18660 = vmatpush3.bf16.msra.mxu1 %v18845_v7  ;;  %v18854_v16 = vld [vmem:[%s23419_s4 + $0x58] sm:$0xff]   ;;  %v18858_v20 = vld [vmem:[%s23419_s4 + $0x60] sm:$0xff]   ;;  %v18862_v24 = vld [vmem:[%s23419_s4 + $0x68] sm:$0xff]   ;;  %v19107_v53 = vsub.s32 %v1072_v48, %v19083_v38  ;;  %vm3088_vm6 = vsmask.f32 5396 }
  0x31   : > { %18661 = vmatprep.subr.bf16.mxu1 %v18848_v10  ;;  %v18855_v17 = vld [vmem:[%s23419_s4 + $0x18] sm:$0xff]   ;;  %v18859_v21 = vld [vmem:[%s23419_s4 + $0x20] sm:$0xff]   ;;  %v18863_v25 = vld [vmem:[%s23419_s4 + $0x28] sm:$0xff]   ;;  %vm3090_vm9 = vsmask.f32 6424 }
  0x32   : > { %18620 = vmatpush3.bf16.msra.mxu0 %v18847_v9  ;;  %v18864_v26 = vld [vmem:[%s23419_s4 + $0xf0] sm:$0xff]   ;;  %v18868_v30 = vld [vmem:[%s23419_s4 + $0xf8] sm:$0xff]   ;;  %v310_v34 = vld [vmem:[%s23416_s1] sm:$0x1]  ;;  %vm3092_vm14 = vsmask.f32 7452 }
  0x33   : > { %18621 = vmatprep.subr.bf16.mxu0 %v18850_v12  ;;  %v18865_v27 = vld [vmem:[%s23419_s4 + $0xb0] sm:$0xff]   ;;  %v18869_v32 = vld [vmem:[%s23419_s4 + $0xb8] sm:$0xff]   ;;  %v312_v35 = vld [vmem:[%s23416_s1 + $0x1] sm:$0x1]  ;;  %v19081_v36 = vmul.f32 0.001953125, %v310_v34 }
  0x34   : > { %18662 = vmatpush3.bf16.msra.mxu1 %v18849_v11  ;;  %v18866_v28 = vld [vmem:[%s23419_s4 + $0x70] sm:$0xff]   ;;  %v18870_v33 = vld [vmem:[%s23419_s4 + $0x78] sm:$0xff]   ;;  %v313_v37 = vmul.f32 0.001953125, %v312_v35  ;;  %v19089_v44 = vld [vmem:[%s18972_s28] sm:$0xff]  }
  0x35   : > { %18663 = vmatprep.subr.bf16.mxu1 %v18852_v14  ;;  %v18867_v29 = vld [vmem:[%s23419_s4 + $0x30] sm:$0xff]   ;;  %v314_v39 = vmul.f32 %v19081_v36, %v19081_v36  ;;  %v18871_v45 = vld [vmem:[%s23419_s4 + $0x38] sm:$0xff]   ;;  %vm19098_vm3 = vmor %vm589_vm1, %vm3081_vm0  ;;  %v18517_v52 = vunpack.c.l.bf16 %v19089_v44  ;;  %v18518_v56 = vunpack.c.h.bf16 %v19089_v44  ;;  %vm2419_vm0 = vcmask 1045509  }
  0x36   : > { %18622 = vmatpush3.bf16.msra.mxu0 %v18851_v13  ;;  %v19095_v47 = vld [vmem:[%s18972_s28 + $0x10] sm:$0xff]   ;;  %v19103_v50 = vld [vmem:[%s18972_s28 + $0x8] sm:$0xff]   ;;  %v18111_v51 = vld.sshfl [vmem:[#allocation2] sm:$0x32 pattern:$0x75316420] }
  0x37   : > { %18623 = vmatprep.subr.bf16.mxu0 %v18854_v16  ;;  %v315_v40 = vsub.f32 %v313_v37, %v314_v39  ;;  %v18112_v54 = vld.sshfl [vmem:[#allocation2 + $0x4] sm:$0x33 pattern:$0x75316420]  ;;  %v4753_v55 = vcombine.high %v18111_v51, %v18111_v51  ;;  %v18525_v57 = vunpack.c.l.bf16 %v19095_v47  ;;  %v18526_v58 = vunpack.c.h.bf16 %v19095_v47  ;;  %vm3084_vm7 = vmor %vm19098_vm3, %vm3083_vm2  ;;  %v320_v43 = vld [vmem:[%s23418_s3] sm:$0x1] }
  0x38   : > { %18664 = vmatpush3.bf16.msra.mxu1 %v18853_v15  ;;  %v18113_v59 = vld.sshfl [vmem:[#allocation2 + $0x8] sm:$0x1 pattern:$0x75316420]  ;;  %v4777_v60 = vcombine.high %v18112_v54, %v18112_v54  ;;  %v18872_v61 = vld [vmem:[%s23419_s4 + $0x1c0] sm:$0xff]   ;;  %v4760_v62 = vrot.slane %v18111_v51, %v19107_v53  ;;  %v19121_v0 = vrot.slane %v18112_v54, %v19107_v53  ;;  %v18521_v2 = vunpack.c.l.bf16 %v19103_v50  ;;  %vm19132_vm10 = vmor %vm3084_vm7, %vm3085_vm4 }
  0x39   : > { %18665 = vmatprep.subr.bf16.mxu1 %v18856_v18  ;;  %v316_v46 = vadd.f32 1e-05, %v315_v40  ;;  %v4767_v63 = vrot.slane %v4753_v55, %v19107_v53  ;;  %v19124_v1 = vrot.slane %v18113_v59, %v19107_v53  ;;  %v18522_v3 = vunpack.c.h.bf16 %v19103_v50  ;;  %v18023_v14 = vld.sshfl [vmem:[#allocation2] sm:$0x33 pattern:$0x75316420]  ;;  %vm19174_vm15 = vmor %vm19132_vm10, %vm590_vm5 }
  0x3a   : > { %18624 = vmatpush3.bf16.msra.mxu0 %v18855_v17  ;;  %v19129_v4 = vrot.slane %v4777_v60, %v19107_v53  ;;  %v4768_v6 = vcombine.high %v4760_v62, %v4760_v62  ;;  %v19138_v8 = vcombine.high %v19121_v0, %v19121_v0  ;;  %v5290_v11 = vrot.slane %v19121_v0, %v19107_v53  ;;  %v18874_v15 = vld [vmem:[%s23419_s4 + $0x140] sm:$0xff]   ;;  %vm3089_vm3 = vmor %vm19174_vm15, %vm3088_vm6 }
  0x3b   : > { %18625 = vmatprep.subr.bf16.mxu0 %v18858_v20  ;;  %18912 = vrsqrt.f32 %v316_v46  ;;  %v4769_v7 = vcombine.high %v4767_v63, %v4767_v63  ;;  %v5248_v9 = vrot.slane %v4767_v63, %v19107_v53  ;;  %v5346_v13 = vrot.slane %v19124_v1, %v19107_v53  ;;  %vm19213_vm6 = vmor %vm3089_vm3, %vm3090_vm9 }
  0x3c   : > { %18666 = vmatpush3.bf16.msra.mxu1 %v18857_v19  ;;  %v19143_v10 = vcombine.high %v19129_v4, %v19129_v4  ;;  %v5304_v12 = vrot.slane %v19129_v4, %v19107_v53  ;;  %v5262_v17 = vrot.slane %v4768_v6, %v19107_v53  ;;  %v5318_v19 = vrot.slane %v19138_v8, %v19107_v53  ;;  %vm19258_vm10 = vmor %vm19213_vm6, %vm3092_vm14 }
  0x3d   : > { %18667 = vmatprep.subr.bf16.mxu1 %v18860_v22  ;;  %v5255_v16 = vrot.slane %v5248_v9, %v19107_v53  ;;  %v5276_v18 = vrot.slane %v4769_v7, %v19107_v53  ;;  %v19160_v20 = vrot.slane %v5290_v11, %v19107_v53  ;;  %v2592_v40 = vcombine.high %v18023_v14, %v18023_v14  ;;  %vm19288_vm15 = vmor %vm589_vm1, %vm590_vm5 }
  0x3e   : > { %18626 = vmatpush3.bf16.msra.mxu0 %v18859_v21  ;;  %v19163_v21 = vrot.slane %v5304_v12, %v19107_v53  ;;  %v5332_v22 = vrot.slane %v19143_v10, %v19107_v53  ;;  %vm2422_vm2 = vcmask 1046534   ;;  %vm2425_vm4 = vcmask 1047559  }
  0x3f   : > { %18627 = vmatprep.subr.bf16.mxu0 %v18862_v24  ;;  %v318_v24 = vld [vmem:[%s23417_s2] sm:$0x1]  ;;  %v6141_v31 = vunpack.c.l.b16 %v19160_v20  ;;  %v19210_v62 = vrot.slane %v18023_v14, %v19107_v53  ;;  %v3124_v6 = vshll.u32 %v19121_v0, 16  ;;  %v3127_v7 = vshrl.u32 %v19121_v0, 16 }
  0x40   : > { %18668 = vmatpush3.bf16.msra.mxu1 %v18861_v23  ;;  %v5353_v23 = vrot.slane %v5346_v13, %v19107_v53  ;;  %vm913_vm7 = vcmask 1043456   ;;  %vm914_vm9 = vsmask.f32 7938  ;;  %v23481_v50 = vmov 0 }
  0x41   : > { %18669 = vmatprep.subr.bf16.mxu1 %v18864_v26  ;;  %v5269_v26 = vrot.slane %v5262_v17, %v19107_v53  ;;  %v6206_v46 = vrot.slane %v6141_v31, 5  ;;  %v19249_v47 = vcombine.high %v19210_v62, %v19210_v62  ;;  %v23482_v50 = vsel %vm19258_vm10, 4294967295, %v23481_v50  ;;  %vm19298_vm3 = vmand %vm913_vm7, %vm914_vm9 }
  0x42   : > { %18628 = vmatpush3.bf16.msra.mxu0 %v18863_v25  ;;  %23483 = vst [vmem:[#allocation6_spill] sm:$0xff] %v23482_v50  ;;  %vm920_vm14 = vcmask 1040384  }
  0x43   : > { %18629 = vmatprep.subr.bf16.mxu0 %v18866_v28  ;;  %v19181_v28 = vrot.slane %v5318_v19, %v19107_v53  ;;  %v6139_v35 = vunpack.c.l.b16 %v5269_v26  ;;  %vm19310_vm5 = vmand %vm920_vm14, %vm589_vm1 }
  0x44   : > { %18670 = vmatpush3.bf16.msra.mxu1 %v18865_v27  ;;  %v5283_v27 = vrot.slane %v5276_v18, %v19107_v53 }
  0x45   : > { %18671 = vmatprep.subr.bf16.mxu1 %v18868_v30  ;;  %v19184_v30 = vrot.slane %v5332_v22, %v19107_v53  ;;  %v18913_v34 = vpop.eup %18912  ;;  %v23423_v39 = vunpack.c.l.b16 %v19181_v28  ;;  %v6202_v49 = vrot.slane %v6139_v35, 7 }
  0x46   : > { %18630 = vmatpush3.bf16.msra.mxu0 %v18867_v29  ;;  %v6138_v29 = vunpack.c.l.b16 %v5255_v16  ;;  %v6140_v37 = vunpack.c.l.b16 %v5283_v27  ;;  %v319_v42 = vmul.f32 %v18913_v34, %v318_v24 }
  0x47   : > { %18631 = vmatprep.subr.bf16.mxu0 %v18870_v33  ;;  %v6145_v33 = vunpack.c.l.b16 %v5353_v23  ;;  %v6210_v54 = vrot.slane %v23423_v39, 3 }
  0x48   : > { %18672 = vmatpush3.bf16.msra.mxu1 %v18869_v32  ;;  %v23424_v32 = vunpack.c.l.b16 %v19163_v21  ;;  %v6204_v51 = vrot.slane %v6140_v37, 6  ;;  %v321_v59 = vmul.f32 %v319_v42, %v19081_v36  ;;  %v19205_v60 = vrot.slane %v319_v42, %v389_v41 }
  0x49   : > { %18737 = vmatprep.subr.bf16.mxu1 %v18872_v61  ;;  %v6214_v55 = vrot.slane %v6145_v33, 1  ;;  %v6203_v5 = vsel %vm2407_vm8, %v6202_v49, %v6138_v29  ;;  %v19219_v36 = vrot.slane %v2592_v40, %v19107_v53  ;;  %v3108_v40 = vshll.u32 %v19249_v47, 16 }
  0x4a   : > { %18632 = vmatpush3.bf16.msra.mxu0 %v18871_v45  ;;  %v23422_v45 = vunpack.c.l.b16 %v19184_v30  ;;  %v6208_v48 = vrot.slane %v23424_v32, 4  ;;  %23477 = vst [vmem:[#allocation4_spill] sm:$0xff] %v19205_v60  ;;  %v322_v9 = vsub.f32 %v320_v43, %v321_v59  ;;  %v391_v11 = vmul.f32 %v18517_v52, %v19205_v60 }
  0x4b   : > { %18697 = vmatprep.subr.bf16.mxu0 %v18874_v15  ;;  %v392_v12 = vmul.f32 %v18518_v56, %v19205_v60  ;;  %v395_v13 = vmul.f32 %v18525_v57, %v19205_v60  ;;  %v396_v14 = vmul.f32 %v18526_v58, %v19205_v60  ;;  %v393_v15 = vmul.f32 %v18521_v2, %v19205_v60 }
  0x4c   : > { %v6212_v61 = vrot.slane %v23422_v45, 2  ;;  %v394_v52 = vmul.f32 %v18522_v3, %v19205_v60  ;;  %v6205_v16 = vsel %vm2410_vm11, %v6204_v51, %v6203_v5  ;;  %v19244_v44 = vrot.slane %v322_v9, %v389_v41 }
  0x4d   : > { %v6207_v56 = vsel %vm2413_vm12, %v6206_v46, %v6205_v16  ;;  %v19253_v57 = vcombine.high %v19219_v36, %v19219_v36  ;;  %v3095_v41 = vshrl.u32 %v19210_v62, 16  ;;  %v3100_v58 = vshll.u32 %v19219_v36, 16 }
  0x4e   : > { %23480 = vst [vmem:[#allocation5_spill] sm:$0xff] %v19244_v44  ;;  %v6209_v38 = vsel %vm2416_vm13, %v6208_v48, %v6207_v56  ;;  %v3103_v2 = vshrl.u32 %v19219_v36, 16  ;;  %v429_v3 = vadd.f32 %v19244_v44, %v391_v11  ;;  %v430_v17 = vadd.f32 %v19244_v44, %v392_v12  ;;  %v932_v56 = vld [vmem:[#allocation2 + $0x24] sm:$0xf] }
  0x4f   : > { %v433_v18 = vadd.f32 %v19244_v44, %v395_v13  ;;  %v434_v19 = vadd.f32 %v19244_v44, %v396_v14  ;;  %v431_v22 = vadd.f32 %v19244_v44, %v393_v15  ;;  %v432_v23 = vadd.f32 %v19244_v44, %v394_v52  ;;  %v916_v15 = vld [vmem:[#allocation2 + $0xc] sm:$0xf] }
  0x50   : > { %v6211_v24 = vsel %vm2419_vm0, %v6210_v54, %v6209_v38  ;;  %v19275_v25 = vsel %vm19258_vm10, %v3095_v41, %v3100_v58  ;;  %v461_v26 = vmax.f32 %v429_v3, 0.0  ;;  %v462_v27 = vmax.f32 %v430_v17, 0.0 }
  0x51   : > { %v465_v29 = vmax.f32 %v433_v18, 0.0  ;;  %v466_v33 = vmax.f32 %v434_v19, 0.0  ;;  %v463_v34 = vmax.f32 %v431_v22, 0.0  ;;  %v464_v35 = vmax.f32 %v432_v23, 0.0  ;;  %v925_v19 = vld [vmem:[#allocation2 + $0x18] sm:$0xf] }
  0x52   : > { %v6213_v37 = vsel %vm2422_vm2, %v6212_v61, %v6211_v24  ;;  %v18475_v42 = vpack.c.bf16 %v461_v26, %v461_v26  ;;  %v18476_v43 = vpack.c.bf16 %v462_v27, %v462_v27  ;;  %v19284_v59 = vsel %vm19258_vm10, %v3103_v2, %v3108_v40  ;;  %v929_v27 = vld [vmem:[#allocation2 + $0x20] sm:$0x1] }
  0x53   : > { %v18479_v46 = vpack.c.bf16 %v465_v29, %v465_v29  ;;  %v18480_v48 = vpack.c.bf16 %v466_v33, %v466_v33  ;;  %v18477_v49 = vpack.c.bf16 %v463_v34, %v463_v34  ;;  %v18478_v51 = vpack.c.bf16 %v464_v35, %v464_v35 }
  0x54   : > { %v19280_v54 = vsel %vm2425_vm4, %v6214_v55, %v6213_v37  ;;  %v593_v63 = vshrl.u32 %v18475_v42, 16  ;;  %v596_v5 = vshll.u32 %v18475_v42, 16  ;;  %v601_v9 = vshrl.u32 %v18476_v43, 16 }
  0x55   : > { %v604_v11 = vshll.u32 %v18476_v43, 16  ;;  %v627_v61 = vshrl.u32 %v18479_v46, 16  ;;  %v630_v12 = vshll.u32 %v18479_v46, 16  ;;  %v635_v13 = vshrl.u32 %v18480_v48, 16 }
  0x56   : > { %v638_v14 = vshll.u32 %v18480_v48, 16  ;;  %v23484_v52 = vmov 0  ;;  %v595_v55 = vrot.slane %v593_v63, 7  ;;  %v19292_v16 = vrot.slane %v601_v9, 7 }
  0x57   : > { %v23485_v52 = vsel %vm19288_vm15, 4294967295, %v23484_v52  ;;  %v610_v38 = vshrl.u32 %v18477_v49, 16  ;;  %v613_v41 = vshll.u32 %v18477_v49, 16  ;;  %v629_v58 = vrot.slane %v627_v61, 7 }
  0x58   : > { %23486 = vst [vmem:[#allocation7_spill] sm:$0xff] %v23485_v52  ;;  %23487 = vst [vmem:[#allocation8_spill] sm:$0xff] %v19292_v16  ;;  %v19294_v2 = vrot.slane %v635_v13, 7  ;;  %v23489_v3 = vmov 0  ;;  %v618_v17 = vshrl.u32 %v18478_v51, 16  ;;  %v621_v18 = vshll.u32 %v18478_v51, 16 }
  0x59   : > { %v23490_v3 = vsel %vm19298_vm3, 4294967295, %v23489_v3  ;;  %v598_v22 = vor.u32 %v596_v5, %v595_v55  ;;  %v599_v23 = vrot.slane %v595_v55, 4  ;;  %v606_v24 = vor.u32 %v604_v11, %v19292_v16 }
  0x5a   : > { %23488 = vst [vmem:[#allocation9_spill] sm:$0xff] %v19294_v2  ;;  %23491 = vst [vmem:[#allocation10_spill] sm:$0xff] %v23490_v3  ;;  %v612_v26 = vrot.slane %v610_v38, 7  ;;  %v632_v29 = vor.u32 %v630_v12, %v629_v58  ;;  %v633_v33 = vrot.slane %v629_v58, 4  ;;  %v640_v34 = vor.u32 %v638_v14, %v19294_v2 }
  0x5b   : > { %v620_v35 = vrot.slane %v618_v17, 7  ;;  %v607_v37 = vsel %vm19288_vm15, %v599_v23, %v606_v24  ;;  %v917_v40 = vsel %vm19298_vm3, %v598_v22, %v916_v15  ;;  %v23492_v46 = vmov 0 }
  0x5c   : > { %v615_v42 = vor.u32 %v613_v41, %v612_v26  ;;  %v616_v43 = vrot.slane %v612_v26, 4  ;;  %v23493_v46 = vsel %vm19310_vm5, 4294967295, %v23492_v46  ;;  %v641_v48 = vsel %vm19288_vm15, %v633_v33, %v640_v34  ;;  %918 = vst [vmem:[#allocation2 + $0xc] sm:$0xf] %v917_v40  ;;  %919 = vst [vmem:[#allocation2 + $0x10] sm:$0xf] %v607_v37 }
  0x5d   : > { %23494 = vst [vmem:[#allocation11_spill] sm:$0xff] %v23493_v46  ;;  %v933_v49 = vsel %vm19298_vm3, %v632_v29, %v932_v56  ;;  %v623_v51 = vor.u32 %v621_v18, %v620_v35  ;;  %v625_v63 = vrot.slane %v620_v35, 4  ;;  %935 = vst [vmem:[#allocation2 + $0x28] sm:$0xf] %v641_v48  ;;  %v3111_v9 = vshrl.u32 %v19249_v47, 16 }
  0x5e   : > { %934 = vst [vmem:[#allocation2 + $0x24] sm:$0xf] %v933_v49  ;;  %v926_v5 = vsel %vm19298_vm3, %v615_v42, %v925_v19  ;;  %v3116_v11 = vshll.u32 %v19253_v57, 16  ;;  %v3119_v61 = vshrl.u32 %v19253_v57, 16  ;;  %v3132_v14 = vshll.u32 %v19129_v4, 16 }
  0x5f   : > { %v624_v12 = vsel %vm19288_vm15, %v616_v43, %v623_v51  ;;  %927 = vst [vmem:[#allocation2 + $0x18] sm:$0xf] %v926_v5  ;;  %v930_v13 = vsel %vm19310_vm5, %v625_v63, %v929_v27  ;;  %v3135_v15 = vshrl.u32 %v19129_v4, 16  ;;  %v3140_v38 = vshll.u32 %v19138_v8, 16 }
  0x60   : > { %928 = vst [vmem:[#allocation2 + $0x1c] sm:$0xf] %v624_v12  ;;  %931 = vst [vmem:[#allocation2 + $0x20] sm:$0x1] %v930_v13  ;;  %v3118_v55 = vsel %vm19258_vm10, %v3111_v9, %v3116_v11  ;;  %v3126_v56 = vsel %vm19258_vm10, %v3119_v61, %v3124_v6  ;;  %v3143_v41 = vshrl.u32 %v19138_v8, 16  ;;  %v3134_v58 = vsel %vm19258_vm10, %v3127_v7, %v3132_v14 }
  0x61   : > { %v3148_v4 = vshll.u32 %v19143_v10, 16  ;;  %v3151_v17 = vshrl.u32 %v19143_v10, 16  ;;  %v3156_v18 = vshll.u32 %v19124_v1, 16  ;;  %v3142_v19 = vsel %vm19258_vm10, %v3135_v15, %v3140_v38 }
  0x62   : > { %v3620_v6 = vrot.slane %v19275_v25, %v19107_v53  ;;  %v3634_v8 = vrot.slane %v19284_v59, %v19107_v53  ;;  %v3648_v0 = vrot.slane %v3118_v55, %v19107_v53  ;;  %v3662_v1 = vrot.slane %v3126_v56, %v19107_v53 }
  0x63   : > { %v19353_v7 = vsel %vm19258_vm10, %v3143_v41, %v3148_v4  ;;  %v19357_v10 = vsel %vm19258_vm10, %v3151_v17, %v3156_v18  ;;  %v3676_v22 = vrot.slane %v3134_v58, %v19107_v53  ;;  %v18135_v23 = vld.sshfl [vmem:[#allocation2 + $0xc] sm:$0x33 pattern:$0x75316420]  ;;  %v3690_v26 = vrot.slane %v3142_v19, %v19107_v53 }
  0x64   : > { %v19362_v25 = vrot.slane %v3620_v6, %v19107_v53  ;;  %v19365_v59 = vrot.slane %v3634_v8, %v19107_v53  ;;  %v19368_v24 = vrot.slane %v3648_v0, %v19107_v53  ;;  %v18136_v27 = vld.sshfl [vmem:[#allocation2 + $0x10] sm:$0x33 pattern:$0x75316420]  ;;  %v6365_v29 = vcombine.high %v18135_v23, %v18135_v23 }
  0x65   : > { %v6372_v33 = vrot.slane %v18135_v23, %v19107_v53  ;;  %v19373_v34 = vrot.slane %v3662_v1, %v19107_v53  ;;  %v19376_v35 = vrot.slane %v3676_v22, %v19107_v53  ;;  %v18137_v37 = vld.sshfl [vmem:[#allocation2 + $0x24] sm:$0x33 pattern:$0x75316420]  ;;  %v6389_v40 = vcombine.high %v18136_v27, %v18136_v27 }
  0x66   : > { %v6396_v42 = vrot.slane %v18136_v27, %v19107_v53  ;;  %v19380_v43 = vrot.slane %v3690_v26, %v19107_v53  ;;  %v3704_v48 = vrot.slane %v19353_v7, %v19107_v53  ;;  %v18138_v49 = vld.sshfl [vmem:[#allocation2 + $0x28] sm:$0x33 pattern:$0x75316420]  ;;  %v6379_v51 = vrot.slane %v6365_v29, %v19107_v53 }
  0x67   : > { %v6380_v63 = vcombine.high %v6372_v33, %v6372_v33  ;;  %v6413_v5 = vcombine.high %v18137_v37, %v18137_v37  ;;  %v6420_v9 = vrot.slane %v18137_v37, %v19107_v53  ;;  %v6403_v11 = vrot.slane %v6389_v40, %v19107_v53 }
  0x68   : > { %v6404_v61 = vcombine.high %v6396_v42, %v6396_v42  ;;  %v6437_v12 = vcombine.high %v18138_v49, %v18138_v49  ;;  %v6444_v13 = vrot.slane %v18138_v49, %v19107_v53  ;;  %v6381_v14 = vcombine.high %v6379_v51, %v6379_v51 }
  0x69   : > { %v6427_v15 = vrot.slane %v6413_v5, %v19107_v53  ;;  %v6428_v55 = vcombine.high %v6420_v9, %v6420_v9  ;;  %v6748_v56 = vrot.slane %v6372_v33, %v19107_v53  ;;  %v6405_v38 = vcombine.high %v6403_v11, %v6403_v11 }
  0x6a   : > { %v6451_v41 = vrot.slane %v6437_v12, %v19107_v53  ;;  %v6452_v58 = vcombine.high %v6444_v13, %v6444_v13  ;;  %v6762_v4 = vrot.slane %v6379_v51, %v19107_v53  ;;  %v6776_v19 = vrot.slane %v6380_v63, %v19107_v53 }
  0x6b   : > { %v6429_v17 = vcombine.high %v6427_v15, %v6427_v15  ;;  %v6755_v18 = vrot.slane %v6748_v56, %v19107_v53  ;;  %v6790_v6 = vrot.slane %v6381_v14, %v19107_v53  ;;  %v6804_v1 = vrot.slane %v6396_v42, %v19107_v53 }
  0x6c   : > { %v6453_v8 = vcombine.high %v6451_v41, %v6451_v41  ;;  %v6769_v0 = vrot.slane %v6762_v4, %v19107_v53  ;;  %v6818_v22 = vrot.slane %v6403_v11, %v19107_v53  ;;  %v6783_v23 = vrot.slane %v6776_v19, %v19107_v53 }
  0x6d   : > { %v6797_v26 = vrot.slane %v6790_v6, %v19107_v53  ;;  %v6832_v27 = vrot.slane %v6404_v61, %v19107_v53  ;;  %v6846_v29 = vrot.slane %v6405_v38, %v19107_v53  ;;  %v6811_v33 = vrot.slane %v6804_v1, %v19107_v53 }
  0x6e   : > { %v6825_v37 = vrot.slane %v6818_v22, %v19107_v53  ;;  %v6860_v40 = vrot.slane %v6420_v9, %v19107_v53  ;;  %v6874_v49 = vrot.slane %v6427_v15, %v19107_v53  ;;  %v6888_v63 = vrot.slane %v6428_v55, %v19107_v53 }
  0x6f   : > { %v6839_v42 = vrot.slane %v6832_v27, %v19107_v53  ;;  %v6853_v51 = vrot.slane %v6846_v29, %v19107_v53  ;;  %v6902_v5 = vrot.slane %v6429_v17, %v19107_v53  ;;  %v6916_v12 = vrot.slane %v6444_v13, %v19107_v53 }
  0x70   : > { %v6867_v11 = vrot.slane %v6860_v40, %v19107_v53  ;;  %v6881_v61 = vrot.slane %v6874_v49, %v19107_v53  ;;  %v6930_v14 = vrot.slane %v6451_v41, %v19107_v53  ;;  %v6895_v9 = vrot.slane %v6888_v63, %v19107_v53 }
  0x71   : > { %v6909_v15 = vrot.slane %v6902_v5, %v19107_v53  ;;  %v6944_v56 = vrot.slane %v6452_v58, %v19107_v53  ;;  %v6958_v38 = vrot.slane %v6453_v8, %v19107_v53  ;;  %v6923_v55 = vrot.slane %v6916_v12, %v19107_v53 }
  0x72   : > { %v6937_v4 = vrot.slane %v6930_v14, %v19107_v53  ;;  %v7638_v17 = vunpack.c.l.b16 %v6755_v18  ;;  %v7639_v19 = vunpack.c.l.b16 %v6769_v0  ;;  %v7640_v1 = vunpack.c.l.b16 %v6783_v23  ;;  %v18114_v18 = vld.sshfl [vmem:[#allocation2 + $0x18] sm:$0x32 pattern:$0x75316420] }
  0x73   : > { %v6951_v6 = vrot.slane %v6944_v56, %v19107_v53  ;;  %v6965_v13 = vrot.slane %v6958_v38, %v19107_v53  ;;  %v7641_v41 = vunpack.c.l.b16 %v6797_v26  ;;  %v7642_v22 = vunpack.c.l.b16 %v6811_v33  ;;  %v18115_v38 = vld.sshfl [vmem:[#allocation2 + $0x1c] sm:$0x33 pattern:$0x75316420] }
  0x74   : > { %v7643_v27 = vunpack.c.l.b16 %v6825_v37  ;;  %v7644_v29 = vunpack.c.l.b16 %v6839_v42  ;;  %v7645_v40 = vunpack.c.l.b16 %v6853_v51  ;;  %v7646_v49 = vunpack.c.l.b16 %v6867_v11 }
  0x75   : > { %v7647_v58 = vunpack.c.l.b16 %v6881_v61  ;;  %v7648_v63 = vunpack.c.l.b16 %v6895_v9  ;;  %v7649_v8 = vunpack.c.l.b16 %v6909_v15  ;;  %v7650_v5 = vunpack.c.l.b16 %v6923_v55 }
  0x76   : > { %v7651_v12 = vunpack.c.l.b16 %v6937_v4  ;;  %v7652_v45 = vunpack.c.l.b16 %v6951_v6  ;;  %v7653_v14 = vunpack.c.l.b16 %v6965_v13  ;;  %v7702_v0 = vrot.slane %v7639_v19, 7 }
  0x77   : > { %v7704_v39 = vrot.slane %v7640_v1, 6  ;;  %v7706_v56 = vrot.slane %v7641_v41, 5  ;;  %v7708_v32 = vrot.slane %v7642_v22, 4  ;;  %v7710_v23 = vrot.slane %v7643_v27, 3 }
  0x78   : > { %v7712_v26 = vrot.slane %v7644_v29, 2  ;;  %v7714_v33 = vrot.slane %v7645_v40, 1  ;;  %v7716_v37 = vrot.slane %v7647_v58, 7  ;;  %v7703_v42 = vsel %vm2407_vm8, %v7702_v0, %v7638_v17 }
  0x79   : > { %v7718_v51 = vrot.slane %v7648_v63, 6  ;;  %v7720_v11 = vrot.slane %v7649_v8, 5  ;;  %v7722_v61 = vrot.slane %v7650_v5, 4  ;;  %v7705_v9 = vsel %vm2410_vm11, %v7704_v39, %v7703_v42 }
  0x7a   : > { %v7717_v15 = vsel %vm2407_vm8, %v7716_v37, %v7646_v49  ;;  %v7724_v55 = vrot.slane %v7651_v12, 3  ;;  %v7726_v4 = vrot.slane %v7652_v45, 2  ;;  %v7707_v19 = vsel %vm2413_vm12, %v7706_v56, %v7705_v9  ;;  %v18116_v40 = vld.sshfl [vmem:[#allocation2 + $0x20] sm:$0x1 pattern:$0x75316420] }
  0x7b   : > { %v7719_v6 = vsel %vm2410_vm11, %v7718_v51, %v7717_v15  ;;  %v7728_v13 = vrot.slane %v7653_v14, 1  ;;  %v4815_v1 = vcombine.high %v18114_v18, %v18114_v18  ;;  %v7709_v41 = vsel %vm2416_vm13, %v7708_v32, %v7707_v19 }
  0x7c   : > { %v7721_v22 = vsel %vm2413_vm12, %v7720_v11, %v7719_v6  ;;  %v4822_v17 = vrot.slane %v18114_v18, %v19107_v53  ;;  %v4839_v27 = vcombine.high %v18115_v38, %v18115_v38  ;;  %v7711_v29 = vsel %vm2419_vm0, %v7710_v23, %v7709_v41  ;;  %v18026_v6 = vld.sshfl [vmem:[#allocation2 + $0x18] sm:$0x33 pattern:$0x75316420] }
  0x7d   : > { %v7723_v39 = vsel %vm2416_vm13, %v7722_v61, %v7721_v22  ;;  %v4829_v45 = vrot.slane %v4815_v1, %v19107_v53  ;;  %v19434_v49 = vrot.slane %v18115_v38, %v19107_v53  ;;  %v7713_v58 = vsel %vm2422_vm2, %v7712_v26, %v7711_v29 }
  0x7e   : > { %v7725_v63 = vsel %vm2419_vm0, %v7724_v55, %v7723_v39  ;;  %v4830_v32 = vcombine.high %v4822_v17, %v4822_v17  ;;  %v19439_v8 = vrot.slane %v4839_v27, %v19107_v53  ;;  %v7715_v5 = vsel %vm2425_vm4, %v7714_v33, %v7713_v58 }
  0x7f   : > { %v7727_v12 = vsel %vm2422_vm2, %v7726_v4, %v7725_v63  ;;  %v4831_v14 = vcombine.high %v4829_v45, %v4829_v45  ;;  %v19445_v18 = vcombine.high %v19434_v49, %v19434_v49  ;;  %v19453_v38 = vrot.slane %v18116_v40, %v19107_v53 }
  0x80   : > { %v7729_v0 = vsel %vm2425_vm4, %v7728_v13, %v7727_v12  ;;  %v19450_v56 = vcombine.high %v19439_v8, %v19439_v8  ;;  %v5360_v23 = vrot.slane %v4829_v45, %v19107_v53  ;;  %v5374_v33 = vrot.slane %v4830_v32, %v19107_v53 }
  0x81   : > { %v7814_v26 = vpack.c.b16 %v7729_v0, %v7715_v5  ;;  %v5388_v37 = vrot.slane %v4831_v14, %v19107_v53  ;;  %v5402_v42 = vrot.slane %v19434_v49, %v19107_v53  ;;  %v5416_v11 = vrot.slane %v19439_v8, %v19107_v53 }
  0x82   : > { %v5367_v51 = vrot.slane %v5360_v23, %v19107_v53  ;;  %v5430_v61 = vrot.slane %v19445_v18, %v19107_v53  ;;  %v5444_v9 = vrot.slane %v19450_v56, %v19107_v53  ;;  %v5381_v15 = vrot.slane %v5374_v33, %v19107_v53 }
  0x83   : > { %17588 = vmatprep.mubr.bf16.mxu1 %v7814_v26  ;;  %v5395_v55 = vrot.slane %v5388_v37, %v19107_v53  ;;  %v19470_v4 = vrot.slane %v5402_v42, %v19107_v53  ;;  %v5458_v19 = vrot.slane %v19453_v38, %v19107_v53  ;;  %v19475_v13 = vrot.slane %v5416_v11, %v19107_v53 }
  0x84   : > { %v19478_v1 = vrot.slane %v5430_v61, %v19107_v53  ;;  %v19481_v41 = vrot.slane %v5444_v9, %v19107_v53  ;;  %v6146_v22 = vunpack.c.l.b16 %v5367_v51  ;;  %v6147_v27 = vunpack.c.l.b16 %v5381_v15 }
  0x85   : > { %v5465_v17 = vrot.slane %v5458_v19, %v19107_v53  ;;  %v6148_v29 = vunpack.c.l.b16 %v5395_v55  ;;  %v6149_v39 = vunpack.c.l.b16 %v19470_v4  ;;  %v6150_v40 = vunpack.c.l.b16 %v19475_v13 }
  0x86   : > { %v6151_v45 = vunpack.c.l.b16 %v19478_v1  ;;  %v23425_v58 = vunpack.c.l.b16 %v19481_v41  ;;  %v2654_v63 = vcombine.high %v18026_v6, %v18026_v6  ;;  %v6216_v5 = vrot.slane %v6147_v27, 7 }
  0x87   : > { %v6153_v32 = vunpack.c.l.b16 %v5465_v17  ;;  %v6218_v12 = vrot.slane %v6148_v29, 6  ;;  %v6220_v14 = vrot.slane %v6149_v39, 5  ;;  %v6222_v0 = vrot.slane %v6150_v40, 4 }
  0x88   : > { %v6224_v23 = vrot.slane %v6151_v45, 3  ;;  %v6226_v26 = vrot.slane %v23425_v58, 2  ;;  %v19497_v33 = vrot.slane %v18026_v6, %v19107_v53  ;;  %v6217_v37 = vsel %vm2407_vm8, %v6216_v5, %v6146_v22 }
  0x89   : > { %v6228_v42 = vrot.slane %v6153_v32, 1  ;;  %v19501_v51 = vrot.slane %v2654_v63, %v19107_v53  ;;  %v3189_v11 = vshll.u32 %v19434_v49, 16  ;;  %v6219_v61 = vsel %vm2410_vm11, %v6218_v12, %v6217_v37 }
  0x8a   : > { %v19507_v9 = vcombine.high %v19497_v33, %v19497_v33  ;;  %v3160_v15 = vshrl.u32 %v19497_v33, 16  ;;  %v3192_v55 = vshrl.u32 %v19434_v49, 16  ;;  %v6221_v19 = vsel %vm2413_vm12, %v6220_v14, %v6219_v61 }
  0x8b   : > { %v19514_v6 = vcombine.high %v19501_v51, %v19501_v51  ;;  %v3165_v22 = vshll.u32 %v19501_v51, 16  ;;  %v3168_v17 = vshrl.u32 %v19501_v51, 16  ;;  %v6223_v27 = vsel %vm2416_vm13, %v6222_v0, %v6221_v19 }
  0x8c   : > { %v3173_v29 = vshll.u32 %v19507_v9, 16  ;;  %v3176_v63 = vshrl.u32 %v19507_v9, 16  ;;  %v3197_v32 = vshll.u32 %v19439_v8, 16  ;;  %v6225_v49 = vsel %vm2419_vm0, %v6224_v23, %v6223_v27  ;;  %v18873_v23 = vld [vmem:[%s23419_s4 + $0x180] sm:$0xff]   ;;  %v18876_v27 = vld [vmem:[%s23419_s4 + $0x1c8] sm:$0xff]  }
  0x8d   : > { %v3167_v5 = vsel %vm19258_vm10, %v3160_v15, %v3165_v22  ;;  %v3181_v12 = vshll.u32 %v19514_v6, 16  ;;  %v3184_v14 = vshrl.u32 %v19514_v6, 16  ;;  %v6227_v37 = vsel %vm2422_vm2, %v6226_v26, %v6225_v49  ;;  %v18877_v49 = vld [vmem:[%s23419_s4 + $0x188] sm:$0xff]  }
  0x8e   : > { %v3175_v0 = vsel %vm19258_vm10, %v3168_v17, %v3173_v29  ;;  %v3199_v61 = vsel %vm19258_vm10, %v3192_v55, %v3197_v32  ;;  %v3200_v19 = vshrl.u32 %v19439_v8, 16  ;;  %v6229_v58 = vsel %vm2425_vm4, %v6228_v42, %v6227_v37 }
  0x8f   : > { %v3183_v15 = vsel %vm19258_vm10, %v3176_v63, %v3181_v12  ;;  %v3191_v26 = vsel %vm19258_vm10, %v3184_v14, %v3189_v11  ;;  %v3205_v22 = vshll.u32 %v19445_v18, 16  ;;  %v6314_v17 = vpack.c.b16 %v6229_v58, %v19280_v54 }
  0x90   : > { %v3208_v55 = vshrl.u32 %v19445_v18, 16  ;;  %v3213_v8 = vshll.u32 %v19450_v56, 16  ;;  %v3216_v42 = vshrl.u32 %v19450_v56, 16  ;;  %v3221_v63 = vshll.u32 %v19453_v38, 16 }
  0x91   : > { %v3207_v29 = vsel %vm19258_vm10, %v3200_v19, %v3205_v22  ;;  %v3711_v54 = vrot.slane %v3704_v48, %v19107_v53  ;;  %v3718_v18 = vrot.slane %v19357_v10, %v19107_v53  ;;  %17589 = vmatmul.mubr.bf16.vlgmr.msra.gmra.mrb[0].mxu1 %v6314_v17  ;;  %v3732_v58 = vrot.slane %v3167_v5, %v19107_v53 }
  0x92   : > { %v3215_v56 = vsel %vm19258_vm10, %v3208_v55, %v3213_v8  ;;  %v3746_v11 = vrot.slane %v3175_v0, %v19107_v53  ;;  %v3760_v32 = vrot.slane %v3183_v15, %v19107_v53  ;;  %18738 = vmatpush3.bf16.msra.mxu1 %v18873_v23  ;;  %v3223_v38 = vsel %vm19258_vm10, %v3216_v42, %v3221_v63  ;;  %v18880_v0 = vld [vmem:[%s23419_s4 + $0x1d0] sm:$0xff]  }
  0x93   : > { %v3725_v7 = vrot.slane %v3718_v18, %v19107_v53  ;;  %v3774_v48 = vrot.slane %v3191_v26, %v19107_v53  ;;  %v3788_v10 = vrot.slane %v3199_v61, %v19107_v53  ;;  %v3739_v5 = vrot.slane %v3732_v58, %v19107_v53  ;;  %18739 = vmatprep.subr.bf16.mxu1 %v18876_v27  ;;  %v18881_v63 = vld [vmem:[%s23419_s4 + $0x190] sm:$0xff]  }
  0x94   : > { %v3753_v12 = vrot.slane %v3746_v11, %v19107_v53  ;;  %v3767_v14 = vrot.slane %v3760_v32, %v19107_v53  ;;  %v3802_v37 = vrot.slane %v3207_v29, %v19107_v53  ;;  %v3816_v23 = vrot.slane %v3215_v56, %v19107_v53 }
  0x95   : > { %v3781_v19 = vrot.slane %v3774_v48, %v19107_v53  ;;  %v3795_v61 = vrot.slane %v3788_v10, %v19107_v53  ;;  %v3830_v15 = vrot.slane %v3223_v38, %v19107_v53  ;;  %v4510_v22 = vunpack.c.l.b16 %v19362_v25 }
  0x96   : > { %v3809_v26 = vrot.slane %v3802_v37, %v19107_v53  ;;  %v4511_v17 = vunpack.c.l.b16 %v19365_v59  ;;  %v4512_v55 = vunpack.c.l.b16 %v19368_v24  ;;  %v3823_v8 = vrot.slane %v3816_v23, %v19107_v53  ;;  %18740 = vmatpush3.bf16.msra.mxu1 %v18877_v49 }
  0x97   : > { %v3837_v42 = vrot.slane %v3830_v15, %v19107_v53  ;;  %v4513_v27 = vunpack.c.l.b16 %v19373_v34  ;;  %v4514_v29 = vunpack.c.l.b16 %v19376_v35  ;;  %v4515_v18 = vunpack.c.l.b16 %v19380_v43  ;;  %18741 = vmatprep.subr.bf16.mxu1 %v18880_v0 }
  0x98   : > { %v4516_v25 = vunpack.c.l.b16 %v3711_v54  ;;  %v4517_v56 = vunpack.c.l.b16 %v3725_v7  ;;  %v4518_v59 = vunpack.c.l.b16 %v3739_v5  ;;  %v4519_v24 = vunpack.c.l.b16 %v3753_v12 }
  0x99   : > { %v4520_v58 = vunpack.c.l.b16 %v3767_v14  ;;  %v4521_v11 = vunpack.c.l.b16 %v3781_v19  ;;  %v4522_v32 = vunpack.c.l.b16 %v3795_v61  ;;  %v4523_v38 = vunpack.c.l.b16 %v3809_v26 }
  0x9a   : > { %v4524_v48 = vunpack.c.l.b16 %v3823_v8  ;;  %v4525_v34 = vunpack.c.l.b16 %v3837_v42  ;;  %v4574_v10 = vrot.slane %v4511_v17, 7  ;;  %v4576_v35 = vrot.slane %v4512_v55, 6  ;;  %18742 = vmatpush3.bf16.msra.mxu1 %v18881_v63 }
  0x9b   : > { %v4578_v49 = vrot.slane %v4513_v27, 5  ;;  %v4580_v37 = vrot.slane %v4514_v29, 4  ;;  %v4582_v23 = vrot.slane %v4515_v18, 3  ;;  %v4584_v43 = vrot.slane %v4516_v25, 2 }
  0x9c   : > { %v4575_v15 = vsel %vm2407_vm8, %v4574_v10, %v4510_v22  ;;  %v4586_v54 = vrot.slane %v4517_v56, 1  ;;  %v4588_v7 = vrot.slane %v4519_v24, 7  ;;  %v4590_v12 = vrot.slane %v4520_v58, 6 }
  0x9d   : > { %v4577_v5 = vsel %vm2410_vm11, %v4576_v35, %v4575_v15  ;;  %v4592_v14 = vrot.slane %v4521_v11, 5  ;;  %v4594_v0 = vrot.slane %v4522_v32, 4  ;;  %v4596_v26 = vrot.slane %v4523_v38, 3 }
  0x9e   : > { %v4579_v19 = vsel %vm2413_vm12, %v4578_v49, %v4577_v5  ;;  %v4589_v61 = vsel %vm2407_vm8, %v4588_v7, %v4518_v59  ;;  %v4598_v17 = vrot.slane %v4524_v48, 2  ;;  %v4600_v42 = vrot.slane %v4525_v34, 1 }
  0x9f   : > { %v4581_v55 = vsel %vm2416_vm13, %v4580_v37, %v4579_v19  ;;  %v4591_v8 = vsel %vm2410_vm11, %v4590_v12, %v4589_v61  ;;  %v1452_v22 = vrot.slane %v19210_v62, %v19107_v53  ;;  %v1466_v63 = vrot.slane %v19219_v36, %v19107_v53 }
  0xa0   : > { %v4583_v27 = vsel %vm2419_vm0, %v4582_v23, %v4581_v55  ;;  %v4593_v29 = vsel %vm2413_vm12, %v4592_v14, %v4591_v8  ;;  %v1480_v18 = vrot.slane %v19249_v47, %v19107_v53  ;;  %v1494_v24 = vrot.slane %v19253_v57, %v19107_v53 }
  0xa1   : > { %v4585_v25 = vsel %vm2422_vm2, %v4584_v43, %v4583_v27  ;;  %v4595_v56 = vsel %vm2416_vm13, %v4594_v0, %v4593_v29  ;;  %v1459_v59 = vrot.slane %v1452_v22, %v19107_v53  ;;  %v1473_v11 = vrot.slane %v1466_v63, %v19107_v53  ;;  %v18602_v27 = vld [vmem:[%s18972_s28 + $0x20] sm:$0xff]  }
  0xa2   : > { %v4587_v62 = vsel %vm2425_vm4, %v4586_v54, %v4585_v25  ;;  %v4597_v58 = vsel %vm2419_vm0, %v4596_v26, %v4595_v56  ;;  %v1487_v36 = vrot.slane %v1480_v18, %v19107_v53  ;;  %v1501_v47 = vrot.slane %v1494_v24, %v19107_v53  ;;  %v18604_v18 = vld [vmem:[%s18972_s28 + $0x30] sm:$0xff]   ;;  %v18884_v25 = vld [vmem:[%s23419_s4 + $0x1d8] sm:$0xff]  }
  0xa3   : > { %v4599_v32 = vsel %vm2422_vm2, %v4598_v17, %v4597_v58  ;;  %v1564_v38 = vrot.slane %v19497_v33, %v19107_v53  ;;  %v1578_v48 = vrot.slane %v19501_v51, %v19107_v53  ;;  %v1592_v34 = vrot.slane %v19507_v9, %v19107_v53  ;;  %18743 = vmatprep.subr.bf16.mxu1 %v18884_v25  ;;  %v18879_v25 = vld [vmem:[%s23419_s4 + $0x108] sm:$0xff]  }
  0xa4   : > { %v4601_v57 = vsel %vm2425_vm4, %v4600_v42, %v4599_v32  ;;  %v1606_v10 = vrot.slane %v19514_v6, %v19107_v53  ;;  %v2342_v35 = vunpack.c.l.b16 %v1459_v59  ;;  %v2343_v15 = vunpack.c.l.b16 %v1473_v11  ;;  %v18885_v59 = vld [vmem:[%s23419_s4 + $0x198] sm:$0xff]  }
  0xa5   : > { %v4686_v49 = vpack.c.b16 %v4601_v57, %v4587_v62  ;;  %v1571_v37 = vrot.slane %v1564_v38, %v19107_v53  ;;  %v1585_v23 = vrot.slane %v1578_v48, %v19107_v53  ;;  %v1599_v33 = vrot.slane %v1592_v34, %v19107_v53  ;;  %18744 = vmatpush3.bf16.msra.mxu1 %v18885_v59  ;;  %v18882_v59 = vld [vmem:[%s23419_s4 + $0x150] sm:$0xff]  }
  0xa6   : > { %v1613_v43 = vrot.slane %v1606_v10, %v19107_v53  ;;  %v2344_v51 = vunpack.c.l.b16 %v1487_v36  ;;  %v2345_v54 = vunpack.c.l.b16 %v1501_v47  ;;  %v2406_v5 = vrot.slane %v2343_v15, 7  ;;  %v18603_v10 = vld [vmem:[%s18972_s28 + $0x28] sm:$0xff]  }
  0xa7   : > { %17523 = vmatprep.mubr.bf16.mxu0 %v4686_v49  ;;  %v2350_v7 = vunpack.c.l.b16 %v1571_v37  ;;  %v2351_v9 = vunpack.c.l.b16 %v1585_v23  ;;  %v2415_v6 = vrot.slane %v6141_v31, 4  ;;  %v2352_v12 = vunpack.c.l.b16 %v1599_v33 }
  0xa8   : > { %v2353_v14 = vunpack.c.l.b16 %v1613_v43  ;;  %v2409_v0 = vrot.slane %v2344_v51, 6  ;;  %v2412_v19 = vrot.slane %v2345_v54, 5  ;;  %v2408_v61 = vsel %vm2407_vm8, %v2406_v5, %v2342_v35 }
  0xa9   : > { %v23495_v26 = vunpack.c.l.b16 %v19163_v21  ;;  %v23496_v55 = vunpack.c.l.b16 %v19181_v28  ;;  %v23497_v42 = vunpack.c.l.b16 %v19184_v30  ;;  %v2427_v20 = vrot.slane %v2351_v9, 7 }
  0xaa   : > { %v2411_v29 = vsel %vm2410_vm11, %v2409_v0, %v2408_v61  ;;  %v2429_v31 = vrot.slane %v2352_v12, 6  ;;  %v2431_v63 = vrot.slane %v2353_v14, 5  ;;  %v2433_v28 = vrot.slane %v6149_v39, 4 }
  0xab   : > { %v2418_v17 = vrot.slane %v23495_v26, 3  ;;  %v2421_v8 = vrot.slane %v23496_v55, 2  ;;  %v2424_v22 = vrot.slane %v23497_v42, 1  ;;  %v2414_v21 = vsel %vm2413_vm12, %v2412_v19, %v2411_v29  ;;  %v18878_v19 = vld [vmem:[%s23419_s4 + $0x148] sm:$0xff]  }
  0xac   : > { %v2435_v30 = vrot.slane %v6150_v40, 3  ;;  %v2437_v56 = vrot.slane %v6151_v45, 2  ;;  %v2417_v24 = vsel %vm2416_vm13, %v2415_v6, %v2414_v21  ;;  %v2428_v62 = vsel %vm2407_vm8, %v2427_v20, %v2350_v7  ;;  %v18601_v40 = vld [vmem:[%s18972_s28 + $0x18] sm:$0xff]   ;;  %v18875_v7 = vld [vmem:[%s23419_s4 + $0x100] sm:$0xff]  }
  0xad   : > { %v23498_v58 = vunpack.c.l.b16 %v19481_v41  ;;  %v18533_v36 = vunpack.c.l.bf16 %v18602_v27  ;;  %v2420_v4 = vsel %vm2419_vm0, %v2418_v17, %v2417_v24  ;;  %v2430_v13 = vsel %vm2410_vm11, %v2429_v31, %v2428_v62 }
  0xae   : > { %v18534_v1 = vunpack.c.h.bf16 %v18602_v27  ;;  %v18541_v39 = vunpack.c.l.bf16 %v18604_v18  ;;  %v2423_v45 = vsel %vm2422_vm2, %v2421_v8, %v2420_v4  ;;  %v2432_v32 = vsel %vm2413_vm12, %v2431_v63, %v2430_v13  ;;  %v946_v13 = vld [vmem:[#allocation2 + $0x3c] sm:$0xf] }
  0xaf   : > { %v2439_v11 = vrot.slane %v23498_v58, 1  ;;  %v18542_v47 = vunpack.c.h.bf16 %v18604_v18  ;;  %v399_v38 = vmul.f32 %v18533_v36, %v19205_v60  ;;  %v2426_v41 = vsel %vm2425_vm4, %v2424_v22, %v2423_v45 }
  0xb0   : > { %v2434_v48 = vsel %vm2416_vm13, %v2433_v28, %v2432_v32  ;;  %v400_v57 = vmul.f32 %v18534_v1, %v19205_v60  ;;  %v403_v34 = vmul.f32 %v18541_v39, %v19205_v60  ;;  %v18529_v23 = vunpack.c.l.bf16 %v18601_v40 }
  0xb1   : > { %v2436_v35 = vsel %vm2419_vm0, %v2435_v30, %v2434_v48  ;;  %v404_v49 = vmul.f32 %v18542_v47, %v19205_v60  ;;  %v437_v37 = vadd.f32 %v19244_v44, %v399_v38  ;;  %v18530_v51 = vunpack.c.h.bf16 %v18601_v40  ;;  %v960_v47 = vld [vmem:[#allocation2 + $0x54] sm:$0xf] }
  0xb2   : > { %v2438_v15 = vsel %vm2422_vm2, %v2437_v56, %v2436_v35  ;;  %v438_v33 = vadd.f32 %v19244_v44, %v400_v57  ;;  %v441_v43 = vadd.f32 %v19244_v44, %v403_v34  ;;  %v18537_v6 = vunpack.c.l.bf16 %v18603_v10  ;;  %v19709_v35 = vld [vmem:[%s18972_s28 + $0x40] sm:$0xff]  }
  0xb3   : > { %v2440_v54 = vsel %vm2425_vm4, %v2439_v11, %v2438_v15  ;;  %v442_v9 = vadd.f32 %v19244_v44, %v404_v49  ;;  %v469_v5 = vmax.f32 %v437_v37, 0.0  ;;  %v18538_v61 = vunpack.c.h.bf16 %v18603_v10 }
  0xb4   : > { %v2525_v12 = vpack.c.b16 %v2440_v54, %v2426_v41  ;;  %v470_v14 = vmax.f32 %v438_v33, 0.0  ;;  %v473_v0 = vmax.f32 %v441_v43, 0.0  ;;  %v397_v55 = vmul.f32 %v18529_v23, %v19205_v60  ;;  %v18883_v41 = vld [vmem:[%s23419_s4 + $0x110] sm:$0xff]  }
  0xb5   : > { %v474_v26 = vmax.f32 %v442_v9, 0.0  ;;  %v18483_v17 = vpack.c.bf16 %v469_v5, %v469_v5  ;;  %v398_v8 = vmul.f32 %v18530_v51, %v19205_v60  ;;  %v401_v27 = vmul.f32 %v18537_v6, %v19205_v60 }
  0xb6   : > { %17524 = vmatmul.mubr.bf16.vlgmr.msra.gmra.mrb[0].mxu0 %v2525_v12  ;;  %v18484_v42 = vpack.c.bf16 %v470_v14, %v470_v14  ;;  %v18487_v22 = vpack.c.bf16 %v473_v0, %v473_v0  ;;  %v402_v29 = vmul.f32 %v18538_v61, %v19205_v60  ;;  %v435_v18 = vadd.f32 %v19244_v44, %v397_v55  ;;  %v19722_v12 = vld [vmem:[%s18972_s28 + $0x50] sm:$0xff]  }
  0xb7   : > { %18698 = vmatpush3.bf16.msra.mxu0 %v18875_v7  ;;  %v18488_v20 = vpack.c.bf16 %v474_v26, %v474_v26  ;;  %v661_v31 = vshrl.u32 %v18483_v17, 16  ;;  %v664_v63 = vshll.u32 %v18483_v17, 16  ;;  %v436_v11 = vadd.f32 %v19244_v44, %v398_v8 }
  0xb8   : > { %v669_v21 = vshrl.u32 %v18484_v42, 16  ;;  %v672_v28 = vshll.u32 %v18484_v42, 16  ;;  %v695_v30 = vshrl.u32 %v18487_v22, 16  ;;  %v698_v56 = vshll.u32 %v18487_v22, 16  ;;  %18699 = vmatprep.subr.bf16.mxu0 %v18878_v19 }
  0xb9   : > { %v663_v24 = vrot.slane %v661_v31, 7  ;;  %v703_v62 = vshrl.u32 %v18488_v20, 16  ;;  %v706_v58 = vshll.u32 %v18488_v20, 16  ;;  %v439_v1 = vadd.f32 %v19244_v44, %v401_v27 }
  0xba   : > { %v19698_v36 = vrot.slane %v669_v21, 7  ;;  %v697_v4 = vrot.slane %v695_v30, 7  ;;  %v440_v39 = vadd.f32 %v19244_v44, %v402_v29  ;;  %v467_v38 = vmax.f32 %v435_v18, 0.0 }
  0xbb   : > { %v666_v40 = vor.u32 %v664_v63, %v663_v24  ;;  %v667_v45 = vrot.slane %v663_v24, 4  ;;  %v19702_v32 = vrot.slane %v703_v62, 7  ;;  %18700 = vmatpush3.bf16.msra.mxu0 %v18879_v25  ;;  %v468_v10 = vmax.f32 %v436_v11, 0.0  ;;  %v939_v63 = vld [vmem:[#allocation2 + $0x30] sm:$0xf] }
  0xbc   : > { %23499 = vst [vmem:[#allocation12_spill] sm:$0xff] %v19698_v36  ;;  %v674_v48 = vor.u32 %v672_v28, %v19698_v36  ;;  %v700_v57 = vor.u32 %v698_v56, %v697_v4  ;;  %v701_v34 = vrot.slane %v697_v4, 4  ;;  %18701 = vmatprep.subr.bf16.mxu0 %v18882_v59  ;;  %v471_v23 = vmax.f32 %v439_v1, 0.0  ;;  %v943_v59 = vld [vmem:[#allocation2 + $0x38] sm:$0x1] }
  0xbd   : > { %23500 = vst [vmem:[#allocation13_spill] sm:$0xff] %v19702_v32  ;;  %v708_v49 = vor.u32 %v706_v58, %v19702_v32  ;;  %v947_v37 = vsel %vm19298_vm3, %v666_v40, %v946_v13  ;;  %v472_v15 = vmax.f32 %v440_v39, 0.0  ;;  %v18481_v51 = vpack.c.bf16 %v467_v38, %v467_v38 }
  0xbe   : > { %v675_v33 = vsel %vm19288_vm15, %v667_v45, %v674_v48  ;;  %948 = vst [vmem:[#allocation2 + $0x3c] sm:$0xf] %v947_v37  ;;  %v961_v43 = vsel %vm19298_vm3, %v700_v57, %v960_v47  ;;  %v18482_v54 = vpack.c.bf16 %v468_v10, %v468_v10  ;;  %v18485_v9 = vpack.c.bf16 %v471_v23, %v471_v23 }
  0xbf   : > { %v709_v7 = vsel %vm19288_vm15, %v701_v34, %v708_v49  ;;  %949 = vst [vmem:[#allocation2 + $0x40] sm:$0xf] %v675_v33  ;;  %962 = vst [vmem:[#allocation2 + $0x54] sm:$0xf] %v961_v43  ;;  %v18486_v5 = vpack.c.bf16 %v472_v15, %v472_v15  ;;  %18702 = vmatpush3.bf16.msra.mxu0 %v18883_v41  ;;  %v18549_v6 = vunpack.c.l.bf16 %v19709_v35  ;;  %v644_v14 = vshrl.u32 %v18481_v51, 16 }
  0xc0   : > { %963 = vst [vmem:[#allocation2 + $0x58] sm:$0xf] %v709_v7  ;;  %v647_v0 = vshll.u32 %v18481_v51, 16  ;;  %v652_v19 = vshrl.u32 %v18482_v54, 16  ;;  %v655_v61 = vshll.u32 %v18482_v54, 16  ;;  %v678_v26 = vshrl.u32 %v18485_v9, 16 }
  0xc1   : > { %v681_v17 = vshll.u32 %v18485_v9, 16  ;;  %v686_v55 = vshrl.u32 %v18486_v5, 16  ;;  %v689_v8 = vshll.u32 %v18486_v5, 16  ;;  %v646_v42 = vrot.slane %v644_v14, 7 }
  0xc2   : > { %v654_v22 = vrot.slane %v652_v19, 7  ;;  %v680_v20 = vrot.slane %v678_v26, 7  ;;  %v19730_v25 = vmul.f32 %v18549_v6, %v19205_v60 }
  0xc3   : > { %v19726_v31 = vrot.slane %v686_v55, 7  ;;  %v649_v21 = vor.u32 %v647_v0, %v646_v42  ;;  %v650_v28 = vrot.slane %v646_v42, 4 }
  0xc4   : > { %v657_v30 = vor.u32 %v655_v61, %v654_v22  ;;  %v659_v56 = vrot.slane %v654_v22, 4  ;;  %v19732_v62 = vor.u32 %v681_v17, %v680_v20  ;;  %v684_v58 = vrot.slane %v680_v20, 4 }
  0xc5   : > { %v18139_v24 = vld.sshfl [vmem:[#allocation2 + $0x3c] sm:$0x33 pattern:$0x75316420]  ;;  %v691_v11 = vor.u32 %v689_v8, %v19726_v31  ;;  %v693_v4 = vrot.slane %v19726_v31, 4  ;;  %v940_v45 = vsel %vm19298_vm3, %v649_v21, %v939_v63 }
  0xc6   : > { %v18140_v13 = vld.sshfl [vmem:[#allocation2 + $0x40] sm:$0x33 pattern:$0x75316420]  ;;  %v6461_v1 = vcombine.high %v18139_v24, %v18139_v24  ;;  %v6468_v39 = vrot.slane %v18139_v24, %v19107_v53  ;;  %v658_v40 = vsel %vm19288_vm15, %v650_v28, %v657_v30  ;;  %941 = vst [vmem:[#allocation2 + $0x30] sm:$0xf] %v940_v45  ;;  %v944_v57 = vsel %vm19310_vm5, %v659_v56, %v943_v59 }
  0xc7   : > { %v18141_v47 = vld.sshfl [vmem:[#allocation2 + $0x54] sm:$0x33 pattern:$0x75316420]  ;;  %v6485_v38 = vcombine.high %v18140_v13, %v18140_v13  ;;  %v6492_v41 = vrot.slane %v18140_v13, %v19107_v53  ;;  %v692_v48 = vsel %vm19288_vm15, %v684_v58, %v691_v11  ;;  %942 = vst [vmem:[#allocation2 + $0x34] sm:$0xf] %v658_v40 }
  0xc8   : > { %v18142_v34 = vld.sshfl [vmem:[#allocation2 + $0x58] sm:$0x33 pattern:$0x75316420]  ;;  %v6475_v10 = vrot.slane %v6461_v1, %v19107_v53  ;;  %v6476_v49 = vcombine.high %v6468_v39, %v6468_v39  ;;  %v6509_v37 = vcombine.high %v18141_v47, %v18141_v47  ;;  %v6516_v23 = vrot.slane %v18141_v47, %v19107_v53  ;;  %945 = vst [vmem:[#allocation2 + $0x38] sm:$0x1] %v944_v57 }
  0xc9   : > { %956 = vst [vmem:[#allocation2 + $0x4c] sm:$0xf] %v692_v48  ;;  %v6499_v15 = vrot.slane %v6485_v38, %v19107_v53  ;;  %v6500_v33 = vcombine.high %v6492_v41, %v6492_v41  ;;  %v6533_v43 = vcombine.high %v18142_v34, %v18142_v34  ;;  %v6540_v51 = vrot.slane %v18142_v34, %v19107_v53 }
  0xca   : > { %v6477_v54 = vcombine.high %v6475_v10, %v6475_v10  ;;  %v6523_v7 = vrot.slane %v6509_v37, %v19107_v53  ;;  %v6524_v9 = vcombine.high %v6516_v23, %v6516_v23  ;;  %v6972_v5 = vrot.slane %v6468_v39, %v19107_v53 }
  0xcb   : > { %v6501_v6 = vcombine.high %v6499_v15, %v6499_v15  ;;  %v6547_v14 = vrot.slane %v6533_v43, %v19107_v53  ;;  %v6548_v0 = vcombine.high %v6540_v51, %v6540_v51  ;;  %v6986_v19 = vrot.slane %v6475_v10, %v19107_v53 }
  0xcc   : > { %v6525_v61 = vcombine.high %v6523_v7, %v6523_v7  ;;  %v6979_v26 = vrot.slane %v6972_v5, %v19107_v53  ;;  %v7000_v17 = vrot.slane %v6476_v49, %v19107_v53  ;;  %v7014_v55 = vrot.slane %v6477_v54, %v19107_v53 }
  0xcd   : > { %v6549_v8 = vcombine.high %v6547_v14, %v6547_v14  ;;  %v6993_v42 = vrot.slane %v6986_v19, %v19107_v53  ;;  %v7028_v22 = vrot.slane %v6492_v41, %v19107_v53  ;;  %v7042_v20 = vrot.slane %v6499_v15, %v19107_v53 }
  0xce   : > { %v7007_v63 = vrot.slane %v7000_v17, %v19107_v53  ;;  %v7021_v21 = vrot.slane %v7014_v55, %v19107_v53  ;;  %v7056_v28 = vrot.slane %v6500_v33, %v19107_v53  ;;  %v7070_v30 = vrot.slane %v6501_v6, %v19107_v53 }
  0xcf   : > { %v7035_v56 = vrot.slane %v7028_v22, %v19107_v53  ;;  %v7049_v59 = vrot.slane %v7042_v20, %v19107_v53  ;;  %v7084_v24 = vrot.slane %v6516_v23, %v19107_v53  ;;  %v7098_v58 = vrot.slane %v6523_v7, %v19107_v53 }
  0xd0   : > { %v7063_v11 = vrot.slane %v7056_v28, %v19107_v53  ;;  %v7077_v13 = vrot.slane %v7070_v30, %v19107_v53  ;;  %v7112_v1 = vrot.slane %v6524_v9, %v19107_v53  ;;  %v7126_v39 = vrot.slane %v6525_v61, %v19107_v53  ;;  %v18117_v28 = vld.sshfl [vmem:[#allocation2 + $0x30] sm:$0x32 pattern:$0x75316420] }
  0xd1   : > { %v7091_v40 = vrot.slane %v7084_v24, %v19107_v53  ;;  %v7105_v45 = vrot.slane %v7098_v58, %v19107_v53  ;;  %v7140_v47 = vrot.slane %v6540_v51, %v19107_v53  ;;  %v7154_v38 = vrot.slane %v6547_v14, %v19107_v53  ;;  %v953_v24 = vld [vmem:[#allocation2 + $0x48] sm:$0xf] }
  0xd2   : > { %v7119_v41 = vrot.slane %v7112_v1, %v19107_v53  ;;  %v7133_v48 = vrot.slane %v7126_v39, %v19107_v53  ;;  %v7168_v57 = vrot.slane %v6548_v0, %v19107_v53  ;;  %v7182_v34 = vrot.slane %v6549_v8, %v19107_v53  ;;  %v957_v39 = vld [vmem:[#allocation2 + $0x50] sm:$0x1] }
  0xd3   : > { %v7147_v10 = vrot.slane %v7140_v47, %v19107_v53  ;;  %v7161_v49 = vrot.slane %v7154_v38, %v19107_v53  ;;  %v7654_v37 = vunpack.c.l.b16 %v6979_v26  ;;  %v7655_v23 = vunpack.c.l.b16 %v6993_v42 }
  0xd4   : > { %v7175_v15 = vrot.slane %v7168_v57, %v19107_v53  ;;  %v7189_v33 = vrot.slane %v7182_v34, %v19107_v53  ;;  %v7656_v43 = vunpack.c.l.b16 %v7007_v63  ;;  %v7657_v51 = vunpack.c.l.b16 %v7021_v21  ;;  %v18886_v63 = vld [vmem:[%s23419_s4 + $0x158] sm:$0xff]  }
  0xd5   : > { %v7658_v54 = vunpack.c.l.b16 %v7035_v56  ;;  %v7659_v7 = vunpack.c.l.b16 %v7049_v59  ;;  %v7660_v9 = vunpack.c.l.b16 %v7063_v11  ;;  %v7661_v5 = vunpack.c.l.b16 %v7077_v13  ;;  %18703 = vmatprep.subr.bf16.mxu0 %v18886_v63 }
  0xd6   : > { %v7662_v6 = vunpack.c.l.b16 %v7091_v40  ;;  %v7663_v14 = vunpack.c.l.b16 %v7105_v45  ;;  %v7664_v0 = vunpack.c.l.b16 %v7119_v41  ;;  %v7665_v19 = vunpack.c.l.b16 %v7133_v48  ;;  %v18118_v41 = vld.sshfl [vmem:[#allocation2 + $0x34] sm:$0x33 pattern:$0x75316420] }
  0xd7   : > { %v7666_v61 = vunpack.c.l.b16 %v7147_v10  ;;  %v7667_v17 = vunpack.c.l.b16 %v7161_v49  ;;  %v7668_v55 = vunpack.c.l.b16 %v7175_v15  ;;  %v7669_v8 = vunpack.c.l.b16 %v7189_v33 }
  0xd8   : > { %v7730_v26 = vrot.slane %v7655_v23, 7  ;;  %v7732_v42 = vrot.slane %v7656_v43, 6  ;;  %v7734_v22 = vrot.slane %v7657_v51, 5  ;;  %v7736_v20 = vrot.slane %v7658_v54, 4 }
  0xd9   : > { %v7738_v21 = vrot.slane %v7659_v7, 3  ;;  %v7740_v30 = vrot.slane %v7660_v9, 2  ;;  %v7742_v56 = vrot.slane %v7661_v5, 1  ;;  %v7744_v59 = vrot.slane %v7663_v14, 7 }
  0xda   : > { %v7731_v58 = vsel %vm2407_vm8, %v7730_v26, %v7654_v37  ;;  %v7746_v11 = vrot.slane %v7664_v0, 6  ;;  %v7748_v13 = vrot.slane %v7665_v19, 5  ;;  %v7750_v1 = vrot.slane %v7666_v61, 4 }
  0xdb   : > { %v7733_v40 = vsel %vm2410_vm11, %v7732_v42, %v7731_v58  ;;  %v7745_v45 = vsel %vm2407_vm8, %v7744_v59, %v7662_v6  ;;  %v7752_v47 = vrot.slane %v7667_v17, 3  ;;  %v7754_v38 = vrot.slane %v7668_v55, 2  ;;  %v18119_v51 = vld.sshfl [vmem:[#allocation2 + $0x38] sm:$0x1 pattern:$0x75316420] }
  0xdc   : > { %v7735_v48 = vsel %vm2413_vm12, %v7734_v22, %v7733_v40  ;;  %v7747_v57 = vsel %vm2410_vm11, %v7746_v11, %v7745_v45  ;;  %v7756_v34 = vrot.slane %v7669_v8, 1  ;;  %v954_v10 = vsel %vm19298_vm3, %v19732_v62, %v953_v24  ;;  %v18121_v5 = vld.sshfl [vmem:[#allocation2 + $0x4c] sm:$0x33 pattern:$0x75316420] }
  0xdd   : > { %v7737_v49 = vsel %vm2416_vm13, %v7736_v20, %v7735_v48  ;;  %v7749_v37 = vsel %vm2413_vm12, %v7748_v13, %v7747_v57  ;;  %955 = vst [vmem:[#allocation2 + $0x48] sm:$0xf] %v954_v10  ;;  %v958_v23 = vsel %vm19310_vm5, %v693_v4, %v957_v39  ;;  %v4877_v15 = vcombine.high %v18117_v28, %v18117_v28 }
  0xde   : > { %v7739_v33 = vsel %vm2419_vm0, %v7738_v21, %v7737_v49  ;;  %v7751_v43 = vsel %vm2416_vm13, %v7750_v1, %v7749_v37  ;;  %959 = vst [vmem:[#allocation2 + $0x50] sm:$0x1] %v958_v23  ;;  %v4884_v54 = vrot.slane %v18117_v28, %v19107_v53  ;;  %v4901_v62 = vcombine.high %v18118_v41, %v18118_v41 }
  0xdf   : > { %v7741_v7 = vsel %vm2422_vm2, %v7740_v30, %v7739_v33  ;;  %v7753_v9 = vsel %vm2419_vm0, %v7752_v47, %v7751_v43  ;;  %v4891_v31 = vrot.slane %v4877_v15, %v19107_v53  ;;  %v19808_v6 = vrot.slane %v18118_v41, %v19107_v53 }
  0xe0   : > { %v7743_v4 = vsel %vm2425_vm4, %v7742_v56, %v7741_v7  ;;  %v7755_v14 = vsel %vm2422_vm2, %v7754_v38, %v7753_v9  ;;  %v4892_v0 = vcombine.high %v4884_v54, %v4884_v54  ;;  %v19813_v19 = vrot.slane %v4901_v62, %v19107_v53 }
  0xe1   : > { %v7757_v61 = vsel %vm2425_vm4, %v7756_v34, %v7755_v14  ;;  %v4893_v17 = vcombine.high %v4891_v31, %v4891_v31  ;;  %v19818_v55 = vcombine.high %v19808_v6, %v19808_v6  ;;  %v19821_v8 = vrot.slane %v18119_v51, %v19107_v53 }
  0xe2   : > { %v7815_v26 = vpack.c.b16 %v7757_v61, %v7743_v4  ;;  %v19825_v42 = vcombine.high %v19813_v19, %v19813_v19  ;;  %v4963_v22 = vcombine.high %v18121_v5, %v18121_v5  ;;  %v19828_v20 = vrot.slane %v18121_v5, %v19107_v53 }
  0xe3   : > { %v5472_v28 = vrot.slane %v4891_v31, %v19107_v53  ;;  %v5486_v63 = vrot.slane %v4892_v0, %v19107_v53  ;;  %v5500_v21 = vrot.slane %v4893_v17, %v19107_v53  ;;  %v5514_v30 = vrot.slane %v19808_v6, %v19107_v53 }
  0xe4   : > { %17596 = vmatprep.mubr.bf16.mxu1 %v7815_v26  ;;  %v18120_v56 = vld.sshfl [vmem:[#allocation2 + $0x48] sm:$0x32 pattern:$0x75316420]  ;;  %v19836_v59 = vrot.slane %v4963_v22, %v19107_v53  ;;  %v19840_v24 = vcombine.high %v19828_v20, %v19828_v20  ;;  %v5528_v58 = vrot.slane %v19813_v19, %v19107_v53  ;;  %v5542_v11 = vrot.slane %v19818_v55, %v19107_v53 }
  0xe5   : > { %v18122_v13 = vld.sshfl [vmem:[#allocation2 + $0x50] sm:$0x1 pattern:$0x75316420]  ;;  %v4939_v1 = vcombine.high %v18120_v56, %v18120_v56  ;;  %v4946_v39 = vrot.slane %v18120_v56, %v19107_v53  ;;  %v5479_v40 = vrot.slane %v5472_v28, %v19107_v53  ;;  %v5493_v45 = vrot.slane %v5486_v63, %v19107_v53 }
  0xe6   : > { %v19851_v47 = vcombine.high %v19836_v59, %v19836_v59  ;;  %v19854_v38 = vrot.slane %v18122_v13, %v19107_v53  ;;  %v5507_v41 = vrot.slane %v5500_v21, %v19107_v53  ;;  %v19858_v48 = vrot.slane %v5514_v30, %v19107_v53 }
  0xe7   : > { %v4953_v57 = vrot.slane %v4939_v1, %v19107_v53  ;;  %v4954_v34 = vcombine.high %v4946_v39, %v4946_v39  ;;  %v19862_v10 = vrot.slane %v5528_v58, %v19107_v53  ;;  %v19865_v49 = vrot.slane %v5542_v11, %v19107_v53 }
  0xe8   : > { %v5556_v37 = vrot.slane %v19825_v42, %v19107_v53  ;;  %v5570_v23 = vrot.slane %v19821_v8, %v19107_v53  ;;  %v5626_v15 = vrot.slane %v19828_v20, %v19107_v53  ;;  %v5640_v33 = vrot.slane %v19836_v59, %v19107_v53 }
  0xe9   : > { %v4955_v43 = vcombine.high %v4953_v57, %v4953_v57  ;;  %v5584_v51 = vrot.slane %v4953_v57, %v19107_v53  ;;  %v5598_v54 = vrot.slane %v4954_v34, %v19107_v53  ;;  %v5654_v62 = vrot.slane %v19840_v24, %v19107_v53 }
  0xea   : > { %v19880_v7 = vrot.slane %v5556_v37, %v19107_v53  ;;  %v5577_v9 = vrot.slane %v5570_v23, %v19107_v53  ;;  %v19884_v5 = vrot.slane %v5626_v15, %v19107_v53  ;;  %v19887_v31 = vrot.slane %v5640_v33, %v19107_v53  ;;  %v18029_v15 = vld.sshfl [vmem:[#allocation2 + $0x30] sm:$0x33 pattern:$0x75316420] }
  0xeb   : > { %v5591_v4 = vrot.slane %v5584_v51, %v19107_v53  ;;  %v5605_v14 = vrot.slane %v5598_v54, %v19107_v53  ;;  %v5612_v0 = vrot.slane %v4955_v43, %v19107_v53  ;;  %v19893_v61 = vrot.slane %v5654_v62, %v19107_v53  ;;  %v18032_v62 = vld.sshfl [vmem:[#allocation2 + $0x48] sm:$0x33 pattern:$0x75316420] }
  0xec   : > { %v5668_v17 = vrot.slane %v19851_v47, %v19107_v53  ;;  %v5682_v26 = vrot.slane %v19854_v38, %v19107_v53  ;;  %v6154_v22 = vunpack.c.l.b16 %v5479_v40  ;;  %v6155_v28 = vunpack.c.l.b16 %v5493_v45 }
  0xed   : > { %v5619_v63 = vrot.slane %v5612_v0, %v19107_v53  ;;  %v6156_v21 = vunpack.c.l.b16 %v5507_v41  ;;  %v23433_v30 = vunpack.c.l.b16 %v19858_v48  ;;  %v23432_v56 = vunpack.c.l.b16 %v19862_v10 }
  0xee   : > { %v19903_v58 = vrot.slane %v5668_v17, %v19107_v53  ;;  %v5689_v11 = vrot.slane %v5682_v26, %v19107_v53  ;;  %v23431_v13 = vunpack.c.l.b16 %v19865_v49  ;;  %v23430_v1 = vunpack.c.l.b16 %v19880_v7 }
  0xef   : > { %v6161_v39 = vunpack.c.l.b16 %v5577_v9  ;;  %v6162_v57 = vunpack.c.l.b16 %v5591_v4  ;;  %v6163_v40 = vunpack.c.l.b16 %v5605_v14  ;;  %v6164_v45 = vunpack.c.l.b16 %v5619_v63 }
  0xf0   : > { %v23429_v34 = vunpack.c.l.b16 %v19884_v5  ;;  %v23426_v41 = vunpack.c.l.b16 %v19887_v31  ;;  %v23427_v37 = vunpack.c.l.b16 %v19893_v61  ;;  %v23428_v23 = vunpack.c.l.b16 %v19903_v58 }
  0xf1   : > { %v6169_v33 = vunpack.c.l.b16 %v5689_v11  ;;  %v6230_v43 = vrot.slane %v6155_v28, 7  ;;  %v6232_v51 = vrot.slane %v6156_v21, 6  ;;  %v6234_v54 = vrot.slane %v23433_v30, 5 }
  0xf2   : > { %v6236_v9 = vrot.slane %v23432_v56, 4  ;;  %v6238_v4 = vrot.slane %v23431_v13, 3  ;;  %v6240_v14 = vrot.slane %v23430_v1, 2  ;;  %v6242_v0 = vrot.slane %v6161_v39, 1 }
  0xf3   : > { %v6231_v17 = vsel %vm2407_vm8, %v6230_v43, %v6154_v22  ;;  %v6244_v26 = vrot.slane %v6163_v40, 7  ;;  %v6246_v63 = vrot.slane %v6164_v45, 6  ;;  %v6248_v28 = vrot.slane %v23429_v34, 5 }
  0xf4   : > { %v6233_v21 = vsel %vm2410_vm11, %v6232_v51, %v6231_v17  ;;  %v6250_v11 = vrot.slane %v23426_v41, 4  ;;  %v6252_v18 = vrot.slane %v23427_v37, 3  ;;  %v6254_v29 = vrot.slane %v23428_v23, 2 }
  0xf5   : > { %v6235_v39 = vsel %vm2413_vm12, %v6234_v54, %v6233_v21  ;;  %v6245_v22 = vsel %vm2407_vm8, %v6244_v26, %v6162_v57  ;;  %v6256_v40 = vrot.slane %v6169_v33, 1  ;;  %v2716_v45 = vcombine.high %v18029_v15, %v18029_v15  ;;  %v18889_v26 = vld [vmem:[%s23419_s4 + $0x1a0] sm:$0xff]  }
  0xf6   : > { %v6237_v43 = vsel %vm2416_vm13, %v6236_v9, %v6235_v39  ;;  %v6247_v27 = vsel %vm2410_vm11, %v6246_v63, %v6245_v22  ;;  %v19935_v51 = vrot.slane %v18029_v15, %v19107_v53  ;;  %v2778_v17 = vcombine.high %v18032_v62, %v18032_v62 }
  0xf7   : > { %v6239_v41 = vsel %vm2419_vm0, %v6238_v4, %v6237_v43  ;;  %v6249_v37 = vsel %vm2413_vm12, %v6248_v28, %v6247_v27  ;;  %v19940_v23 = vrot.slane %v2716_v45, %v19107_v53  ;;  %v19943_v54 = vrot.slane %v18032_v62, %v19107_v53  ;;  %v18888_v27 = vld [vmem:[%s23419_s4 + $0x1e0] sm:$0xff]  }
  0xf8   : > { %v6241_v57 = vsel %vm2422_vm2, %v6240_v14, %v6239_v41  ;;  %v6251_v33 = vsel %vm2416_vm13, %v6250_v11, %v6249_v37  ;;  %v19949_v9 = vcombine.high %v19935_v51, %v19935_v51  ;;  %v19952_v15 = vrot.slane %v2778_v17, %v19107_v53  ;;  %v18887_v14 = vld [vmem:[%s23419_s4 + $0x118] sm:$0xff]   ;;  %18745 = vmatprep.subr.bf16.mxu1 %v18888_v27 }
  0xf9   : > { %v6243_v4 = vsel %vm2425_vm4, %v6242_v0, %v6241_v57  ;;  %v6253_v62 = vsel %vm2419_vm0, %v6252_v18, %v6251_v33  ;;  %v19961_v41 = vcombine.high %v19940_v23, %v19940_v23  ;;  %v19965_v37 = vcombine.high %v19943_v54, %v19943_v54  ;;  %18704 = vmatpush3.bf16.msra.mxu0 %v18887_v14 }
  0xfa   : > { %v6255_v0 = vsel %vm2422_vm2, %v6254_v29, %v6253_v62  ;;  %v19976_v18 = vcombine.high %v19952_v15, %v19952_v15  ;;  %v3225_v63 = vshrl.u32 %v19935_v51, 16  ;;  %v3230_v28 = vshll.u32 %v19940_v23, 16  ;;  %18746 = vmatpush3.bf16.msra.mxu1 %v18889_v26 }
  0xfb   : > { %v6257_v21 = vsel %vm2425_vm4, %v6256_v40, %v6255_v0  ;;  %v3233_v11 = vshrl.u32 %v19940_v23, 16  ;;  %v3238_v39 = vshll.u32 %v19949_v9, 16  ;;  %v3241_v22 = vshrl.u32 %v19949_v9, 16 }
  0xfc   : > { %v6315_v29 = vpack.c.b16 %v6257_v21, %v6243_v4  ;;  %v3232_v45 = vsel %vm19258_vm10, %v3225_v63, %v3230_v28  ;;  %v3246_v43 = vshll.u32 %v19961_v41, 16  ;;  %v3249_v17 = vshrl.u32 %v19961_v41, 16 }
  0xfd   : > { %v3240_v57 = vsel %vm19258_vm10, %v3233_v11, %v3238_v39  ;;  %v3254_v40 = vshll.u32 %v19808_v6, 16  ;;  %v3257_v33 = vshrl.u32 %v19808_v6, 16  ;;  %v3262_v27 = vshll.u32 %v19813_v19, 16 }
  0xfe   : > { %17597 = vmatmul.mubr.bf16.gmra.mrb[4].mxu1 %v6315_v29  ;;  %v3248_v4 = vsel %vm19258_vm10, %v3241_v22, %v3246_v43  ;;  %v3265_v62 = vshrl.u32 %v19813_v19, 16  ;;  %v3270_v14 = vshll.u32 %v19818_v55, 16  ;;  %v3273_v26 = vshrl.u32 %v19818_v55, 16 }
  0xff   : > { %v3256_v0 = vsel %vm19258_vm10, %v3249_v17, %v3254_v40  ;;  %v3264_v63 = vsel %vm19258_vm10, %v3257_v33, %v3262_v27  ;;  %v3278_v6 = vshll.u32 %v19825_v42, 16  ;;  %v3281_v28 = vshrl.u32 %v19825_v42, 16 }
 0x100   : > { %v3272_v21 = vsel %vm19258_vm10, %v3265_v62, %v3270_v14  ;;  %v3286_v11 = vshll.u32 %v19821_v8, 16  ;;  %v3290_v19 = vshrl.u32 %v19943_v54, 16  ;;  %v3295_v39 = vshll.u32 %v19952_v15, 16 }
 0x101   : > { %v3280_v55 = vsel %vm19258_vm10, %v3273_v26, %v3278_v6  ;;  %v3298_v22 = vshrl.u32 %v19952_v15, 16  ;;  %v3303_v29 = vshll.u32 %v19965_v37, 16  ;;  %v3306_v43 = vshrl.u32 %v19965_v37, 16 }
 0x102   : > { %v3288_v42 = vsel %vm19258_vm10, %v3281_v28, %v3286_v11  ;;  %v3297_v17 = vsel %vm19258_vm10, %v3290_v19, %v3295_v39  ;;  %v3311_v8 = vshll.u32 %v19976_v18, 16  ;;  %v3314_v40 = vshrl.u32 %v19976_v18, 16 }
 0x103   : > { %v3305_v33 = vsel %vm19258_vm10, %v3298_v22, %v3303_v29  ;;  %v3319_v27 = vshll.u32 %v19828_v20, 16  ;;  %v3322_v62 = vshrl.u32 %v19828_v20, 16  ;;  %v3327_v14 = vshll.u32 %v19836_v59, 16 }
 0x104   : > { %v3313_v26 = vsel %vm19258_vm10, %v3306_v43, %v3311_v8  ;;  %v3330_v6 = vshrl.u32 %v19836_v59, 16  ;;  %v3335_v28 = vshll.u32 %v19840_v24, 16  ;;  %v3338_v11 = vshrl.u32 %v19840_v24, 16 }
 0x105   : > { %v3321_v19 = vsel %vm19258_vm10, %v3314_v40, %v3319_v27  ;;  %v3329_v39 = vsel %vm19258_vm10, %v3322_v62, %v3327_v14  ;;  %v3343_v22 = vshll.u32 %v19851_v47, 16  ;;  %v3346_v20 = vshrl.u32 %v19851_v47, 16 }
 0x106   : > { %v3337_v29 = vsel %vm19258_vm10, %v3330_v6, %v3335_v28  ;;  %v3351_v43 = vshll.u32 %v19854_v38, 16  ;;  %v3844_v59 = vrot.slane %v3232_v45, %v19107_v53  ;;  %v3858_v8 = vrot.slane %v3240_v57, %v19107_v53 }
 0x107   : > { %v3345_v24 = vsel %vm19258_vm10, %v3338_v11, %v3343_v22  ;;  %v3872_v40 = vrot.slane %v3248_v4, %v19107_v53  ;;  %v3886_v27 = vrot.slane %v3256_v0, %v19107_v53  ;;  %v3900_v62 = vrot.slane %v3264_v63, %v19107_v53 }
 0x108   : > { %v3353_v47 = vsel %vm19258_vm10, %v3346_v20, %v3351_v43  ;;  %v3851_v14 = vrot.slane %v3844_v59, %v19107_v53  ;;  %v3865_v38 = vrot.slane %v3858_v8, %v19107_v53  ;;  %v3914_v45 = vrot.slane %v3272_v21, %v19107_v53 }
 0x109   : > { %v3879_v57 = vrot.slane %v3872_v40, %v19107_v53  ;;  %v3893_v6 = vrot.slane %v3886_v27, %v19107_v53  ;;  %v3907_v28 = vrot.slane %v3900_v62, %v19107_v53  ;;  %v3928_v4 = vrot.slane %v3280_v55, %v19107_v53 }
 0x10a   : > { %v3921_v0 = vrot.slane %v3914_v45, %v19107_v53  ;;  %v3942_v63 = vrot.slane %v3288_v42, %v19107_v53  ;;  %v3956_v11 = vrot.slane %v3297_v17, %v19107_v53  ;;  %v3970_v22 = vrot.slane %v3305_v33, %v19107_v53 }
 0x10b   : > { %v3935_v20 = vrot.slane %v3928_v4, %v19107_v53  ;;  %v3984_v21 = vrot.slane %v3313_v26, %v19107_v53  ;;  %v3998_v43 = vrot.slane %v3321_v19, %v19107_v53  ;;  %v4012_v59 = vrot.slane %v3329_v39, %v19107_v53 }
 0x10c   : > { %v3949_v8 = vrot.slane %v3942_v63, %v19107_v53  ;;  %v3963_v55 = vrot.slane %v3956_v11, %v19107_v53  ;;  %v3977_v40 = vrot.slane %v3970_v22, %v19107_v53  ;;  %v4026_v42 = vrot.slane %v3337_v29, %v19107_v53 }
 0x10d   : > { %v3991_v17 = vrot.slane %v3984_v21, %v19107_v53  ;;  %v4005_v33 = vrot.slane %v3998_v43, %v19107_v53  ;;  %v4019_v27 = vrot.slane %v4012_v59, %v19107_v53  ;;  %v4040_v26 = vrot.slane %v3345_v24, %v19107_v53 }
 0x10e   : > { %v4033_v19 = vrot.slane %v4026_v42, %v19107_v53  ;;  %v4054_v39 = vrot.slane %v3353_v47, %v19107_v53  ;;  %v4526_v62 = vunpack.c.l.b16 %v3851_v14  ;;  %v4527_v45 = vunpack.c.l.b16 %v3865_v38 }
 0x10f   : > { %v4047_v4 = vrot.slane %v4040_v26, %v19107_v53  ;;  %v4528_v63 = vunpack.c.l.b16 %v3879_v57  ;;  %v4529_v11 = vunpack.c.l.b16 %v3893_v6  ;;  %v4530_v22 = vunpack.c.l.b16 %v3907_v28 }
 0x110   : > { %v4061_v29 = vrot.slane %v4054_v39, %v19107_v53  ;;  %v4531_v21 = vunpack.c.l.b16 %v3921_v0  ;;  %v4532_v34 = vunpack.c.l.b16 %v3935_v20  ;;  %v4533_v43 = vunpack.c.l.b16 %v3949_v8 }
 0x111   : > { %v4534_v1 = vunpack.c.l.b16 %v3963_v55  ;;  %v4535_v59 = vunpack.c.l.b16 %v3977_v40  ;;  %v4536_v13 = vunpack.c.l.b16 %v3991_v17  ;;  %v4537_v24 = vunpack.c.l.b16 %v4005_v33 }
 0x112   : > { %v4538_v56 = vunpack.c.l.b16 %v4019_v27  ;;  %v4539_v42 = vunpack.c.l.b16 %v4033_v19  ;;  %v4540_v30 = vunpack.c.l.b16 %v4047_v4  ;;  %v4541_v47 = vunpack.c.l.b16 %v4061_v29 }
 0x113   : > { %v4602_v14 = vrot.slane %v4527_v45, 7  ;;  %v4604_v38 = vrot.slane %v4528_v63, 6  ;;  %v4606_v32 = vrot.slane %v4529_v11, 5  ;;  %v4608_v26 = vrot.slane %v4530_v22, 4 }
 0x114   : > { %v4610_v57 = vrot.slane %v4531_v21, 3  ;;  %v4612_v6 = vrot.slane %v4532_v34, 2  ;;  %v4614_v28 = vrot.slane %v4533_v43, 1  ;;  %v4616_v36 = vrot.slane %v4535_v59, 7 }
 0x115   : > { %v4603_v0 = vsel %vm2407_vm8, %v4602_v14, %v4526_v62  ;;  %v4618_v20 = vrot.slane %v4536_v13, 6  ;;  %v4620_v8 = vrot.slane %v4537_v24, 5  ;;  %v4622_v55 = vrot.slane %v4538_v56, 4 }
 0x116   : > { %v4605_v40 = vsel %vm2410_vm11, %v4604_v38, %v4603_v0  ;;  %v4617_v17 = vsel %vm2407_vm8, %v4616_v36, %v4534_v1  ;;  %v4624_v33 = vrot.slane %v4539_v42, 3  ;;  %v4626_v27 = vrot.slane %v4540_v30, 2 }
 0x117   : > { %v4607_v19 = vsel %vm2413_vm12, %v4606_v32, %v4605_v40  ;;  %v4619_v39 = vsel %vm2410_vm11, %v4618_v20, %v4617_v17  ;;  %v4628_v45 = vrot.slane %v4541_v47, 1  ;;  %v1676_v34 = vrot.slane %v19935_v51, %v19107_v53 }
 0x118   : > { %v4609_v4 = vsel %vm2416_vm13, %v4608_v26, %v4607_v19  ;;  %v4621_v13 = vsel %vm2413_vm12, %v4620_v8, %v4619_v39  ;;  %v1690_v56 = vrot.slane %v19940_v23, %v19107_v53  ;;  %v1704_v36 = vrot.slane %v19949_v9, %v19107_v53  ;;  %v18890_v9 = vld [vmem:[%s23419_s4 + $0x160] sm:$0xff]  }
 0x119   : > { %v4611_v30 = vsel %vm2419_vm0, %v4610_v57, %v4609_v4  ;;  %v4623_v32 = vsel %vm2416_vm13, %v4622_v55, %v4621_v13  ;;  %v1683_v1 = vrot.slane %v1676_v34, %v19107_v53  ;;  %v1718_v62 = vrot.slane %v19961_v41, %v19107_v53  ;;  %18705 = vmatprep.subr.bf16.mxu0 %v18890_v9 }
 0x11a   : > { %v4613_v51 = vsel %vm2422_vm2, %v4612_v6, %v4611_v30  ;;  %v4625_v63 = vsel %vm2419_vm0, %v4624_v33, %v4623_v32  ;;  %v1697_v11 = vrot.slane %v1690_v56, %v19107_v53  ;;  %v1711_v23 = vrot.slane %v1704_v36, %v19107_v53 }
 0x11b   : > { %v4615_v22 = vsel %vm2425_vm4, %v4614_v28, %v4613_v51  ;;  %v4627_v29 = vsel %vm2422_vm2, %v4626_v27, %v4625_v63  ;;  %v1725_v21 = vrot.slane %v1718_v62, %v19107_v53  ;;  %v1788_v41 = vrot.slane %v19943_v54, %v19107_v53 }
 0x11c   : > { %v4629_v43 = vsel %vm2425_vm4, %v4628_v45, %v4627_v29  ;;  %v1802_v59 = vrot.slane %v19952_v15, %v19107_v53  ;;  %v1816_v24 = vrot.slane %v19965_v37, %v19107_v53  ;;  %v1830_v42 = vrot.slane %v19976_v18, %v19107_v53 }
 0x11d   : > { %v4687_v47 = vpack.c.b16 %v4629_v43, %v4615_v22  ;;  %v1795_v14 = vrot.slane %v1788_v41, %v19107_v53  ;;  %v2358_v38 = vunpack.c.l.b16 %v1683_v1  ;;  %v2359_v26 = vunpack.c.l.b16 %v1697_v11  ;;  %v18605_v43 = vld [vmem:[%s18972_s28 + $0x38] sm:$0xff]  }
 0x11e   : > { %v1809_v57 = vrot.slane %v1802_v59, %v19107_v53  ;;  %v1823_v54 = vrot.slane %v1816_v24, %v19107_v53  ;;  %v1837_v6 = vrot.slane %v1830_v42, %v19107_v53  ;;  %v2360_v28 = vunpack.c.l.b16 %v1711_v23 }
 0x11f   : > { %17531 = vmatprep.mubr.bf16.mxu0 %v4687_v47  ;;  %v2361_v15 = vunpack.c.l.b16 %v1725_v21  ;;  %v2366_v0 = vunpack.c.l.b16 %v1795_v14  ;;  %v2441_v37 = vrot.slane %v2359_v26, 7  ;;  %v23501_v20 = vunpack.c.l.b16 %v19858_v48  ;;  %v18607_v26 = vld [vmem:[%s18972_s28 + $0x48] sm:$0xff]  }
 0x120   : > { %v2367_v8 = vunpack.c.l.b16 %v1809_v57  ;;  %v2368_v55 = vunpack.c.l.b16 %v1823_v54  ;;  %v2369_v40 = vunpack.c.l.b16 %v1837_v6  ;;  %v2443_v17 = vrot.slane %v2360_v28, 6  ;;  %v18892_v57 = vld [vmem:[%s23419_s4 + $0x1e8] sm:$0xff]  }
 0x121   : > { %v2447_v18 = vrot.slane %v23501_v20, 4  ;;  %v2442_v33 = vsel %vm2407_vm8, %v2441_v37, %v2358_v38  ;;  %v2445_v27 = vrot.slane %v2361_v15, 5  ;;  %v23502_v19 = vunpack.c.l.b16 %v19862_v10  ;;  %v18893_v15 = vld [vmem:[%s23419_s4 + $0x1a8] sm:$0xff]   ;;  %18747 = vmatprep.subr.bf16.mxu1 %v18892_v57 }
 0x122   : > { %v23503_v45 = vunpack.c.l.b16 %v19865_v49  ;;  %v2444_v4 = vsel %vm2410_vm11, %v2443_v17, %v2442_v33  ;;  %v23504_v13 = vunpack.c.l.b16 %v19880_v7  ;;  %v2455_v56 = vrot.slane %v2367_v8, 7  ;;  %18748 = vmatpush3.bf16.msra.mxu1 %v18893_v15 }
 0x123   : > { %v2449_v39 = vrot.slane %v23502_v19, 3  ;;  %v2457_v36 = vrot.slane %v2368_v55, 6  ;;  %v2446_v30 = vsel %vm2413_vm12, %v2445_v27, %v2444_v4  ;;  %v2459_v32 = vrot.slane %v2369_v40, 5 }
 0x124   : > { %v2451_v34 = vrot.slane %v23503_v45, 2  ;;  %v2453_v48 = vrot.slane %v23504_v13, 1  ;;  %v23505_v1 = vunpack.c.l.b16 %v19884_v5  ;;  %v23506_v10 = vunpack.c.l.b16 %v19887_v31 }
 0x125   : > { %v2448_v49 = vsel %vm2416_vm13, %v2447_v18, %v2446_v30  ;;  %v2456_v63 = vsel %vm2407_vm8, %v2455_v56, %v2366_v0  ;;  %v23507_v11 = vunpack.c.l.b16 %v19893_v61  ;;  %v23508_v23 = vunpack.c.l.b16 %v19903_v58 }
 0x126   : > { %v2461_v62 = vrot.slane %v23505_v1, 4  ;;  %v2463_v51 = vrot.slane %v23506_v10, 3  ;;  %v2450_v22 = vsel %vm2419_vm0, %v2449_v39, %v2448_v49  ;;  %v2458_v29 = vsel %vm2410_vm11, %v2457_v36, %v2456_v63  ;;  %v974_v63 = vld [vmem:[#allocation2 + $0x6c] sm:$0xf] }
 0x127   : > { %v2465_v7 = vrot.slane %v23507_v11, 2  ;;  %v2467_v9 = vrot.slane %v23508_v23, 1  ;;  %v23509_v5 = vunpack.c.h.bf16 %v19709_v35  ;;  %v23510_v21 = vunpack.c.l.bf16 %v19722_v12 }
 0x128   : > { %v2452_v61 = vsel %vm2422_vm2, %v2451_v34, %v2450_v22  ;;  %v2460_v59 = vsel %vm2413_vm12, %v2459_v32, %v2458_v29  ;;  %v23511_v58 = vunpack.c.h.bf16 %v19722_v12  ;;  %v445_v42 = vadd.f32 %v19244_v44, %v19730_v25  ;;  %v18891_v25 = vld [vmem:[%s23419_s4 + $0x120] sm:$0xff]  }
 0x129   : > { %v408_v31 = vmul.f32 %v23509_v5, %v19205_v60  ;;  %v411_v41 = vmul.f32 %v23510_v21, %v19205_v60  ;;  %v2454_v47 = vsel %vm2425_vm4, %v2453_v48, %v2452_v61  ;;  %v2462_v35 = vsel %vm2416_vm13, %v2461_v62, %v2460_v59  ;;  %18706 = vmatpush3.bf16.msra.mxu0 %v18891_v25  ;;  %v988_v29 = vld [vmem:[#allocation2 + $0x84] sm:$0xf] }
 0x12a   : > { %v412_v24 = vmul.f32 %v23511_v58, %v19205_v60  ;;  %v2464_v54 = vsel %vm2419_vm0, %v2463_v51, %v2462_v35  ;;  %v477_v6 = vmax.f32 %v445_v42, 0.0  ;;  %v18545_v28 = vunpack.c.l.bf16 %v18605_v43  ;;  %v18610_v61 = vld [vmem:[%s18972_s28 + $0x60] sm:$0xff]  }
 0x12b   : > { %v446_v14 = vadd.f32 %v19244_v44, %v408_v31  ;;  %v449_v38 = vadd.f32 %v19244_v44, %v411_v41  ;;  %v2466_v0 = vsel %vm2422_vm2, %v2465_v7, %v2464_v54  ;;  %v18546_v18 = vunpack.c.h.bf16 %v18605_v43 }
 0x12c   : > { %v450_v12 = vadd.f32 %v19244_v44, %v412_v24  ;;  %v2468_v8 = vsel %vm2425_vm4, %v2467_v9, %v2466_v0  ;;  %v18491_v40 = vpack.c.bf16 %v477_v6, %v477_v6  ;;  %v18553_v17 = vunpack.c.l.bf16 %v18607_v26 }
 0x12d   : > { %v478_v37 = vmax.f32 %v446_v14, 0.0  ;;  %v481_v20 = vmax.f32 %v449_v38, 0.0  ;;  %v2526_v33 = vpack.c.b16 %v2468_v8, %v2454_v47  ;;  %v18554_v39 = vunpack.c.h.bf16 %v18607_v26  ;;  %v18612_v47 = vld [vmem:[%s18972_s28 + $0x70] sm:$0xff]  }
 0x12e   : > { %v482_v55 = vmax.f32 %v450_v12, 0.0  ;;  %v729_v34 = vshrl.u32 %v18491_v40, 16  ;;  %v732_v4 = vshll.u32 %v18491_v40, 16  ;;  %v405_v13 = vmul.f32 %v18545_v28, %v19205_v60 }
 0x12f   : > { %v18492_v27 = vpack.c.bf16 %v478_v37, %v478_v37  ;;  %v18495_v19 = vpack.c.bf16 %v481_v20, %v481_v20  ;;  %17532 = vmatmul.mubr.bf16.gmra.mrb[4].mxu0 %v2526_v33  ;;  %v406_v10 = vmul.f32 %v18546_v18, %v19205_v60  ;;  %v409_v11 = vmul.f32 %v18553_v17, %v19205_v60 }
 0x130   : > { %v18496_v45 = vpack.c.bf16 %v482_v55, %v482_v55  ;;  %v731_v32 = vrot.slane %v729_v34, 7  ;;  %v410_v7 = vmul.f32 %v18554_v39, %v19205_v60  ;;  %v443_v5 = vadd.f32 %v19244_v44, %v405_v13 }
 0x131   : > { %v737_v48 = vshrl.u32 %v18492_v27, 16  ;;  %v740_v56 = vshll.u32 %v18492_v27, 16  ;;  %v763_v36 = vshrl.u32 %v18495_v19, 16  ;;  %v766_v30 = vshll.u32 %v18495_v19, 16 }
 0x132   : > { %v771_v1 = vshrl.u32 %v18496_v45, 16  ;;  %v774_v62 = vshll.u32 %v18496_v45, 16  ;;  %v734_v23 = vor.u32 %v732_v4, %v731_v32  ;;  %v735_v9 = vrot.slane %v731_v32, 4 }
 0x133   : > { %v20173_v51 = vrot.slane %v737_v48, 7  ;;  %v765_v49 = vrot.slane %v763_v36, 7  ;;  %v444_v43 = vadd.f32 %v19244_v44, %v406_v10  ;;  %v447_v24 = vadd.f32 %v19244_v44, %v409_v11 }
 0x134   : > { %v20177_v22 = vrot.slane %v771_v1, 7  ;;  %v975_v58 = vsel %vm19298_vm3, %v734_v23, %v974_v63  ;;  %v448_v42 = vadd.f32 %v19244_v44, %v410_v7  ;;  %v475_v38 = vmax.f32 %v443_v5, 0.0 }
 0x135   : > { %23512 = vst [vmem:[#allocation14_spill] sm:$0xff] %v20173_v51  ;;  %v742_v31 = vor.u32 %v740_v56, %v20173_v51  ;;  %v768_v21 = vor.u32 %v766_v30, %v765_v49  ;;  %v769_v41 = vrot.slane %v765_v49, 4  ;;  %976 = vst [vmem:[#allocation2 + $0x6c] sm:$0xf] %v975_v58  ;;  %v476_v26 = vmax.f32 %v444_v43, 0.0 }
 0x136   : > { %23513 = vst [vmem:[#allocation15_spill] sm:$0xff] %v20177_v22  ;;  %v776_v59 = vor.u32 %v774_v62, %v20177_v22  ;;  %v479_v54 = vmax.f32 %v447_v24, 0.0  ;;  %v480_v12 = vmax.f32 %v448_v42, 0.0  ;;  %v18565_v6 = vunpack.c.l.bf16 %v18610_v61 }
 0x137   : > { %v743_v35 = vsel %vm19288_vm15, %v735_v9, %v742_v31  ;;  %v989_v14 = vsel %vm19298_vm3, %v768_v21, %v988_v29  ;;  %v18489_v28 = vpack.c.bf16 %v475_v38, %v475_v38  ;;  %v18490_v25 = vpack.c.bf16 %v476_v26, %v476_v26 }
 0x138   : > { %v777_v57 = vsel %vm19288_vm15, %v769_v41, %v776_v59  ;;  %977 = vst [vmem:[#allocation2 + $0x70] sm:$0xf] %v743_v35  ;;  %990 = vst [vmem:[#allocation2 + $0x84] sm:$0xf] %v989_v14  ;;  %v18566_v15 = vunpack.c.h.bf16 %v18610_v61  ;;  %v18573_v0 = vunpack.c.l.bf16 %v18612_v47  ;;  %v20195_v37 = vpack.c.bf16 %v479_v54, %v479_v54 }
 0x139   : > { %991 = vst [vmem:[#allocation2 + $0x88] sm:$0xf] %v777_v57  ;;  %v20197_v20 = vpack.c.bf16 %v480_v12, %v480_v12  ;;  %v18574_v18 = vunpack.c.h.bf16 %v18612_v47  ;;  %v415_v8 = vmul.f32 %v18565_v6, %v19205_v60  ;;  %v712_v55 = vshrl.u32 %v18489_v28, 16 }
 0x13a   : > { %v715_v40 = vshll.u32 %v18489_v28, 16  ;;  %v720_v17 = vshrl.u32 %v18490_v25, 16  ;;  %v723_v33 = vshll.u32 %v18490_v25, 16  ;;  %v746_v27 = vshrl.u32 %v20195_v37, 16 }
 0x13b   : > { %v749_v19 = vshll.u32 %v20195_v37, 16  ;;  %v754_v39 = vshrl.u32 %v20197_v20, 16  ;;  %v757_v45 = vshll.u32 %v20197_v20, 16  ;;  %v20204_v34 = vrot.slane %v712_v55, 7 }
 0x13c   : > { %v20206_v4 = vrot.slane %v720_v17, 7  ;;  %v20209_v13 = vmul.f32 %v18566_v15, %v19205_v60  ;;  %v20212_v48 = vmul.f32 %v18573_v0, %v19205_v60  ;;  %v18143_v56 = vld.sshfl [vmem:[#allocation2 + $0x6c] sm:$0x33 pattern:$0x75316420]  ;;  %v20214_v36 = vrot.slane %v746_v27, 7 }
 0x13d   : > { %v20216_v30 = vrot.slane %v754_v39, 7  ;;  %v20219_v32 = vmul.f32 %v18574_v18, %v19205_v60  ;;  %v20222_v1 = vadd.f32 %v19244_v44, %v415_v8  ;;  %v6557_v10 = vcombine.high %v18143_v56, %v18143_v56 }
 0x13e   : > { %v6564_v49 = vrot.slane %v18143_v56, %v19107_v53  ;;  %v20226_v63 = vor.u32 %v715_v40, %v20204_v34  ;;  %v718_v11 = vrot.slane %v20204_v34, 4  ;;  %v20231_v29 = vor.u32 %v723_v33, %v20206_v4 }
 0x13f   : > { %v18144_v62 = vld.sshfl [vmem:[#allocation2 + $0x70] sm:$0x33 pattern:$0x75316420]  ;;  %v727_v5 = vrot.slane %v20206_v4, 4  ;;  %v6571_v21 = vrot.slane %v6557_v10, %v19107_v53 }
 0x140   : > { %v18145_v7 = vld.sshfl [vmem:[#allocation2 + $0x84] sm:$0x33 pattern:$0x75316420]  ;;  %v6581_v23 = vcombine.high %v18144_v62, %v18144_v62  ;;  %v6588_v9 = vrot.slane %v18144_v62, %v19107_v53  ;;  %v6572_v41 = vcombine.high %v6564_v49, %v6564_v49  ;;  %v7196_v38 = vrot.slane %v6564_v49, %v19107_v53 }
 0x141   : > { %v18146_v31 = vld.sshfl [vmem:[#allocation2 + $0x88] sm:$0x33 pattern:$0x75316420]  ;;  %v6605_v43 = vcombine.high %v18145_v7, %v18145_v7  ;;  %v6612_v61 = vrot.slane %v18145_v7, %v19107_v53  ;;  %v6573_v47 = vcombine.high %v6571_v21, %v6571_v21  ;;  %v7210_v12 = vrot.slane %v6571_v21, %v19107_v53 }
 0x142   : > { %v6595_v59 = vrot.slane %v6581_v23, %v19107_v53  ;;  %v6596_v58 = vcombine.high %v6588_v9, %v6588_v9  ;;  %v6629_v24 = vcombine.high %v18146_v31, %v18146_v31  ;;  %v6636_v42 = vrot.slane %v18146_v31, %v19107_v53 }
 0x143   : > { %v6619_v35 = vrot.slane %v6605_v43, %v19107_v53  ;;  %v6620_v14 = vcombine.high %v6612_v61, %v6612_v61  ;;  %v7203_v28 = vrot.slane %v7196_v38, %v19107_v53  ;;  %v7224_v25 = vrot.slane %v6572_v41, %v19107_v53 }
 0x144   : > { %v6597_v26 = vcombine.high %v6595_v59, %v6595_v59  ;;  %v6643_v57 = vrot.slane %v6629_v24, %v19107_v53  ;;  %v6644_v54 = vcombine.high %v6636_v42, %v6636_v42  ;;  %v7238_v15 = vrot.slane %v6573_v47, %v19107_v53 }
 0x145   : > { %v6621_v6 = vcombine.high %v6619_v35, %v6619_v35  ;;  %v7217_v18 = vrot.slane %v7210_v12, %v19107_v53  ;;  %v7252_v8 = vrot.slane %v6588_v9, %v19107_v53  ;;  %v7266_v55 = vrot.slane %v6595_v59, %v19107_v53 }
 0x146   : > { %v6645_v0 = vcombine.high %v6643_v57, %v6643_v57  ;;  %v7231_v40 = vrot.slane %v7224_v25, %v19107_v53  ;;  %v7245_v17 = vrot.slane %v7238_v15, %v19107_v53  ;;  %v7280_v33 = vrot.slane %v6596_v58, %v19107_v53 }
 0x147   : > { %v7294_v27 = vrot.slane %v6597_v26, %v19107_v53  ;;  %v7259_v39 = vrot.slane %v7252_v8, %v19107_v53  ;;  %v7273_v56 = vrot.slane %v7266_v55, %v19107_v53  ;;  %v7308_v62 = vrot.slane %v6612_v61, %v19107_v53 }
 0x148   : > { %v7322_v10 = vrot.slane %v6619_v35, %v19107_v53  ;;  %v7287_v49 = vrot.slane %v7280_v33, %v19107_v53  ;;  %v7336_v23 = vrot.slane %v6620_v14, %v19107_v53  ;;  %v7350_v9 = vrot.slane %v6621_v6, %v19107_v53 }
 0x149   : > { %v7301_v7 = vrot.slane %v7294_v27, %v19107_v53  ;;  %v7315_v31 = vrot.slane %v7308_v62, %v19107_v53  ;;  %v7364_v41 = vrot.slane %v6636_v42, %v19107_v53  ;;  %v7378_v43 = vrot.slane %v6643_v57, %v19107_v53 }
 0x14a   : > { %v7329_v21 = vrot.slane %v7322_v10, %v19107_v53  ;;  %v7343_v61 = vrot.slane %v7336_v23, %v19107_v53  ;;  %v7357_v59 = vrot.slane %v7350_v9, %v19107_v53  ;;  %v7392_v58 = vrot.slane %v6644_v54, %v19107_v53 }
 0x14b   : > { %v7406_v24 = vrot.slane %v6645_v0, %v19107_v53  ;;  %v7371_v47 = vrot.slane %v7364_v41, %v19107_v53  ;;  %v7385_v35 = vrot.slane %v7378_v43, %v19107_v53  ;;  %v7670_v14 = vunpack.c.l.b16 %v7203_v28 }
 0x14c   : > { %v7671_v38 = vunpack.c.l.b16 %v7217_v18  ;;  %v7399_v26 = vrot.slane %v7392_v58, %v19107_v53  ;;  %v7672_v12 = vunpack.c.l.b16 %v7231_v40  ;;  %v7673_v57 = vunpack.c.l.b16 %v7245_v17  ;;  %v18894_v40 = vld [vmem:[%s23419_s4 + $0x168] sm:$0xff]  }
 0x14d   : > { %v7413_v42 = vrot.slane %v7406_v24, %v19107_v53  ;;  %v7674_v6 = vunpack.c.l.b16 %v7259_v39  ;;  %v7675_v25 = vunpack.c.l.b16 %v7273_v56  ;;  %v7676_v15 = vunpack.c.l.b16 %v7287_v49  ;;  %18707 = vmatprep.subr.bf16.mxu0 %v18894_v40 }
 0x14e   : > { %v7677_v8 = vunpack.c.l.b16 %v7301_v7  ;;  %v7678_v55 = vunpack.c.l.b16 %v7315_v31  ;;  %v7679_v54 = vunpack.c.l.b16 %v7329_v21  ;;  %v7680_v33 = vunpack.c.l.b16 %v7343_v61 }
 0x14f   : > { %v7681_v0 = vunpack.c.l.b16 %v7357_v59  ;;  %v7682_v27 = vunpack.c.l.b16 %v7371_v47  ;;  %v7683_v62 = vunpack.c.l.b16 %v7385_v35  ;;  %v7684_v10 = vunpack.c.l.b16 %v7399_v26  ;;  %v967_v26 = vld [vmem:[#allocation2 + $0x60] sm:$0xf] }
 0x150   : > { %v7685_v23 = vunpack.c.l.b16 %v7413_v42  ;;  %v7758_v28 = vrot.slane %v7671_v38, 7  ;;  %v7760_v18 = vrot.slane %v7672_v12, 6  ;;  %v7762_v9 = vrot.slane %v7673_v57, 5  ;;  %v971_v42 = vld [vmem:[#allocation2 + $0x68] sm:$0x1] }
 0x151   : > { %v7764_v41 = vrot.slane %v7674_v6, 4  ;;  %v7766_v17 = vrot.slane %v7675_v25, 3  ;;  %v7768_v39 = vrot.slane %v7676_v15, 2  ;;  %v7770_v56 = vrot.slane %v7677_v8, 1  ;;  %v981_v15 = vld [vmem:[#allocation2 + $0x78] sm:$0xf] }
 0x152   : > { %v7772_v49 = vrot.slane %v7679_v54, 7  ;;  %v7759_v7 = vsel %vm2407_vm8, %v7758_v28, %v7670_v14  ;;  %v7774_v31 = vrot.slane %v7680_v33, 6  ;;  %v7776_v21 = vrot.slane %v7681_v0, 5  ;;  %v18609_v33 = vld [vmem:[%s18972_s28 + $0x58] sm:$0xff]  }
 0x153   : > { %v7778_v43 = vrot.slane %v7682_v27, 4  ;;  %v7761_v61 = vsel %vm2410_vm11, %v7760_v18, %v7759_v7  ;;  %v7780_v58 = vrot.slane %v7683_v62, 3  ;;  %v7782_v24 = vrot.slane %v7684_v10, 2  ;;  %v20314_v27 = vld [vmem:[%s18972_s28 + $0x68] sm:$0xff]  }
 0x154   : > { %v7773_v59 = vsel %vm2407_vm8, %v7772_v49, %v7678_v55  ;;  %v7763_v47 = vsel %vm2413_vm12, %v7762_v9, %v7761_v61  ;;  %v7784_v38 = vrot.slane %v7685_v23, 1  ;;  %v726_v14 = vsel %vm19288_vm15, %v718_v11, %v20231_v29  ;;  %v985_v55 = vld [vmem:[#allocation2 + $0x80] sm:$0x1] }
 0x155   : > { %v7775_v35 = vsel %vm2410_vm11, %v7774_v31, %v7773_v59  ;;  %v7765_v12 = vsel %vm2416_vm13, %v7764_v41, %v7763_v47  ;;  %v751_v6 = vor.u32 %v749_v19, %v20214_v36  ;;  %v752_v25 = vrot.slane %v20214_v36, 4  ;;  %970 = vst [vmem:[#allocation2 + $0x64] sm:$0xf] %v726_v14 }
 0x156   : > { %v7777_v57 = vsel %vm2413_vm12, %v7776_v21, %v7775_v35  ;;  %v7767_v34 = vsel %vm2419_vm0, %v7766_v17, %v7765_v12  ;;  %v759_v29 = vor.u32 %v757_v45, %v20216_v30  ;;  %v761_v8 = vrot.slane %v20216_v30, 4 }
 0x157   : > { %v7779_v11 = vsel %vm2416_vm13, %v7778_v43, %v7777_v57  ;;  %v7769_v54 = vsel %vm2422_vm2, %v7768_v39, %v7767_v34  ;;  %v968_v19 = vsel %vm19298_vm3, %v20226_v63, %v967_v26  ;;  %v972_v36 = vsel %vm19310_vm5, %v727_v5, %v971_v42 }
 0x158   : > { %v7781_v37 = vsel %vm2419_vm0, %v7780_v58, %v7779_v11  ;;  %v7771_v20 = vsel %vm2425_vm4, %v7770_v56, %v7769_v54  ;;  %v760_v30 = vsel %vm19288_vm15, %v752_v25, %v759_v29  ;;  %969 = vst [vmem:[#allocation2 + $0x60] sm:$0xf] %v968_v19  ;;  %973 = vst [vmem:[#allocation2 + $0x68] sm:$0x1] %v972_v36  ;;  %v485_v28 = vmax.f32 %v20222_v1, 0.0 }
 0x159   : > { %v7783_v45 = vsel %vm2422_vm2, %v7782_v24, %v7781_v37  ;;  %v982_v0 = vsel %vm19298_vm3, %v751_v6, %v981_v15  ;;  %984 = vst [vmem:[#allocation2 + $0x7c] sm:$0xf] %v760_v30  ;;  %v986_v63 = vsel %vm19310_vm5, %v761_v8, %v985_v55  ;;  %v454_v5 = vadd.f32 %v19244_v44, %v20209_v13 }
 0x15a   : > { %v7785_v4 = vsel %vm2425_vm4, %v7784_v38, %v7783_v45  ;;  %983 = vst [vmem:[#allocation2 + $0x78] sm:$0xf] %v982_v0  ;;  %v457_v62 = vadd.f32 %v19244_v44, %v20212_v48  ;;  %987 = vst [vmem:[#allocation2 + $0x80] sm:$0x1] %v986_v63  ;;  %v458_v23 = vadd.f32 %v19244_v44, %v20219_v32  ;;  %v18561_v18 = vunpack.c.l.bf16 %v18609_v33 }
 0x15b   : > { %v7816_v10 = vpack.c.b16 %v7785_v4, %v7771_v20  ;;  %v486_v9 = vmax.f32 %v454_v5, 0.0  ;;  %v18562_v40 = vunpack.c.h.bf16 %v18609_v33  ;;  %v20327_v13 = vpack.c.bf16 %v485_v28, %v485_v28 }
 0x15c   : > { %v489_v41 = vmax.f32 %v457_v62, 0.0  ;;  %v18124_v39 = vld.sshfl [vmem:[#allocation2 + $0x64] sm:$0x33 pattern:$0x75316420]  ;;  %v490_v56 = vmax.f32 %v458_v23, 0.0  ;;  %v20331_v49 = vmul.f32 %v18561_v18, %v19205_v60 }
 0x15d   : > { %17604 = vmatprep.mubr.bf16.mxu1 %v7816_v10  ;;  %v5025_v7 = vcombine.high %v18124_v39, %v18124_v39  ;;  %v20334_v32 = vrot.slane %v18124_v39, %v19107_v53  ;;  %v20336_v1 = vpack.c.bf16 %v486_v9, %v486_v9  ;;  %v797_v43 = vshrl.u32 %v20327_v13, 16 }
 0x15e   : > { %v20338_v31 = vpack.c.bf16 %v489_v41, %v489_v41  ;;  %v20340_v21 = vpack.c.bf16 %v490_v56, %v490_v56  ;;  %v20345_v59 = vmul.f32 %v18562_v40, %v19205_v60 }
 0x15f   : > { %v18123_v58 = vld.sshfl [vmem:[#allocation2 + $0x60] sm:$0x32 pattern:$0x75316420]  ;;  %v20348_v24 = vrot.slane %v5025_v7, %v19107_v53  ;;  %v20352_v47 = vcombine.high %v20334_v32, %v20334_v32  ;;  %v5738_v35 = vrot.slane %v20334_v32, %v19107_v53  ;;  %v20359_v57 = vrot.slane %v797_v43, 7 }
 0x160   : > { %23514 = vst [vmem:[#allocation16_spill] sm:$0xff] %v20345_v59  ;;  %v18125_v14 = vld.sshfl [vmem:[#allocation2 + $0x68] sm:$0x1 pattern:$0x75316420]  ;;  %v5001_v26 = vcombine.high %v18123_v58, %v18123_v58  ;;  %v5008_v42 = vrot.slane %v18123_v58, %v19107_v53 }
 0x161   : > { %v18126_v6 = vld.sshfl [vmem:[#allocation2 + $0x78] sm:$0x32 pattern:$0x75316420]  ;;  %v20363_v25 = vcombine.high %v20348_v24, %v20348_v24  ;;  %v20366_v15 = vrot.slane %v18125_v14, %v19107_v53  ;;  %v20369_v34 = vrot.slane %v5738_v35, %v19107_v53  ;;  %v5752_v11 = vrot.slane %v20348_v24, %v19107_v53 }
 0x162   : > { %v18127_v29 = vld.sshfl [vmem:[#allocation2 + $0x7c] sm:$0x33 pattern:$0x75316420]  ;;  %v5015_v8 = vrot.slane %v5001_v26, %v19107_v53  ;;  %v5016_v55 = vcombine.high %v5008_v42, %v5008_v42  ;;  %v5063_v54 = vcombine.high %v18126_v6, %v18126_v6  ;;  %v5070_v37 = vrot.slane %v18126_v6, %v19107_v53 }
 0x163   : > { %v18128_v19 = vld.sshfl [vmem:[#allocation2 + $0x80] sm:$0x1 pattern:$0x75316420]  ;;  %v5087_v36 = vcombine.high %v18127_v29, %v18127_v29  ;;  %v20376_v33 = vrot.slane %v18127_v29, %v19107_v53  ;;  %v20379_v20 = vrot.slane %v5752_v11, %v19107_v53  ;;  %v5766_v45 = vrot.slane %v20352_v47, %v19107_v53 }
 0x164   : > { %v5017_v30 = vcombine.high %v5015_v8, %v5015_v8  ;;  %v5077_v0 = vrot.slane %v5063_v54, %v19107_v53  ;;  %v5078_v4 = vcombine.high %v5070_v37, %v5070_v37  ;;  %v20385_v63 = vrot.slane %v18128_v19, %v19107_v53  ;;  %v18035_v48 = vld.sshfl [vmem:[#allocation2 + $0x60] sm:$0x33 pattern:$0x75316420] }
 0x165   : > { %v20388_v5 = vrot.slane %v5087_v36, %v19107_v53  ;;  %v20392_v62 = vcombine.high %v20376_v33, %v20376_v33  ;;  %v5696_v10 = vrot.slane %v5015_v8, %v19107_v53  ;;  %v5710_v23 = vrot.slane %v5016_v55, %v19107_v53 }
 0x166   : > { %v5079_v28 = vcombine.high %v5077_v0, %v5077_v0  ;;  %v5724_v18 = vrot.slane %v5017_v30, %v19107_v53  ;;  %v20398_v9 = vrot.slane %v5766_v45, %v19107_v53  ;;  %v5780_v41 = vrot.slane %v20363_v25, %v19107_v53 }
 0x167   : > { %v20404_v40 = vcombine.high %v20388_v5, %v20388_v5  ;;  %v5703_v39 = vrot.slane %v5696_v10, %v19107_v53  ;;  %v5717_v56 = vrot.slane %v5710_v23, %v19107_v53  ;;  %v5794_v7 = vrot.slane %v20366_v15, %v19107_v53 }
 0x168   : > { %v5731_v43 = vrot.slane %v5724_v18, %v19107_v53  ;;  %v20412_v58 = vrot.slane %v5780_v41, %v19107_v53  ;;  %v5808_v35 = vrot.slane %v5077_v0, %v19107_v53  ;;  %v5822_v14 = vrot.slane %v5078_v4, %v19107_v53 }
 0x169   : > { %v5801_v26 = vrot.slane %v5794_v7, %v19107_v53  ;;  %v5836_v42 = vrot.slane %v5079_v28, %v19107_v53  ;;  %v5850_v6 = vrot.slane %v20376_v33, %v19107_v53  ;;  %v5864_v11 = vrot.slane %v20388_v5, %v19107_v53 }
 0x16a   : > { %v5815_v29 = vrot.slane %v5808_v35, %v19107_v53  ;;  %v5829_v8 = vrot.slane %v5822_v14, %v19107_v53  ;;  %v5878_v55 = vrot.slane %v20392_v62, %v19107_v53  ;;  %v5892_v54 = vrot.slane %v20404_v40, %v19107_v53 }
 0x16b   : > { %v5843_v37 = vrot.slane %v5836_v42, %v19107_v53  ;;  %v20430_v19 = vrot.slane %v5850_v6, %v19107_v53  ;;  %v20433_v36 = vrot.slane %v5864_v11, %v19107_v53  ;;  %v5906_v45 = vrot.slane %v20385_v63, %v19107_v53 }
 0x16c   : > { %v20438_v30 = vrot.slane %v5878_v55, %v19107_v53  ;;  %v20441_v0 = vrot.slane %v5892_v54, %v19107_v53  ;;  %v6170_v4 = vunpack.c.l.b16 %v5703_v39  ;;  %v6171_v10 = vunpack.c.l.b16 %v5717_v56 }
 0x16d   : > { %v5913_v23 = vrot.slane %v5906_v45, %v19107_v53  ;;  %v6172_v28 = vunpack.c.l.b16 %v5731_v43  ;;  %v23436_v18 = vunpack.c.l.b16 %v20369_v34  ;;  %v23438_v41 = vunpack.c.l.b16 %v20379_v20 }
 0x16e   : > { %v23437_v7 = vunpack.c.l.b16 %v20398_v9  ;;  %v23439_v35 = vunpack.c.l.b16 %v20412_v58  ;;  %v6177_v14 = vunpack.c.l.b16 %v5801_v26  ;;  %v6178_v42 = vunpack.c.l.b16 %v5815_v29 }
 0x16f   : > { %v6179_v6 = vunpack.c.l.b16 %v5829_v8  ;;  %v6180_v11 = vunpack.c.l.b16 %v5843_v37  ;;  %v23441_v55 = vunpack.c.l.b16 %v20430_v19  ;;  %v23443_v39 = vunpack.c.l.b16 %v20433_v36  ;;  %v18038_v8 = vld.sshfl [vmem:[#allocation2 + $0x78] sm:$0x33 pattern:$0x75316420]  ;;  %v18896_v37 = vld [vmem:[%s23419_s4 + $0x1f0] sm:$0xff]  }
 0x170   : > { %v23442_v56 = vunpack.c.l.b16 %v20438_v30  ;;  %v6185_v54 = vunpack.c.l.b16 %v5913_v23  ;;  %v6258_v45 = vrot.slane %v6171_v10, 7  ;;  %v6260_v17 = vrot.slane %v6172_v28, 6  ;;  %18749 = vmatprep.subr.bf16.mxu1 %v18896_v37 }
 0x171   : > { %v6262_v61 = vrot.slane %v23436_v18, 5  ;;  %v6264_v26 = vrot.slane %v23438_v41, 4  ;;  %v6266_v29 = vrot.slane %v23437_v7, 3  ;;  %v6268_v10 = vrot.slane %v23439_v35, 2  ;;  %v18895_v18 = vld [vmem:[%s23419_s4 + $0x128] sm:$0xff]   ;;  %v18897_v7 = vld [vmem:[%s23419_s4 + $0x1b0] sm:$0xff]  }
 0x172   : > { %v6259_v12 = vsel %vm2407_vm8, %v6258_v45, %v6170_v4  ;;  %v6270_v23 = vrot.slane %v6177_v14, 1  ;;  %v6272_v28 = vrot.slane %v6179_v6, 7  ;;  %v6274_v38 = vrot.slane %v6180_v11, 6  ;;  %18708 = vmatpush3.bf16.msra.mxu0 %v18895_v18  ;;  %18750 = vmatpush3.bf16.msra.mxu1 %v18897_v7 }
 0x173   : > { %v6261_v41 = vsel %vm2410_vm11, %v6260_v17, %v6259_v12  ;;  %v6276_v43 = vrot.slane %v23441_v55, 5  ;;  %v6278_v4 = vrot.slane %v23443_v39, 4  ;;  %v6280_v45 = vrot.slane %v23442_v56, 3 }
 0x174   : > { %v6263_v14 = vsel %vm2413_vm12, %v6262_v61, %v6261_v41  ;;  %v6273_v6 = vsel %vm2407_vm8, %v6272_v28, %v6178_v42  ;;  %v23515_v35 = vunpack.c.l.b16 %v20441_v0  ;;  %v6284_v11 = vrot.slane %v6185_v54, 1 }
 0x175   : > { %v6265_v17 = vsel %vm2416_vm13, %v6264_v26, %v6263_v14  ;;  %v6275_v12 = vsel %vm2410_vm11, %v6274_v38, %v6273_v6  ;;  %v2840_v55 = vcombine.high %v18035_v48, %v18035_v48  ;;  %v20486_v41 = vrot.slane %v18035_v48, %v19107_v53 }
 0x176   : > { %v6282_v22 = vrot.slane %v23515_v35, 2  ;;  %v6267_v37 = vsel %vm2419_vm0, %v6266_v29, %v6265_v17  ;;  %v6277_v61 = vsel %vm2413_vm12, %v6276_v43, %v6275_v12  ;;  %v2902_v42 = vcombine.high %v18038_v8, %v18038_v8 }
 0x177   : > { %v6269_v28 = vsel %vm2422_vm2, %v6268_v10, %v6267_v37  ;;  %v6279_v35 = vsel %vm2416_vm13, %v6278_v4, %v6277_v61  ;;  %v20491_v18 = vrot.slane %v2840_v55, %v19107_v53  ;;  %v20494_v7 = vrot.slane %v18038_v8, %v19107_v53 }
 0x178   : > { %v6271_v38 = vsel %vm2425_vm4, %v6270_v23, %v6269_v28  ;;  %v6281_v54 = vsel %vm2419_vm0, %v6280_v45, %v6279_v35  ;;  %v20500_v43 = vcombine.high %v20486_v41, %v20486_v41  ;;  %v20503_v48 = vrot.slane %v2902_v42, %v19107_v53 }
 0x179   : > { %v6283_v26 = vsel %vm2422_vm2, %v6282_v22, %v6281_v54  ;;  %v20508_v55 = vcombine.high %v20491_v18, %v20491_v18  ;;  %v20512_v29 = vcombine.high %v20494_v7, %v20494_v7  ;;  %v3355_v8 = vshrl.u32 %v20486_v41, 16 }
 0x17a   : > { %v6285_v10 = vsel %vm2425_vm4, %v6284_v11, %v6283_v26  ;;  %v20518_v23 = vcombine.high %v20503_v48, %v20503_v48  ;;  %v3360_v4 = vshll.u32 %v20491_v18, 16  ;;  %v3363_v22 = vshrl.u32 %v20491_v18, 16 }
 0x17b   : > { %v6316_v14 = vpack.c.b16 %v6285_v10, %v6271_v38  ;;  %v3368_v6 = vshll.u32 %v20500_v43, 16  ;;  %v3371_v45 = vshrl.u32 %v20500_v43, 16  ;;  %v3376_v17 = vshll.u32 %v20508_v55, 16 }
 0x17c   : > { %v3362_v12 = vsel %vm19258_vm10, %v3355_v8, %v3360_v4  ;;  %v3379_v11 = vshrl.u32 %v20508_v55, 16  ;;  %v3392_v37 = vshll.u32 %v20348_v24, 16  ;;  %v3395_v61 = vshrl.u32 %v20348_v24, 16 }
 0x17d   : > { %17605 = vmatmul.mubr.bf16.gmra.mrb[8].mxu1 %v6316_v14  ;;  %v3370_v42 = vsel %vm19258_vm10, %v3363_v22, %v3368_v6  ;;  %v3378_v28 = vsel %vm19258_vm10, %v3371_v45, %v3376_v17  ;;  %v3400_v35 = vshll.u32 %v20352_v47, 16  ;;  %v3403_v38 = vshrl.u32 %v20352_v47, 16 }
 0x17e   : > { %v23516_v54 = vshll.u32 %v20334_v32, 16  ;;  %v23517_v8 = vshrl.u32 %v20334_v32, 16  ;;  %v3408_v10 = vshll.u32 %v20363_v25, 16  ;;  %v3411_v4 = vshrl.u32 %v20363_v25, 16 }
 0x17f   : > { %v3402_v22 = vsel %vm19258_vm10, %v3395_v61, %v3400_v35  ;;  %v3416_v14 = vshll.u32 %v20366_v15, 16  ;;  %v3420_v47 = vshrl.u32 %v20494_v7, 16  ;;  %v3425_v6 = vshll.u32 %v20503_v48, 16 }
 0x180   : > { %v3386_v26 = vsel %vm19258_vm10, %v3379_v11, %v23516_v54  ;;  %v3394_v24 = vsel %vm19258_vm10, %v23517_v8, %v3392_v37  ;;  %v3410_v45 = vsel %vm19258_vm10, %v3403_v38, %v3408_v10  ;;  %v3428_v32 = vshrl.u32 %v20503_v48, 16 }
 0x181   : > { %v3433_v17 = vshll.u32 %v20512_v29, 16  ;;  %v3436_v11 = vshrl.u32 %v20512_v29, 16  ;;  %v3418_v25 = vsel %vm19258_vm10, %v3411_v4, %v3416_v14  ;;  %v3427_v37 = vsel %vm19258_vm10, %v3420_v47, %v3425_v6 }
 0x182   : > { %v3441_v15 = vshll.u32 %v20518_v23, 16  ;;  %v3444_v61 = vshrl.u32 %v20518_v23, 16  ;;  %v3449_v38 = vshll.u32 %v20376_v33, 16  ;;  %v3452_v54 = vshrl.u32 %v20376_v33, 16 }
 0x183   : > { %v3435_v35 = vsel %vm19258_vm10, %v3428_v32, %v3433_v17  ;;  %v3457_v8 = vshll.u32 %v20388_v5, 16  ;;  %v3460_v4 = vshrl.u32 %v20388_v5, 16  ;;  %v3465_v14 = vshll.u32 %v20392_v62, 16 }
 0x184   : > { %v3443_v10 = vsel %vm19258_vm10, %v3436_v11, %v3441_v15  ;;  %v3468_v47 = vshrl.u32 %v20392_v62, 16  ;;  %v3451_v6 = vsel %vm19258_vm10, %v3444_v61, %v3449_v38  ;;  %v3473_v17 = vshll.u32 %v20404_v40, 16 }
 0x185   : > { %v3459_v32 = vsel %vm19258_vm10, %v3452_v54, %v3457_v8  ;;  %v3476_v33 = vshrl.u32 %v20404_v40, 16  ;;  %v3467_v56 = vsel %vm19258_vm10, %v3460_v4, %v3465_v14  ;;  %v3481_v11 = vshll.u32 %v20385_v63, 16 }
 0x186   : > { %v4068_v5 = vrot.slane %v3362_v12, %v19107_v53  ;;  %v4082_v15 = vrot.slane %v3370_v42, %v19107_v53  ;;  %v3475_v62 = vsel %vm19258_vm10, %v3468_v47, %v3473_v17  ;;  %v4096_v61 = vrot.slane %v3378_v28, %v19107_v53 }
 0x187   : > { %v4110_v38 = vrot.slane %v3386_v26, %v19107_v53  ;;  %v4124_v54 = vrot.slane %v3394_v24, %v19107_v53  ;;  %v3483_v40 = vsel %vm19258_vm10, %v3476_v33, %v3481_v11  ;;  %v4138_v12 = vrot.slane %v3402_v22, %v19107_v53 }
 0x188   : > { %v4075_v8 = vrot.slane %v4068_v5, %v19107_v53  ;;  %v4089_v63 = vrot.slane %v4082_v15, %v19107_v53  ;;  %v4103_v42 = vrot.slane %v4096_v61, %v19107_v53  ;;  %v4152_v28 = vrot.slane %v3410_v45, %v19107_v53 }
 0x189   : > { %v4117_v4 = vrot.slane %v4110_v38, %v19107_v53  ;;  %v4131_v14 = vrot.slane %v4124_v54, %v19107_v53  ;;  %v4145_v26 = vrot.slane %v4138_v12, %v19107_v53  ;;  %v4166_v24 = vrot.slane %v3418_v25, %v19107_v53 }
 0x18a   : > { %v4180_v47 = vrot.slane %v3427_v37, %v19107_v53  ;;  %v4194_v17 = vrot.slane %v3435_v35, %v19107_v53  ;;  %v4159_v33 = vrot.slane %v4152_v28, %v19107_v53  ;;  %v4208_v22 = vrot.slane %v3443_v10, %v19107_v53 }
 0x18b   : > { %v4222_v11 = vrot.slane %v3451_v6, %v19107_v53  ;;  %v4236_v5 = vrot.slane %v3459_v32, %v19107_v53  ;;  %v4173_v15 = vrot.slane %v4166_v24, %v19107_v53  ;;  %v4250_v25 = vrot.slane %v3467_v56, %v19107_v53 }
 0x18c   : > { %v4187_v45 = vrot.slane %v4180_v47, %v19107_v53  ;;  %v4201_v61 = vrot.slane %v4194_v17, %v19107_v53  ;;  %v4215_v37 = vrot.slane %v4208_v22, %v19107_v53  ;;  %v4264_v10 = vrot.slane %v3475_v62, %v19107_v53 }
 0x18d   : > { %v4229_v35 = vrot.slane %v4222_v11, %v19107_v53  ;;  %v4243_v38 = vrot.slane %v4236_v5, %v19107_v53  ;;  %v4257_v6 = vrot.slane %v4250_v25, %v19107_v53  ;;  %v4278_v32 = vrot.slane %v3483_v40, %v19107_v53 }
 0x18e   : > { %v4542_v54 = vunpack.c.l.b16 %v4075_v8  ;;  %v4543_v12 = vunpack.c.l.b16 %v4089_v63  ;;  %v4271_v28 = vrot.slane %v4264_v10, %v19107_v53  ;;  %v4544_v24 = vunpack.c.l.b16 %v4103_v42 }
 0x18f   : > { %v4545_v47 = vunpack.c.l.b16 %v4117_v4  ;;  %v4546_v17 = vunpack.c.l.b16 %v4131_v14  ;;  %v4285_v56 = vrot.slane %v4278_v32, %v19107_v53  ;;  %v4547_v22 = vunpack.c.l.b16 %v4145_v26  ;;  %v18898_v26 = vld [vmem:[%s23419_s4 + $0x170] sm:$0xff]  }
 0x190   : > { %v4548_v39 = vunpack.c.l.b16 %v4159_v33  ;;  %v4549_v11 = vunpack.c.l.b16 %v4173_v15  ;;  %v4550_v51 = vunpack.c.l.b16 %v4187_v45  ;;  %v4551_v5 = vunpack.c.l.b16 %v4201_v61  ;;  %18709 = vmatprep.subr.bf16.mxu0 %v18898_v26 }
 0x191   : > { %v4552_v2 = vunpack.c.l.b16 %v4215_v37  ;;  %v4553_v62 = vunpack.c.l.b16 %v4229_v35  ;;  %v4554_v16 = vunpack.c.l.b16 %v4243_v38  ;;  %v4555_v25 = vunpack.c.l.b16 %v4257_v6 }
 0x192   : > { %v4556_v50 = vunpack.c.l.b16 %v4271_v28  ;;  %v4557_v40 = vunpack.c.l.b16 %v4285_v56  ;;  %v4630_v8 = vrot.slane %v4543_v12, 7  ;;  %v4632_v63 = vrot.slane %v4544_v24, 6 }
 0x193   : > { %v4634_v46 = vrot.slane %v4545_v47, 5  ;;  %v4636_v10 = vrot.slane %v4546_v17, 4  ;;  %v4638_v42 = vrot.slane %v4547_v22, 3  ;;  %v4640_v4 = vrot.slane %v4548_v39, 2 }
 0x194   : > { %v4642_v14 = vrot.slane %v4549_v11, 1  ;;  %v4644_v59 = vrot.slane %v4551_v5, 7  ;;  %v4631_v33 = vsel %vm2407_vm8, %v4630_v8, %v4542_v54  ;;  %v4646_v15 = vrot.slane %v4552_v2, 6 }
 0x195   : > { %v4648_v45 = vrot.slane %v4553_v62, 5  ;;  %v4650_v61 = vrot.slane %v4554_v16, 4  ;;  %v4633_v37 = vsel %vm2410_vm11, %v4632_v63, %v4631_v33  ;;  %v4652_v38 = vrot.slane %v4555_v25, 3 }
 0x196   : > { %v4645_v35 = vsel %vm2407_vm8, %v4644_v59, %v4550_v51  ;;  %v4654_v6 = vrot.slane %v4556_v50, 2  ;;  %v4635_v39 = vsel %vm2413_vm12, %v4634_v46, %v4633_v37  ;;  %v4656_v12 = vrot.slane %v4557_v40, 1 }
 0x197   : > { %v4647_v32 = vsel %vm2410_vm11, %v4646_v15, %v4645_v35  ;;  %v1900_v28 = vrot.slane %v20486_v41, %v19107_v53  ;;  %v4637_v54 = vsel %vm2416_vm13, %v4636_v10, %v4635_v39  ;;  %v1914_v16 = vrot.slane %v20491_v18, %v19107_v53 }
 0x198   : > { %v4649_v2 = vsel %vm2413_vm12, %v4648_v45, %v4647_v32  ;;  %v1928_v51 = vrot.slane %v20500_v43, %v19107_v53  ;;  %v4639_v50 = vsel %vm2419_vm0, %v4638_v42, %v4637_v54  ;;  %v1942_v24 = vrot.slane %v20508_v55, %v19107_v53 }
 0x199   : > { %v4651_v46 = vsel %vm2416_vm13, %v4650_v61, %v4649_v2  ;;  %v1907_v59 = vrot.slane %v1900_v28, %v19107_v53  ;;  %v4641_v41 = vsel %vm2422_vm2, %v4640_v4, %v4639_v50  ;;  %v1921_v17 = vrot.slane %v1914_v16, %v19107_v53  ;;  %v18900_v28 = vld [vmem:[%s23419_s4 + $0x1f8] sm:$0xff]   ;;  %v18899_v50 = vld [vmem:[%s23419_s4 + $0x130] sm:$0xff]  }
 0x19a   : > { %v4653_v47 = vsel %vm2419_vm0, %v4652_v38, %v4651_v46  ;;  %v1935_v18 = vrot.slane %v1928_v51, %v19107_v53  ;;  %v4643_v56 = vsel %vm2425_vm4, %v4642_v14, %v4641_v41  ;;  %v1949_v22 = vrot.slane %v1942_v24, %v19107_v53  ;;  %18751 = vmatprep.subr.bf16.mxu1 %v18900_v28  ;;  %v23531_v28 = vld [vmem:[#allocation16_spill] sm:$0xff] }
 0x19b   : > { %v4655_v43 = vsel %vm2422_vm2, %v4654_v6, %v4653_v47  ;;  %v2012_v11 = vrot.slane %v20494_v7, %v19107_v53  ;;  %v2026_v55 = vrot.slane %v20503_v48, %v19107_v53  ;;  %v2040_v62 = vrot.slane %v20512_v29, %v19107_v53  ;;  %v18902_v47 = vld [vmem:[%s23419_s4 + $0x178] sm:$0xff]   ;;  %18710 = vmatpush3.bf16.msra.mxu0 %v18899_v50 }
 0x19c   : > { %v4657_v5 = vsel %vm2425_vm4, %v4656_v12, %v4655_v43  ;;  %v2054_v25 = vrot.slane %v20518_v23, %v19107_v53  ;;  %v2374_v63 = vunpack.c.l.b16 %v1907_v59  ;;  %v2375_v10 = vunpack.c.l.b16 %v1921_v17  ;;  %18711 = vmatprep.subr.bf16.mxu0 %v18902_v47 }
 0x19d   : > { %v4688_v40 = vpack.c.b16 %v4657_v5, %v4643_v56  ;;  %v2019_v8 = vrot.slane %v2012_v11, %v19107_v53  ;;  %v2033_v42 = vrot.slane %v2026_v55, %v19107_v53  ;;  %v2047_v7 = vrot.slane %v2040_v62, %v19107_v53 }
 0x19e   : > { %v2061_v4 = vrot.slane %v2054_v25, %v19107_v53  ;;  %v2376_v14 = vunpack.c.l.b16 %v1935_v18  ;;  %v2377_v48 = vunpack.c.l.b16 %v1949_v22  ;;  %v2469_v33 = vrot.slane %v2375_v10, 7 }
 0x19f   : > { %17539 = vmatprep.mubr.bf16.mxu0 %v4688_v40  ;;  %v2382_v26 = vunpack.c.l.b16 %v2019_v8  ;;  %v23518_v29 = vunpack.c.l.b16 %v20369_v34  ;;  %v2383_v23 = vunpack.c.l.b16 %v2033_v42  ;;  %v2384_v45 = vunpack.c.l.b16 %v2047_v7  ;;  %v1002_v8 = vld [vmem:[#allocation2 + $0x9c] sm:$0xf] }
 0x1a0   : > { %v2385_v61 = vunpack.c.l.b16 %v2061_v4  ;;  %v2471_v37 = vrot.slane %v2376_v14, 6  ;;  %v2470_v35 = vsel %vm2407_vm8, %v2469_v33, %v2374_v63  ;;  %v2473_v38 = vrot.slane %v2377_v48, 5  ;;  %v1016_v33 = vld [vmem:[#allocation2 + $0xb4] sm:$0xf] }
 0x1a1   : > { %v2475_v15 = vrot.slane %v23518_v29, 4  ;;  %v23519_v6 = vunpack.c.l.b16 %v20379_v20  ;;  %v23520_v32 = vunpack.c.l.b16 %v20398_v9  ;;  %v23521_v54 = vunpack.c.l.b16 %v20412_v58  ;;  %v18901_v20 = vld [vmem:[%s23419_s4 + $0x1b8] sm:$0xff]  }
 0x1a2   : > { %v2472_v34 = vsel %vm2410_vm11, %v2471_v37, %v2470_v35  ;;  %v2483_v16 = vrot.slane %v2383_v23, 7  ;;  %v2485_v51 = vrot.slane %v2384_v45, 6  ;;  %v2487_v46 = vrot.slane %v2385_v61, 5  ;;  %18752 = vmatpush3.bf16.msra.mxu1 %v18901_v20 }
 0x1a3   : > { %v2477_v39 = vrot.slane %v23519_v6, 3  ;;  %v2479_v12 = vrot.slane %v23520_v32, 2  ;;  %v2481_v2 = vrot.slane %v23521_v54, 1  ;;  %v2474_v9 = vsel %vm2413_vm12, %v2473_v38, %v2472_v34 }
 0x1a4   : > { %v23522_v59 = vunpack.c.l.b16 %v20430_v19  ;;  %v23523_v41 = vunpack.c.l.b16 %v20433_v36  ;;  %v2476_v17 = vsel %vm2416_vm13, %v2475_v15, %v2474_v9  ;;  %v2484_v18 = vsel %vm2407_vm8, %v2483_v16, %v2382_v26  ;;  %v18279_v37 = vld.sshfl [vmem:[#allocation2 + $0x18] sm:$0x33 pattern:$0x75316420] }
 0x1a5   : > { %v23524_v56 = vunpack.c.l.b16 %v20438_v30  ;;  %v23525_v22 = vunpack.c.l.b16 %v20441_v0  ;;  %v2478_v19 = vsel %vm2419_vm0, %v2477_v39, %v2476_v17  ;;  %v2486_v36 = vsel %vm2410_vm11, %v2485_v51, %v2484_v18 }
 0x1a6   : > { %v2489_v24 = vrot.slane %v23522_v59, 4  ;;  %v2491_v58 = vrot.slane %v23523_v41, 3  ;;  %v23526_v5 = vshll.u32 %v20327_v13, 16  ;;  %v803_v62 = vrot.slane %v20359_v57, 4 }
 0x1a7   : > { %v2493_v43 = vrot.slane %v23524_v56, 2  ;;  %v2495_v11 = vrot.slane %v23525_v22, 1  ;;  %v2480_v25 = vsel %vm2422_vm2, %v2479_v12, %v2478_v19  ;;  %v2488_v30 = vsel %vm2413_vm12, %v2487_v46, %v2486_v36 }
 0x1a8   : > { %v802_v55 = vor.u32 %v23526_v5, %v20359_v57  ;;  %v805_v0 = vshrl.u32 %v20336_v1, 16  ;;  %v808_v40 = vshll.u32 %v20336_v1, 16  ;;  %v2482_v63 = vsel %vm2425_vm4, %v2481_v2, %v2480_v25  ;;  %v20731_v2 = vld.sshfl [vmem:[#allocation2 + $0x1c] sm:$0x33 pattern:$0x75316420] }
 0x1a9   : > { %v2490_v10 = vsel %vm2416_vm13, %v2489_v24, %v2488_v30  ;;  %v831_v42 = vshrl.u32 %v20338_v31, 16  ;;  %v834_v13 = vshll.u32 %v20338_v31, 16  ;;  %v839_v4 = vshrl.u32 %v20340_v21, 16 }
 0x1aa   : > { %v2492_v57 = vsel %vm2419_vm0, %v2491_v58, %v2490_v10  ;;  %v20706_v7 = vrot.slane %v805_v0, 7  ;;  %v842_v14 = vshll.u32 %v20340_v21, 16  ;;  %v1003_v26 = vsel %vm19298_vm3, %v802_v55, %v1002_v8 }
 0x1ab   : > { %v2494_v48 = vsel %vm2422_vm2, %v2493_v43, %v2492_v57  ;;  %v833_v1 = vrot.slane %v831_v42, 7  ;;  %v23528_v29 = vunpack.c.l.bf16 %v20314_v27  ;;  %v20718_v45 = vrot.slane %v839_v4, 7  ;;  %1004 = vst [vmem:[#allocation2 + $0x9c] sm:$0xf] %v1003_v26 }
 0x1ac   : > { %23527 = vst [vmem:[#allocation17_spill] sm:$0xff] %v20706_v7  ;;  %v2496_v31 = vsel %vm2425_vm4, %v2495_v11, %v2494_v48  ;;  %v810_v23 = vor.u32 %v808_v40, %v20706_v7  ;;  %v23530_v21 = vunpack.c.h.bf16 %v20314_v27  ;;  %v451_v39 = vadd.f32 %v19244_v44, %v20331_v49 }
 0x1ad   : > { %v417_v15 = vmul.f32 %v23528_v29, %v19205_v60  ;;  %23529 = vst [vmem:[#allocation18_spill] sm:$0xff] %v20718_v45  ;;  %v2527_v35 = vpack.c.b16 %v2496_v31, %v2482_v63  ;;  %v836_v38 = vor.u32 %v834_v13, %v833_v1  ;;  %v837_v6 = vrot.slane %v833_v1, 4 }
 0x1ae   : > { %v418_v61 = vmul.f32 %v23530_v21, %v19205_v60  ;;  %v811_v32 = vsel %vm19288_vm15, %v803_v62, %v810_v23  ;;  %v844_v12 = vor.u32 %v842_v14, %v20718_v45  ;;  %v452_v34 = vadd.f32 %v19244_v44, %v23531_v28 }
 0x1af   : > { %v455_v54 = vadd.f32 %v19244_v44, %v417_v15  ;;  %17540 = vmatmul.mubr.bf16.gmra.mrb[8].mxu0 %v2527_v35  ;;  %1005 = vst [vmem:[#allocation2 + $0xa0] sm:$0xf] %v811_v32  ;;  %v1017_v27 = vsel %vm19298_vm3, %v836_v38, %v1016_v33  ;;  %v483_v49 = vmax.f32 %v451_v39, 0.0  ;;  %v13158_v51 = vcombine.high %v18279_v37, %v18279_v37 }
 0x1b0   : > { %v456_v16 = vadd.f32 %v19244_v44, %v418_v61  ;;  %v845_v50 = vsel %vm19288_vm15, %v837_v6, %v844_v12  ;;  %1018 = vst [vmem:[#allocation2 + $0xb4] sm:$0xf] %v1017_v27  ;;  %v484_v20 = vmax.f32 %v452_v34, 0.0  ;;  %v20739_v46 = vrot.slane %v18279_v37, %v19107_v53 }
 0x1b1   : > { %v487_v9 = vmax.f32 %v455_v54, 0.0  ;;  %1019 = vst [vmem:[#allocation2 + $0xb8] sm:$0xf] %v845_v50  ;;  %v18497_v24 = vpack.c.bf16 %v483_v49, %v483_v49  ;;  %v20742_v41 = vrot.slane %v13158_v51, %v19107_v53  ;;  %v13182_v58 = vcombine.high %v20731_v2, %v20731_v2 }
 0x1b2   : > { %23532 = vst [vmem:[#allocation16_spill] sm:$0xff] %v20739_v46  ;;  %v488_v59 = vmax.f32 %v456_v16, 0.0  ;;  %v20746_v47 = vpack.c.bf16 %v484_v20, %v484_v20  ;;  %v20752_v18 = vcombine.high %v20739_v46, %v20739_v46  ;;  %v20756_v56 = vrot.slane %v20731_v2, %v19107_v53  ;;  %v18147_v43 = vld.sshfl [vmem:[#allocation2 + $0x9c] sm:$0x33 pattern:$0x75316420] }
 0x1b3   : > { %23533 = vst [vmem:[#allocation19_spill] sm:$0xff] %v20742_v41  ;;  %v20748_v17 = vpack.c.bf16 %v487_v9, %v487_v9  ;;  %v780_v11 = vshrl.u32 %v18497_v24, 16  ;;  %v783_v19 = vshll.u32 %v18497_v24, 16  ;;  %v20762_v36 = vcombine.high %v20742_v41, %v20742_v41 }
 0x1b4   : > { %v20758_v22 = vpack.c.bf16 %v488_v59, %v488_v59  ;;  %v6653_v5 = vcombine.high %v18147_v43, %v18147_v43  ;;  %v6660_v55 = vrot.slane %v18147_v43, %v19107_v53  ;;  %v788_v62 = vshrl.u32 %v20746_v47, 16 }
 0x1b5   : > { %v791_v25 = vshll.u32 %v20746_v47, 16  ;;  %v20767_v30 = vrot.slane %v780_v11, 7  ;;  %v814_v0 = vshrl.u32 %v20748_v17, 16  ;;  %v817_v40 = vshll.u32 %v20748_v17, 16 }
 0x1b6   : > { %v822_v8 = vshrl.u32 %v20758_v22, 16  ;;  %v18148_v63 = vld.sshfl [vmem:[#allocation2 + $0xa0] sm:$0x33 pattern:$0x75316420]  ;;  %v6667_v10 = vrot.slane %v6653_v5, %v19107_v53  ;;  %v6668_v42 = vcombine.high %v6660_v55, %v6660_v55  ;;  %v7420_v13 = vrot.slane %v6660_v55, %v19107_v53 }
 0x1b7   : > { %v20774_v57 = vrot.slane %v788_v62, 7  ;;  %v18149_v4 = vld.sshfl [vmem:[#allocation2 + $0xb4] sm:$0x33 pattern:$0x75316420]  ;;  %v6677_v14 = vcombine.high %v18148_v63, %v18148_v63  ;;  %v6684_v48 = vrot.slane %v18148_v63, %v19107_v53  ;;  %v20778_v1 = vor.u32 %v783_v19, %v20767_v30 }
 0x1b8   : > { %v786_v26 = vrot.slane %v20767_v30, 4  ;;  %v18150_v33 = vld.sshfl [vmem:[#allocation2 + $0xb8] sm:$0x33 pattern:$0x75316420]  ;;  %v6669_v29 = vcombine.high %v6667_v10, %v6667_v10  ;;  %v6701_v15 = vcombine.high %v18149_v4, %v18149_v4  ;;  %v6708_v31 = vrot.slane %v18149_v4, %v19107_v53 }
 0x1b9   : > { %v20783_v23 = vrot.slane %v7420_v13, %v19107_v53  ;;  %v6691_v21 = vrot.slane %v6677_v14, %v19107_v53  ;;  %v6692_v61 = vcombine.high %v6684_v48, %v6684_v48  ;;  %v6725_v37 = vcombine.high %v18150_v33, %v18150_v33 }
 0x1ba   : > { %v6732_v35 = vrot.slane %v18150_v33, %v19107_v53  ;;  %v6715_v38 = vrot.slane %v6701_v15, %v19107_v53  ;;  %v6716_v6 = vcombine.high %v6708_v31, %v6708_v31  ;;  %v7434_v39 = vrot.slane %v6667_v10, %v19107_v53 }
 0x1bb   : > { %v7448_v32 = vrot.slane %v6668_v42, %v19107_v53  ;;  %v6693_v12 = vcombine.high %v6691_v21, %v6691_v21  ;;  %v6739_v28 = vrot.slane %v6725_v37, %v19107_v53  ;;  %v7462_v54 = vrot.slane %v6669_v29, %v19107_v53  ;;  %v18903_v37 = vld [vmem:[%s23419_s4 + $0x138] sm:$0xff]  }
 0x1bc   : > { %v6740_v34 = vcombine.high %v6732_v35, %v6732_v35  ;;  %v6717_v27 = vcombine.high %v6715_v38, %v6715_v38  ;;  %v7441_v16 = vrot.slane %v7434_v39, %v19107_v53  ;;  %v7476_v51 = vrot.slane %v6684_v48, %v19107_v53  ;;  %18712 = vmatpush3.bf16.msra.mxu0 %v18903_v37 }
 0x1bd   : > { %v7455_v49 = vrot.slane %v7448_v32, %v19107_v53  ;;  %v6741_v50 = vcombine.high %v6739_v28, %v6739_v28  ;;  %v7469_v20 = vrot.slane %v7462_v54, %v19107_v53  ;;  %v7490_v9 = vrot.slane %v6691_v21, %v19107_v53 }
 0x1be   : > { %v7504_v59 = vrot.slane %v6692_v61, %v19107_v53  ;;  %v7483_v24 = vrot.slane %v7476_v51, %v19107_v53  ;;  %v7518_v43 = vrot.slane %v6693_v12, %v19107_v53  ;;  %v7532_v11 = vrot.slane %v6708_v31, %v19107_v53 }
 0x1bf   : > { %v7546_v19 = vrot.slane %v6715_v38, %v19107_v53  ;;  %v7497_v5 = vrot.slane %v7490_v9, %v19107_v53  ;;  %v7560_v62 = vrot.slane %v6716_v6, %v19107_v53  ;;  %v7574_v63 = vrot.slane %v6717_v27, %v19107_v53 }
 0x1c0   : > { %v7511_v55 = vrot.slane %v7504_v59, %v19107_v53  ;;  %v7525_v10 = vrot.slane %v7518_v43, %v19107_v53  ;;  %v7539_v42 = vrot.slane %v7532_v11, %v19107_v53  ;;  %v7588_v4 = vrot.slane %v6732_v35, %v19107_v53 }
 0x1c1   : > { %v7553_v13 = vrot.slane %v7546_v19, %v19107_v53  ;;  %v7567_v14 = vrot.slane %v7560_v62, %v19107_v53  ;;  %v7581_v48 = vrot.slane %v7574_v63, %v19107_v53  ;;  %v7602_v33 = vrot.slane %v6739_v28, %v19107_v53 }
 0x1c2   : > { %v7616_v29 = vrot.slane %v6740_v34, %v19107_v53  ;;  %v7595_v15 = vrot.slane %v7588_v4, %v19107_v53  ;;  %v7630_v31 = vrot.slane %v6741_v50, %v19107_v53  ;;  %v7686_v21 = vunpack.c.l.b16 %v20783_v23 }
 0x1c3   : > { %v7687_v61 = vunpack.c.l.b16 %v7441_v16  ;;  %v7609_v35 = vrot.slane %v7602_v33, %v19107_v53  ;;  %v7688_v6 = vunpack.c.l.b16 %v7455_v49  ;;  %v7689_v39 = vunpack.c.l.b16 %v7469_v20 }
 0x1c4   : > { %v7623_v38 = vrot.slane %v7616_v29, %v19107_v53  ;;  %v7637_v32 = vrot.slane %v7630_v31, %v19107_v53  ;;  %v7690_v12 = vunpack.c.l.b16 %v7483_v24  ;;  %v7691_v28 = vunpack.c.l.b16 %v7497_v5 }
 0x1c5   : > { %v7692_v34 = vunpack.c.l.b16 %v7511_v55  ;;  %v7693_v54 = vunpack.c.l.b16 %v7525_v10  ;;  %v7694_v27 = vunpack.c.l.b16 %v7539_v42  ;;  %v7695_v23 = vunpack.c.l.b16 %v7553_v13 }
 0x1c6   : > { %v7696_v16 = vunpack.c.l.b16 %v7567_v14  ;;  %v7697_v51 = vunpack.c.l.b16 %v7581_v48  ;;  %v7698_v50 = vunpack.c.l.b16 %v7595_v15  ;;  %v7699_v9 = vunpack.c.l.b16 %v7609_v35 }
 0x1c7   : > { %v7700_v59 = vunpack.c.l.b16 %v7623_v38  ;;  %v7701_v43 = vunpack.c.l.b16 %v7637_v32  ;;  %v7786_v11 = vrot.slane %v7687_v61, 7  ;;  %v7788_v19 = vrot.slane %v7688_v6, 6  ;;  %v995_v38 = vld [vmem:[#allocation2 + $0x90] sm:$0xf]  ;;  %v1009_v6 = vld [vmem:[#allocation2 + $0xa8] sm:$0xf] }
 0x1c8   : > { %v7790_v62 = vrot.slane %v7689_v39, 5  ;;  %v7792_v49 = vrot.slane %v7690_v12, 4  ;;  %v7794_v20 = vrot.slane %v7691_v28, 3  ;;  %v7796_v63 = vrot.slane %v7692_v34, 2  ;;  %v999_v12 = vld [vmem:[#allocation2 + $0x98] sm:$0x1] }
 0x1c9   : > { %v7798_v4 = vrot.slane %v7693_v54, 1  ;;  %v7787_v24 = vsel %vm2407_vm8, %v7786_v11, %v7686_v21  ;;  %v7800_v5 = vrot.slane %v7695_v23, 7  ;;  %v7802_v55 = vrot.slane %v7696_v16, 6  ;;  %v1013_v28 = vld [vmem:[#allocation2 + $0xb0] sm:$0x1] }
 0x1ca   : > { %v7804_v10 = vrot.slane %v7697_v51, 5  ;;  %v7789_v42 = vsel %vm2410_vm11, %v7788_v19, %v7787_v24  ;;  %v7806_v13 = vrot.slane %v7698_v50, 4  ;;  %v7808_v14 = vrot.slane %v7699_v9, 3 }
 0x1cb   : > { %v7810_v48 = vrot.slane %v7700_v59, 2  ;;  %v7791_v33 = vsel %vm2413_vm12, %v7790_v62, %v7789_v42  ;;  %v7801_v29 = vsel %vm2407_vm8, %v7800_v5, %v7694_v27  ;;  %v7812_v15 = vrot.slane %v7701_v43, 1  ;;  %v18282_v27 = vld.sshfl [vmem:[#allocation2 + $0x30] sm:$0x33 pattern:$0x75316420] }
 0x1cc   : > { %v793_v31 = vor.u32 %v791_v25, %v20774_v57  ;;  %v7793_v61 = vsel %vm2416_vm13, %v7792_v49, %v7791_v33  ;;  %v7803_v21 = vsel %vm2410_vm11, %v7802_v55, %v7801_v29  ;;  %v795_v37 = vrot.slane %v20774_v57, 4  ;;  %v18283_v59 = vld.sshfl [vmem:[#allocation2 + $0x34] sm:$0x33 pattern:$0x75316420]  ;;  %v18904_v5 = vld [vmem:[%s23419_s4 + $0x200] sm:$0xff]  }
 0x1cd   : > { %v816_v35 = vrot.slane %v814_v0, 7  ;;  %v7795_v39 = vsel %vm2419_vm0, %v7794_v20, %v7793_v61  ;;  %v7805_v32 = vsel %vm2413_vm12, %v7804_v10, %v7803_v21  ;;  %v824_v25 = vrot.slane %v822_v8, 7  ;;  %v20850_v8 = vld.sshfl [vmem:[#allocation2 + $0x20] sm:$0x1 pattern:$0x75316420]  ;;  %18813 = vmatprep.subr.bf16.mxu1 %v18904_v5  ;;  %18789 = vmatprep.subr.bf16.mxu0 %v18904_v5 }
 0x1ce   : > { %v794_v47 = vsel %vm19288_vm15, %v786_v26, %v793_v31  ;;  %v7797_v57 = vsel %vm2422_vm2, %v7796_v63, %v7795_v39  ;;  %v7807_v0 = vsel %vm2416_vm13, %v7806_v13, %v7805_v32  ;;  %v825_v26 = vshll.u32 %v20758_v22, 16  ;;  %v20863_v19 = vld.sshfl [vmem:[#allocation2 + $0x38] sm:$0x1 pattern:$0x75316420] }
 0x1cf   : > { %v819_v34 = vor.u32 %v817_v40, %v816_v35  ;;  %v820_v54 = vrot.slane %v816_v35, 4  ;;  %998 = vst [vmem:[#allocation2 + $0x94] sm:$0xf] %v794_v47  ;;  %v7799_v30 = vsel %vm2425_vm4, %v7798_v4, %v7797_v57  ;;  %v7809_v23 = vsel %vm2419_vm0, %v7808_v14, %v7807_v0  ;;  %23535 = vst [vmem:[#allocation20_spill] sm:$0xff] %v20863_v19 }
 0x1d0   : > { %v829_v16 = vrot.slane %v824_v25, 4  ;;  %v7811_v51 = vsel %vm2422_vm2, %v7810_v48, %v7809_v23  ;;  %v996_v50 = vsel %vm19298_vm3, %v20778_v1, %v995_v38  ;;  %v1000_v40 = vsel %vm19310_vm5, %v795_v37, %v999_v12 }
 0x1d1   : > { %v1010_v9 = vsel %vm19298_vm3, %v819_v34, %v1009_v6  ;;  %v7813_v43 = vsel %vm2425_vm4, %v7812_v15, %v7811_v51  ;;  %v827_v11 = vor.u32 %v825_v26, %v824_v25  ;;  %997 = vst [vmem:[#allocation2 + $0x90] sm:$0xf] %v996_v50  ;;  %1001 = vst [vmem:[#allocation2 + $0x98] sm:$0x1] %v1000_v40  ;;  %v13648_v13 = vshrl.u32 %v20739_v46, 16 }
 0x1d2   : > { %1011 = vst [vmem:[#allocation2 + $0xa8] sm:$0xf] %v1010_v9  ;;  %v1014_v22 = vsel %vm19310_vm5, %v829_v16, %v1013_v28  ;;  %v20869_v1 = vrot.slane %v13182_v58, %v19107_v53  ;;  %v7817_v62 = vpack.c.b16 %v7813_v43, %v7799_v30  ;;  %v20873_v49 = vcombine.high %v20756_v56, %v20756_v56 }
 0x1d3   : > { %1015 = vst [vmem:[#allocation2 + $0xb0] sm:$0x1] %v1014_v22  ;;  %v13220_v63 = vcombine.high %v18282_v27, %v18282_v27  ;;  %v828_v4 = vsel %vm19288_vm15, %v820_v54, %v827_v11  ;;  %v20884_v2 = vrot.slane %v18282_v27, %v19107_v53  ;;  %v13244_v58 = vcombine.high %v18283_v59, %v18283_v59 }
 0x1d4   : > { %v20881_v24 = vcombine.high %v20869_v1, %v20869_v1  ;;  %17612 = vmatprep.mubr.bf16.mxu1 %v7817_v62  ;;  %1012 = vst [vmem:[#allocation2 + $0xac] sm:$0xf] %v828_v4  ;;  %v20893_v10 = vrot.slane %v18283_v59, %v19107_v53  ;;  %v13653_v29 = vshll.u32 %v20742_v41, 16  ;;  %v13656_v15 = vshrl.u32 %v20742_v41, 16 }
 0x1d5   : > { %v20890_v55 = vrot.slane %v13220_v63, %v19107_v53  ;;  %v20900_v48 = vcombine.high %v20884_v2, %v20884_v2  ;;  %v20903_v33 = vrot.slane %v13244_v58, %v19107_v53  ;;  %v13661_v39 = vshll.u32 %v20752_v18, 16 }
 0x1d6   : > { %23536 = vst [vmem:[#allocation21_spill] sm:$0xff] %v20893_v10  ;;  %v18130_v14 = vld.sshfl [vmem:[#allocation2 + $0x94] sm:$0x33 pattern:$0x75316420]  ;;  %v20916_v37 = vcombine.high %v20893_v10, %v20893_v10  ;;  %v20924_v6 = vsel %vm19258_vm10, %v13648_v13, %v13653_v29 }
 0x1d7   : > { %23537 = vst [vmem:[#allocation22_spill] sm:$0xff] %v20903_v33  ;;  %v5149_v31 = vcombine.high %v18130_v14, %v18130_v14  ;;  %v20908_v61 = vrot.slane %v18130_v14, %v19107_v53  ;;  %v20912_v21 = vcombine.high %v20890_v55, %v20890_v55  ;;  %v20920_v35 = vcombine.high %v20903_v33, %v20903_v33 }
 0x1d8   : > { %23539 = vst [vmem:[#allocation24_spill] sm:$0xff] %v20916_v37  ;;  %23542 = vst [vmem:[#allocation6_spill] sm:$0xff] %v20924_v6  ;;  %v18129_v47 = vld.sshfl [vmem:[#allocation2 + $0x90] sm:$0x32 pattern:$0x75316420]  ;;  %v20942_v30 = vsel %vm19258_vm10, %v13656_v15, %v13661_v39 }
 0x1d9   : > { %23538 = vst [vmem:[#allocation23_spill] sm:$0xff] %v20912_v21  ;;  %23540 = vst [vmem:[#allocation25_spill] sm:$0xff] %v20920_v35  ;;  %v20929_v25 = vrot.slane %v5149_v31, %v19107_v53  ;;  %v20933_v12 = vcombine.high %v20908_v61, %v20908_v61  ;;  %v5962_v28 = vrot.slane %v20908_v61, %v19107_v53  ;;  %v18131_v0 = vld.sshfl [vmem:[#allocation2 + $0x98] sm:$0x1 pattern:$0x75316420] }
 0x1da   : > { %v5125_v34 = vcombine.high %v18129_v47, %v18129_v47  ;;  %v5132_v54 = vrot.slane %v18129_v47, %v19107_v53  ;;  %23543 = vst [vmem:[#allocation26_spill] sm:$0xff] %v20942_v30  ;;  %v18132_v23 = vld.sshfl [vmem:[#allocation2 + $0xa8] sm:$0x32 pattern:$0x75316420]  ;;  %v20949_v16 = vrot.slane %v18131_v0, %v19107_v53 }
 0x1db   : > { %v20946_v26 = vcombine.high %v20929_v25, %v20929_v25  ;;  %v20952_v51 = vrot.slane %v5962_v28, %v19107_v53  ;;  %v5976_v50 = vrot.slane %v20929_v25, %v19107_v53  ;;  %v18133_v40 = vld.sshfl [vmem:[#allocation2 + $0xac] sm:$0x33 pattern:$0x75316420]  ;;  %v5187_v43 = vcombine.high %v18132_v23, %v18132_v23 }
 0x1dc   : > { %v5139_v9 = vrot.slane %v5125_v34, %v19107_v53  ;;  %v5140_v59 = vcombine.high %v5132_v54, %v5132_v54  ;;  %v5194_v11 = vrot.slane %v18132_v23, %v19107_v53  ;;  %v18134_v22 = vld.sshfl [vmem:[#allocation2 + $0xb0] sm:$0x1 pattern:$0x75316420]  ;;  %v5211_v62 = vcombine.high %v18133_v40, %v18133_v40 }
 0x1dd   : > { %v20959_v63 = vrot.slane %v18133_v40, %v19107_v53  ;;  %v20962_v4 = vrot.slane %v5976_v50, %v19107_v53  ;;  %v5990_v58 = vrot.slane %v20933_v12, %v19107_v53  ;;  %v5201_v13 = vrot.slane %v5187_v43, %v19107_v53  ;;  %v18041_v44 = vld.sshfl [vmem:[#allocation2 + $0x90] sm:$0x33 pattern:$0x75316420] }
 0x1de   : > { %v5141_v5 = vcombine.high %v5139_v9, %v5139_v9  ;;  %v5202_v14 = vcombine.high %v5194_v11, %v5194_v11  ;;  %v20968_v29 = vrot.slane %v18134_v22, %v19107_v53  ;;  %v20971_v15 = vrot.slane %v5211_v62, %v19107_v53 }
 0x1df   : > { %v20975_v31 = vcombine.high %v20959_v63, %v20959_v63  ;;  %v5920_v39 = vrot.slane %v5139_v9, %v19107_v53  ;;  %v5934_v47 = vrot.slane %v5140_v59, %v19107_v53  ;;  %v5203_v28 = vcombine.high %v5201_v13, %v5201_v13 }
 0x1e0   : > { %v5948_v0 = vrot.slane %v5141_v5, %v19107_v53  ;;  %v20981_v34 = vrot.slane %v5990_v58, %v19107_v53  ;;  %v6004_v54 = vrot.slane %v20946_v26, %v19107_v53  ;;  %v20987_v23 = vcombine.high %v20971_v15, %v20971_v15 }
 0x1e1   : > { %v5927_v50 = vrot.slane %v5920_v39, %v19107_v53  ;;  %v5941_v40 = vrot.slane %v5934_v47, %v19107_v53  ;;  %v6018_v9 = vrot.slane %v20949_v16, %v19107_v53  ;;  %v6032_v11 = vrot.slane %v5201_v13, %v19107_v53 }
 0x1e2   : > { %v5955_v59 = vrot.slane %v5948_v0, %v19107_v53  ;;  %v20995_v43 = vrot.slane %v6004_v54, %v19107_v53  ;;  %v6046_v22 = vrot.slane %v5202_v14, %v19107_v53  ;;  %v6060_v58 = vrot.slane %v5203_v28, %v19107_v53 }
 0x1e3   : > { %v6025_v62 = vrot.slane %v6018_v9, %v19107_v53  ;;  %v6074_v5 = vrot.slane %v20959_v63, %v19107_v53  ;;  %v6088_v39 = vrot.slane %v20971_v15, %v19107_v53  ;;  %v6039_v47 = vrot.slane %v6032_v11, %v19107_v53 }
 0x1e4   : > { %v6053_v0 = vrot.slane %v6046_v22, %v19107_v53  ;;  %v6102_v54 = vrot.slane %v20975_v31, %v19107_v53  ;;  %v6116_v13 = vrot.slane %v20987_v23, %v19107_v53  ;;  %v6067_v14 = vrot.slane %v6060_v58, %v19107_v53 }
 0x1e5   : > { %v21013_v28 = vrot.slane %v6074_v5, %v19107_v53  ;;  %v21016_v9 = vrot.slane %v6088_v39, %v19107_v53  ;;  %v6130_v42 = vrot.slane %v20968_v29, %v19107_v53  ;;  %v6186_v20 = vunpack.c.l.b16 %v5927_v50 }
 0x1e6   : > { %v21021_v11 = vrot.slane %v6102_v54, %v19107_v53  ;;  %v21024_v22 = vrot.slane %v6116_v13, %v19107_v53  ;;  %v6187_v32 = vunpack.c.l.b16 %v5941_v40  ;;  %v6188_v58 = vunpack.c.l.b16 %v5955_v59  ;;  %v18044_v13 = vld.sshfl [vmem:[#allocation2 + $0xa8] sm:$0x33 pattern:$0x75316420] }
 0x1e7   : > { %v6137_v27 = vrot.slane %v6130_v42, %v19107_v53  ;;  %v23462_v45 = vunpack.c.l.b16 %v20995_v43  ;;  %v6193_v7 = vunpack.c.l.b16 %v6025_v62  ;;  %v6194_v3 = vunpack.c.l.b16 %v6039_v47 }
 0x1e8   : > { %v6195_v54 = vunpack.c.l.b16 %v6053_v0  ;;  %v6196_v52 = vunpack.c.l.b16 %v6067_v14  ;;  %v6286_v5 = vrot.slane %v6187_v32, 7  ;;  %v6288_v57 = vrot.slane %v6188_v58, 6 }
 0x1e9   : > { %v6201_v59 = vunpack.c.l.b16 %v6137_v27  ;;  %v23544_v39 = vunpack.c.l.b16 %v20952_v51  ;;  %v23545_v62 = vunpack.c.l.b16 %v20962_v4  ;;  %v23546_v0 = vunpack.c.l.b16 %v20981_v34 }
 0x1ea   : > { %v6287_v50 = vsel %vm2407_vm8, %v6286_v5, %v6186_v20  ;;  %v6296_v40 = vrot.slane %v23462_v45, 2  ;;  %v6298_v42 = vrot.slane %v6193_v7, 1  ;;  %v6300_v27 = vrot.slane %v6195_v54, 7 }
 0x1eb   : > { %v6290_v60 = vrot.slane %v23544_v39, 5  ;;  %v6292_v47 = vrot.slane %v23545_v62, 4  ;;  %v6294_v14 = vrot.slane %v23546_v0, 3  ;;  %v6289_v32 = vsel %vm2410_vm11, %v6288_v57, %v6287_v50 }
 0x1ec   : > { %v6302_v58 = vrot.slane %v6196_v52, 6  ;;  %v23547_v17 = vunpack.c.l.b16 %v21013_v28  ;;  %v23548_v41 = vunpack.c.l.b16 %v21016_v9  ;;  %v6301_v0 = vsel %vm2407_vm8, %v6300_v27, %v6194_v3 }
 0x1ed   : > { %v6291_v46 = vsel %vm2413_vm12, %v6290_v60, %v6289_v32  ;;  %v23549_v20 = vunpack.c.l.b16 %v21021_v11  ;;  %v23550_v45 = vunpack.c.l.b16 %v21024_v22  ;;  %v6312_v57 = vrot.slane %v6201_v59, 1 }
 0x1ee   : > { %v6304_v39 = vrot.slane %v23547_v17, 5  ;;  %v6306_v62 = vrot.slane %v23548_v41, 4  ;;  %v6293_v54 = vsel %vm2416_vm13, %v6292_v47, %v6291_v46  ;;  %v6303_v52 = vsel %vm2410_vm11, %v6302_v58, %v6301_v0 }
 0x1ef   : > { %v6308_v5 = vrot.slane %v23549_v20, 3  ;;  %v6310_v7 = vrot.slane %v23550_v45, 2  ;;  %v2964_v50 = vcombine.high %v18041_v44, %v18041_v44  ;;  %v6295_v17 = vsel %vm2419_vm0, %v6294_v14, %v6293_v54 }
 0x1f0   : > { %v6305_v41 = vsel %vm2413_vm12, %v6304_v39, %v6303_v52  ;;  %v21060_v60 = vrot.slane %v18041_v44, %v19107_v53  ;;  %v3026_v3 = vcombine.high %v18044_v13, %v18044_v13  ;;  %v6297_v27 = vsel %vm2422_vm2, %v6296_v40, %v6295_v17 }
 0x1f1   : > { %v6307_v32 = vsel %vm2416_vm13, %v6306_v62, %v6305_v41  ;;  %v21065_v45 = vrot.slane %v2964_v50, %v19107_v53  ;;  %v21068_v46 = vrot.slane %v18044_v13, %v19107_v53  ;;  %v6299_v59 = vsel %vm2425_vm4, %v6298_v42, %v6297_v27 }
 0x1f2   : > { %v6309_v47 = vsel %vm2419_vm0, %v6308_v5, %v6307_v32  ;;  %v21074_v14 = vcombine.high %v21060_v60, %v21060_v60  ;;  %v21077_v44 = vrot.slane %v3026_v3, %v19107_v53  ;;  %v3485_v42 = vshrl.u32 %v21060_v60, 16 }
 0x1f3   : > { %v6311_v40 = vsel %vm2422_vm2, %v6310_v7, %v6309_v47  ;;  %v21082_v58 = vcombine.high %v21065_v45, %v21065_v45  ;;  %v21086_v13 = vcombine.high %v21068_v46, %v21068_v46  ;;  %v3490_v0 = vshll.u32 %v21065_v45, 16 }
 0x1f4   : > { %v6313_v39 = vsel %vm2425_vm4, %v6312_v57, %v6311_v40  ;;  %v21092_v62 = vcombine.high %v21077_v44, %v21077_v44  ;;  %v3493_v20 = vshrl.u32 %v21065_v45, 16  ;;  %v3498_v7 = vshll.u32 %v21074_v14, 16 }
 0x1f5   : > { %v6317_v5 = vpack.c.b16 %v6313_v39, %v6299_v59  ;;  %v3501_v54 = vshrl.u32 %v21074_v14, 16  ;;  %v3506_v52 = vshll.u32 %v21082_v58, 16  ;;  %v3492_v50 = vsel %vm19258_vm10, %v3485_v42, %v3490_v0 }
 0x1f6   : > { %v3509_v57 = vshrl.u32 %v21082_v58, 16  ;;  %v3522_v17 = vshll.u32 %v20929_v25, 16  ;;  %v3525_v41 = vshrl.u32 %v20929_v25, 16  ;;  %v3500_v3 = vsel %vm19258_vm10, %v3493_v20, %v3498_v7 }
 0x1f7   : > { %17613 = vmatmul.mubr.bf16.gmra.mrb[12].mxu1 %v6317_v5  ;;  %v3508_v27 = vsel %vm19258_vm10, %v3501_v54, %v3506_v52  ;;  %v3530_v32 = vshll.u32 %v20933_v12, 16  ;;  %v3533_v59 = vshrl.u32 %v20933_v12, 16  ;;  %v23551_v47 = vshll.u32 %v20908_v61, 16 }
 0x1f8   : > { %v23552_v42 = vshrl.u32 %v20908_v61, 16  ;;  %v3538_v39 = vshll.u32 %v20946_v26, 16  ;;  %v3541_v0 = vshrl.u32 %v20946_v26, 16  ;;  %v3546_v5 = vshll.u32 %v20949_v16, 16 }
 0x1f9   : > { %v3516_v40 = vsel %vm19258_vm10, %v3509_v57, %v23551_v47  ;;  %v3532_v20 = vsel %vm19258_vm10, %v3525_v41, %v3530_v32  ;;  %v3550_v12 = vshrl.u32 %v21068_v46, 16  ;;  %v3555_v7 = vshll.u32 %v21077_v44, 16 }
 0x1fa   : > { %v3524_v25 = vsel %vm19258_vm10, %v23552_v42, %v3522_v17  ;;  %v3540_v54 = vsel %vm19258_vm10, %v3533_v59, %v3538_v39  ;;  %v3558_v61 = vshrl.u32 %v21077_v44, 16  ;;  %v3563_v52 = vshll.u32 %v21086_v13, 16 }
 0x1fb   : > { %v3566_v57 = vshrl.u32 %v21086_v13, 16  ;;  %v3548_v26 = vsel %vm19258_vm10, %v3541_v0, %v3546_v5  ;;  %v3557_v17 = vsel %vm19258_vm10, %v3550_v12, %v3555_v7  ;;  %v3571_v16 = vshll.u32 %v21092_v62, 16 }
 0x1fc   : > { %v3574_v41 = vshrl.u32 %v21092_v62, 16  ;;  %v3565_v32 = vsel %vm19258_vm10, %v3558_v61, %v3563_v52  ;;  %v3579_v59 = vshll.u32 %v20959_v63, 16  ;;  %v3582_v47 = vshrl.u32 %v20959_v63, 16 }
 0x1fd   : > { %v3587_v42 = vshll.u32 %v20971_v15, 16  ;;  %v3573_v39 = vsel %vm19258_vm10, %v3566_v57, %v3571_v16  ;;  %v3590_v0 = vshrl.u32 %v20971_v15, 16  ;;  %v3595_v5 = vshll.u32 %v20975_v31, 16 }
 0x1fe   : > { %v3598_v12 = vshrl.u32 %v20975_v31, 16  ;;  %v3581_v7 = vsel %vm19258_vm10, %v3574_v41, %v3579_v59  ;;  %v3603_v52 = vshll.u32 %v20987_v23, 16  ;;  %v3606_v63 = vshrl.u32 %v20987_v23, 16 }
 0x1ff   : > { %v3589_v61 = vsel %vm19258_vm10, %v3582_v47, %v3587_v42  ;;  %v3597_v30 = vsel %vm19258_vm10, %v3590_v0, %v3595_v5  ;;  %v3611_v57 = vshll.u32 %v20968_v29, 16  ;;  %v4292_v15 = vrot.slane %v3492_v50, %v19107_v53 }
 0x200   : > { %v4306_v16 = vrot.slane %v3500_v3, %v19107_v53  ;;  %v3605_v31 = vsel %vm19258_vm10, %v3598_v12, %v3603_v52  ;;  %v4320_v41 = vrot.slane %v3508_v27, %v19107_v53  ;;  %v4334_v59 = vrot.slane %v3516_v40, %v19107_v53 }
 0x201   : > { %v4348_v47 = vrot.slane %v3524_v25, %v19107_v53  ;;  %v3613_v23 = vsel %vm19258_vm10, %v3606_v63, %v3611_v57  ;;  %v4299_v42 = vrot.slane %v4292_v15, %v19107_v53  ;;  %v4362_v50 = vrot.slane %v3532_v20, %v19107_v53 }
 0x202   : > { %v4313_v29 = vrot.slane %v4306_v16, %v19107_v53  ;;  %v4327_v3 = vrot.slane %v4320_v41, %v19107_v53  ;;  %v4341_v0 = vrot.slane %v4334_v59, %v19107_v53  ;;  %v4376_v27 = vrot.slane %v3540_v54, %v19107_v53 }
 0x203   : > { %v4355_v5 = vrot.slane %v4348_v47, %v19107_v53  ;;  %v4369_v40 = vrot.slane %v4362_v50, %v19107_v53  ;;  %v4390_v25 = vrot.slane %v3548_v26, %v19107_v53  ;;  %v4404_v12 = vrot.slane %v3557_v17, %v19107_v53 }
 0x204   : > { %v4418_v52 = vrot.slane %v3565_v32, %v19107_v53  ;;  %v4383_v63 = vrot.slane %v4376_v27, %v19107_v53  ;;  %v4432_v20 = vrot.slane %v3573_v39, %v19107_v53  ;;  %v4446_v57 = vrot.slane %v3581_v7, %v19107_v53 }
 0x205   : > { %v4460_v15 = vrot.slane %v3589_v61, %v19107_v53  ;;  %v4397_v16 = vrot.slane %v4390_v25, %v19107_v53  ;;  %v4411_v54 = vrot.slane %v4404_v12, %v19107_v53  ;;  %v4474_v26 = vrot.slane %v3597_v30, %v19107_v53 }
 0x206   : > { %v4425_v41 = vrot.slane %v4418_v52, %v19107_v53  ;;  %v4439_v17 = vrot.slane %v4432_v20, %v19107_v53  ;;  %v4453_v32 = vrot.slane %v4446_v57, %v19107_v53  ;;  %v4488_v39 = vrot.slane %v3605_v31, %v19107_v53 }
 0x207   : > { %v4467_v59 = vrot.slane %v4460_v15, %v19107_v53  ;;  %v4481_v7 = vrot.slane %v4474_v26, %v19107_v53  ;;  %v4502_v61 = vrot.slane %v3613_v23, %v19107_v53  ;;  %v4558_v47 = vunpack.c.l.b16 %v4299_v42 }
 0x208   : > { %v4559_v50 = vunpack.c.l.b16 %v4313_v29  ;;  %v4495_v27 = vrot.slane %v4488_v39, %v19107_v53  ;;  %v4560_v25 = vunpack.c.l.b16 %v4327_v3  ;;  %v4561_v12 = vunpack.c.l.b16 %v4341_v0 }
 0x209   : > { %v4562_v52 = vunpack.c.l.b16 %v4355_v5  ;;  %v4509_v30 = vrot.slane %v4502_v61, %v19107_v53  ;;  %v4563_v20 = vunpack.c.l.b16 %v4369_v40  ;;  %v4564_v6 = vunpack.c.l.b16 %v4383_v63 }
 0x20a   : > { %v4565_v57 = vunpack.c.l.b16 %v4397_v16  ;;  %v4566_v19 = vunpack.c.l.b16 %v4411_v54  ;;  %v4567_v15 = vunpack.c.l.b16 %v4425_v41  ;;  %v4568_v35 = vunpack.c.l.b16 %v4439_v17 }
 0x20b   : > { %v4569_v31 = vunpack.c.l.b16 %v4453_v32  ;;  %v4570_v37 = vunpack.c.l.b16 %v4467_v59  ;;  %v4571_v26 = vunpack.c.l.b16 %v4481_v7  ;;  %v4572_v33 = vunpack.c.l.b16 %v4495_v27 }
 0x20c   : > { %v4573_v23 = vunpack.c.l.b16 %v4509_v30  ;;  %v4658_v42 = vrot.slane %v4559_v50, 7  ;;  %v4660_v29 = vrot.slane %v4560_v25, 6  ;;  %v4662_v10 = vrot.slane %v4561_v12, 5 }
 0x20d   : > { %v4664_v39 = vrot.slane %v4562_v52, 4  ;;  %v4666_v3 = vrot.slane %v4563_v20, 3  ;;  %v4668_v0 = vrot.slane %v4564_v6, 2  ;;  %v4670_v5 = vrot.slane %v4565_v57, 1 }
 0x20e   : > { %v4672_v21 = vrot.slane %v4567_v15, 7  ;;  %v4659_v40 = vsel %vm2407_vm8, %v4658_v42, %v4558_v47  ;;  %v4674_v63 = vrot.slane %v4568_v35, 6  ;;  %v4676_v16 = vrot.slane %v4569_v31, 5 }
 0x20f   : > { %v4678_v54 = vrot.slane %v4570_v37, 4  ;;  %v4661_v41 = vsel %vm2410_vm11, %v4660_v29, %v4659_v40  ;;  %v4680_v32 = vrot.slane %v4571_v26, 3  ;;  %v4682_v59 = vrot.slane %v4572_v33, 2 }
 0x210   : > { %v4673_v17 = vsel %vm2407_vm8, %v4672_v21, %v4566_v19  ;;  %v4663_v7 = vsel %vm2413_vm12, %v4662_v10, %v4661_v41  ;;  %v4684_v50 = vrot.slane %v4573_v23, 1  ;;  %v2124_v6 = vrot.slane %v21060_v60, %v19107_v53 }
 0x211   : > { %v4675_v61 = vsel %vm2410_vm11, %v4674_v63, %v4673_v17  ;;  %v4665_v27 = vsel %vm2416_vm13, %v4664_v39, %v4663_v7  ;;  %v2138_v37 = vrot.slane %v21065_v45, %v19107_v53  ;;  %v2152_v19 = vrot.slane %v21074_v14, %v19107_v53 }
 0x212   : > { %v4677_v35 = vsel %vm2413_vm12, %v4676_v16, %v4675_v61  ;;  %v4667_v33 = vsel %vm2419_vm0, %v4666_v3, %v4665_v27  ;;  %v2131_v21 = vrot.slane %v2124_v6, %v19107_v53  ;;  %v2166_v47 = vrot.slane %v21082_v58, %v19107_v53 }
 0x213   : > { %v4679_v10 = vsel %vm2416_vm13, %v4678_v54, %v4677_v35  ;;  %v4669_v60 = vsel %vm2422_vm2, %v4668_v0, %v4667_v33  ;;  %v2145_v12 = vrot.slane %v2138_v37, %v19107_v53  ;;  %v2159_v45 = vrot.slane %v2152_v19, %v19107_v53 }
 0x214   : > { %v4681_v25 = vsel %vm2419_vm0, %v4680_v32, %v4679_v10  ;;  %v4671_v52 = vsel %vm2425_vm4, %v4670_v5, %v4669_v60  ;;  %v2173_v30 = vrot.slane %v2166_v47, %v19107_v53  ;;  %v2236_v20 = vrot.slane %v21068_v46, %v19107_v53 }
 0x215   : > { %v4683_v14 = vsel %vm2422_vm2, %v4682_v59, %v4681_v25  ;;  %v2250_v58 = vrot.slane %v21077_v44, %v19107_v53  ;;  %v2264_v15 = vrot.slane %v21086_v13, %v19107_v53  ;;  %v2278_v31 = vrot.slane %v21092_v62, %v19107_v53 }
 0x216   : > { %v4685_v57 = vsel %vm2425_vm4, %v4684_v50, %v4683_v14  ;;  %v2243_v23 = vrot.slane %v2236_v20, %v19107_v53  ;;  %v2390_v42 = vunpack.c.l.b16 %v2131_v21  ;;  %v2391_v29 = vunpack.c.l.b16 %v2145_v12 }
 0x217   : > { %v4689_v26 = vpack.c.b16 %v4685_v57, %v4671_v52  ;;  %v2257_v39 = vrot.slane %v2250_v58, %v19107_v53  ;;  %v2271_v46 = vrot.slane %v2264_v15, %v19107_v53  ;;  %v2285_v3 = vrot.slane %v2278_v31, %v19107_v53 }
 0x218   : > { %v2392_v0 = vunpack.c.l.b16 %v2159_v45  ;;  %v2393_v44 = vunpack.c.l.b16 %v2173_v30  ;;  %v2398_v5 = vunpack.c.l.b16 %v2243_v23  ;;  %v2497_v40 = vrot.slane %v2391_v29, 7 }
 0x219   : > { %17547 = vmatprep.mubr.bf16.mxu0 %v4689_v26  ;;  %v23553_v13 = vunpack.c.l.b16 %v20952_v51  ;;  %v2399_v62 = vunpack.c.l.b16 %v2257_v39  ;;  %v2400_v16 = vunpack.c.l.b16 %v2271_v46  ;;  %v2401_v54 = vunpack.c.l.b16 %v2285_v3 }
 0x21a   : > { %v2499_v41 = vrot.slane %v2392_v0, 6  ;;  %v2498_v17 = vsel %vm2407_vm8, %v2497_v40, %v2390_v42  ;;  %v2501_v32 = vrot.slane %v2393_v44, 5  ;;  %v23554_v59 = vunpack.c.l.b16 %v20962_v4 }
 0x21b   : > { %v2503_v63 = vrot.slane %v23553_v13, 4  ;;  %v23555_v61 = vunpack.c.l.b16 %v20981_v34  ;;  %v23556_v27 = vunpack.c.l.b16 %v20995_v43  ;;  %v2511_v51 = vrot.slane %v2399_v62, 7 }
 0x21c   : > { %v2505_v7 = vrot.slane %v23554_v59, 3  ;;  %v2500_v6 = vsel %vm2410_vm11, %v2499_v41, %v2498_v17  ;;  %v2513_v37 = vrot.slane %v2400_v16, 6  ;;  %v2515_v33 = vrot.slane %v2401_v54, 5 }
 0x21d   : > { %v2507_v50 = vrot.slane %v23555_v61, 2  ;;  %v2509_v35 = vrot.slane %v23556_v27, 1  ;;  %v2502_v19 = vsel %vm2413_vm12, %v2501_v32, %v2500_v6  ;;  %v23557_v10 = vunpack.c.l.b16 %v21013_v28 }
 0x21e   : > { %v23558_v47 = vunpack.c.l.b16 %v21016_v9  ;;  %v2504_v60 = vsel %vm2416_vm13, %v2503_v63, %v2502_v19  ;;  %v2512_v34 = vsel %vm2407_vm8, %v2511_v51, %v2398_v5  ;;  %v23559_v25 = vunpack.c.l.b16 %v21021_v11 }
 0x21f   : > { %v2517_v21 = vrot.slane %v23557_v10, 4  ;;  %v23560_v43 = vunpack.c.l.b16 %v21024_v22  ;;  %v2506_v52 = vsel %vm2419_vm0, %v2505_v7, %v2504_v60  ;;  %v2514_v14 = vsel %vm2410_vm11, %v2513_v37, %v2512_v34  ;;  %v23566_v60 = vld [vmem:[#allocation24_spill] sm:$0xff] }
 0x220   : > { %v2519_v4 = vrot.slane %v23558_v47, 3  ;;  %v2521_v12 = vrot.slane %v23559_v25, 2  ;;  %v13669_v28 = vshll.u32 %v20762_v36, 16  ;;  %v13672_v30 = vshrl.u32 %v20762_v36, 16 }
 0x221   : > { %v2523_v45 = vrot.slane %v23560_v43, 1  ;;  %v2508_v9 = vsel %vm2422_vm2, %v2507_v50, %v2506_v52  ;;  %v2516_v20 = vsel %vm2413_vm12, %v2515_v33, %v2514_v14  ;;  %v13677_v57 = vshll.u32 %v20756_v56, 16  ;;  %v23563_v50 = vld [vmem:[#allocation23_spill] sm:$0xff]  ;;  %v23565_v33 = vld [vmem:[#allocation22_spill] sm:$0xff]  ;;  %v23567_v43 = vld [vmem:[#allocation25_spill] sm:$0xff] }
 0x222   : > { %v13680_v11 = vshrl.u32 %v20756_v56, 16  ;;  %v2510_v58 = vsel %vm2425_vm4, %v2509_v35, %v2508_v9  ;;  %v2518_v22 = vsel %vm2416_vm13, %v2517_v21, %v2516_v20  ;;  %v23561_v15 = vshrl.u32 %v20752_v18, 16  ;;  %v23564_v35 = vld [vmem:[#allocation21_spill] sm:$0xff]  ;;  %v23568_v14 = vld [vmem:[#allocation20_spill] sm:$0xff]  ;;  %v23570_v20 = vld [vmem:[#allocation6_spill] sm:$0xff] }
 0x223   : > { %v13685_v26 = vshll.u32 %v20869_v1, 16  ;;  %v2520_v23 = vsel %vm2419_vm0, %v2519_v4, %v2518_v22  ;;  %v13679_v42 = vsel %vm19258_vm10, %v13672_v30, %v13677_v57  ;;  %v13688_v29 = vshrl.u32 %v20869_v1, 16 }
 0x224   : > { %v13671_v31 = vsel %vm19258_vm10, %v23561_v15, %v13669_v28  ;;  %v13693_v39 = vshll.u32 %v20873_v49, 16  ;;  %v2522_v46 = vsel %vm2422_vm2, %v2521_v12, %v2520_v23  ;;  %v13696_v0 = vshrl.u32 %v20873_v49, 16 }
 0x225   : > { %v13687_v3 = vsel %vm19258_vm10, %v13680_v11, %v13685_v26  ;;  %v13701_v44 = vshll.u32 %v20881_v24, 16  ;;  %v2524_v5 = vsel %vm2425_vm4, %v2523_v45, %v2522_v46  ;;  %v13704_v13 = vshrl.u32 %v20881_v24, 16  ;;  %v23571_v11 = vld [vmem:[#allocation26_spill] sm:$0xff] }
 0x226   : > { %v13695_v40 = vsel %vm19258_vm10, %v13688_v29, %v13693_v39  ;;  %v23562_v63 = vrot.slane %v20850_v8, %v19107_v53  ;;  %v2528_v16 = vpack.c.b16 %v2524_v5, %v2510_v58  ;;  %v13713_v41 = vshrl.u32 %v20884_v2, 16 }
 0x227   : > { %v13703_v54 = vsel %vm19258_vm10, %v13696_v0, %v13701_v44  ;;  %v13718_v17 = vshll.u32 %v20890_v55, 16  ;;  %v13721_v59 = vshrl.u32 %v20890_v55, 16  ;;  %v13726_v7 = vshll.u32 %v20900_v48, 16 }
 0x228   : > { %v13709_v62 = vshll.u32 %v23562_v63, 16  ;;  %v13729_v61 = vshrl.u32 %v20900_v48, 16  ;;  %17548 = vmatmul.mubr.bf16.gmra.mrb[12].mxu0 %v2528_v16  ;;  %v13734_v6 = vshll.u32 %v23563_v50, 16  ;;  %v13737_v27 = vshrl.u32 %v23563_v50, 16 }
 0x229   : > { %v13720_v8 = vsel %vm19258_vm10, %v13713_v41, %v13718_v17  ;;  %v13742_v51 = vshll.u32 %v23564_v35, 16  ;;  %v13728_v37 = vsel %vm19258_vm10, %v13721_v59, %v13726_v7  ;;  %v13745_v19 = vshrl.u32 %v23564_v35, 16 }
 0x22a   : > { %v13711_v32 = vsel %vm19258_vm10, %v13704_v13, %v13709_v62  ;;  %v13750_v10 = vshll.u32 %v23565_v33, 16  ;;  %v13753_v21 = vshrl.u32 %v23565_v33, 16  ;;  %v13736_v47 = vsel %vm19258_vm10, %v13729_v61, %v13734_v6 }
 0x22b   : > { %v13744_v4 = vsel %vm19258_vm10, %v13737_v27, %v13742_v51  ;;  %v13758_v34 = vshll.u32 %v23566_v60, 16  ;;  %v13761_v25 = vshrl.u32 %v23566_v60, 16  ;;  %v13766_v45 = vshll.u32 %v23567_v43, 16 }
 0x22c   : > { %v13752_v12 = vsel %vm19258_vm10, %v13745_v19, %v13750_v10  ;;  %v13769_v52 = vshrl.u32 %v23567_v43, 16  ;;  %v23569_v28 = vrot.slane %v23568_v14, %v19107_v53  ;;  %v14173_v57 = vrot.slane %v23570_v20, %v19107_v53 }
 0x22d   : > { %v13760_v9 = vsel %vm19258_vm10, %v13753_v21, %v13758_v34  ;;  %v14187_v58 = vrot.slane %v23571_v11, %v19107_v53  ;;  %v14201_v22 = vrot.slane %v13671_v31, %v19107_v53  ;;  %v13768_v15 = vsel %vm19258_vm10, %v13761_v25, %v13766_v45 }
 0x22e   : > { %v13774_v30 = vshll.u32 %v23569_v28, 16  ;;  %v14215_v23 = vrot.slane %v13679_v42, %v19107_v53  ;;  %v14229_v29 = vrot.slane %v13687_v3, %v19107_v53  ;;  %v14180_v39 = vrot.slane %v14173_v57, %v19107_v53 }
 0x22f   : > { %v14194_v46 = vrot.slane %v14187_v58, %v19107_v53  ;;  %v14208_v0 = vrot.slane %v14201_v22, %v19107_v53  ;;  %v14243_v44 = vrot.slane %v13695_v40, %v19107_v53  ;;  %v14257_v13 = vrot.slane %v13703_v54, %v19107_v53 }
 0x230   : > { %v13776_v26 = vsel %vm19258_vm10, %v13769_v52, %v13774_v30  ;;  %v14222_v31 = vrot.slane %v14215_v23, %v19107_v53  ;;  %v14236_v5 = vrot.slane %v14229_v29, %v19107_v53  ;;  %v14271_v63 = vrot.slane %v13711_v32, %v19107_v53 }
 0x231   : > { %v14250_v42 = vrot.slane %v14243_v44, %v19107_v53  ;;  %v14285_v3 = vrot.slane %v13720_v8, %v19107_v53  ;;  %v14299_v62 = vrot.slane %v13728_v37, %v19107_v53  ;;  %v14313_v16 = vrot.slane %v13736_v47, %v19107_v53 }
 0x232   : > { %v14264_v41 = vrot.slane %v14257_v13, %v19107_v53  ;;  %v14278_v40 = vrot.slane %v14271_v63, %v19107_v53  ;;  %v14327_v17 = vrot.slane %v13744_v4, %v19107_v53  ;;  %v14341_v59 = vrot.slane %v13752_v12, %v19107_v53 }
 0x233   : > { %v14292_v54 = vrot.slane %v14285_v3, %v19107_v53  ;;  %v14306_v32 = vrot.slane %v14299_v62, %v19107_v53  ;;  %v14320_v7 = vrot.slane %v14313_v16, %v19107_v53  ;;  %v14355_v61 = vrot.slane %v13760_v9, %v19107_v53 }
 0x234   : > { %v14334_v8 = vrot.slane %v14327_v17, %v19107_v53  ;;  %v14348_v6 = vrot.slane %v14341_v59, %v19107_v53  ;;  %v14369_v27 = vrot.slane %v13768_v15, %v19107_v53  ;;  %v14383_v51 = vrot.slane %v13776_v26, %v19107_v53  ;;  %v23572_v59 = vld [vmem:[#allocation16_spill] sm:$0xff] }
 0x235   : > { %v14362_v37 = vrot.slane %v14355_v61, %v19107_v53  ;;  %v15063_v19 = vunpack.c.l.b16 %v14180_v39  ;;  %v15064_v10 = vunpack.c.l.b16 %v14194_v46  ;;  %v15065_v21 = vunpack.c.l.b16 %v14208_v0  ;;  %v23573_v61 = vld [vmem:[#allocation19_spill] sm:$0xff] }
 0x236   : > { %v14376_v47 = vrot.slane %v14369_v27, %v19107_v53  ;;  %v14390_v4 = vrot.slane %v14383_v51, %v19107_v53  ;;  %v15066_v34 = vunpack.c.l.b16 %v14222_v31  ;;  %v15067_v25 = vunpack.c.l.b16 %v14236_v5 }
 0x237   : > { %v15068_v12 = vunpack.c.l.b16 %v14250_v42  ;;  %v15069_v45 = vunpack.c.l.b16 %v14264_v41  ;;  %v15070_v52 = vunpack.c.l.b16 %v14278_v40  ;;  %v15071_v14 = vunpack.c.l.b16 %v14292_v54 }
 0x238   : > { %v15072_v28 = vunpack.c.l.b16 %v14306_v32  ;;  %v15073_v30 = vunpack.c.l.b16 %v14320_v7  ;;  %v15074_v9 = vunpack.c.l.b16 %v14334_v8  ;;  %v15075_v20 = vunpack.c.l.b16 %v14348_v6 }
 0x239   : > { %v15076_v57 = vunpack.c.l.b16 %v14362_v37  ;;  %v15077_v11 = vunpack.c.l.b16 %v14376_v47  ;;  %v15078_v58 = vunpack.c.l.b16 %v14390_v4  ;;  %v15127_v22 = vrot.slane %v15064_v10, 7 }
 0x23a   : > { %v15129_v15 = vrot.slane %v15065_v21, 6  ;;  %v15131_v26 = vrot.slane %v15066_v34, 5  ;;  %v15133_v23 = vrot.slane %v15067_v25, 4  ;;  %v15135_v29 = vrot.slane %v15068_v12, 3 }
 0x23b   : > { %v15128_v39 = vsel %vm2407_vm8, %v15127_v22, %v15063_v19  ;;  %v15137_v46 = vrot.slane %v15069_v45, 2  ;;  %v15139_v0 = vrot.slane %v15070_v52, 1  ;;  %v15141_v44 = vrot.slane %v15072_v28, 7 }
 0x23c   : > { %v15130_v31 = vsel %vm2410_vm11, %v15129_v15, %v15128_v39  ;;  %v15143_v5 = vrot.slane %v15073_v30, 6  ;;  %v15145_v13 = vrot.slane %v15074_v9, 5  ;;  %v15147_v63 = vrot.slane %v15075_v20, 4 }
 0x23d   : > { %v15132_v42 = vsel %vm2413_vm12, %v15131_v26, %v15130_v31  ;;  %v15142_v3 = vsel %vm2407_vm8, %v15141_v44, %v15071_v14  ;;  %v15149_v62 = vrot.slane %v15076_v57, 3  ;;  %v15151_v16 = vrot.slane %v15077_v11, 2 }
 0x23e   : > { %v15134_v41 = vsel %vm2416_vm13, %v15133_v23, %v15132_v42  ;;  %v15144_v40 = vsel %vm2410_vm11, %v15143_v5, %v15142_v3  ;;  %v15153_v17 = vrot.slane %v15078_v58, 1  ;;  %v12025_v54 = vrot.slane %v23572_v59, %v19107_v53 }
 0x23f   : > { %v15136_v32 = vsel %vm2419_vm0, %v15135_v29, %v15134_v41  ;;  %v15146_v7 = vsel %vm2413_vm12, %v15145_v13, %v15144_v40  ;;  %v12039_v8 = vrot.slane %v23573_v61, %v19107_v53  ;;  %v12053_v6 = vrot.slane %v20752_v18, %v19107_v53 }
 0x240   : > { %v15138_v27 = vsel %vm2422_vm2, %v15137_v46, %v15136_v32  ;;  %v15148_v51 = vsel %vm2416_vm13, %v15147_v63, %v15146_v7  ;;  %v12032_v37 = vrot.slane %v12025_v54, %v19107_v53  ;;  %v12067_v19 = vrot.slane %v20762_v36, %v19107_v53  ;;  %v18239_v54 = vld.sshfl [vmem:[#allocation2 + $0xc] sm:$0x32 pattern:$0x75316420] }
 0x241   : > { %v15140_v10 = vsel %vm2425_vm4, %v15139_v0, %v15138_v27  ;;  %v15150_v21 = vsel %vm2419_vm0, %v15149_v62, %v15148_v51  ;;  %v12046_v47 = vrot.slane %v12039_v8, %v19107_v53  ;;  %v12060_v4 = vrot.slane %v12053_v6, %v19107_v53 }
 0x242   : > { %v15152_v34 = vsel %vm2422_vm2, %v15151_v16, %v15150_v21  ;;  %v12074_v18 = vrot.slane %v12067_v19, %v19107_v53  ;;  %v12081_v25 = vrot.slane %v20756_v56, %v19107_v53  ;;  %v12095_v12 = vrot.slane %v20869_v1, %v19107_v53 }
 0x243   : > { %v15154_v36 = vsel %vm2425_vm4, %v15153_v17, %v15152_v34  ;;  %v12109_v45 = vrot.slane %v20873_v49, %v19107_v53  ;;  %v12123_v52 = vrot.slane %v20881_v24, %v19107_v53  ;;  %v12137_v14 = vrot.slane %v20884_v2, %v19107_v53 }
 0x244   : > { %v15239_v28 = vpack.c.b16 %v15154_v36, %v15140_v10  ;;  %v12088_v30 = vrot.slane %v12081_v25, %v19107_v53  ;;  %v12102_v9 = vrot.slane %v12095_v12, %v19107_v53  ;;  %v12151_v56 = vrot.slane %v20890_v55, %v19107_v53  ;;  %v23574_v12 = vld [vmem:[#allocation8_spill] sm:$0xff] }
 0x245   : > { %v12116_v1 = vrot.slane %v12109_v45, %v19107_v53  ;;  %v12130_v20 = vrot.slane %v12123_v52, %v19107_v53  ;;  %v12144_v49 = vrot.slane %v12137_v14, %v19107_v53  ;;  %v12165_v24 = vrot.slane %v20900_v48, %v19107_v53  ;;  %v936_v45 = vld [vmem:[#allocation2 + $0x2c] sm:$0x1] }
 0x246   : > { %17718 = vmatprep.mubr.bf16.mxu1 %v15239_v28  ;;  %v12158_v2 = vrot.slane %v12151_v56, %v19107_v53  ;;  %v12179_v57 = vrot.slane %v23563_v50, %v19107_v53  ;;  %v12193_v11 = vrot.slane %v23564_v35, %v19107_v53  ;;  %v12207_v55 = vrot.slane %v23565_v33, %v19107_v53  ;;  %v23575_v28 = vld [vmem:[#allocation9_spill] sm:$0xff] }
 0x247   : > { %v12172_v58 = vrot.slane %v12165_v24, %v19107_v53  ;;  %v12221_v22 = vrot.slane %v23566_v60, %v19107_v53  ;;  %v12235_v48 = vrot.slane %v23567_v43, %v19107_v53  ;;  %v12915_v15 = vunpack.c.l.b16 %v12032_v37 }
 0x248   : > { %v12186_v26 = vrot.slane %v12179_v57, %v19107_v53  ;;  %v12200_v23 = vrot.slane %v12193_v11, %v19107_v53  ;;  %v12214_v50 = vrot.slane %v12207_v55, %v19107_v53  ;;  %v12916_v29 = vunpack.c.l.b16 %v12046_v47 }
 0x249   : > { %v12228_v35 = vrot.slane %v12221_v22, %v19107_v53  ;;  %v12242_v33 = vrot.slane %v12235_v48, %v19107_v53  ;;  %v12917_v39 = vunpack.c.l.b16 %v12060_v4  ;;  %v12918_v46 = vunpack.c.l.b16 %v12074_v18  ;;  %v922_v4 = vld [vmem:[#allocation2 + $0x14] sm:$0x1]  ;;  %v18243_v22 = vld.sshfl [vmem:[#allocation2 + $0x28] sm:$0x33 pattern:$0x75316420] }
 0x24a   : > { %v12919_v0 = vunpack.c.l.b16 %v12088_v30  ;;  %v12920_v44 = vunpack.c.l.b16 %v12102_v9  ;;  %v12921_v60 = vunpack.c.l.b16 %v12116_v1  ;;  %v12922_v31 = vunpack.c.l.b16 %v12130_v20  ;;  %v18240_v9 = vld.sshfl [vmem:[#allocation2 + $0x10] sm:$0x33 pattern:$0x75316420] }
 0x24b   : > { %v12923_v5 = vunpack.c.l.b16 %v12144_v49  ;;  %v12924_v43 = vunpack.c.l.b16 %v12158_v2  ;;  %v12925_v13 = vunpack.c.l.b16 %v12172_v58  ;;  %v12926_v63 = vunpack.c.l.b16 %v12186_v26  ;;  %v18242_v2 = vld.sshfl [vmem:[#allocation2 + $0x24] sm:$0x32 pattern:$0x75316420] }
 0x24c   : > { %v12927_v42 = vunpack.c.l.b16 %v12200_v23  ;;  %v12928_v3 = vunpack.c.l.b16 %v12214_v50  ;;  %v12929_v62 = vunpack.c.l.b16 %v12228_v35  ;;  %v12930_v16 = vunpack.c.l.b16 %v12242_v33 }
 0x24d   : > { %v12979_v41 = vrot.slane %v12916_v29, 7  ;;  %v12981_v40 = vrot.slane %v12917_v39, 6  ;;  %v12983_v17 = vrot.slane %v12918_v46, 5  ;;  %v12985_v59 = vrot.slane %v12919_v0, 4 }
 0x24e   : > { %v12987_v32 = vrot.slane %v12920_v44, 3  ;;  %v12989_v7 = vrot.slane %v12921_v60, 2  ;;  %v12991_v61 = vrot.slane %v12922_v31, 1  ;;  %v12993_v8 = vrot.slane %v12924_v43, 7  ;;  %v21448_v31 = vld [vmem:[%s23419_s4 + $0x208] sm:$0xff]  }
 0x24f   : > { %v12980_v6 = vsel %vm2407_vm8, %v12979_v41, %v12915_v15  ;;  %v12995_v27 = vrot.slane %v12925_v13, 6  ;;  %v12997_v51 = vrot.slane %v12926_v63, 5  ;;  %v12999_v37 = vrot.slane %v12927_v42, 4  ;;  %v21470_v41 = vld [vmem:[%s23419_s4 + $0x200] sm:$0xff]  }
 0x250   : > { %v12982_v19 = vsel %vm2410_vm11, %v12981_v40, %v12980_v6  ;;  %v12994_v10 = vsel %vm2407_vm8, %v12993_v8, %v12923_v5  ;;  %v13001_v21 = vrot.slane %v12928_v3, 3  ;;  %v13003_v47 = vrot.slane %v12929_v62, 2 }
 0x251   : > { %v12984_v34 = vsel %vm2413_vm12, %v12983_v17, %v12982_v19  ;;  %v12996_v18 = vsel %vm2410_vm11, %v12995_v27, %v12994_v10  ;;  %v13005_v25 = vrot.slane %v12930_v16, 1  ;;  %v608_v36 = vrot.slane %v23574_v12, 4  ;;  %v21494_v27 = vld [vmem:[%s23419_s4 + $0x210] sm:$0xff]  }
 0x252   : > { %v12986_v52 = vsel %vm2416_vm13, %v12985_v59, %v12984_v34  ;;  %v12998_v14 = vsel %vm2413_vm12, %v12997_v51, %v12996_v18  ;;  %v642_v30 = vrot.slane %v23575_v28, 4  ;;  %v10029_v56 = vcombine.high %v18239_v54, %v18239_v54 }
 0x253   : > { %v12988_v1 = vsel %vm2419_vm0, %v12987_v32, %v12986_v52  ;;  %v13000_v20 = vsel %vm2416_vm13, %v12999_v37, %v12998_v14  ;;  %v923_v24 = vsel %vm19310_vm5, %v608_v36, %v922_v4  ;;  %v10036_v57 = vrot.slane %v18239_v54, %v19107_v53 }
 0x254   : > { %v12990_v11 = vsel %vm2422_vm2, %v12989_v7, %v12988_v1  ;;  %v13002_v55 = vsel %vm2419_vm0, %v13001_v21, %v13000_v20  ;;  %924 = vst [vmem:[#allocation2 + $0x14] sm:$0x1] %v923_v24  ;;  %v937_v58 = vsel %vm19310_vm5, %v642_v30, %v936_v45  ;;  %v10043_v48 = vrot.slane %v10029_v56, %v19107_v53 }
 0x255   : > { %v12992_v15 = vsel %vm2425_vm4, %v12991_v61, %v12990_v11  ;;  %v13004_v26 = vsel %vm2422_vm2, %v13003_v47, %v13002_v55  ;;  %938 = vst [vmem:[#allocation2 + $0x2c] sm:$0x1] %v937_v58  ;;  %v10044_v23 = vcombine.high %v10036_v57, %v10036_v57  ;;  %v10053_v50 = vcombine.high %v18240_v9, %v18240_v9 }
 0x256   : > { %v13006_v29 = vsel %vm2425_vm4, %v13005_v25, %v13004_v26  ;;  %v10045_v35 = vcombine.high %v10043_v48, %v10043_v48  ;;  %v21439_v33 = vrot.slane %v18240_v9, %v19107_v53  ;;  %v10091_v39 = vcombine.high %v18242_v2, %v18242_v2 }
 0x257   : > { %v13091_v46 = vpack.c.b16 %v13006_v29, %v12992_v15  ;;  %v21442_v0 = vrot.slane %v10053_v50, %v19107_v53  ;;  %v10098_v44 = vrot.slane %v18242_v2, %v19107_v53  ;;  %v10115_v60 = vcombine.high %v18243_v22, %v18243_v22 }
 0x258   : > { %v21452_v5 = vcombine.high %v21439_v33, %v21439_v33  ;;  %v10105_v43 = vrot.slane %v10091_v39, %v19107_v53  ;;  %v21456_v13 = vrot.slane %v18243_v22, %v19107_v53  ;;  %v10524_v63 = vrot.slane %v10043_v48, %v19107_v53 }
 0x259   : > { %17719 = vmatmul.mubr.bf16.vlgmr.msra.gmra.mrb[16].mxu1 %v13091_v46  ;;  %v21461_v42 = vcombine.high %v21442_v0, %v21442_v0  ;;  %v10106_v3 = vcombine.high %v10098_v44, %v10098_v44  ;;  %v21464_v62 = vrot.slane %v10115_v60, %v19107_v53  ;;  %v10538_v16 = vrot.slane %v10044_v23, %v19107_v53 }
 0x25a   : > { %18821 = vmatpush3.bf16.msra.mxu1 %v21470_v41  ;;  %v10107_v40 = vcombine.high %v10105_v43, %v10105_v43  ;;  %v21475_v17 = vcombine.high %v21456_v13, %v21456_v13  ;;  %v21478_v59 = vrot.slane %v10524_v63, %v19107_v53  ;;  %v10552_v54 = vrot.slane %v10045_v35, %v19107_v53 }
 0x25b   : > { %v18241_v32 = vld.sshfl [vmem:[#allocation2 + $0x14] sm:$0x1 pattern:$0x75316420]  ;;  %v21483_v7 = vcombine.high %v21464_v62, %v21464_v62  ;;  %v10545_v61 = vrot.slane %v10538_v16, %v19107_v53  ;;  %v10566_v8 = vrot.slane %v21439_v33, %v19107_v53  ;;  %v10580_v6 = vrot.slane %v21442_v0, %v19107_v53  ;;  %18814 = vmatprep.subr.bf16.mxu1 %v21448_v31 }
 0x25c   : > { %v18244_v51 = vld.sshfl [vmem:[#allocation2 + $0x2c] sm:$0x1 pattern:$0x75316420]  ;;  %v21497_v37 = vrot.slane %v18241_v32, %v19107_v53  ;;  %v10559_v19 = vrot.slane %v10552_v54, %v19107_v53  ;;  %v10594_v10 = vrot.slane %v21452_v5, %v19107_v53  ;;  %v10608_v21 = vrot.slane %v21461_v42, %v19107_v53 }
 0x25d   : > { %v21505_v47 = vrot.slane %v18244_v51, %v19107_v53  ;;  %v10573_v4 = vrot.slane %v10566_v8, %v19107_v53  ;;  %v10587_v34 = vrot.slane %v10580_v6, %v19107_v53  ;;  %v10636_v18 = vrot.slane %v10105_v43, %v19107_v53  ;;  %v18151_v54 = vld.sshfl [vmem:[#allocation2 + $0xc] sm:$0x33 pattern:$0x75316420] }
 0x25e   : > { %v10601_v25 = vrot.slane %v10594_v10, %v19107_v53  ;;  %v10615_v12 = vrot.slane %v10608_v21, %v19107_v53  ;;  %v10622_v36 = vrot.slane %v21497_v37, %v19107_v53  ;;  %v10650_v45 = vrot.slane %v10106_v3, %v19107_v53  ;;  %18822 = vmatpush3.bf16.msra.mxu1 %v21448_v31  ;;  %v18154_v51 = vld.sshfl [vmem:[#allocation2 + $0x24] sm:$0x33 pattern:$0x75316420] }
 0x25f   : > { %v10643_v52 = vrot.slane %v10636_v18, %v19107_v53  ;;  %v10664_v14 = vrot.slane %v10107_v40, %v19107_v53  ;;  %v10678_v28 = vrot.slane %v21456_v13, %v19107_v53  ;;  %v10692_v30 = vrot.slane %v21464_v62, %v19107_v53  ;;  %18815 = vmatprep.subr.bf16.mxu1 %v21494_v27 }
 0x260   : > { %v10629_v9 = vrot.slane %v10622_v36, %v19107_v53  ;;  %v10657_v56 = vrot.slane %v10650_v45, %v19107_v53  ;;  %v10706_v1 = vrot.slane %v21475_v17, %v19107_v53  ;;  %v10720_v20 = vrot.slane %v21483_v7, %v19107_v53 }
 0x261   : > { %v10671_v24 = vrot.slane %v10664_v14, %v19107_v53  ;;  %v10685_v2 = vrot.slane %v10678_v28, %v19107_v53  ;;  %v10699_v57 = vrot.slane %v10692_v30, %v19107_v53  ;;  %v10734_v11 = vrot.slane %v21505_v47, %v19107_v53 }
 0x262   : > { %v10713_v55 = vrot.slane %v10706_v1, %v19107_v53  ;;  %v10727_v58 = vrot.slane %v10720_v20, %v19107_v53  ;;  %v11414_v22 = vunpack.c.l.b16 %v21478_v59  ;;  %v11415_v48 = vunpack.c.l.b16 %v10545_v61  ;;  %18823 = vmatpush3.bf16.msra.mxu1 %v21494_v27 }
 0x263   : > { %v10741_v15 = vrot.slane %v10734_v11, %v19107_v53  ;;  %v11416_v26 = vunpack.c.l.b16 %v10559_v19  ;;  %v11417_v23 = vunpack.c.l.b16 %v10573_v4  ;;  %v11418_v50 = vunpack.c.l.b16 %v10587_v34 }
 0x264   : > { %v11419_v29 = vunpack.c.l.b16 %v10601_v25  ;;  %v11420_v35 = vunpack.c.l.b16 %v10615_v12  ;;  %v11421_v39 = vunpack.c.l.b16 %v10629_v9  ;;  %v11422_v46 = vunpack.c.l.b16 %v10643_v52 }
 0x265   : > { %v11423_v44 = vunpack.c.l.b16 %v10657_v56  ;;  %v11424_v60 = vunpack.c.l.b16 %v10671_v24  ;;  %v11425_v43 = vunpack.c.l.b16 %v10685_v2  ;;  %v11426_v63 = vunpack.c.l.b16 %v10699_v57 }
 0x266   : > { %v11427_v3 = vunpack.c.l.b16 %v10713_v55  ;;  %v11428_v16 = vunpack.c.l.b16 %v10727_v58  ;;  %v11429_v40 = vunpack.c.l.b16 %v10741_v15  ;;  %v11478_v59 = vrot.slane %v11415_v48, 7 }
 0x267   : > { %v11480_v32 = vrot.slane %v11416_v26, 6  ;;  %v11482_v61 = vrot.slane %v11417_v23, 5  ;;  %v11484_v8 = vrot.slane %v11418_v50, 4  ;;  %v11486_v6 = vrot.slane %v11419_v29, 3 }
 0x268   : > { %v11479_v19 = vsel %vm2407_vm8, %v11478_v59, %v11414_v22  ;;  %v11488_v10 = vrot.slane %v11420_v35, 2  ;;  %v11490_v21 = vrot.slane %v11421_v39, 1  ;;  %v11492_v4 = vrot.slane %v11423_v44, 7 }
 0x269   : > { %v11481_v34 = vsel %vm2410_vm11, %v11480_v32, %v11479_v19  ;;  %v11494_v18 = vrot.slane %v11424_v60, 6  ;;  %v11496_v25 = vrot.slane %v11425_v43, 5  ;;  %v11498_v12 = vrot.slane %v11426_v63, 4 }
 0x26a   : > { %v11483_v36 = vsel %vm2413_vm12, %v11482_v61, %v11481_v34  ;;  %v11493_v45 = vsel %vm2407_vm8, %v11492_v4, %v11422_v46  ;;  %v11500_v52 = vrot.slane %v11427_v3, 3  ;;  %v11502_v14 = vrot.slane %v11428_v16, 2 }
 0x26b   : > { %v11485_v28 = vsel %vm2416_vm13, %v11484_v8, %v11483_v36  ;;  %v11495_v30 = vsel %vm2410_vm11, %v11494_v18, %v11493_v45  ;;  %v11504_v9 = vrot.slane %v11429_v40, 1  ;;  %v7881_v56 = vcombine.high %v18151_v54, %v18151_v54 }
 0x26c   : > { %v11487_v1 = vsel %vm2419_vm0, %v11486_v6, %v11485_v28  ;;  %v11497_v20 = vsel %vm2413_vm12, %v11496_v25, %v11495_v30  ;;  %v7888_v24 = vrot.slane %v18151_v54, %v19107_v53  ;;  %v7943_v2 = vcombine.high %v18154_v51, %v18154_v51 }
 0x26d   : > { %v11489_v57 = vsel %vm2422_vm2, %v11488_v10, %v11487_v1  ;;  %v11499_v11 = vsel %vm2416_vm13, %v11498_v12, %v11497_v20  ;;  %v7895_v55 = vrot.slane %v7881_v56, %v19107_v53  ;;  %v7950_v58 = vrot.slane %v18154_v51, %v19107_v53 }
 0x26e   : > { %v11491_v22 = vsel %vm2425_vm4, %v11490_v21, %v11489_v57  ;;  %v11501_v48 = vsel %vm2419_vm0, %v11500_v52, %v11499_v11  ;;  %v7896_v15 = vcombine.high %v7888_v24, %v7888_v24  ;;  %v7957_v26 = vrot.slane %v7943_v2, %v19107_v53 }
 0x26f   : > { %v11503_v23 = vsel %vm2422_vm2, %v11502_v14, %v11501_v48  ;;  %v7897_v50 = vcombine.high %v7895_v55, %v7895_v55  ;;  %v7958_v29 = vcombine.high %v7950_v58, %v7950_v58  ;;  %v8371_v35 = vshrl.u32 %v7888_v24, 16 }
 0x270   : > { %v11505_v39 = vsel %vm2425_vm4, %v11504_v9, %v11503_v23  ;;  %v7959_v46 = vcombine.high %v7957_v26, %v7957_v26  ;;  %v8376_v44 = vshll.u32 %v7895_v55, 16  ;;  %v8379_v60 = vshrl.u32 %v7895_v55, 16 }
 0x271   : > { %v11590_v43 = vpack.c.b16 %v11505_v39, %v11491_v22  ;;  %v8384_v63 = vshll.u32 %v7896_v15, 16  ;;  %v8387_v3 = vshrl.u32 %v7896_v15, 16  ;;  %v8392_v16 = vshll.u32 %v7897_v50, 16 }
 0x272   : > { %v8378_v40 = vsel %vm19258_vm10, %v8371_v35, %v8376_v44  ;;  %v8395_v59 = vshrl.u32 %v7897_v50, 16  ;;  %v8400_v54 = vshll.u32 %v21439_v33, 16  ;;  %v8403_v32 = vshrl.u32 %v21439_v33, 16 }
 0x273   : > { %17653 = vmatprep.mubr.bf16.mxu0 %v11590_v43  ;;  %v8386_v61 = vsel %vm19258_vm10, %v8379_v60, %v8384_v63  ;;  %v8394_v8 = vsel %vm19258_vm10, %v8387_v3, %v8392_v16  ;;  %v8408_v6 = vshll.u32 %v21442_v0, 16  ;;  %v8411_v51 = vshrl.u32 %v21442_v0, 16 }
 0x274   : > { %v8402_v19 = vsel %vm19258_vm10, %v8395_v59, %v8400_v54  ;;  %v8416_v10 = vshll.u32 %v21452_v5, 16  ;;  %v8419_v21 = vshrl.u32 %v21452_v5, 16  ;;  %v8424_v33 = vshll.u32 %v21461_v42, 16 }
 0x275   : > { %v8410_v4 = vsel %vm19258_vm10, %v8403_v32, %v8408_v6  ;;  %v8427_v34 = vshrl.u32 %v21461_v42, 16  ;;  %v8432_v18 = vshll.u32 %v21497_v37, 16  ;;  %v8436_v25 = vshrl.u32 %v7950_v58, 16 }
 0x276   : > { %v8418_v0 = vsel %vm19258_vm10, %v8411_v51, %v8416_v10  ;;  %v8426_v12 = vsel %vm19258_vm10, %v8419_v21, %v8424_v33  ;;  %v8441_v36 = vshll.u32 %v7957_v26, 16  ;;  %v8444_v45 = vshrl.u32 %v7957_v26, 16 }
 0x277   : > { %v8434_v5 = vsel %vm19258_vm10, %v8427_v34, %v8432_v18  ;;  %v8449_v52 = vshll.u32 %v7958_v29, 16  ;;  %v8452_v14 = vshrl.u32 %v7958_v29, 16  ;;  %v8457_v28 = vshll.u32 %v7959_v46, 16 }
 0x278   : > { %v8443_v42 = vsel %vm19258_vm10, %v8436_v25, %v8441_v36  ;;  %v8460_v30 = vshrl.u32 %v7959_v46, 16  ;;  %v8465_v37 = vshll.u32 %v21456_v13, 16  ;;  %v8468_v9 = vshrl.u32 %v21456_v13, 16 }
 0x279   : > { %v8451_v56 = vsel %vm19258_vm10, %v8444_v45, %v8449_v52  ;;  %v8459_v1 = vsel %vm19258_vm10, %v8452_v14, %v8457_v28  ;;  %v8473_v20 = vshll.u32 %v21464_v62, 16  ;;  %v8476_v24 = vshrl.u32 %v21464_v62, 16 }
 0x27a   : > { %v8467_v2 = vsel %vm19258_vm10, %v8460_v30, %v8465_v37  ;;  %v8481_v57 = vshll.u32 %v21475_v17, 16  ;;  %v8484_v11 = vshrl.u32 %v21475_v17, 16  ;;  %v8489_v55 = vshll.u32 %v21483_v7, 16  ;;  %v21642_v37 = vld [vmem:[%s23419_s4 + $0x218] sm:$0xff]  }
 0x27b   : > { %v8475_v13 = vsel %vm19258_vm10, %v8468_v9, %v8473_v20  ;;  %v8492_v58 = vshrl.u32 %v21483_v7, 16  ;;  %v8497_v22 = vshll.u32 %v21505_v47, 16  ;;  %v8896_v48 = vrot.slane %v8378_v40, %v19107_v53  ;;  %18816 = vmatprep.subr.bf16.mxu1 %v21642_v37 }
 0x27c   : > { %v8483_v62 = vsel %vm19258_vm10, %v8476_v24, %v8481_v57  ;;  %v8491_v15 = vsel %vm19258_vm10, %v8484_v11, %v8489_v55  ;;  %v8910_v26 = vrot.slane %v8386_v61, %v19107_v53  ;;  %v8924_v17 = vrot.slane %v8394_v8, %v19107_v53  ;;  %v18285_v55 = vld.sshfl [vmem:[#allocation2 + $0x48] sm:$0x33 pattern:$0x75316420]  ;;  %18824 = vmatpush3.bf16.msra.mxu1 %v21642_v37 }
 0x27d   : > { %v8499_v23 = vsel %vm19258_vm10, %v8492_v58, %v8497_v22  ;;  %v8903_v50 = vrot.slane %v8896_v48, %v19107_v53  ;;  %v8938_v7 = vrot.slane %v8402_v19, %v19107_v53  ;;  %v8952_v47 = vrot.slane %v8410_v4, %v19107_v53 }
 0x27e   : > { %v8917_v29 = vrot.slane %v8910_v26, %v19107_v53  ;;  %v8931_v35 = vrot.slane %v8924_v17, %v19107_v53  ;;  %v8966_v39 = vrot.slane %v8418_v0, %v19107_v53  ;;  %v8980_v46 = vrot.slane %v8426_v12, %v19107_v53 }
 0x27f   : > { %v8945_v44 = vrot.slane %v8938_v7, %v19107_v53  ;;  %v8959_v60 = vrot.slane %v8952_v47, %v19107_v53  ;;  %v8994_v43 = vrot.slane %v8434_v5, %v19107_v53  ;;  %v9008_v63 = vrot.slane %v8443_v42, %v19107_v53 }
 0x280   : > { %v8973_v3 = vrot.slane %v8966_v39, %v19107_v53  ;;  %v8987_v16 = vrot.slane %v8980_v46, %v19107_v53  ;;  %v9022_v40 = vrot.slane %v8451_v56, %v19107_v53  ;;  %v9036_v59 = vrot.slane %v8459_v1, %v19107_v53 }
 0x281   : > { %v9001_v54 = vrot.slane %v8994_v43, %v19107_v53  ;;  %v9015_v32 = vrot.slane %v9008_v63, %v19107_v53  ;;  %v9050_v61 = vrot.slane %v8467_v2, %v19107_v53  ;;  %v9064_v8 = vrot.slane %v8475_v13, %v19107_v53  ;;  %v18288_v63 = vld.sshfl [vmem:[#allocation2 + $0x60] sm:$0x33 pattern:$0x75316420] }
 0x282   : > { %v9029_v6 = vrot.slane %v9022_v40, %v19107_v53  ;;  %v9043_v51 = vrot.slane %v9036_v59, %v19107_v53  ;;  %v9078_v19 = vrot.slane %v8483_v62, %v19107_v53  ;;  %v9092_v10 = vrot.slane %v8491_v15, %v19107_v53  ;;  %v18286_v62 = vld.sshfl [vmem:[#allocation2 + $0x4c] sm:$0x33 pattern:$0x75316420] }
 0x283   : > { %v9057_v21 = vrot.slane %v9050_v61, %v19107_v53  ;;  %v9071_v33 = vrot.slane %v9064_v8, %v19107_v53  ;;  %v9106_v4 = vrot.slane %v8499_v23, %v19107_v53  ;;  %v9786_v34 = vunpack.c.l.b16 %v8903_v50 }
 0x284   : > { %v9085_v18 = vrot.slane %v9078_v19, %v19107_v53  ;;  %v9099_v25 = vrot.slane %v9092_v10, %v19107_v53  ;;  %v9787_v0 = vunpack.c.l.b16 %v8917_v29  ;;  %v9788_v12 = vunpack.c.l.b16 %v8931_v35 }
 0x285   : > { %v9113_v36 = vrot.slane %v9106_v4, %v19107_v53  ;;  %v9789_v45 = vunpack.c.l.b16 %v8945_v44  ;;  %v9790_v5 = vunpack.c.l.b16 %v8959_v60  ;;  %v9791_v52 = vunpack.c.l.b16 %v8973_v3  ;;  %v21671_v4 = vld.sshfl [vmem:[#allocation2 + $0x68] sm:$0x1 pattern:$0x75316420] }
 0x286   : > { %v9792_v14 = vunpack.c.l.b16 %v8987_v16  ;;  %v9793_v28 = vunpack.c.l.b16 %v9001_v54  ;;  %v9794_v42 = vunpack.c.l.b16 %v9015_v32  ;;  %v9795_v30 = vunpack.c.l.b16 %v9029_v6  ;;  %v18287_v54 = vld.sshfl [vmem:[#allocation2 + $0x50] sm:$0x1 pattern:$0x75316420] }
 0x287   : > { %v9796_v9 = vunpack.c.l.b16 %v9043_v51  ;;  %v9797_v56 = vunpack.c.l.b16 %v9057_v21  ;;  %v9798_v1 = vunpack.c.l.b16 %v9071_v33  ;;  %v9799_v20 = vunpack.c.l.b16 %v9085_v18  ;;  %v18289_v51 = vld.sshfl [vmem:[#allocation2 + $0x64] sm:$0x33 pattern:$0x75316420] }
 0x288   : > { %v9800_v24 = vunpack.c.l.b16 %v9099_v25  ;;  %v9801_v2 = vunpack.c.l.b16 %v9113_v36  ;;  %v9850_v57 = vrot.slane %v9787_v0, 7  ;;  %v9852_v11 = vrot.slane %v9788_v12, 6 }
 0x289   : > { %v9854_v13 = vrot.slane %v9789_v45, 5  ;;  %v9856_v58 = vrot.slane %v9790_v5, 4  ;;  %v9858_v22 = vrot.slane %v9791_v52, 3  ;;  %v9860_v48 = vrot.slane %v9792_v14, 2 }
 0x28a   : > { %v9851_v15 = vsel %vm2407_vm8, %v9850_v57, %v9786_v34  ;;  %v9862_v26 = vrot.slane %v9793_v28, 1  ;;  %v9864_v17 = vrot.slane %v9795_v30, 7  ;;  %v9866_v23 = vrot.slane %v9796_v9, 6 }
 0x28b   : > { %v9853_v50 = vsel %vm2410_vm11, %v9852_v11, %v9851_v15  ;;  %v9868_v7 = vrot.slane %v9797_v56, 5  ;;  %v9870_v47 = vrot.slane %v9798_v1, 4  ;;  %v9872_v29 = vrot.slane %v9799_v20, 3 }
 0x28c   : > { %v9855_v35 = vsel %vm2413_vm12, %v9854_v13, %v9853_v50  ;;  %v9865_v39 = vsel %vm2407_vm8, %v9864_v17, %v9794_v42  ;;  %v9874_v46 = vrot.slane %v9800_v24, 2  ;;  %v9876_v44 = vrot.slane %v9801_v2, 1 }
 0x28d   : > { %v9857_v60 = vsel %vm2416_vm13, %v9856_v58, %v9855_v35  ;;  %v9867_v43 = vsel %vm2410_vm11, %v9866_v23, %v9865_v39  ;;  %v13282_v3 = vcombine.high %v18285_v55, %v18285_v55  ;;  %v21653_v16 = vrot.slane %v18285_v55, %v19107_v53 }
 0x28e   : > { %v9859_v40 = vsel %vm2419_vm0, %v9858_v22, %v9857_v60  ;;  %v9869_v59 = vsel %vm2413_vm12, %v9868_v7, %v9867_v43  ;;  %v13306_v32 = vcombine.high %v18286_v62, %v18286_v62  ;;  %v21658_v61 = vrot.slane %v18286_v62, %v19107_v53 }
 0x28f   : > { %v9861_v8 = vsel %vm2422_vm2, %v9860_v48, %v9859_v40  ;;  %v9871_v6 = vsel %vm2416_vm13, %v9870_v47, %v9869_v59  ;;  %v21663_v19 = vrot.slane %v13282_v3, %v19107_v53  ;;  %v21667_v10 = vcombine.high %v21653_v16, %v21653_v16 }
 0x290   : > { %v9863_v21 = vsel %vm2425_vm4, %v9862_v26, %v9861_v8  ;;  %v9873_v33 = vsel %vm2419_vm0, %v9872_v29, %v9871_v6  ;;  %v21674_v34 = vrot.slane %v13306_v32, %v19107_v53  ;;  %v21678_v18 = vcombine.high %v21658_v61, %v21658_v61 }
 0x291   : > { %v9875_v25 = vsel %vm2422_vm2, %v9874_v46, %v9873_v33  ;;  %v21683_v0 = vcombine.high %v21663_v19, %v21663_v19  ;;  %v13336_v12 = vrot.slane %v18287_v54, %v19107_v53  ;;  %v13344_v36 = vcombine.high %v18288_v63, %v18288_v63 }
 0x292   : > { %v9877_v45 = vsel %vm2425_vm4, %v9876_v44, %v9875_v25  ;;  %v21689_v5 = vcombine.high %v21674_v34, %v21674_v34  ;;  %v21692_v52 = vrot.slane %v18288_v63, %v19107_v53  ;;  %v13368_v14 = vcombine.high %v18289_v51, %v18289_v51 }
 0x293   : > { %v9962_v28 = vpack.c.b16 %v9877_v45, %v9863_v21  ;;  %v21695_v42 = vrot.slane %v13344_v36, %v19107_v53  ;;  %v21698_v30 = vrot.slane %v18289_v51, %v19107_v53  ;;  %v13398_v9 = vrot.slane %v21671_v4, %v19107_v53 }
 0x294   : > { %v21704_v56 = vcombine.high %v21692_v52, %v21692_v52  ;;  %v21707_v1 = vrot.slane %v13368_v14, %v19107_v53  ;;  %v13778_v20 = vshrl.u32 %v21653_v16, 16  ;;  %v13783_v24 = vshll.u32 %v21663_v19, 16 }
 0x295   : > { %17654 = vmatmul.mubr.bf16.vlgmr.msra.gmra.mrb[16].mxu0 %v9962_v28  ;;  %v21713_v2 = vcombine.high %v21695_v42, %v21695_v42  ;;  %v21717_v57 = vcombine.high %v21698_v30, %v21698_v30  ;;  %v13786_v11 = vshrl.u32 %v21663_v19, 16  ;;  %v13791_v55 = vshll.u32 %v21667_v10, 16 }
 0x296   : > { %18790 = vmatpush3.bf16.msra.mxu0 %v21470_v41  ;;  %v21724_v13 = vcombine.high %v21707_v1, %v21707_v1  ;;  %v13785_v58 = vsel %vm19258_vm10, %v13778_v20, %v13783_v24  ;;  %v13794_v22 = vshrl.u32 %v21667_v10, 16  ;;  %v13799_v48 = vshll.u32 %v21683_v0, 16 }
 0x297   : > { %v13793_v62 = vsel %vm19258_vm10, %v13786_v11, %v13791_v55  ;;  %v13802_v15 = vshrl.u32 %v21683_v0, 16  ;;  %v13807_v26 = vshll.u32 %v21658_v61, 16  ;;  %v13810_v41 = vshrl.u32 %v21658_v61, 16  ;;  %18791 = vmatprep.subr.bf16.mxu0 %v21448_v31 }
 0x298   : > { %v13801_v17 = vsel %vm19258_vm10, %v13794_v22, %v13799_v48  ;;  %v13815_v23 = vshll.u32 %v21674_v34, 16  ;;  %v13818_v50 = vshrl.u32 %v21674_v34, 16  ;;  %v13823_v7 = vshll.u32 %v21678_v18, 16 }
 0x299   : > { %v13809_v47 = vsel %vm19258_vm10, %v13802_v15, %v13807_v26  ;;  %v13826_v29 = vshrl.u32 %v21678_v18, 16  ;;  %v13831_v35 = vshll.u32 %v21689_v5, 16  ;;  %v13834_v39 = vshrl.u32 %v21689_v5, 16 }
 0x29a   : > { %v13817_v46 = vsel %vm19258_vm10, %v13810_v41, %v13815_v23  ;;  %v13825_v44 = vsel %vm19258_vm10, %v13818_v50, %v13823_v7  ;;  %v13839_v60 = vshll.u32 %v13336_v12, 16  ;;  %v13843_v43 = vshrl.u32 %v21692_v52, 16  ;;  %18792 = vmatpush3.bf16.msra.mxu0 %v21448_v31 }
 0x29b   : > { %v13833_v63 = vsel %vm19258_vm10, %v13826_v29, %v13831_v35  ;;  %v13848_v3 = vshll.u32 %v21695_v42, 16  ;;  %v13851_v40 = vshrl.u32 %v21695_v42, 16  ;;  %v13856_v59 = vshll.u32 %v21704_v56, 16  ;;  %18793 = vmatprep.subr.bf16.mxu0 %v21494_v27 }
 0x29c   : > { %v13841_v54 = vsel %vm19258_vm10, %v13834_v39, %v13839_v60  ;;  %v13859_v32 = vshrl.u32 %v21704_v56, 16  ;;  %v13864_v8 = vshll.u32 %v21713_v2, 16  ;;  %v13867_v31 = vshrl.u32 %v21713_v2, 16 }
 0x29d   : > { %v13850_v6 = vsel %vm19258_vm10, %v13843_v43, %v13848_v3  ;;  %v13858_v51 = vsel %vm19258_vm10, %v13851_v40, %v13856_v59  ;;  %v13872_v21 = vshll.u32 %v21698_v30, 16  ;;  %v13875_v33 = vshrl.u32 %v21698_v30, 16 }
 0x29e   : > { %v13866_v4 = vsel %vm19258_vm10, %v13859_v32, %v13864_v8  ;;  %v13880_v25 = vshll.u32 %v21707_v1, 16  ;;  %v13883_v12 = vshrl.u32 %v21707_v1, 16  ;;  %v13888_v36 = vshll.u32 %v21717_v57, 16  ;;  %18794 = vmatpush3.bf16.msra.mxu0 %v21494_v27 }
 0x29f   : > { %v13874_v45 = vsel %vm19258_vm10, %v13867_v31, %v13872_v21  ;;  %v13891_v14 = vshrl.u32 %v21717_v57, 16  ;;  %v13896_v28 = vshll.u32 %v21724_v13, 16  ;;  %v13899_v20 = vshrl.u32 %v21724_v13, 16  ;;  %18795 = vmatprep.subr.bf16.mxu0 %v21642_v37 }
 0x2a0   : > { %v13882_v24 = vsel %vm19258_vm10, %v13875_v33, %v13880_v25  ;;  %v13890_v11 = vsel %vm19258_vm10, %v13883_v12, %v13888_v36  ;;  %v13904_v55 = vshll.u32 %v13398_v9, 16  ;;  %v14397_v27 = vrot.slane %v13785_v58, %v19107_v53 }
 0x2a1   : > { %v13898_v22 = vsel %vm19258_vm10, %v13891_v14, %v13896_v28  ;;  %v14411_v48 = vrot.slane %v13793_v62, %v19107_v53  ;;  %v14425_v15 = vrot.slane %v13801_v17, %v19107_v53  ;;  %v14439_v26 = vrot.slane %v13809_v47, %v19107_v53 }
 0x2a2   : > { %v13906_v41 = vsel %vm19258_vm10, %v13899_v20, %v13904_v55  ;;  %v14404_v23 = vrot.slane %v14397_v27, %v19107_v53  ;;  %v14453_v50 = vrot.slane %v13817_v46, %v19107_v53  ;;  %v14467_v9 = vrot.slane %v13825_v44, %v19107_v53  ;;  %18796 = vmatpush3.bf16.msra.mxu0 %v21642_v37 }
 0x2a3   : > { %v14418_v58 = vrot.slane %v14411_v48, %v19107_v53  ;;  %v14432_v7 = vrot.slane %v14425_v15, %v19107_v53  ;;  %v14446_v62 = vrot.slane %v14439_v26, %v19107_v53  ;;  %v14481_v17 = vrot.slane %v13833_v63, %v19107_v53 }
 0x2a4   : > { %v14460_v47 = vrot.slane %v14453_v50, %v19107_v53  ;;  %v14474_v29 = vrot.slane %v14467_v9, %v19107_v53  ;;  %v14495_v35 = vrot.slane %v13841_v54, %v19107_v53  ;;  %v14509_v39 = vrot.slane %v13850_v6, %v19107_v53 }
 0x2a5   : > { %v14488_v46 = vrot.slane %v14481_v17, %v19107_v53  ;;  %v14523_v37 = vrot.slane %v13858_v51, %v19107_v53  ;;  %v14537_v44 = vrot.slane %v13866_v4, %v19107_v53  ;;  %v14551_v60 = vrot.slane %v13874_v45, %v19107_v53 }
 0x2a6   : > { %v14502_v43 = vrot.slane %v14495_v35, %v19107_v53  ;;  %v14516_v63 = vrot.slane %v14509_v39, %v19107_v53  ;;  %v14565_v3 = vrot.slane %v13882_v24, %v19107_v53  ;;  %v14579_v40 = vrot.slane %v13890_v11, %v19107_v53 }
 0x2a7   : > { %v14530_v59 = vrot.slane %v14523_v37, %v19107_v53  ;;  %v14544_v54 = vrot.slane %v14537_v44, %v19107_v53  ;;  %v14558_v32 = vrot.slane %v14551_v60, %v19107_v53  ;;  %v14593_v8 = vrot.slane %v13898_v22, %v19107_v53 }
 0x2a8   : > { %v14572_v31 = vrot.slane %v14565_v3, %v19107_v53  ;;  %v14586_v6 = vrot.slane %v14579_v40, %v19107_v53  ;;  %v14607_v51 = vrot.slane %v13906_v41, %v19107_v53  ;;  %v15079_v21 = vunpack.c.l.b16 %v14404_v23 }
 0x2a9   : > { %v14600_v33 = vrot.slane %v14593_v8, %v19107_v53  ;;  %v15080_v4 = vunpack.c.l.b16 %v14418_v58  ;;  %v15081_v25 = vunpack.c.l.b16 %v14432_v7  ;;  %v15082_v12 = vunpack.c.l.b16 %v14446_v62 }
 0x2aa   : > { %v14614_v36 = vrot.slane %v14607_v51, %v19107_v53  ;;  %v15083_v45 = vunpack.c.l.b16 %v14460_v47  ;;  %v15084_v14 = vunpack.c.l.b16 %v14474_v29  ;;  %v15085_v28 = vunpack.c.l.b16 %v14488_v46 }
 0x2ab   : > { %v15086_v20 = vunpack.c.l.b16 %v14502_v43  ;;  %v15087_v24 = vunpack.c.l.b16 %v14516_v63  ;;  %v15088_v11 = vunpack.c.l.b16 %v14530_v59  ;;  %v15089_v55 = vunpack.c.l.b16 %v14544_v54 }
 0x2ac   : > { %v15090_v27 = vunpack.c.l.b16 %v14558_v32  ;;  %v15091_v22 = vunpack.c.l.b16 %v14572_v31  ;;  %v15092_v48 = vunpack.c.l.b16 %v14586_v6  ;;  %v15093_v15 = vunpack.c.l.b16 %v14600_v33 }
 0x2ad   : > { %v15094_v26 = vunpack.c.l.b16 %v14614_v36  ;;  %v15155_v41 = vrot.slane %v15080_v4, 7  ;;  %v15157_v23 = vrot.slane %v15081_v25, 6  ;;  %v15159_v50 = vrot.slane %v15082_v12, 5 }
 0x2ae   : > { %v15161_v9 = vrot.slane %v15083_v45, 4  ;;  %v15163_v58 = vrot.slane %v15084_v14, 3  ;;  %v15165_v7 = vrot.slane %v15085_v28, 2  ;;  %v15167_v62 = vrot.slane %v15086_v20, 1 }
 0x2af   : > { %v15156_v17 = vsel %vm2407_vm8, %v15155_v41, %v15079_v21  ;;  %v15169_v47 = vrot.slane %v15088_v11, 7  ;;  %v15171_v29 = vrot.slane %v15089_v55, 6  ;;  %v15173_v35 = vrot.slane %v15090_v27, 5 }
 0x2b0   : > { %v15158_v39 = vsel %vm2410_vm11, %v15157_v23, %v15156_v17  ;;  %v15175_v46 = vrot.slane %v15091_v22, 4  ;;  %v15177_v37 = vrot.slane %v15092_v48, 3  ;;  %v15179_v44 = vrot.slane %v15093_v15, 2 }
 0x2b1   : > { %v15160_v60 = vsel %vm2413_vm12, %v15159_v50, %v15158_v39  ;;  %v15170_v43 = vsel %vm2407_vm8, %v15169_v47, %v15087_v24  ;;  %v15181_v63 = vrot.slane %v15094_v26, 1  ;;  %v12249_v3 = vrot.slane %v21653_v16, %v19107_v53 }
 0x2b2   : > { %v15162_v40 = vsel %vm2416_vm13, %v15161_v9, %v15160_v60  ;;  %v15172_v59 = vsel %vm2410_vm11, %v15171_v29, %v15170_v43  ;;  %v12263_v54 = vrot.slane %v21663_v19, %v19107_v53  ;;  %v12277_v32 = vrot.slane %v21667_v10, %v19107_v53 }
 0x2b3   : > { %v15164_v8 = vsel %vm2419_vm0, %v15163_v58, %v15162_v40  ;;  %v15174_v31 = vsel %vm2413_vm12, %v15173_v35, %v15172_v59  ;;  %v21837_v6 = vrot.slane %v12249_v3, %v19107_v53  ;;  %v12291_v16 = vrot.slane %v21683_v0, %v19107_v53  ;;  %v18908_v35 = vld [vmem:[%s23419_s4 + $0x220] sm:$0xff]  }
 0x2b4   : > { %v15166_v51 = vsel %vm2422_vm2, %v15165_v7, %v15164_v8  ;;  %v15176_v21 = vsel %vm2416_vm13, %v15175_v46, %v15174_v31  ;;  %v12270_v33 = vrot.slane %v12263_v54, %v19107_v53  ;;  %v12284_v19 = vrot.slane %v12277_v32, %v19107_v53  ;;  %18817 = vmatprep.subr.bf16.mxu1 %v18908_v35  ;;  %v18245_v8 = vld.sshfl [vmem:[#allocation2 + $0x3c] sm:$0x32 pattern:$0x75316420] }
 0x2b5   : > { %v15168_v10 = vsel %vm2425_vm4, %v15167_v62, %v15166_v51  ;;  %v15178_v4 = vsel %vm2419_vm0, %v15177_v37, %v15176_v21  ;;  %v12298_v25 = vrot.slane %v12291_v16, %v19107_v53  ;;  %v12305_v12 = vrot.slane %v21658_v61, %v19107_v53  ;;  %18797 = vmatprep.subr.bf16.mxu0 %v18908_v35 }
 0x2b6   : > { %v15180_v36 = vsel %vm2422_vm2, %v15179_v44, %v15178_v4  ;;  %v12319_v0 = vrot.slane %v21674_v34, %v19107_v53  ;;  %v12333_v45 = vrot.slane %v21678_v18, %v19107_v53  ;;  %v12347_v14 = vrot.slane %v21689_v5, %v19107_v53  ;;  %18825 = vmatpush3.bf16.msra.mxu1 %v18908_v35 }
 0x2b7   : > { %v15182_v28 = vsel %vm2425_vm4, %v15181_v63, %v15180_v36  ;;  %v12312_v20 = vrot.slane %v12305_v12, %v19107_v53  ;;  %v12361_v24 = vrot.slane %v21692_v52, %v19107_v53  ;;  %v12375_v61 = vrot.slane %v21695_v42, %v19107_v53  ;;  %18798 = vmatpush3.bf16.msra.mxu0 %v18908_v35 }
 0x2b8   : > { %v15240_v11 = vpack.c.b16 %v15182_v28, %v15168_v10  ;;  %v12326_v55 = vrot.slane %v12319_v0, %v19107_v53  ;;  %v12340_v34 = vrot.slane %v12333_v45, %v19107_v53  ;;  %v12354_v18 = vrot.slane %v12347_v14, %v19107_v53  ;;  %v950_v0 = vld [vmem:[#allocation2 + $0x44] sm:$0x1]  ;;  %v964_v45 = vld [vmem:[#allocation2 + $0x5c] sm:$0x1] }
 0x2b9   : > { %v12368_v27 = vrot.slane %v12361_v24, %v19107_v53  ;;  %v12382_v5 = vrot.slane %v12375_v61, %v19107_v53  ;;  %v12389_v22 = vrot.slane %v21704_v56, %v19107_v53  ;;  %v12403_v52 = vrot.slane %v21713_v2, %v19107_v53  ;;  %v23578_v61 = vld [vmem:[#allocation13_spill] sm:$0xff] }
 0x2ba   : > { %17726 = vmatprep.mubr.bf16.mxu1 %v15240_v11  ;;  %v12417_v42 = vrot.slane %v21698_v30, %v19107_v53  ;;  %v12431_v48 = vrot.slane %v21707_v1, %v19107_v53  ;;  %v12445_v15 = vrot.slane %v21717_v57, %v19107_v53  ;;  %v12459_v26 = vrot.slane %v21724_v13, %v19107_v53 }
 0x2bb   : > { %v12396_v41 = vrot.slane %v12389_v22, %v19107_v53  ;;  %v12410_v56 = vrot.slane %v12403_v52, %v19107_v53  ;;  %v12931_v23 = vunpack.c.l.b16 %v21837_v6  ;;  %v12932_v2 = vunpack.c.l.b16 %v12270_v33 }
 0x2bc   : > { %v12424_v50 = vrot.slane %v12417_v42, %v19107_v53  ;;  %v12438_v30 = vrot.slane %v12431_v48, %v19107_v53  ;;  %v12452_v9 = vrot.slane %v12445_v15, %v19107_v53  ;;  %v12466_v1 = vrot.slane %v12459_v26, %v19107_v53  ;;  %v18249_v26 = vld.sshfl [vmem:[#allocation2 + $0x58] sm:$0x33 pattern:$0x75316420] }
 0x2bd   : > { %v12933_v58 = vunpack.c.l.b16 %v12284_v19  ;;  %v12934_v57 = vunpack.c.l.b16 %v12298_v25  ;;  %v12935_v7 = vunpack.c.l.b16 %v12312_v20  ;;  %v12936_v62 = vunpack.c.l.b16 %v12326_v55  ;;  %v23577_v20 = vld [vmem:[#allocation12_spill] sm:$0xff]  ;;  %v18248_v55 = vld.sshfl [vmem:[#allocation2 + $0x54] sm:$0x32 pattern:$0x75316420] }
 0x2be   : > { %v12937_v13 = vunpack.c.l.b16 %v12340_v34  ;;  %v12938_v17 = vunpack.c.l.b16 %v12354_v18  ;;  %v12939_v47 = vunpack.c.l.b16 %v12368_v27  ;;  %v12940_v29 = vunpack.c.l.b16 %v12382_v5  ;;  %v18246_v27 = vld.sshfl [vmem:[#allocation2 + $0x40] sm:$0x33 pattern:$0x75316420] }
 0x2bf   : > { %v12941_v39 = vunpack.c.l.b16 %v12396_v41  ;;  %v12942_v46 = vunpack.c.l.b16 %v12410_v56  ;;  %v12943_v37 = vunpack.c.l.b16 %v12424_v50  ;;  %v12944_v44 = vunpack.c.l.b16 %v12438_v30 }
 0x2c0   : > { %v12945_v60 = vunpack.c.l.b16 %v12452_v9  ;;  %v12946_v43 = vunpack.c.l.b16 %v12466_v1  ;;  %v13007_v63 = vrot.slane %v12932_v2, 7  ;;  %v13009_v3 = vrot.slane %v12933_v58, 6 }
 0x2c1   : > { %v13011_v40 = vrot.slane %v12934_v57, 5  ;;  %v13013_v59 = vrot.slane %v12935_v7, 4  ;;  %v13015_v54 = vrot.slane %v12936_v62, 3  ;;  %v13017_v32 = vrot.slane %v12937_v13, 2 }
 0x2c2   : > { %v13008_v31 = vsel %vm2407_vm8, %v13007_v63, %v12931_v23  ;;  %v13019_v6 = vrot.slane %v12938_v17, 1  ;;  %v13021_v16 = vrot.slane %v12940_v29, 7  ;;  %v13023_v51 = vrot.slane %v12941_v39, 6 }
 0x2c3   : > { %v13010_v21 = vsel %vm2410_vm11, %v13009_v3, %v13008_v31  ;;  %v13025_v33 = vrot.slane %v12942_v46, 5  ;;  %v13027_v19 = vrot.slane %v12943_v37, 4  ;;  %v13029_v10 = vrot.slane %v12944_v44, 3 }
 0x2c4   : > { %v13012_v4 = vsel %vm2413_vm12, %v13011_v40, %v13010_v21  ;;  %v13022_v25 = vsel %vm2407_vm8, %v13021_v16, %v12939_v47  ;;  %v13031_v12 = vrot.slane %v12945_v60, 2  ;;  %v13033_v36 = vrot.slane %v12946_v43, 1 }
 0x2c5   : > { %v13014_v14 = vsel %vm2416_vm13, %v13013_v59, %v13012_v4  ;;  %v13024_v28 = vsel %vm2410_vm11, %v13023_v51, %v13022_v25  ;;  %v676_v24 = vrot.slane %v23577_v20, 4  ;;  %v710_v11 = vrot.slane %v23578_v61, 4 }
 0x2c6   : > { %v13016_v34 = vsel %vm2419_vm0, %v13015_v54, %v13014_v14  ;;  %v13026_v18 = vsel %vm2413_vm12, %v13025_v33, %v13024_v28  ;;  %v10153_v5 = vcombine.high %v18245_v8, %v18245_v8  ;;  %v10160_v22 = vrot.slane %v18245_v8, %v19107_v53 }
 0x2c7   : > { %v13018_v52 = vsel %vm2422_vm2, %v13017_v32, %v13016_v34  ;;  %v13028_v42 = vsel %vm2416_vm13, %v13027_v19, %v13026_v18  ;;  %v951_v48 = vsel %vm19310_vm5, %v676_v24, %v950_v0  ;;  %v965_v15 = vsel %vm19310_vm5, %v710_v11, %v964_v45 }
 0x2c8   : > { %v13020_v41 = vsel %vm2425_vm4, %v13019_v6, %v13018_v52  ;;  %v13030_v56 = vsel %vm2419_vm0, %v13029_v10, %v13028_v42  ;;  %952 = vst [vmem:[#allocation2 + $0x44] sm:$0x1] %v951_v48  ;;  %966 = vst [vmem:[#allocation2 + $0x5c] sm:$0x1] %v965_v15  ;;  %v10167_v23 = vrot.slane %v10153_v5, %v19107_v53 }
 0x2c9   : > { %v10168_v2 = vcombine.high %v10160_v22, %v10160_v22  ;;  %v13032_v50 = vsel %vm2422_vm2, %v13031_v12, %v13030_v56  ;;  %v10177_v30 = vcombine.high %v18246_v27, %v18246_v27  ;;  %v21912_v9 = vrot.slane %v18246_v27, %v19107_v53 }
 0x2ca   : > { %v10215_v1 = vcombine.high %v18248_v55, %v18248_v55  ;;  %v13034_v58 = vsel %vm2425_vm4, %v13033_v36, %v13032_v50  ;;  %v10169_v57 = vcombine.high %v10167_v23, %v10167_v23  ;;  %v10222_v7 = vrot.slane %v18248_v55, %v19107_v53 }
 0x2cb   : > { %v10239_v62 = vcombine.high %v18249_v26, %v18249_v26  ;;  %v13092_v13 = vpack.c.b16 %v13034_v58, %v13020_v41  ;;  %v21917_v17 = vrot.slane %v10177_v30, %v19107_v53  ;;  %v21921_v47 = vcombine.high %v21912_v9, %v21912_v9 }
 0x2cc   : > { %v10229_v29 = vrot.slane %v10215_v1, %v19107_v53  ;;  %v10230_v35 = vcombine.high %v10222_v7, %v10222_v7  ;;  %v21925_v39 = vrot.slane %v18249_v26, %v19107_v53  ;;  %v10748_v37 = vrot.slane %v10167_v23, %v19107_v53 }
 0x2cd   : > { %v21928_v46 = vrot.slane %v10239_v62, %v19107_v53  ;;  %17727 = vmatmul.mubr.bf16.gmra.mrb[20].mxu1 %v13092_v13  ;;  %v21933_v44 = vcombine.high %v21917_v17, %v21917_v17  ;;  %v10762_v43 = vrot.slane %v10168_v2, %v19107_v53  ;;  %v10776_v63 = vrot.slane %v10169_v57, %v19107_v53 }
 0x2ce   : > { %v10231_v60 = vcombine.high %v10229_v29, %v10229_v29  ;;  %v21939_v3 = vcombine.high %v21925_v39, %v21925_v39  ;;  %v10755_v59 = vrot.slane %v10748_v37, %v19107_v53  ;;  %v10790_v54 = vrot.slane %v21912_v9, %v19107_v53 }
 0x2cf   : > { %v21943_v40 = vcombine.high %v21928_v46, %v21928_v46  ;;  %v18247_v32 = vld.sshfl [vmem:[#allocation2 + $0x44] sm:$0x1 pattern:$0x75316420]  ;;  %v10769_v8 = vrot.slane %v10762_v43, %v19107_v53  ;;  %v10783_v31 = vrot.slane %v10776_v63, %v19107_v53  ;;  %v10804_v6 = vrot.slane %v21917_v17, %v19107_v53 }
 0x2d0   : > { %v10818_v16 = vrot.slane %v21921_v47, %v19107_v53  ;;  %v18250_v51 = vld.sshfl [vmem:[#allocation2 + $0x5c] sm:$0x1 pattern:$0x75316420]  ;;  %v21955_v21 = vrot.slane %v18247_v32, %v19107_v53  ;;  %v10797_v33 = vrot.slane %v10790_v54, %v19107_v53  ;;  %v10832_v19 = vrot.slane %v21933_v44, %v19107_v53 }
 0x2d1   : > { %v10860_v10 = vrot.slane %v10229_v29, %v19107_v53  ;;  %v21962_v4 = vrot.slane %v18250_v51, %v19107_v53  ;;  %v10811_v25 = vrot.slane %v10804_v6, %v19107_v53  ;;  %v10874_v36 = vrot.slane %v10230_v35, %v19107_v53  ;;  %v18157_v35 = vld.sshfl [vmem:[#allocation2 + $0x3c] sm:$0x33 pattern:$0x75316420] }
 0x2d2   : > { %v10825_v12 = vrot.slane %v10818_v16, %v19107_v53  ;;  %v10839_v0 = vrot.slane %v10832_v19, %v19107_v53  ;;  %v10846_v45 = vrot.slane %v21955_v21, %v19107_v53  ;;  %v10888_v28 = vrot.slane %v10231_v60, %v19107_v53 }
 0x2d3   : > { %v10867_v14 = vrot.slane %v10860_v10, %v19107_v53  ;;  %v10881_v20 = vrot.slane %v10874_v36, %v19107_v53  ;;  %v10902_v24 = vrot.slane %v21925_v39, %v19107_v53  ;;  %v10916_v61 = vrot.slane %v21928_v46, %v19107_v53 }
 0x2d4   : > { %v10930_v11 = vrot.slane %v21939_v3, %v19107_v53  ;;  %v10853_v55 = vrot.slane %v10846_v45, %v19107_v53  ;;  %v10895_v34 = vrot.slane %v10888_v28, %v19107_v53  ;;  %v10944_v18 = vrot.slane %v21943_v40, %v19107_v53 }
 0x2d5   : > { %v10958_v27 = vrot.slane %v21962_v4, %v19107_v53  ;;  %v10909_v5 = vrot.slane %v10902_v24, %v19107_v53  ;;  %v10923_v22 = vrot.slane %v10916_v61, %v19107_v53  ;;  %v11430_v42 = vunpack.c.l.b16 %v10755_v59  ;;  %v18160_v59 = vld.sshfl [vmem:[#allocation2 + $0x54] sm:$0x33 pattern:$0x75316420] }
 0x2d6   : > { %v10937_v52 = vrot.slane %v10930_v11, %v19107_v53  ;;  %v10951_v48 = vrot.slane %v10944_v18, %v19107_v53  ;;  %v11431_v26 = vunpack.c.l.b16 %v10769_v8  ;;  %v11432_v41 = vunpack.c.l.b16 %v10783_v31 }
 0x2d7   : > { %v10965_v15 = vrot.slane %v10958_v27, %v19107_v53  ;;  %v11433_v56 = vunpack.c.l.b16 %v10797_v33  ;;  %v11434_v23 = vunpack.c.l.b16 %v10811_v25  ;;  %v11435_v2 = vunpack.c.l.b16 %v10825_v12 }
 0x2d8   : > { %v11436_v50 = vunpack.c.l.b16 %v10839_v0  ;;  %v11437_v30 = vunpack.c.l.b16 %v10853_v55  ;;  %v11438_v1 = vunpack.c.l.b16 %v10867_v14  ;;  %v11439_v58 = vunpack.c.l.b16 %v10881_v20 }
 0x2d9   : > { %v11440_v57 = vunpack.c.l.b16 %v10895_v34  ;;  %v11441_v7 = vunpack.c.l.b16 %v10909_v5  ;;  %v11442_v62 = vunpack.c.l.b16 %v10923_v22  ;;  %v11443_v13 = vunpack.c.l.b16 %v10937_v52 }
 0x2da   : > { %v11444_v29 = vunpack.c.l.b16 %v10951_v48  ;;  %v11445_v37 = vunpack.c.l.b16 %v10965_v15  ;;  %v11506_v60 = vrot.slane %v11431_v26, 7  ;;  %v11508_v43 = vrot.slane %v11432_v41, 6 }
 0x2db   : > { %v11510_v63 = vrot.slane %v11433_v56, 5  ;;  %v11512_v54 = vrot.slane %v11434_v23, 4  ;;  %v11514_v32 = vrot.slane %v11435_v2, 3  ;;  %v11516_v8 = vrot.slane %v11436_v50, 2 }
 0x2dc   : > { %v11518_v31 = vrot.slane %v11437_v30, 1  ;;  %v11507_v6 = vsel %vm2407_vm8, %v11506_v60, %v11430_v42  ;;  %v11520_v16 = vrot.slane %v11439_v58, 7  ;;  %v11522_v51 = vrot.slane %v11440_v57, 6 }
 0x2dd   : > { %v11524_v33 = vrot.slane %v11441_v7, 5  ;;  %v11509_v19 = vsel %vm2410_vm11, %v11508_v43, %v11507_v6  ;;  %v11526_v10 = vrot.slane %v11442_v62, 4  ;;  %v11528_v25 = vrot.slane %v11443_v13, 3 }
 0x2de   : > { %v11530_v12 = vrot.slane %v11444_v29, 2  ;;  %v11511_v36 = vsel %vm2413_vm12, %v11510_v63, %v11509_v19  ;;  %v11521_v0 = vsel %vm2407_vm8, %v11520_v16, %v11438_v1  ;;  %v11532_v45 = vrot.slane %v11445_v37, 1 }
 0x2df   : > { %v8005_v14 = vcombine.high %v18157_v35, %v18157_v35  ;;  %v11513_v28 = vsel %vm2416_vm13, %v11512_v54, %v11511_v36  ;;  %v11523_v20 = vsel %vm2410_vm11, %v11522_v51, %v11521_v0  ;;  %v8012_v24 = vrot.slane %v18157_v35, %v19107_v53 }
 0x2e0   : > { %v8067_v61 = vcombine.high %v18160_v59, %v18160_v59  ;;  %v11515_v11 = vsel %vm2419_vm0, %v11514_v32, %v11513_v28  ;;  %v11525_v55 = vsel %vm2413_vm12, %v11524_v33, %v11523_v20  ;;  %v8074_v18 = vrot.slane %v18160_v59, %v19107_v53 }
 0x2e1   : > { %v8019_v34 = vrot.slane %v8005_v14, %v19107_v53  ;;  %v11517_v27 = vsel %vm2422_vm2, %v11516_v8, %v11515_v11  ;;  %v11527_v5 = vsel %vm2416_vm13, %v11526_v10, %v11525_v55  ;;  %v8020_v22 = vcombine.high %v8012_v24, %v8012_v24 }
 0x2e2   : > { %v8081_v52 = vrot.slane %v8067_v61, %v19107_v53  ;;  %v11519_v42 = vsel %vm2425_vm4, %v11518_v31, %v11517_v27  ;;  %v11529_v48 = vsel %vm2419_vm0, %v11528_v25, %v11527_v5  ;;  %v8082_v26 = vcombine.high %v8074_v18, %v8074_v18 }
 0x2e3   : > { %v8021_v15 = vcombine.high %v8019_v34, %v8019_v34  ;;  %v11531_v41 = vsel %vm2422_vm2, %v11530_v12, %v11529_v48  ;;  %v8501_v23 = vshrl.u32 %v8012_v24, 16  ;;  %v8506_v2 = vshll.u32 %v8019_v34, 16 }
 0x2e4   : > { %v8083_v56 = vcombine.high %v8081_v52, %v8081_v52  ;;  %v11533_v50 = vsel %vm2425_vm4, %v11532_v45, %v11531_v41  ;;  %v8509_v30 = vshrl.u32 %v8019_v34, 16  ;;  %v8514_v1 = vshll.u32 %v8020_v22, 16 }
 0x2e5   : > { %v8517_v58 = vshrl.u32 %v8020_v22, 16  ;;  %v11591_v57 = vpack.c.b16 %v11533_v50, %v11519_v42  ;;  %v8508_v7 = vsel %vm19258_vm10, %v8501_v23, %v8506_v2  ;;  %v8522_v62 = vshll.u32 %v8021_v15, 16 }
 0x2e6   : > { %v8525_v13 = vshrl.u32 %v8021_v15, 16  ;;  %v8516_v29 = vsel %vm19258_vm10, %v8509_v30, %v8514_v1  ;;  %v8530_v35 = vshll.u32 %v21912_v9, 16  ;;  %v8533_v37 = vshrl.u32 %v21912_v9, 16 }
 0x2e7   : > { %v8538_v60 = vshll.u32 %v21917_v17, 16  ;;  %17661 = vmatprep.mubr.bf16.mxu0 %v11591_v57  ;;  %v8524_v43 = vsel %vm19258_vm10, %v8517_v58, %v8522_v62  ;;  %v8541_v63 = vshrl.u32 %v21917_v17, 16  ;;  %v8546_v59 = vshll.u32 %v21921_v47, 16 }
 0x2e8   : > { %v8549_v54 = vshrl.u32 %v21921_v47, 16  ;;  %v8532_v32 = vsel %vm19258_vm10, %v8525_v13, %v8530_v35  ;;  %v8554_v9 = vshll.u32 %v21933_v44, 16  ;;  %v8557_v31 = vshrl.u32 %v21933_v44, 16 }
 0x2e9   : > { %v8540_v8 = vsel %vm19258_vm10, %v8533_v37, %v8538_v60  ;;  %v8548_v6 = vsel %vm19258_vm10, %v8541_v63, %v8546_v59  ;;  %v8562_v16 = vshll.u32 %v21955_v21, 16  ;;  %v8566_v17 = vshrl.u32 %v8074_v18, 16 }
 0x2ea   : > { %v8571_v51 = vshll.u32 %v8081_v52, 16  ;;  %v8556_v47 = vsel %vm19258_vm10, %v8549_v54, %v8554_v9  ;;  %v8574_v33 = vshrl.u32 %v8081_v52, 16  ;;  %v8579_v19 = vshll.u32 %v8082_v26, 16 }
 0x2eb   : > { %v8582_v10 = vshrl.u32 %v8082_v26, 16  ;;  %v8564_v25 = vsel %vm19258_vm10, %v8557_v31, %v8562_v16  ;;  %v8587_v44 = vshll.u32 %v8083_v56, 16  ;;  %v8590_v36 = vshrl.u32 %v8083_v56, 16 }
 0x2ec   : > { %v8573_v12 = vsel %vm19258_vm10, %v8566_v17, %v8571_v51  ;;  %v8581_v0 = vsel %vm19258_vm10, %v8574_v33, %v8579_v19  ;;  %v8595_v21 = vshll.u32 %v21925_v39, 16  ;;  %v8598_v45 = vshrl.u32 %v21925_v39, 16 }
 0x2ed   : > { %v8603_v14 = vshll.u32 %v21928_v46, 16  ;;  %v8589_v28 = vsel %vm19258_vm10, %v8582_v10, %v8587_v44  ;;  %v8606_v20 = vshrl.u32 %v21928_v46, 16  ;;  %v8611_v24 = vshll.u32 %v21939_v3, 16 }
 0x2ee   : > { %v8614_v61 = vshrl.u32 %v21939_v3, 16  ;;  %v8597_v11 = vsel %vm19258_vm10, %v8590_v36, %v8595_v21  ;;  %v8619_v34 = vshll.u32 %v21943_v40, 16  ;;  %v8622_v39 = vshrl.u32 %v21943_v40, 16  ;;  %v18909_v36 = vld [vmem:[%s23419_s4 + $0x228] sm:$0xff]  }
 0x2ef   : > { %v8605_v55 = vsel %vm19258_vm10, %v8598_v45, %v8603_v14  ;;  %v8613_v18 = vsel %vm19258_vm10, %v8606_v20, %v8611_v24  ;;  %v8627_v27 = vshll.u32 %v21962_v4, 16  ;;  %v9120_v46 = vrot.slane %v8508_v7, %v19107_v53  ;;  %18818 = vmatprep.subr.bf16.mxu1 %v18909_v36  ;;  %18799 = vmatprep.subr.bf16.mxu0 %v18909_v36 }
 0x2f0   : > { %v9134_v5 = vrot.slane %v8516_v29, %v19107_v53  ;;  %v8621_v3 = vsel %vm19258_vm10, %v8614_v61, %v8619_v34  ;;  %v9148_v22 = vrot.slane %v8524_v43, %v19107_v53  ;;  %v9162_v52 = vrot.slane %v8532_v32, %v19107_v53  ;;  %18826 = vmatpush3.bf16.msra.mxu1 %v18909_v36 }
 0x2f1   : > { %v9176_v42 = vrot.slane %v8540_v8, %v19107_v53  ;;  %v8629_v40 = vsel %vm19258_vm10, %v8622_v39, %v8627_v27  ;;  %v9127_v48 = vrot.slane %v9120_v46, %v19107_v53  ;;  %v9190_v15 = vrot.slane %v8548_v6, %v19107_v53  ;;  %18800 = vmatpush3.bf16.msra.mxu0 %v18909_v36 }
 0x2f2   : > { %v9141_v4 = vrot.slane %v9134_v5, %v19107_v53  ;;  %v9155_v26 = vrot.slane %v9148_v22, %v19107_v53  ;;  %v9169_v41 = vrot.slane %v9162_v52, %v19107_v53  ;;  %v9204_v23 = vrot.slane %v8556_v47, %v19107_v53 }
 0x2f3   : > { %v9183_v56 = vrot.slane %v9176_v42, %v19107_v53  ;;  %v9197_v2 = vrot.slane %v9190_v15, %v19107_v53  ;;  %v9218_v50 = vrot.slane %v8564_v25, %v19107_v53  ;;  %v9232_v30 = vrot.slane %v8573_v12, %v19107_v53 }
 0x2f4   : > { %v9246_v1 = vrot.slane %v8581_v0, %v19107_v53  ;;  %v9211_v58 = vrot.slane %v9204_v23, %v19107_v53  ;;  %v9260_v57 = vrot.slane %v8589_v28, %v19107_v53  ;;  %v9274_v7 = vrot.slane %v8597_v11, %v19107_v53  ;;  %v18291_v28 = vld.sshfl [vmem:[#allocation2 + $0x78] sm:$0x33 pattern:$0x75316420] }
 0x2f5   : > { %v9288_v62 = vrot.slane %v8605_v55, %v19107_v53  ;;  %v9225_v13 = vrot.slane %v9218_v50, %v19107_v53  ;;  %v9239_v29 = vrot.slane %v9232_v30, %v19107_v53  ;;  %v9302_v37 = vrot.slane %v8613_v18, %v19107_v53  ;;  %v18292_v55 = vld.sshfl [vmem:[#allocation2 + $0x7c] sm:$0x33 pattern:$0x75316420] }
 0x2f6   : > { %v9253_v35 = vrot.slane %v9246_v1, %v19107_v53  ;;  %v9267_v60 = vrot.slane %v9260_v57, %v19107_v53  ;;  %v9281_v43 = vrot.slane %v9274_v7, %v19107_v53  ;;  %v9316_v59 = vrot.slane %v8621_v3, %v19107_v53  ;;  %v18293_v57 = vld.sshfl [vmem:[#allocation2 + $0x80] sm:$0x1 pattern:$0x75316420] }
 0x2f7   : > { %v9295_v63 = vrot.slane %v9288_v62, %v19107_v53  ;;  %v9309_v54 = vrot.slane %v9302_v37, %v19107_v53  ;;  %v9330_v32 = vrot.slane %v8629_v40, %v19107_v53  ;;  %v9802_v8 = vunpack.c.l.b16 %v9127_v48 }
 0x2f8   : > { %v9803_v9 = vunpack.c.l.b16 %v9141_v4  ;;  %v9323_v31 = vrot.slane %v9316_v59, %v19107_v53  ;;  %v9804_v6 = vunpack.c.l.b16 %v9155_v26  ;;  %v9805_v16 = vunpack.c.l.b16 %v9169_v41  ;;  %v22122_v59 = vld.sshfl [vmem:[#allocation2 + $0x98] sm:$0x1 pattern:$0x75316420] }
 0x2f9   : > { %v9806_v17 = vunpack.c.l.b16 %v9183_v56  ;;  %v9337_v51 = vrot.slane %v9330_v32, %v19107_v53  ;;  %v9807_v47 = vunpack.c.l.b16 %v9197_v2  ;;  %v9808_v33 = vunpack.c.l.b16 %v9211_v58  ;;  %v18294_v2 = vld.sshfl [vmem:[#allocation2 + $0x90] sm:$0x33 pattern:$0x75316420] }
 0x2fa   : > { %v9809_v19 = vunpack.c.l.b16 %v9225_v13  ;;  %v9810_v10 = vunpack.c.l.b16 %v9239_v29  ;;  %v9811_v25 = vunpack.c.l.b16 %v9253_v35  ;;  %v9812_v12 = vunpack.c.l.b16 %v9267_v60  ;;  %v18295_v35 = vld.sshfl [vmem:[#allocation2 + $0x94] sm:$0x33 pattern:$0x75316420] }
 0x2fb   : > { %v9813_v44 = vunpack.c.l.b16 %v9281_v43  ;;  %v9814_v0 = vunpack.c.l.b16 %v9295_v63  ;;  %v9815_v21 = vunpack.c.l.b16 %v9309_v54  ;;  %v9816_v45 = vunpack.c.l.b16 %v9323_v31 }
 0x2fc   : > { %v9817_v14 = vunpack.c.l.b16 %v9337_v51  ;;  %v9878_v20 = vrot.slane %v9803_v9, 7  ;;  %v9880_v24 = vrot.slane %v9804_v6, 6  ;;  %v9882_v61 = vrot.slane %v9805_v16, 5 }
 0x2fd   : > { %v9884_v11 = vrot.slane %v9806_v17, 4  ;;  %v9886_v34 = vrot.slane %v9807_v47, 3  ;;  %v9888_v39 = vrot.slane %v9808_v33, 2  ;;  %v9890_v18 = vrot.slane %v9809_v19, 1 }
 0x2fe   : > { %v9892_v27 = vrot.slane %v9811_v25, 7  ;;  %v9879_v46 = vsel %vm2407_vm8, %v9878_v20, %v9802_v8  ;;  %v9894_v5 = vrot.slane %v9812_v12, 6  ;;  %v9896_v3 = vrot.slane %v9813_v44, 5 }
 0x2ff   : > { %v9898_v22 = vrot.slane %v9814_v0, 4  ;;  %v9881_v52 = vsel %vm2410_vm11, %v9880_v24, %v9879_v46  ;;  %v9900_v40 = vrot.slane %v9815_v21, 3  ;;  %v9902_v48 = vrot.slane %v9816_v45, 2 }
 0x300   : > { %v9893_v42 = vsel %vm2407_vm8, %v9892_v27, %v9810_v10  ;;  %v9883_v4 = vsel %vm2413_vm12, %v9882_v61, %v9881_v52  ;;  %v9904_v26 = vrot.slane %v9817_v14, 1  ;;  %v13406_v41 = vcombine.high %v18291_v28, %v18291_v28 }
 0x301   : > { %v9895_v15 = vsel %vm2410_vm11, %v9894_v5, %v9893_v42  ;;  %v9885_v56 = vsel %vm2416_vm13, %v9884_v11, %v9883_v4  ;;  %v22101_v50 = vrot.slane %v18291_v28, %v19107_v53  ;;  %v13430_v30 = vcombine.high %v18292_v55, %v18292_v55 }
 0x302   : > { %v9897_v23 = vsel %vm2413_vm12, %v9896_v3, %v9895_v15  ;;  %v9887_v1 = vsel %vm2419_vm0, %v9886_v34, %v9885_v56  ;;  %v22106_v7 = vrot.slane %v13406_v41, %v19107_v53  ;;  %v22109_v62 = vrot.slane %v18292_v55, %v19107_v53 }
 0x303   : > { %v9899_v58 = vsel %vm2416_vm13, %v9898_v22, %v9897_v23  ;;  %v9889_v13 = vsel %vm2422_vm2, %v9888_v39, %v9887_v1  ;;  %v22115_v37 = vcombine.high %v22101_v50, %v22101_v50  ;;  %v22118_v60 = vrot.slane %v13430_v30, %v19107_v53 }
 0x304   : > { %v9901_v29 = vsel %vm2419_vm0, %v9900_v40, %v9899_v58  ;;  %v9891_v43 = vsel %vm2425_vm4, %v9890_v18, %v9889_v13  ;;  %v22126_v54 = vcombine.high %v22106_v7, %v22106_v7  ;;  %v22130_v32 = vcombine.high %v22109_v62, %v22109_v62 }
 0x305   : > { %v9903_v63 = vsel %vm2422_vm2, %v9902_v48, %v9901_v29  ;;  %v22135_v9 = vcombine.high %v22118_v60, %v22118_v60  ;;  %v13460_v31 = vrot.slane %v18293_v57, %v19107_v53  ;;  %v13468_v6 = vcombine.high %v18294_v2, %v18294_v2 }
 0x306   : > { %v9905_v8 = vsel %vm2425_vm4, %v9904_v26, %v9903_v63  ;;  %v22139_v17 = vrot.slane %v18294_v2, %v19107_v53  ;;  %v13492_v51 = vcombine.high %v18295_v35, %v18295_v35  ;;  %v22142_v47 = vrot.slane %v18295_v35, %v19107_v53 }
 0x307   : > { %v9963_v16 = vpack.c.b16 %v9905_v8, %v9891_v43  ;;  %v22145_v33 = vrot.slane %v13468_v6, %v19107_v53  ;;  %v13522_v19 = vrot.slane %v22122_v59, %v19107_v53  ;;  %v13908_v10 = vshrl.u32 %v22101_v50, 16 }
 0x308   : > { %v13913_v25 = vshll.u32 %v22106_v7, 16  ;;  %v22153_v12 = vcombine.high %v22139_v17, %v22139_v17  ;;  %v22156_v44 = vrot.slane %v13492_v51, %v19107_v53  ;;  %v22160_v36 = vcombine.high %v22142_v47, %v22142_v47 }
 0x309   : > { %17662 = vmatmul.mubr.bf16.gmra.mrb[20].mxu0 %v9963_v16  ;;  %v13916_v0 = vshrl.u32 %v22106_v7, 16  ;;  %v22165_v21 = vcombine.high %v22145_v33, %v22145_v33  ;;  %v13921_v14 = vshll.u32 %v22115_v37, 16  ;;  %v13924_v28 = vshrl.u32 %v22115_v37, 16 }
 0x30a   : > { %v13915_v45 = vsel %vm19258_vm10, %v13908_v10, %v13913_v25  ;;  %v22173_v20 = vcombine.high %v22156_v44, %v22156_v44  ;;  %v13929_v24 = vshll.u32 %v22126_v54, 16  ;;  %v13932_v61 = vshrl.u32 %v22126_v54, 16 }
 0x30b   : > { %v13937_v11 = vshll.u32 %v22109_v62, 16  ;;  %v13923_v55 = vsel %vm19258_vm10, %v13916_v0, %v13921_v14  ;;  %v13940_v34 = vshrl.u32 %v22109_v62, 16  ;;  %v13945_v39 = vshll.u32 %v22118_v60, 16 }
 0x30c   : > { %v13948_v18 = vshrl.u32 %v22118_v60, 16  ;;  %v13931_v27 = vsel %vm19258_vm10, %v13924_v28, %v13929_v24  ;;  %v13953_v5 = vshll.u32 %v22130_v32, 16  ;;  %v13956_v3 = vshrl.u32 %v22130_v32, 16 }
 0x30d   : > { %v13939_v46 = vsel %vm19258_vm10, %v13932_v61, %v13937_v11  ;;  %v13947_v22 = vsel %vm19258_vm10, %v13940_v34, %v13945_v39  ;;  %v13961_v52 = vshll.u32 %v22135_v9, 16  ;;  %v13964_v42 = vshrl.u32 %v22135_v9, 16 }
 0x30e   : > { %v13969_v40 = vshll.u32 %v13460_v31, 16  ;;  %v13955_v48 = vsel %vm19258_vm10, %v13948_v18, %v13953_v5  ;;  %v13973_v4 = vshrl.u32 %v22139_v17, 16  ;;  %v13978_v15 = vshll.u32 %v22145_v33, 16 }
 0x30f   : > { %v13981_v26 = vshrl.u32 %v22145_v33, 16  ;;  %v13963_v41 = vsel %vm19258_vm10, %v13956_v3, %v13961_v52  ;;  %v13986_v23 = vshll.u32 %v22153_v12, 16  ;;  %v13989_v2 = vshrl.u32 %v22153_v12, 16 }
 0x310   : > { %v13971_v56 = vsel %vm19258_vm10, %v13964_v42, %v13969_v40  ;;  %v13980_v30 = vsel %vm19258_vm10, %v13973_v4, %v13978_v15  ;;  %v13994_v1 = vshll.u32 %v22165_v21, 16  ;;  %v13997_v58 = vshrl.u32 %v22165_v21, 16 }
 0x311   : > { %v14002_v57 = vshll.u32 %v22142_v47, 16  ;;  %v13988_v13 = vsel %vm19258_vm10, %v13981_v26, %v13986_v23  ;;  %v14005_v29 = vshrl.u32 %v22142_v47, 16  ;;  %v14010_v35 = vshll.u32 %v22156_v44, 16 }
 0x312   : > { %v14013_v43 = vshrl.u32 %v22156_v44, 16  ;;  %v13996_v63 = vsel %vm19258_vm10, %v13989_v2, %v13994_v1  ;;  %v14018_v8 = vshll.u32 %v22160_v36, 16  ;;  %v14021_v31 = vshrl.u32 %v22160_v36, 16 }
 0x313   : > { %v14004_v59 = vsel %vm19258_vm10, %v13997_v58, %v14002_v57  ;;  %v14012_v6 = vsel %vm19258_vm10, %v14005_v29, %v14010_v35  ;;  %v14026_v16 = vshll.u32 %v22173_v20, 16  ;;  %v14029_v51 = vshrl.u32 %v22173_v20, 16 }
 0x314   : > { %v14034_v10 = vshll.u32 %v13522_v19, 16  ;;  %v14020_v25 = vsel %vm19258_vm10, %v14013_v43, %v14018_v8  ;;  %v14621_v0 = vrot.slane %v13915_v45, %v19107_v53  ;;  %v14635_v14 = vrot.slane %v13923_v55, %v19107_v53 }
 0x315   : > { %v14649_v28 = vrot.slane %v13931_v27, %v19107_v53  ;;  %v14028_v24 = vsel %vm19258_vm10, %v14021_v31, %v14026_v16  ;;  %v14663_v11 = vrot.slane %v13939_v46, %v19107_v53  ;;  %v14677_v34 = vrot.slane %v13947_v22, %v19107_v53 }
 0x316   : > { %v14036_v61 = vsel %vm19258_vm10, %v14029_v51, %v14034_v10  ;;  %v14628_v19 = vrot.slane %v14621_v0, %v19107_v53  ;;  %v14642_v39 = vrot.slane %v14635_v14, %v19107_v53  ;;  %v14691_v55 = vrot.slane %v13955_v48, %v19107_v53 }
 0x317   : > { %v14656_v45 = vrot.slane %v14649_v28, %v19107_v53  ;;  %v14670_v18 = vrot.slane %v14663_v11, %v19107_v53  ;;  %v14684_v27 = vrot.slane %v14677_v34, %v19107_v53  ;;  %v14705_v5 = vrot.slane %v13963_v41, %v19107_v53 }
 0x318   : > { %v14719_v3 = vrot.slane %v13971_v56, %v19107_v53  ;;  %v14698_v46 = vrot.slane %v14691_v55, %v19107_v53  ;;  %v14733_v22 = vrot.slane %v13980_v30, %v19107_v53  ;;  %v14747_v52 = vrot.slane %v13988_v13, %v19107_v53 }
 0x319   : > { %v14761_v42 = vrot.slane %v13996_v63, %v19107_v53  ;;  %v14712_v40 = vrot.slane %v14705_v5, %v19107_v53  ;;  %v14775_v4 = vrot.slane %v14004_v59, %v19107_v53  ;;  %v14789_v15 = vrot.slane %v14012_v6, %v19107_v53 }
 0x31a   : > { %v14726_v48 = vrot.slane %v14719_v3, %v19107_v53  ;;  %v14740_v26 = vrot.slane %v14733_v22, %v19107_v53  ;;  %v14754_v41 = vrot.slane %v14747_v52, %v19107_v53  ;;  %v14803_v23 = vrot.slane %v14020_v25, %v19107_v53 }
 0x31b   : > { %v14768_v56 = vrot.slane %v14761_v42, %v19107_v53  ;;  %v14782_v2 = vrot.slane %v14775_v4, %v19107_v53  ;;  %v14796_v30 = vrot.slane %v14789_v15, %v19107_v53  ;;  %v14817_v1 = vrot.slane %v14028_v24, %v19107_v53 }
 0x31c   : > { %v14831_v58 = vrot.slane %v14036_v61, %v19107_v53  ;;  %v14810_v57 = vrot.slane %v14803_v23, %v19107_v53  ;;  %v15095_v13 = vunpack.c.l.b16 %v14628_v19  ;;  %v15096_v29 = vunpack.c.l.b16 %v14642_v39 }
 0x31d   : > { %v15097_v35 = vunpack.c.l.b16 %v14656_v45  ;;  %v14824_v43 = vrot.slane %v14817_v1, %v19107_v53  ;;  %v15098_v59 = vunpack.c.l.b16 %v14670_v18  ;;  %v15099_v8 = vunpack.c.l.b16 %v14684_v27 }
 0x31e   : > { %v14838_v63 = vrot.slane %v14831_v58, %v19107_v53  ;;  %v15100_v31 = vunpack.c.l.b16 %v14698_v46  ;;  %v15101_v6 = vunpack.c.l.b16 %v14712_v40  ;;  %v15102_v16 = vunpack.c.l.b16 %v14726_v48 }
 0x31f   : > { %v15103_v51 = vunpack.c.l.b16 %v14740_v26  ;;  %v15104_v10 = vunpack.c.l.b16 %v14754_v41  ;;  %v15105_v25 = vunpack.c.l.b16 %v14768_v56  ;;  %v15106_v0 = vunpack.c.l.b16 %v14782_v2 }
 0x320   : > { %v15107_v14 = vunpack.c.l.b16 %v14796_v30  ;;  %v15108_v28 = vunpack.c.l.b16 %v14810_v57  ;;  %v15109_v24 = vunpack.c.l.b16 %v14824_v43  ;;  %v15110_v61 = vunpack.c.l.b16 %v14838_v63 }
 0x321   : > { %v15183_v11 = vrot.slane %v15096_v29, 7  ;;  %v15185_v34 = vrot.slane %v15097_v35, 6  ;;  %v15187_v19 = vrot.slane %v15098_v59, 5  ;;  %v15189_v39 = vrot.slane %v15099_v8, 4 }
 0x322   : > { %v15191_v45 = vrot.slane %v15100_v31, 3  ;;  %v15193_v18 = vrot.slane %v15101_v6, 2  ;;  %v15195_v27 = vrot.slane %v15102_v16, 1  ;;  %v15197_v5 = vrot.slane %v15104_v10, 7 }
 0x323   : > { %v15184_v55 = vsel %vm2407_vm8, %v15183_v11, %v15095_v13  ;;  %v15199_v46 = vrot.slane %v15105_v25, 6  ;;  %v15201_v22 = vrot.slane %v15106_v0, 5  ;;  %v15203_v52 = vrot.slane %v15107_v14, 4 }
 0x324   : > { %v15186_v3 = vsel %vm2410_vm11, %v15185_v34, %v15184_v55  ;;  %v15198_v40 = vsel %vm2407_vm8, %v15197_v5, %v15103_v51  ;;  %v15205_v48 = vrot.slane %v15108_v28, 3  ;;  %v15207_v4 = vrot.slane %v15109_v24, 2 }
 0x325   : > { %v15188_v42 = vsel %vm2413_vm12, %v15187_v19, %v15186_v3  ;;  %v15200_v26 = vsel %vm2410_vm11, %v15199_v46, %v15198_v40  ;;  %v15209_v41 = vrot.slane %v15110_v61, 1  ;;  %v12473_v56 = vrot.slane %v22101_v50, %v19107_v53 }
 0x326   : > { %v15190_v15 = vsel %vm2416_vm13, %v15189_v39, %v15188_v42  ;;  %v15202_v2 = vsel %vm2413_vm12, %v15201_v22, %v15200_v26  ;;  %v12487_v30 = vrot.slane %v22106_v7, %v19107_v53  ;;  %v12501_v1 = vrot.slane %v22115_v37, %v19107_v53 }
 0x327   : > { %v15192_v23 = vsel %vm2419_vm0, %v15191_v45, %v15190_v15  ;;  %v15204_v57 = vsel %vm2416_vm13, %v15203_v52, %v15202_v2  ;;  %v12480_v13 = vrot.slane %v12473_v56, %v19107_v53  ;;  %v12515_v29 = vrot.slane %v22126_v54, %v19107_v53  ;;  %v18251_v56 = vld.sshfl [vmem:[#allocation2 + $0x6c] sm:$0x32 pattern:$0x75316420] }
 0x328   : > { %v15194_v58 = vsel %vm2422_vm2, %v15193_v18, %v15192_v23  ;;  %v15206_v35 = vsel %vm2419_vm0, %v15205_v48, %v15204_v57  ;;  %v12494_v43 = vrot.slane %v12487_v30, %v19107_v53  ;;  %v12508_v7 = vrot.slane %v12501_v1, %v19107_v53 }
 0x329   : > { %v15196_v50 = vsel %vm2425_vm4, %v15195_v27, %v15194_v58  ;;  %v15208_v63 = vsel %vm2422_vm2, %v15207_v4, %v15206_v35  ;;  %v12522_v37 = vrot.slane %v12515_v29, %v19107_v53  ;;  %v12529_v59 = vrot.slane %v22109_v62, %v19107_v53 }
 0x32a   : > { %v12543_v8 = vrot.slane %v22118_v60, %v19107_v53  ;;  %v15210_v54 = vsel %vm2425_vm4, %v15209_v41, %v15208_v63  ;;  %v12557_v31 = vrot.slane %v22130_v32, %v19107_v53  ;;  %v12571_v6 = vrot.slane %v22135_v9, %v19107_v53  ;;  %v978_v63 = vld [vmem:[#allocation2 + $0x74] sm:$0x1] }
 0x32b   : > { %v12585_v16 = vrot.slane %v22139_v17, %v19107_v53  ;;  %v15241_v51 = vpack.c.b16 %v15210_v54, %v15196_v50  ;;  %v12536_v10 = vrot.slane %v12529_v59, %v19107_v53  ;;  %v12599_v62 = vrot.slane %v22145_v33, %v19107_v53  ;;  %v23579_v54 = vld [vmem:[#allocation14_spill] sm:$0xff] }
 0x32c   : > { %v12550_v25 = vrot.slane %v12543_v8, %v19107_v53  ;;  %v12564_v60 = vrot.slane %v12557_v31, %v19107_v53  ;;  %v12578_v0 = vrot.slane %v12571_v6, %v19107_v53  ;;  %v12613_v9 = vrot.slane %v22153_v12, %v19107_v53  ;;  %v992_v6 = vld [vmem:[#allocation2 + $0x8c] sm:$0x1] }
 0x32d   : > { %v12592_v32 = vrot.slane %v12585_v16, %v19107_v53  ;;  %17734 = vmatprep.mubr.bf16.mxu1 %v15241_v51  ;;  %v12606_v17 = vrot.slane %v12599_v62, %v19107_v53  ;;  %v12627_v14 = vrot.slane %v22165_v21, %v19107_v53  ;;  %v12641_v28 = vrot.slane %v22142_v47, %v19107_v53  ;;  %v18910_v16 = vld [vmem:[%s23419_s4 + $0x230] sm:$0xff]  }
 0x32e   : > { %v12655_v33 = vrot.slane %v22156_v44, %v19107_v53  ;;  %v12620_v24 = vrot.slane %v12613_v9, %v19107_v53  ;;  %v12669_v61 = vrot.slane %v22160_v36, %v19107_v53  ;;  %v12683_v12 = vrot.slane %v22173_v20, %v19107_v53  ;;  %18819 = vmatprep.subr.bf16.mxu1 %v18910_v16 }
 0x32f   : > { %v12947_v11 = vunpack.c.l.b16 %v12480_v13  ;;  %v12634_v34 = vrot.slane %v12627_v14, %v19107_v53  ;;  %v12648_v19 = vrot.slane %v12641_v28, %v19107_v53  ;;  %v12948_v39 = vunpack.c.l.b16 %v12494_v43  ;;  %v18254_v14 = vld.sshfl [vmem:[#allocation2 + $0x84] sm:$0x32 pattern:$0x75316420]  ;;  %18827 = vmatpush3.bf16.msra.mxu1 %v18910_v16  ;;  %18801 = vmatprep.subr.bf16.mxu0 %v18910_v16 }
 0x330   : > { %v12662_v21 = vrot.slane %v12655_v33, %v19107_v53  ;;  %v12676_v47 = vrot.slane %v12669_v61, %v19107_v53  ;;  %v12690_v44 = vrot.slane %v12683_v12, %v19107_v53  ;;  %v12949_v45 = vunpack.c.l.b16 %v12508_v7  ;;  %v18255_v12 = vld.sshfl [vmem:[#allocation2 + $0x88] sm:$0x33 pattern:$0x75316420]  ;;  %18802 = vmatpush3.bf16.msra.mxu0 %v18910_v16 }
 0x331   : > { %v12950_v55 = vunpack.c.l.b16 %v12522_v37  ;;  %v12951_v18 = vunpack.c.l.b16 %v12536_v10  ;;  %v12952_v27 = vunpack.c.l.b16 %v12550_v25  ;;  %v12953_v36 = vunpack.c.l.b16 %v12564_v60  ;;  %v23580_v25 = vld [vmem:[#allocation15_spill] sm:$0xff] }
 0x332   : > { %v12954_v5 = vunpack.c.l.b16 %v12578_v0  ;;  %v12955_v3 = vunpack.c.l.b16 %v12592_v32  ;;  %v12956_v20 = vunpack.c.l.b16 %v12606_v17  ;;  %v12957_v46 = vunpack.c.l.b16 %v12620_v24  ;;  %v18252_v60 = vld.sshfl [vmem:[#allocation2 + $0x70] sm:$0x33 pattern:$0x75316420] }
 0x333   : > { %v12958_v22 = vunpack.c.l.b16 %v12634_v34  ;;  %v12959_v52 = vunpack.c.l.b16 %v12648_v19  ;;  %v12960_v42 = vunpack.c.l.b16 %v12662_v21  ;;  %v12961_v40 = vunpack.c.l.b16 %v12676_v47 }
 0x334   : > { %v12962_v48 = vunpack.c.l.b16 %v12690_v44  ;;  %v13035_v4 = vrot.slane %v12948_v39, 7  ;;  %v13037_v15 = vrot.slane %v12949_v45, 6  ;;  %v13039_v26 = vrot.slane %v12950_v55, 5 }
 0x335   : > { %v13041_v41 = vrot.slane %v12951_v18, 4  ;;  %v13043_v23 = vrot.slane %v12952_v27, 3  ;;  %v13045_v2 = vrot.slane %v12953_v36, 2  ;;  %v13047_v30 = vrot.slane %v12954_v5, 1 }
 0x336   : > { %v13049_v1 = vrot.slane %v12956_v20, 7  ;;  %v13036_v58 = vsel %vm2407_vm8, %v13035_v4, %v12947_v11  ;;  %v13051_v57 = vrot.slane %v12957_v46, 6  ;;  %v13053_v13 = vrot.slane %v12958_v22, 5 }
 0x337   : > { %v13055_v29 = vrot.slane %v12959_v52, 4  ;;  %v13038_v50 = vsel %vm2410_vm11, %v13037_v15, %v13036_v58  ;;  %v13057_v43 = vrot.slane %v12960_v42, 3  ;;  %v13059_v7 = vrot.slane %v12961_v40, 2 }
 0x338   : > { %v13050_v35 = vsel %vm2407_vm8, %v13049_v1, %v12955_v3  ;;  %v13040_v37 = vsel %vm2413_vm12, %v13039_v26, %v13038_v50  ;;  %v13061_v8 = vrot.slane %v12962_v48, 1  ;;  %v744_v31 = vrot.slane %v23579_v54, 4 }
 0x339   : > { %v13052_v59 = vsel %vm2410_vm11, %v13051_v57, %v13050_v35  ;;  %v13042_v51 = vsel %vm2416_vm13, %v13041_v41, %v13040_v37  ;;  %v778_v62 = vrot.slane %v23580_v25, 4  ;;  %v10277_v0 = vcombine.high %v18251_v56, %v18251_v56 }
 0x33a   : > { %v13054_v10 = vsel %vm2413_vm12, %v13053_v13, %v13052_v59  ;;  %v13044_v32 = vsel %vm2419_vm0, %v13043_v23, %v13042_v51  ;;  %v979_v17 = vsel %vm19310_vm5, %v744_v31, %v978_v63  ;;  %v10284_v28 = vrot.slane %v18251_v56, %v19107_v53 }
 0x33b   : > { %v13056_v9 = vsel %vm2416_vm13, %v13055_v29, %v13054_v10  ;;  %v13046_v33 = vsel %vm2422_vm2, %v13045_v2, %v13044_v32  ;;  %980 = vst [vmem:[#allocation2 + $0x74] sm:$0x1] %v979_v17  ;;  %v993_v61 = vsel %vm19310_vm5, %v778_v62, %v992_v6  ;;  %v10291_v11 = vrot.slane %v10277_v0, %v19107_v53 }
 0x33c   : > { %v13058_v24 = vsel %vm2419_vm0, %v13057_v43, %v13056_v9  ;;  %v13048_v34 = vsel %vm2425_vm4, %v13047_v30, %v13046_v33  ;;  %994 = vst [vmem:[#allocation2 + $0x8c] sm:$0x1] %v993_v61  ;;  %v10292_v21 = vcombine.high %v10284_v28, %v10284_v28  ;;  %v10301_v39 = vcombine.high %v18252_v60, %v18252_v60 }
 0x33d   : > { %v13060_v19 = vsel %vm2422_vm2, %v13059_v7, %v13058_v24  ;;  %v10293_v44 = vcombine.high %v10291_v11, %v10291_v11  ;;  %v22350_v45 = vrot.slane %v18252_v60, %v19107_v53  ;;  %v10339_v55 = vcombine.high %v18254_v14, %v18254_v14 }
 0x33e   : > { %v13062_v47 = vsel %vm2425_vm4, %v13061_v8, %v13060_v19  ;;  %v22353_v27 = vrot.slane %v10301_v39, %v19107_v53  ;;  %v10346_v36 = vrot.slane %v18254_v14, %v19107_v53  ;;  %v10363_v5 = vcombine.high %v18255_v12, %v18255_v12 }
 0x33f   : > { %v13093_v18 = vpack.c.b16 %v13062_v47, %v13048_v34  ;;  %v22358_v3 = vcombine.high %v22350_v45, %v22350_v45  ;;  %v10353_v20 = vrot.slane %v10339_v55, %v19107_v53  ;;  %v22362_v46 = vrot.slane %v18255_v12, %v19107_v53 }
 0x340   : > { %v10972_v22 = vrot.slane %v10291_v11, %v19107_v53  ;;  %v22367_v52 = vcombine.high %v22353_v27, %v22353_v27  ;;  %v10354_v42 = vcombine.high %v10346_v36, %v10346_v36  ;;  %v22370_v40 = vrot.slane %v10363_v5, %v19107_v53 }
 0x341   : > { %17735 = vmatmul.mubr.bf16.gmra.mrb[24].mxu1 %v13093_v18  ;;  %v10986_v48 = vrot.slane %v10292_v21, %v19107_v53  ;;  %v10355_v4 = vcombine.high %v10353_v20, %v10353_v20  ;;  %v22375_v15 = vcombine.high %v22362_v46, %v22362_v46  ;;  %v11000_v41 = vrot.slane %v10293_v44, %v19107_v53 }
 0x342   : > { %v10979_v26 = vrot.slane %v10972_v22, %v19107_v53  ;;  %v18253_v56 = vld.sshfl [vmem:[#allocation2 + $0x74] sm:$0x1 pattern:$0x75316420]  ;;  %v22381_v23 = vcombine.high %v22370_v40, %v22370_v40  ;;  %v11014_v30 = vrot.slane %v22350_v45, %v19107_v53  ;;  %v11028_v1 = vrot.slane %v22353_v27, %v19107_v53 }
 0x343   : > { %v10993_v2 = vrot.slane %v10986_v48, %v19107_v53  ;;  %v18256_v58 = vld.sshfl [vmem:[#allocation2 + $0x8c] sm:$0x1 pattern:$0x75316420]  ;;  %v22389_v57 = vrot.slane %v18253_v56, %v19107_v53  ;;  %v11007_v13 = vrot.slane %v11000_v41, %v19107_v53  ;;  %v11042_v29 = vrot.slane %v22358_v3, %v19107_v53 }
 0x344   : > { %v11056_v50 = vrot.slane %v22367_v52, %v19107_v53  ;;  %v22397_v35 = vrot.slane %v18256_v58, %v19107_v53  ;;  %v11021_v43 = vrot.slane %v11014_v30, %v19107_v53  ;;  %v11035_v7 = vrot.slane %v11028_v1, %v19107_v53  ;;  %v18163_v48 = vld.sshfl [vmem:[#allocation2 + $0x6c] sm:$0x33 pattern:$0x75316420] }
 0x345   : > { %v11084_v63 = vrot.slane %v10353_v20, %v19107_v53  ;;  %v11049_v37 = vrot.slane %v11042_v29, %v19107_v53  ;;  %v11070_v8 = vrot.slane %v22389_v57, %v19107_v53  ;;  %v11098_v54 = vrot.slane %v10354_v42, %v19107_v53 }
 0x346   : > { %v11063_v59 = vrot.slane %v11056_v50, %v19107_v53  ;;  %v11112_v6 = vrot.slane %v10355_v4, %v19107_v53  ;;  %v11126_v16 = vrot.slane %v22362_v46, %v19107_v53  ;;  %v11140_v51 = vrot.slane %v22370_v40, %v19107_v53 }
 0x347   : > { %v11091_v31 = vrot.slane %v11084_v63, %v19107_v53  ;;  %v11077_v10 = vrot.slane %v11070_v8, %v19107_v53  ;;  %v11105_v25 = vrot.slane %v11098_v54, %v19107_v53  ;;  %v11154_v62 = vrot.slane %v22375_v15, %v19107_v53 }
 0x348   : > { %v11168_v60 = vrot.slane %v22381_v23, %v19107_v53  ;;  %v11119_v0 = vrot.slane %v11112_v6, %v19107_v53  ;;  %v11133_v32 = vrot.slane %v11126_v16, %v19107_v53  ;;  %v11147_v9 = vrot.slane %v11140_v51, %v19107_v53 }
 0x349   : > { %v11182_v17 = vrot.slane %v22397_v35, %v19107_v53  ;;  %v11161_v14 = vrot.slane %v11154_v62, %v19107_v53  ;;  %v11446_v33 = vunpack.c.l.b16 %v10979_v26  ;;  %v11447_v24 = vunpack.c.l.b16 %v10993_v2  ;;  %v18166_v2 = vld.sshfl [vmem:[#allocation2 + $0x84] sm:$0x33 pattern:$0x75316420] }
 0x34a   : > { %v11175_v28 = vrot.slane %v11168_v60, %v19107_v53  ;;  %v11448_v12 = vunpack.c.l.b16 %v11007_v13  ;;  %v11449_v11 = vunpack.c.l.b16 %v11021_v43  ;;  %v11450_v34 = vunpack.c.l.b16 %v11035_v7 }
 0x34b   : > { %v11189_v61 = vrot.slane %v11182_v17, %v19107_v53  ;;  %v11451_v19 = vunpack.c.l.b16 %v11049_v37  ;;  %v11452_v21 = vunpack.c.l.b16 %v11063_v59  ;;  %v11453_v39 = vunpack.c.l.b16 %v11077_v10 }
 0x34c   : > { %v11454_v47 = vunpack.c.l.b16 %v11091_v31  ;;  %v11455_v44 = vunpack.c.l.b16 %v11105_v25  ;;  %v11456_v55 = vunpack.c.l.b16 %v11119_v0  ;;  %v11457_v18 = vunpack.c.l.b16 %v11133_v32 }
 0x34d   : > { %v11458_v36 = vunpack.c.l.b16 %v11147_v9  ;;  %v11459_v5 = vunpack.c.l.b16 %v11161_v14  ;;  %v11460_v20 = vunpack.c.l.b16 %v11175_v28  ;;  %v11461_v22 = vunpack.c.l.b16 %v11189_v61 }
 0x34e   : > { %v11534_v42 = vrot.slane %v11447_v24, 7  ;;  %v11536_v4 = vrot.slane %v11448_v12, 6  ;;  %v11538_v26 = vrot.slane %v11449_v11, 5  ;;  %v11540_v41 = vrot.slane %v11450_v34, 4 }
 0x34f   : > { %v11542_v56 = vrot.slane %v11451_v19, 3  ;;  %v11544_v1 = vrot.slane %v11452_v21, 2  ;;  %v11546_v58 = vrot.slane %v11453_v39, 1  ;;  %v11548_v13 = vrot.slane %v11455_v44, 7 }
 0x350   : > { %v11535_v30 = vsel %vm2407_vm8, %v11534_v42, %v11446_v33  ;;  %v11550_v50 = vrot.slane %v11456_v55, 6  ;;  %v11552_v43 = vrot.slane %v11457_v18, 5  ;;  %v11554_v7 = vrot.slane %v11458_v36, 4 }
 0x351   : > { %v11537_v29 = vsel %vm2410_vm11, %v11536_v4, %v11535_v30  ;;  %v11549_v37 = vsel %vm2407_vm8, %v11548_v13, %v11454_v47  ;;  %v11556_v59 = vrot.slane %v11459_v5, 3  ;;  %v11558_v8 = vrot.slane %v11460_v20, 2 }
 0x352   : > { %v11539_v63 = vsel %vm2413_vm12, %v11538_v26, %v11537_v29  ;;  %v11551_v31 = vsel %vm2410_vm11, %v11550_v50, %v11549_v37  ;;  %v11560_v6 = vrot.slane %v11461_v22, 1  ;;  %v8129_v16 = vcombine.high %v18163_v48, %v18163_v48 }
 0x353   : > { %v11541_v54 = vsel %vm2416_vm13, %v11540_v41, %v11539_v63  ;;  %v11553_v10 = vsel %vm2413_vm12, %v11552_v43, %v11551_v31  ;;  %v8136_v25 = vrot.slane %v18163_v48, %v19107_v53  ;;  %v8191_v62 = vcombine.high %v18166_v2, %v18166_v2 }
 0x354   : > { %v11543_v51 = vsel %vm2419_vm0, %v11542_v56, %v11541_v54  ;;  %v11555_v0 = vsel %vm2416_vm13, %v11554_v7, %v11553_v10  ;;  %v8143_v32 = vrot.slane %v8129_v16, %v19107_v53  ;;  %v8198_v9 = vrot.slane %v18166_v2, %v19107_v53 }
 0x355   : > { %v11545_v60 = vsel %vm2422_vm2, %v11544_v1, %v11543_v51  ;;  %v11557_v14 = vsel %vm2419_vm0, %v11556_v59, %v11555_v0  ;;  %v8144_v28 = vcombine.high %v8136_v25, %v8136_v25  ;;  %v8205_v33 = vrot.slane %v8191_v62, %v19107_v53 }
 0x356   : > { %v11547_v17 = vsel %vm2425_vm4, %v11546_v58, %v11545_v60  ;;  %v11559_v24 = vsel %vm2422_vm2, %v11558_v8, %v11557_v14  ;;  %v8145_v61 = vcombine.high %v8143_v32, %v8143_v32  ;;  %v8206_v12 = vcombine.high %v8198_v9, %v8198_v9 }
 0x357   : > { %v8631_v11 = vshrl.u32 %v8136_v25, 16  ;;  %v11561_v34 = vsel %vm2425_vm4, %v11560_v6, %v11559_v24  ;;  %v8207_v19 = vcombine.high %v8205_v33, %v8205_v33  ;;  %v8636_v21 = vshll.u32 %v8143_v32, 16 }
 0x358   : > { %v8639_v39 = vshrl.u32 %v8143_v32, 16  ;;  %v11592_v47 = vpack.c.b16 %v11561_v34, %v11547_v17  ;;  %v8644_v44 = vshll.u32 %v8144_v28, 16  ;;  %v8647_v55 = vshrl.u32 %v8144_v28, 16 }
 0x359   : > { %v8652_v18 = vshll.u32 %v8145_v61, 16  ;;  %v8638_v36 = vsel %vm19258_vm10, %v8631_v11, %v8636_v21  ;;  %v8655_v5 = vshrl.u32 %v8145_v61, 16  ;;  %v8660_v20 = vshll.u32 %v22350_v45, 16 }
 0x35a   : > { %v8663_v22 = vshrl.u32 %v22350_v45, 16  ;;  %17669 = vmatprep.mubr.bf16.mxu0 %v11592_v47  ;;  %v8646_v42 = vsel %vm19258_vm10, %v8639_v39, %v8644_v44  ;;  %v8668_v4 = vshll.u32 %v22353_v27, 16  ;;  %v8671_v26 = vshrl.u32 %v22353_v27, 16 }
 0x35b   : > { %v8654_v48 = vsel %vm19258_vm10, %v8647_v55, %v8652_v18  ;;  %v8662_v41 = vsel %vm19258_vm10, %v8655_v5, %v8660_v20  ;;  %v8676_v56 = vshll.u32 %v22358_v3, 16  ;;  %v8679_v2 = vshrl.u32 %v22358_v3, 16 }
 0x35c   : > { %v8684_v45 = vshll.u32 %v22367_v52, 16  ;;  %v8670_v30 = vsel %vm19258_vm10, %v8663_v22, %v8668_v4  ;;  %v8687_v1 = vshrl.u32 %v22367_v52, 16  ;;  %v8692_v58 = vshll.u32 %v22389_v57, 16 }
 0x35d   : > { %v8696_v13 = vshrl.u32 %v8198_v9, 16  ;;  %v8678_v27 = vsel %vm19258_vm10, %v8671_v26, %v8676_v56  ;;  %v8701_v50 = vshll.u32 %v8205_v33, 16  ;;  %v8704_v43 = vshrl.u32 %v8205_v33, 16 }
 0x35e   : > { %v8686_v29 = vsel %vm19258_vm10, %v8679_v2, %v8684_v45  ;;  %v8694_v3 = vsel %vm19258_vm10, %v8687_v1, %v8692_v58  ;;  %v8709_v7 = vshll.u32 %v8206_v12, 16  ;;  %v8712_v63 = vshrl.u32 %v8206_v12, 16 }
 0x35f   : > { %v8717_v37 = vshll.u32 %v8207_v19, 16  ;;  %v8703_v52 = vsel %vm19258_vm10, %v8696_v13, %v8701_v50  ;;  %v8720_v59 = vshrl.u32 %v8207_v19, 16  ;;  %v8725_v57 = vshll.u32 %v22362_v46, 16 }
 0x360   : > { %v8728_v8 = vshrl.u32 %v22362_v46, 16  ;;  %v8711_v54 = vsel %vm19258_vm10, %v8704_v43, %v8709_v7  ;;  %v8733_v6 = vshll.u32 %v22370_v40, 16  ;;  %v8736_v16 = vshrl.u32 %v22370_v40, 16 }
 0x361   : > { %v8719_v31 = vsel %vm19258_vm10, %v8712_v63, %v8717_v37  ;;  %v8727_v51 = vsel %vm19258_vm10, %v8720_v59, %v8725_v57  ;;  %v8741_v10 = vshll.u32 %v22375_v15, 16  ;;  %v8744_v25 = vshrl.u32 %v22375_v15, 16 }
 0x362   : > { %v8749_v62 = vshll.u32 %v22381_v23, 16  ;;  %v8735_v46 = vsel %vm19258_vm10, %v8728_v8, %v8733_v6  ;;  %v8752_v60 = vshrl.u32 %v22381_v23, 16  ;;  %v8757_v0 = vshll.u32 %v22397_v35, 16 }
 0x363   : > { %v9344_v32 = vrot.slane %v8638_v36, %v19107_v53  ;;  %v8743_v40 = vsel %vm19258_vm10, %v8736_v16, %v8741_v10  ;;  %v9358_v17 = vrot.slane %v8646_v42, %v19107_v53  ;;  %v9372_v15 = vrot.slane %v8654_v48, %v19107_v53 }
 0x364   : > { %v8751_v9 = vsel %vm19258_vm10, %v8744_v25, %v8749_v62  ;;  %v8759_v14 = vsel %vm19258_vm10, %v8752_v60, %v8757_v0  ;;  %v9386_v23 = vrot.slane %v8662_v41, %v19107_v53  ;;  %v9400_v35 = vrot.slane %v8670_v30, %v19107_v53  ;;  %v18297_v62 = vld.sshfl [vmem:[#allocation2 + $0xa8] sm:$0x33 pattern:$0x75316420] }
 0x365   : > { %v9351_v28 = vrot.slane %v9344_v32, %v19107_v53  ;;  %v9365_v33 = vrot.slane %v9358_v17, %v19107_v53  ;;  %v9379_v24 = vrot.slane %v9372_v15, %v19107_v53  ;;  %v9414_v61 = vrot.slane %v8678_v27, %v19107_v53 }
 0x366   : > { %v9428_v12 = vrot.slane %v8686_v29, %v19107_v53  ;;  %v9393_v11 = vrot.slane %v9386_v23, %v19107_v53  ;;  %v9407_v34 = vrot.slane %v9400_v35, %v19107_v53  ;;  %v9442_v19 = vrot.slane %v8694_v3, %v19107_v53 }
 0x367   : > { %v9456_v21 = vrot.slane %v8703_v52, %v19107_v53  ;;  %v9421_v39 = vrot.slane %v9414_v61, %v19107_v53  ;;  %v9470_v44 = vrot.slane %v8711_v54, %v19107_v53  ;;  %v9484_v55 = vrot.slane %v8719_v31, %v19107_v53 }
 0x368   : > { %v9435_v47 = vrot.slane %v9428_v12, %v19107_v53  ;;  %v9449_v18 = vrot.slane %v9442_v19, %v19107_v53  ;;  %v9498_v5 = vrot.slane %v8727_v51, %v19107_v53  ;;  %v9512_v20 = vrot.slane %v8735_v46, %v19107_v53 }
 0x369   : > { %v9463_v36 = vrot.slane %v9456_v21, %v19107_v53  ;;  %v9477_v22 = vrot.slane %v9470_v44, %v19107_v53  ;;  %v9491_v42 = vrot.slane %v9484_v55, %v19107_v53  ;;  %v9526_v48 = vrot.slane %v8743_v40, %v19107_v53  ;;  %v18613_v40 = vld [vmem:[%s18972_s28 + $0x78] sm:$0xff]  }
 0x36a   : > { %v9540_v4 = vrot.slane %v8751_v9, %v19107_v53  ;;  %v9505_v26 = vrot.slane %v9498_v5, %v19107_v53  ;;  %v9519_v41 = vrot.slane %v9512_v20, %v19107_v53  ;;  %v9554_v56 = vrot.slane %v8759_v14, %v19107_v53 }
 0x36b   : > { %v9818_v2 = vunpack.c.l.b16 %v9351_v28  ;;  %v9533_v45 = vrot.slane %v9526_v48, %v19107_v53  ;;  %v9819_v1 = vunpack.c.l.b16 %v9365_v33  ;;  %v9820_v58 = vunpack.c.l.b16 %v9379_v24  ;;  %v18911_v24 = vld [vmem:[%s23419_s4 + $0x238] sm:$0xff]  }
 0x36c   : > { %v9547_v30 = vrot.slane %v9540_v4, %v19107_v53  ;;  %v9561_v13 = vrot.slane %v9554_v56, %v19107_v53  ;;  %v9821_v27 = vunpack.c.l.b16 %v9393_v11  ;;  %v9822_v29 = vunpack.c.l.b16 %v9407_v34  ;;  %18820 = vmatprep.subr.bf16.mxu1 %v18911_v24  ;;  %18803 = vmatprep.subr.bf16.mxu0 %v18911_v24  ;;  %v23582_v56 = vld [vmem:[#allocation5_spill] sm:$0xff] }
 0x36d   : > { %v9823_v50 = vunpack.c.l.b16 %v9421_v39  ;;  %v9824_v43 = vunpack.c.l.b16 %v9435_v47  ;;  %v9825_v3 = vunpack.c.l.b16 %v9449_v18  ;;  %v9826_v7 = vunpack.c.l.b16 %v9463_v36  ;;  %v18298_v39 = vld.sshfl [vmem:[#allocation2 + $0xac] sm:$0x33 pattern:$0x75316420]  ;;  %v23581_v36 = vld [vmem:[#allocation4_spill] sm:$0xff]  ;;  %18828 = vmatpush3.bf16.msra.mxu1 %v18911_v24  ;;  %18804 = vmatpush3.bf16.msra.mxu0 %v18911_v24 }
 0x36e   : > { %v9827_v63 = vunpack.c.l.b16 %v9477_v22  ;;  %v9828_v37 = vunpack.c.l.b16 %v9491_v42  ;;  %v9829_v52 = vunpack.c.l.b16 %v9505_v26  ;;  %v9830_v59 = vunpack.c.l.b16 %v9519_v41  ;;  %v22546_v22 = vld.sshfl [vmem:[#allocation2 + $0xb0] sm:$0x1 pattern:$0x75316420] }
 0x36f   : > { %v9831_v57 = vunpack.c.l.b16 %v9533_v45  ;;  %v9832_v8 = vunpack.c.l.b16 %v9547_v30  ;;  %v9833_v54 = vunpack.c.l.b16 %v9561_v13  ;;  %v9906_v31 = vrot.slane %v9819_v1, 7 }
 0x370   : > { %v9908_v6 = vrot.slane %v9820_v58, 6  ;;  %v9910_v16 = vrot.slane %v9821_v27, 5  ;;  %v9912_v51 = vrot.slane %v9822_v29, 4  ;;  %v9914_v10 = vrot.slane %v9823_v50, 3 }
 0x371   : > { %v9916_v25 = vrot.slane %v9824_v43, 2  ;;  %v9907_v46 = vsel %vm2407_vm8, %v9906_v31, %v9818_v2  ;;  %v9918_v60 = vrot.slane %v9825_v3, 1  ;;  %v9920_v0 = vrot.slane %v9827_v63, 7 }
 0x372   : > { %v9922_v32 = vrot.slane %v9828_v37, 6  ;;  %v9909_v9 = vsel %vm2410_vm11, %v9908_v6, %v9907_v46  ;;  %v9924_v17 = vrot.slane %v9829_v52, 5  ;;  %v9926_v15 = vrot.slane %v9830_v59, 4 }
 0x373   : > { %v9928_v14 = vrot.slane %v9831_v57, 3  ;;  %v9911_v28 = vsel %vm2413_vm12, %v9910_v16, %v9909_v9  ;;  %v9921_v23 = vsel %vm2407_vm8, %v9920_v0, %v9826_v7  ;;  %v9930_v35 = vrot.slane %v9832_v8, 2 }
 0x374   : > { %v9932_v33 = vrot.slane %v9833_v54, 1  ;;  %v9913_v61 = vsel %vm2416_vm13, %v9912_v51, %v9911_v28  ;;  %v9923_v12 = vsel %vm2410_vm11, %v9922_v32, %v9921_v23  ;;  %v18577_v11 = vunpack.c.l.bf16 %v18613_v40  ;;  %v1027_v23 = vld [vmem:[#allocation2 + $0xc8] sm:$0x1] }
 0x375   : > { %v18578_v34 = vunpack.c.h.bf16 %v18613_v40  ;;  %v9915_v19 = vsel %vm2419_vm0, %v9914_v10, %v9913_v61  ;;  %v9925_v21 = vsel %vm2413_vm12, %v9924_v17, %v9923_v12  ;;  %v13530_v47 = vcombine.high %v18297_v62, %v18297_v62 }
 0x376   : > { %v22540_v44 = vrot.slane %v18297_v62, %v19107_v53  ;;  %v9917_v55 = vsel %vm2422_vm2, %v9916_v25, %v9915_v19  ;;  %v9927_v18 = vsel %vm2416_vm13, %v9926_v15, %v9925_v21  ;;  %v421_v5 = vmul.f32 %v18577_v11, %v23581_v36  ;;  %v1023_v15 = vld [vmem:[#allocation2 + $0xc0] sm:$0xf] }
 0x377   : > { %v422_v20 = vmul.f32 %v18578_v34, %v23581_v36  ;;  %v9919_v42 = vsel %vm2425_vm4, %v9918_v60, %v9917_v55  ;;  %v9929_v48 = vsel %vm2419_vm0, %v9928_v14, %v9927_v18  ;;  %v22551_v4 = vrot.slane %v13530_v47, %v19107_v53 }
 0x378   : > { %v22555_v26 = vcombine.high %v22540_v44, %v22540_v44  ;;  %v9931_v41 = vsel %vm2422_vm2, %v9930_v35, %v9929_v48  ;;  %v459_v2 = vadd.f32 %v23582_v56, %v421_v5  ;;  %v13554_v30 = vcombine.high %v18298_v39, %v18298_v39 }
 0x379   : > { %v460_v45 = vadd.f32 %v23582_v56, %v422_v20  ;;  %v9933_v1 = vsel %vm2425_vm4, %v9932_v33, %v9931_v41  ;;  %v22563_v58 = vcombine.high %v22551_v4, %v22551_v4  ;;  %v22566_v13 = vrot.slane %v18298_v39, %v19107_v53 }
 0x37a   : > { %v13584_v27 = vrot.slane %v22546_v22, %v19107_v53  ;;  %v9964_v29 = vpack.c.b16 %v9933_v1, %v9919_v42  ;;  %v491_v50 = vmax.f32 %v459_v2, 0.0  ;;  %v22571_v3 = vrot.slane %v13554_v30, %v19107_v53 }
 0x37b   : > { %v492_v43 = vmax.f32 %v460_v45, 0.0  ;;  %v22575_v7 = vcombine.high %v22566_v13, %v22566_v13  ;;  %v14038_v63 = vshrl.u32 %v22540_v44, 16  ;;  %v14043_v37 = vshll.u32 %v22551_v4, 16 }
 0x37c   : > { %v14046_v52 = vshrl.u32 %v22551_v4, 16  ;;  %17670 = vmatmul.mubr.bf16.gmra.mrb[24].mxu0 %v9964_v29  ;;  %v18505_v59 = vpack.c.bf16 %v491_v50, %v491_v50  ;;  %v22582_v8 = vcombine.high %v22571_v3, %v22571_v3  ;;  %v14051_v54 = vshll.u32 %v22555_v26, 16 }
 0x37d   : > { %v18506_v57 = vpack.c.bf16 %v492_v43, %v492_v43  ;;  %v14045_v31 = vsel %vm19258_vm10, %v14038_v63, %v14043_v37  ;;  %v14054_v6 = vshrl.u32 %v22555_v26, 16  ;;  %v14059_v16 = vshll.u32 %v22563_v58, 16 }
 0x37e   : > { %v14062_v51 = vshrl.u32 %v22563_v58, 16  ;;  %v848_v10 = vshrl.u32 %v18505_v59, 16  ;;  %v851_v25 = vshll.u32 %v18505_v59, 16  ;;  %v14053_v60 = vsel %vm19258_vm10, %v14046_v52, %v14051_v54 }
 0x37f   : > { %v856_v62 = vshrl.u32 %v18506_v57, 16  ;;  %v859_v46 = vshll.u32 %v18506_v57, 16  ;;  %v14061_v0 = vsel %vm19258_vm10, %v14054_v6, %v14059_v16  ;;  %v14067_v32 = vshll.u32 %v22566_v13, 16 }
 0x380   : > { %v14070_v40 = vshrl.u32 %v22566_v13, 16  ;;  %v850_v9 = vrot.slane %v848_v10, 7  ;;  %v14075_v14 = vshll.u32 %v22571_v3, 16  ;;  %v14078_v28 = vshrl.u32 %v22571_v3, 16 }
 0x381   : > { %v858_v17 = vrot.slane %v856_v62, 7  ;;  %v14069_v35 = vsel %vm19258_vm10, %v14062_v51, %v14067_v32  ;;  %v14083_v33 = vshll.u32 %v22575_v7, 16  ;;  %v14086_v24 = vshrl.u32 %v22575_v7, 16 }
 0x382   : > { %v14091_v61 = vshll.u32 %v22582_v8, 16  ;;  %v853_v12 = vor.u32 %v851_v25, %v850_v9  ;;  %v854_v11 = vrot.slane %v850_v9, 4  ;;  %v14077_v21 = vsel %vm19258_vm10, %v14070_v40, %v14075_v14 }
 0x383   : > { %v861_v34 = vor.u32 %v859_v46, %v858_v17  ;;  %v863_v19 = vrot.slane %v858_v17, 4  ;;  %v14085_v39 = vsel %vm19258_vm10, %v14078_v28, %v14083_v33  ;;  %v14094_v55 = vshrl.u32 %v22582_v8, 16 }
 0x384   : > { %v14093_v47 = vsel %vm19258_vm10, %v14086_v24, %v14091_v61  ;;  %v1024_v20 = vsel %vm19298_vm3, %v853_v12, %v1023_v15  ;;  %v14099_v42 = vshll.u32 %v13584_v27, 16  ;;  %v14845_v48 = vrot.slane %v14045_v31, %v19107_v53 }
 0x385   : > { %v862_v36 = vsel %vm19288_vm15, %v854_v11, %v861_v34  ;;  %v1028_v22 = vsel %vm19310_vm5, %v863_v19, %v1027_v23  ;;  %1025 = vst [vmem:[#allocation2 + $0xc0] sm:$0xf] %v1024_v20  ;;  %v14859_v41 = vrot.slane %v14053_v60, %v19107_v53  ;;  %v14873_v56 = vrot.slane %v14061_v0, %v19107_v53 }
 0x386   : > { %1026 = vst [vmem:[#allocation2 + $0xc4] sm:$0xf] %v862_v36  ;;  %1029 = vst [vmem:[#allocation2 + $0xc8] sm:$0x1] %v1028_v22  ;;  %v14887_v2 = vrot.slane %v14069_v35, %v19107_v53  ;;  %v14101_v45 = vsel %vm19258_vm10, %v14094_v55, %v14099_v42  ;;  %v14901_v30 = vrot.slane %v14077_v21, %v19107_v53 }
 0x387   : > { %v14915_v1 = vrot.slane %v14085_v39, %v19107_v53  ;;  %v14929_v27 = vrot.slane %v14093_v47, %v19107_v53  ;;  %v14852_v29 = vrot.slane %v14845_v48, %v19107_v53  ;;  %v14866_v50 = vrot.slane %v14859_v41, %v19107_v53 }
 0x388   : > { %v14880_v43 = vrot.slane %v14873_v56, %v19107_v53  ;;  %v14894_v63 = vrot.slane %v14887_v2, %v19107_v53  ;;  %v14908_v37 = vrot.slane %v14901_v30, %v19107_v53  ;;  %v14943_v57 = vrot.slane %v14101_v45, %v19107_v53 }
 0x389   : > { %v14922_v52 = vrot.slane %v14915_v1, %v19107_v53  ;;  %v14936_v59 = vrot.slane %v14929_v27, %v19107_v53  ;;  %v15111_v54 = vunpack.c.l.b16 %v14852_v29  ;;  %v15112_v31 = vunpack.c.l.b16 %v14866_v50 }
 0x38a   : > { %v15113_v6 = vunpack.c.l.b16 %v14880_v43  ;;  %v15114_v16 = vunpack.c.l.b16 %v14894_v63  ;;  %v14950_v51 = vrot.slane %v14943_v57, %v19107_v53  ;;  %v15115_v10 = vunpack.c.l.b16 %v14908_v37 }
 0x38b   : > { %v15116_v25 = vunpack.c.l.b16 %v14922_v52  ;;  %v15117_v62 = vunpack.c.l.b16 %v14936_v59  ;;  %v15211_v46 = vrot.slane %v15112_v31, 7  ;;  %v12697_v32 = vrot.slane %v22540_v44, %v19107_v53 }
 0x38c   : > { %v15213_v60 = vrot.slane %v15113_v6, 6  ;;  %v22634_v0 = vrot.slane %v15114_v16, 5  ;;  %v18300_v40 = vld.sshfl [vmem:[#allocation2 + $0xc0] sm:$0x33 pattern:$0x75316420]  ;;  %v15118_v9 = vunpack.c.l.b16 %v14950_v51  ;;  %v12711_v14 = vrot.slane %v22551_v4, %v19107_v53 }
 0x38d   : > { %v22638_v17 = vrot.slane %v15115_v10, 4  ;;  %v22640_v15 = vrot.slane %v15116_v25, 3  ;;  %v18301_v28 = vld.sshfl [vmem:[#allocation2 + $0xc4] sm:$0x33 pattern:$0x75316420]  ;;  %v13592_v23 = vcombine.high %v18300_v40, %v18300_v40  ;;  %v22645_v35 = vrot.slane %v18300_v40, %v19107_v53 }
 0x38e   : > { %v15212_v33 = vsel %vm2407_vm8, %v15211_v46, %v15111_v54  ;;  %v22648_v24 = vrot.slane %v15117_v62, 2  ;;  %v18302_v61 = vld.sshfl [vmem:[#allocation2 + $0xc8] sm:$0x1 pattern:$0x75316420]  ;;  %v13616_v12 = vcombine.high %v18301_v28, %v18301_v28  ;;  %v22651_v11 = vrot.slane %v18301_v28, %v19107_v53 }
 0x38f   : > { %v15214_v34 = vsel %vm2410_vm11, %v15213_v60, %v15212_v33  ;;  %v22654_v19 = vrot.slane %v15118_v9, 1  ;;  %v22657_v21 = vrot.slane %v13592_v23, %v19107_v53  ;;  %v22661_v39 = vcombine.high %v22645_v35, %v22645_v35 }
 0x390   : > { %v13646_v47 = vrot.slane %v18302_v61, %v19107_v53  ;;  %v14103_v55 = vshrl.u32 %v22645_v35, 16  ;;  %v22666_v18 = vrot.slane %v13616_v12, %v19107_v53  ;;  %v22670_v36 = vcombine.high %v22651_v11, %v22651_v11 }
 0x391   : > { %v14132_v5 = vshll.u32 %v22651_v11, 16  ;;  %v14135_v20 = vshrl.u32 %v22651_v11, 16  ;;  %v22676_v22 = vcombine.high %v22657_v21, %v22657_v21  ;;  %v14108_v42 = vshll.u32 %v22657_v21, 16 }
 0x392   : > { %v14111_v48 = vshrl.u32 %v22657_v21, 16  ;;  %v14116_v41 = vshll.u32 %v22661_v39, 16  ;;  %v22683_v56 = vcombine.high %v22666_v18, %v22666_v18  ;;  %v14119_v2 = vshrl.u32 %v22661_v39, 16 }
 0x393   : > { %v14140_v45 = vshll.u32 %v22666_v18, 16  ;;  %v14143_v30 = vshrl.u32 %v22666_v18, 16  ;;  %v14110_v1 = vsel %vm19258_vm10, %v14103_v55, %v14108_v42  ;;  %v14124_v29 = vshll.u32 %v22676_v22, 16 }
 0x394   : > { %v14118_v27 = vsel %vm19258_vm10, %v14111_v48, %v14116_v41  ;;  %v14127_v50 = vshrl.u32 %v22676_v22, 16  ;;  %v14148_v63 = vshll.u32 %v22670_v36, 16  ;;  %v14151_v37 = vshrl.u32 %v22670_v36, 16 }
 0x395   : > { %v14142_v43 = vsel %vm19258_vm10, %v14135_v20, %v14140_v45  ;;  %v14156_v52 = vshll.u32 %v22683_v56, 16  ;;  %v14126_v59 = vsel %vm19258_vm10, %v14119_v2, %v14124_v29  ;;  %v14159_v54 = vshrl.u32 %v22683_v56, 16 }
 0x396   : > { %v14134_v57 = vsel %vm19258_vm10, %v14127_v50, %v14132_v5  ;;  %v14164_v31 = vshll.u32 %v13646_v47, 16  ;;  %v14150_v6 = vsel %vm19258_vm10, %v14143_v30, %v14148_v63  ;;  %v14957_v51 = vrot.slane %v14110_v1, %v19107_v53 }
 0x397   : > { %v14158_v16 = vsel %vm19258_vm10, %v14151_v37, %v14156_v52  ;;  %v14971_v10 = vrot.slane %v14118_v27, %v19107_v53  ;;  %v14985_v62 = vrot.slane %v14126_v59, %v19107_v53  ;;  %v14999_v46 = vrot.slane %v14134_v57, %v19107_v53 }
 0x398   : > { %v14166_v25 = vsel %vm19258_vm10, %v14159_v54, %v14164_v31  ;;  %v15013_v60 = vrot.slane %v14142_v43, %v19107_v53  ;;  %v14964_v40 = vrot.slane %v14957_v51, %v19107_v53  ;;  %v15027_v28 = vrot.slane %v14150_v6, %v19107_v53 }
 0x399   : > { %v14978_v9 = vrot.slane %v14971_v10, %v19107_v53  ;;  %v15041_v23 = vrot.slane %v14158_v16, %v19107_v53  ;;  %v14992_v33 = vrot.slane %v14985_v62, %v19107_v53  ;;  %v15006_v61 = vrot.slane %v14999_v46, %v19107_v53 }
 0x39a   : > { %v15020_v12 = vrot.slane %v15013_v60, %v19107_v53  ;;  %v15055_v47 = vrot.slane %v14166_v25, %v19107_v53  ;;  %v15034_v55 = vrot.slane %v15027_v28, %v19107_v53  ;;  %v15119_v20 = vunpack.c.l.b16 %v14964_v40 }
 0x39b   : > { %v15048_v5 = vrot.slane %v15041_v23, %v19107_v53  ;;  %v15120_v42 = vunpack.c.l.b16 %v14978_v9  ;;  %v15121_v41 = vunpack.c.l.b16 %v14992_v33  ;;  %v15122_v2 = vunpack.c.l.b16 %v15006_v61 }
 0x39c   : > { %v15062_v48 = vrot.slane %v15055_v47, %v19107_v53  ;;  %v15123_v45 = vunpack.c.l.b16 %v15020_v12  ;;  %v15124_v30 = vunpack.c.l.b16 %v15034_v55  ;;  %v15216_v27 = vsel %vm2413_vm12, %v22634_v0, %v15214_v34 }
 0x39d   : > { %v15125_v1 = vunpack.c.l.b16 %v15048_v5  ;;  %v15225_v29 = vrot.slane %v15120_v42, 7  ;;  %v15218_v43 = vsel %vm2416_vm13, %v22638_v17, %v15216_v27  ;;  %v15227_v63 = vrot.slane %v15121_v41, 6 }
 0x39e   : > { %v15126_v50 = vunpack.c.l.b16 %v15062_v48  ;;  %v15229_v37 = vrot.slane %v15122_v2, 5  ;;  %v15220_v52 = vsel %vm2419_vm0, %v22640_v15, %v15218_v43  ;;  %v15231_v57 = vrot.slane %v15123_v45, 4 }
 0x39f   : > { %v15226_v59 = vsel %vm2407_vm8, %v15225_v29, %v15119_v20  ;;  %v15233_v54 = vrot.slane %v15124_v30, 3  ;;  %v15222_v31 = vsel %vm2422_vm2, %v22648_v24, %v15220_v52  ;;  %v15235_v0 = vrot.slane %v15125_v1, 2 }
 0x3a0   : > { %v15228_v6 = vsel %vm2410_vm11, %v15227_v63, %v15226_v59  ;;  %v15237_v34 = vrot.slane %v15126_v50, 1  ;;  %v15224_v16 = vsel %vm2425_vm4, %v22654_v19, %v15222_v31  ;;  %v12704_v15 = vrot.slane %v12697_v32, %v19107_v53 }
 0x3a1   : > { %v15230_v17 = vsel %vm2413_vm12, %v15229_v37, %v15228_v6  ;;  %v12718_v51 = vrot.slane %v12711_v14, %v19107_v53  ;;  %v12725_v10 = vrot.slane %v22555_v26, %v19107_v53  ;;  %v12739_v19 = vrot.slane %v22563_v58, %v19107_v53 }
 0x3a2   : > { %v15232_v24 = vsel %vm2416_vm13, %v15231_v57, %v15230_v17  ;;  %v12753_v25 = vrot.slane %v22566_v13, %v19107_v53  ;;  %v12767_v44 = vrot.slane %v22571_v3, %v19107_v53  ;;  %v12781_v4 = vrot.slane %v22575_v7, %v19107_v53 }
 0x3a3   : > { %v15234_v62 = vsel %vm2419_vm0, %v15233_v54, %v15232_v24  ;;  %v12795_v32 = vrot.slane %v22582_v8, %v19107_v53  ;;  %v12732_v26 = vrot.slane %v12725_v10, %v19107_v53  ;;  %v12746_v58 = vrot.slane %v12739_v19, %v19107_v53  ;;  %v18257_v54 = vld.sshfl [vmem:[#allocation2 + $0x9c] sm:$0x32 pattern:$0x75316420] }
 0x3a4   : > { %v15236_v14 = vsel %vm2422_vm2, %v15235_v0, %v15234_v62  ;;  %v12760_v46 = vrot.slane %v12753_v25, %v19107_v53  ;;  %v12774_v60 = vrot.slane %v12767_v44, %v19107_v53  ;;  %v12788_v3 = vrot.slane %v12781_v4, %v19107_v53  ;;  %v1006_v62 = vld [vmem:[#allocation2 + $0xa4] sm:$0x1] }
 0x3a5   : > { %v15238_v13 = vsel %vm2425_vm4, %v15237_v34, %v15236_v14  ;;  %v12802_v40 = vrot.slane %v12795_v32, %v19107_v53  ;;  %v12809_v8 = vrot.slane %v22645_v35, %v19107_v53  ;;  %v12823_v9 = vrot.slane %v22657_v21, %v19107_v53  ;;  %v23585_v14 = vld [vmem:[#allocation17_spill] sm:$0xff] }
 0x3a6   : > { %v15242_v7 = vpack.c.b16 %v15238_v13, %v15224_v16  ;;  %v12837_v28 = vrot.slane %v22661_v39, %v19107_v53  ;;  %v12851_v23 = vrot.slane %v22676_v22, %v19107_v53  ;;  %v12865_v33 = vrot.slane %v22651_v11, %v19107_v53 }
 0x3a7   : > { %v12879_v61 = vrot.slane %v22666_v18, %v19107_v53  ;;  %v12893_v12 = vrot.slane %v22670_v36, %v19107_v53  ;;  %v12816_v35 = vrot.slane %v12809_v8, %v19107_v53  ;;  %v12830_v21 = vrot.slane %v12823_v9, %v19107_v53 }
 0x3a8   : > { %17742 = vmatprep.mubr.bf16.mxu1 %v15242_v7  ;;  %v12844_v47 = vrot.slane %v12837_v28, %v19107_v53  ;;  %v12907_v39 = vrot.slane %v22683_v56, %v19107_v53  ;;  %v12858_v22 = vrot.slane %v12851_v23, %v19107_v53  ;;  %v12872_v11 = vrot.slane %v12865_v33, %v19107_v53  ;;  %v18260_v23 = vld.sshfl [vmem:[#allocation2 + $0xb4] sm:$0x32 pattern:$0x75316420] }
 0x3a9   : > { %v12886_v55 = vrot.slane %v12879_v61, %v19107_v53  ;;  %v12900_v18 = vrot.slane %v12893_v12, %v19107_v53  ;;  %v12963_v5 = vunpack.c.l.b16 %v12704_v15  ;;  %v12964_v20 = vunpack.c.l.b16 %v12718_v51 }
 0x3aa   : > { %v12914_v36 = vrot.slane %v12907_v39, %v19107_v53  ;;  %v12965_v42 = vunpack.c.l.b16 %v12732_v26  ;;  %v12966_v48 = vunpack.c.l.b16 %v12746_v58  ;;  %v12967_v41 = vunpack.c.l.b16 %v12760_v46  ;;  %v1020_v58 = vld [vmem:[#allocation2 + $0xbc] sm:$0x1] }
 0x3ab   : > { %v12968_v2 = vunpack.c.l.b16 %v12774_v60  ;;  %v12969_v45 = vunpack.c.l.b16 %v12788_v3  ;;  %v12970_v30 = vunpack.c.l.b16 %v12802_v40  ;;  %v12971_v1 = vunpack.c.l.b16 %v12816_v35  ;;  %v23586_v60 = vld [vmem:[#allocation18_spill] sm:$0xff]  ;;  %v18258_v40 = vld.sshfl [vmem:[#allocation2 + $0xa0] sm:$0x33 pattern:$0x75316420] }
 0x3ac   : > { %v12972_v56 = vunpack.c.l.b16 %v12830_v21  ;;  %v12973_v27 = vunpack.c.l.b16 %v12844_v47  ;;  %v12974_v29 = vunpack.c.l.b16 %v12858_v22  ;;  %v12975_v50 = vunpack.c.l.b16 %v12872_v11  ;;  %v18261_v21 = vld.sshfl [vmem:[#allocation2 + $0xb8] sm:$0x33 pattern:$0x75316420] }
 0x3ad   : > { %v12976_v43 = vunpack.c.l.b16 %v12886_v55  ;;  %v12977_v63 = vunpack.c.l.b16 %v12900_v18  ;;  %v12978_v37 = vunpack.c.l.b16 %v12914_v36  ;;  %v13063_v52 = vrot.slane %v12964_v20, 7 }
 0x3ae   : > { %v13065_v59 = vrot.slane %v12965_v42, 6  ;;  %v13067_v57 = vrot.slane %v12966_v48, 5  ;;  %v13069_v31 = vrot.slane %v12967_v41, 4  ;;  %v13071_v6 = vrot.slane %v12968_v2, 3 }
 0x3af   : > { %v13073_v0 = vrot.slane %v12969_v45, 2  ;;  %v13075_v34 = vrot.slane %v12970_v30, 1  ;;  %v13064_v16 = vsel %vm2407_vm8, %v13063_v52, %v12963_v5  ;;  %v13077_v17 = vrot.slane %v12972_v56, 7 }
 0x3b0   : > { %v13079_v15 = vrot.slane %v12973_v27, 6  ;;  %v13081_v51 = vrot.slane %v12974_v29, 5  ;;  %v13066_v24 = vsel %vm2410_vm11, %v13065_v59, %v13064_v16  ;;  %v13083_v10 = vrot.slane %v12975_v50, 4 }
 0x3b1   : > { %v13085_v19 = vrot.slane %v12976_v43, 3  ;;  %v13087_v25 = vrot.slane %v12977_v63, 2  ;;  %v13068_v44 = vsel %vm2413_vm12, %v13067_v57, %v13066_v24  ;;  %v13078_v4 = vsel %vm2407_vm8, %v13077_v17, %v12971_v1 }
 0x3b2   : > { %v13089_v32 = vrot.slane %v12978_v37, 1  ;;  %v812_v26 = vrot.slane %v23585_v14, 4  ;;  %v13070_v46 = vsel %vm2416_vm13, %v13069_v31, %v13068_v44  ;;  %v13080_v13 = vsel %vm2410_vm11, %v13079_v15, %v13078_v4 }
 0x3b3   : > { %v846_v3 = vrot.slane %v23586_v60, 4  ;;  %v10401_v7 = vcombine.high %v18257_v54, %v18257_v54  ;;  %v13072_v8 = vsel %vm2419_vm0, %v13071_v6, %v13070_v46  ;;  %v13082_v9 = vsel %vm2413_vm12, %v13081_v51, %v13080_v13 }
 0x3b4   : > { %v1007_v28 = vsel %vm19310_vm5, %v812_v26, %v1006_v62  ;;  %v10408_v33 = vrot.slane %v18257_v54, %v19107_v53  ;;  %v13074_v61 = vsel %vm2422_vm2, %v13073_v0, %v13072_v8  ;;  %v13084_v12 = vsel %vm2416_vm13, %v13083_v10, %v13082_v9 }
 0x3b5   : > { %1008 = vst [vmem:[#allocation2 + $0xa4] sm:$0x1] %v1007_v28  ;;  %v1021_v35 = vsel %vm19310_vm5, %v846_v3, %v1020_v58  ;;  %v10415_v47 = vrot.slane %v10401_v7, %v19107_v53  ;;  %v13076_v39 = vsel %vm2425_vm4, %v13075_v34, %v13074_v61  ;;  %v13086_v22 = vsel %vm2419_vm0, %v13085_v19, %v13084_v12 }
 0x3b6   : > { %1022 = vst [vmem:[#allocation2 + $0xbc] sm:$0x1] %v1021_v35  ;;  %v10416_v11 = vcombine.high %v10408_v33, %v10408_v33  ;;  %v10425_v55 = vcombine.high %v18258_v40, %v18258_v40  ;;  %v13088_v18 = vsel %vm2422_vm2, %v13087_v25, %v13086_v22  ;;  %v22815_v5 = vrot.slane %v18258_v40, %v19107_v53 }
 0x3b7   : > { %v10417_v36 = vcombine.high %v10415_v47, %v10415_v47  ;;  %v10463_v20 = vcombine.high %v18260_v23, %v18260_v23  ;;  %v13090_v49 = vsel %vm2425_vm4, %v13089_v32, %v13088_v18  ;;  %v10470_v48 = vrot.slane %v18260_v23, %v19107_v53 }
 0x3b8   : > { %v22819_v42 = vrot.slane %v10425_v55, %v19107_v53  ;;  %v10487_v41 = vcombine.high %v18261_v21, %v18261_v21  ;;  %v13094_v2 = vpack.c.b16 %v13090_v49, %v13076_v39  ;;  %v22824_v45 = vcombine.high %v22815_v5, %v22815_v5 }
 0x3b9   : > { %v10477_v30 = vrot.slane %v10463_v20, %v19107_v53  ;;  %v22828_v1 = vrot.slane %v18261_v21, %v19107_v53  ;;  %v10478_v27 = vcombine.high %v10470_v48, %v10470_v48  ;;  %v11196_v50 = vrot.slane %v10415_v47, %v19107_v53 }
 0x3ba   : > { %v22832_v56 = vcombine.high %v22819_v42, %v22819_v42  ;;  %v22835_v29 = vrot.slane %v10487_v41, %v19107_v53  ;;  %17743 = vmatmul.mubr.bf16.gmra.mrb[28].mxu1 %v13094_v2  ;;  %v11210_v37 = vrot.slane %v10416_v11, %v19107_v53  ;;  %v11224_v52 = vrot.slane %v10417_v36, %v19107_v53 }
 0x3bb   : > { %v10479_v43 = vcombine.high %v10477_v30, %v10477_v30  ;;  %v22840_v63 = vcombine.high %v22828_v1, %v22828_v1  ;;  %v11203_v54 = vrot.slane %v11196_v50, %v19107_v53  ;;  %v11238_v31 = vrot.slane %v22815_v5, %v19107_v53 }
 0x3bc   : > { %v18259_v59 = vld.sshfl [vmem:[#allocation2 + $0xa4] sm:$0x1 pattern:$0x75316420]  ;;  %v22846_v57 = vcombine.high %v22835_v29, %v22835_v29  ;;  %v11252_v6 = vrot.slane %v22819_v42, %v19107_v53  ;;  %v11217_v16 = vrot.slane %v11210_v37, %v19107_v53  ;;  %v11231_v17 = vrot.slane %v11224_v52, %v19107_v53 }
 0x3bd   : > { %v18262_v0 = vld.sshfl [vmem:[#allocation2 + $0xbc] sm:$0x1 pattern:$0x75316420]  ;;  %v22854_v34 = vrot.slane %v18259_v59, %v19107_v53  ;;  %v11266_v15 = vrot.slane %v22824_v45, %v19107_v53  ;;  %v11245_v24 = vrot.slane %v11238_v31, %v19107_v53  ;;  %v11280_v19 = vrot.slane %v22832_v56, %v19107_v53 }
 0x3be   : > { %v22861_v51 = vrot.slane %v18262_v0, %v19107_v53  ;;  %v11259_v10 = vrot.slane %v11252_v6, %v19107_v53  ;;  %v11308_v44 = vrot.slane %v10477_v30, %v19107_v53  ;;  %v11322_v4 = vrot.slane %v10478_v27, %v19107_v53  ;;  %v18169_v27 = vld.sshfl [vmem:[#allocation2 + $0x9c] sm:$0x33 pattern:$0x75316420] }
 0x3bf   : > { %v11273_v25 = vrot.slane %v11266_v15, %v19107_v53  ;;  %v11294_v62 = vrot.slane %v22854_v34, %v19107_v53  ;;  %v11287_v32 = vrot.slane %v11280_v19, %v19107_v53  ;;  %v11336_v14 = vrot.slane %v10479_v43, %v19107_v53  ;;  %v18172_v59 = vld.sshfl [vmem:[#allocation2 + $0xb4] sm:$0x33 pattern:$0x75316420] }
 0x3c0   : > { %v11350_v26 = vrot.slane %v22828_v1, %v19107_v53  ;;  %v11364_v58 = vrot.slane %v22835_v29, %v19107_v53  ;;  %v11315_v13 = vrot.slane %v11308_v44, %v19107_v53  ;;  %v11329_v60 = vrot.slane %v11322_v4, %v19107_v53 }
 0x3c1   : > { %v11301_v46 = vrot.slane %v11294_v62, %v19107_v53  ;;  %v11378_v3 = vrot.slane %v22840_v63, %v19107_v53  ;;  %v11343_v40 = vrot.slane %v11336_v14, %v19107_v53  ;;  %v11392_v9 = vrot.slane %v22846_v57, %v19107_v53 }
 0x3c2   : > { %v11357_v7 = vrot.slane %v11350_v26, %v19107_v53  ;;  %v11371_v8 = vrot.slane %v11364_v58, %v19107_v53  ;;  %v11406_v23 = vrot.slane %v22861_v51, %v19107_v53  ;;  %v11462_v33 = vunpack.c.l.b16 %v11203_v54 }
 0x3c3   : > { %v11385_v28 = vrot.slane %v11378_v3, %v19107_v53  ;;  %v11463_v61 = vunpack.c.l.b16 %v11217_v16  ;;  %v11399_v12 = vrot.slane %v11392_v9, %v19107_v53  ;;  %v11464_v35 = vunpack.c.l.b16 %v11231_v17 }
 0x3c4   : > { %v11465_v21 = vunpack.c.l.b16 %v11245_v24  ;;  %v11466_v47 = vunpack.c.l.b16 %v11259_v10  ;;  %v11413_v39 = vrot.slane %v11406_v23, %v19107_v53  ;;  %v11467_v22 = vunpack.c.l.b16 %v11273_v25 }
 0x3c5   : > { %v11468_v11 = vunpack.c.l.b16 %v11287_v32  ;;  %v11469_v55 = vunpack.c.l.b16 %v11301_v46  ;;  %v11470_v18 = vunpack.c.l.b16 %v11315_v13  ;;  %v11471_v36 = vunpack.c.l.b16 %v11329_v60 }
 0x3c6   : > { %v11472_v20 = vunpack.c.l.b16 %v11343_v40  ;;  %v11473_v49 = vunpack.c.l.b16 %v11357_v7  ;;  %v11474_v48 = vunpack.c.l.b16 %v11371_v8  ;;  %v11475_v41 = vunpack.c.l.b16 %v11385_v28 }
 0x3c7   : > { %v11476_v2 = vunpack.c.l.b16 %v11399_v12  ;;  %v11477_v30 = vunpack.c.l.b16 %v11413_v39  ;;  %v11562_v50 = vrot.slane %v11463_v61, 7  ;;  %v11564_v43 = vrot.slane %v11464_v35, 6 }
 0x3c8   : > { %v11566_v37 = vrot.slane %v11465_v21, 5  ;;  %v11568_v52 = vrot.slane %v11466_v47, 4  ;;  %v11570_v54 = vrot.slane %v11467_v22, 3  ;;  %v11572_v31 = vrot.slane %v11468_v11, 2 }
 0x3c9   : > { %v11574_v6 = vrot.slane %v11469_v55, 1  ;;  %v11576_v0 = vrot.slane %v11471_v36, 7  ;;  %v11563_v16 = vsel %vm2407_vm8, %v11562_v50, %v11462_v33  ;;  %v11578_v17 = vrot.slane %v11472_v20, 6 }
 0x3ca   : > { %v11580_v15 = vrot.slane %v11473_v49, 5  ;;  %v11582_v24 = vrot.slane %v11474_v48, 4  ;;  %v11565_v10 = vsel %vm2410_vm11, %v11564_v43, %v11563_v16  ;;  %v11584_v25 = vrot.slane %v11475_v41, 3 }
 0x3cb   : > { %v11577_v19 = vsel %vm2407_vm8, %v11576_v0, %v11470_v18  ;;  %v11586_v62 = vrot.slane %v11476_v2, 2  ;;  %v11567_v44 = vsel %vm2413_vm12, %v11566_v37, %v11565_v10  ;;  %v11588_v32 = vrot.slane %v11477_v30, 1 }
 0x3cc   : > { %v11579_v4 = vsel %vm2410_vm11, %v11578_v17, %v11577_v19  ;;  %v8253_v14 = vcombine.high %v18169_v27, %v18169_v27  ;;  %v11569_v26 = vsel %vm2416_vm13, %v11568_v52, %v11567_v44  ;;  %v8260_v46 = vrot.slane %v18169_v27, %v19107_v53  ;;  %v22941_v44 = vpop.f32.mrb[0].mxu1 }
 0x3cd   : > { %v11581_v58 = vsel %vm2413_vm12, %v11580_v15, %v11579_v4  ;;  %v8315_v13 = vcombine.high %v18172_v59, %v18172_v59  ;;  %v11571_v60 = vsel %vm2419_vm0, %v11570_v54, %v11569_v26  ;;  %v8322_v7 = vrot.slane %v18172_v59, %v19107_v53 }
 0x3ce   : > { %v11583_v3 = vsel %vm2416_vm13, %v11582_v24, %v11581_v58  ;;  %v8267_v40 = vrot.slane %v8253_v14, %v19107_v53  ;;  %v11573_v8 = vsel %vm2422_vm2, %v11572_v31, %v11571_v60  ;;  %v8268_v28 = vcombine.high %v8260_v46, %v8260_v46 }
 0x3cf   : > { %v11585_v9 = vsel %vm2419_vm0, %v11584_v25, %v11583_v3  ;;  %v8329_v23 = vrot.slane %v8315_v13, %v19107_v53  ;;  %v11575_v33 = vsel %vm2425_vm4, %v11574_v6, %v11573_v8  ;;  %v8330_v35 = vcombine.high %v8322_v7, %v8322_v7 }
 0x3d0   : > { %v11587_v61 = vsel %vm2422_vm2, %v11586_v62, %v11585_v9  ;;  %v8269_v12 = vcombine.high %v8267_v40, %v8267_v40  ;;  %v8761_v39 = vshrl.u32 %v8260_v46, 16  ;;  %v8766_v22 = vshll.u32 %v8267_v40, 16  ;;  %v22939_v62 = vpop.f32.mrb[0].mxu0  ;;  %v22950_v46 = vpop.f32.mrb[1].mxu1 }
 0x3d1   : > { %v11589_v21 = vsel %vm2425_vm4, %v11588_v32, %v11587_v61  ;;  %v8331_v47 = vcombine.high %v8329_v23, %v8329_v23  ;;  %v8769_v55 = vshrl.u32 %v8267_v40, 16  ;;  %v8774_v18 = vshll.u32 %v8268_v28, 16  ;;  %v22948_v58 = vpop.f32.mrb[1].mxu0 }
 0x3d2   : > { %v11593_v11 = vpack.c.b16 %v11589_v21, %v11575_v33  ;;  %v8777_v36 = vshrl.u32 %v8268_v28, 16  ;;  %v8768_v20 = vsel %vm19258_vm10, %v8761_v39, %v8766_v22  ;;  %v8782_v49 = vshll.u32 %v8269_v12, 16 }
 0x3d3   : > { %v8785_v48 = vshrl.u32 %v8269_v12, 16  ;;  %v8790_v41 = vshll.u32 %v22815_v5, 16  ;;  %v8776_v2 = vsel %vm19258_vm10, %v8769_v55, %v8774_v18  ;;  %v8793_v30 = vshrl.u32 %v22815_v5, 16 }
 0x3d4   : > { %17677 = vmatprep.mubr.bf16.mxu0 %v11593_v11  ;;  %v8798_v27 = vshll.u32 %v22819_v42, 16  ;;  %v8801_v50 = vshrl.u32 %v22819_v42, 16  ;;  %v8784_v43 = vsel %vm19258_vm10, %v8777_v36, %v8782_v49  ;;  %v8806_v52 = vshll.u32 %v22824_v45, 16 }
 0x3d5   : > { %v8792_v37 = vsel %vm19258_vm10, %v8785_v48, %v8790_v41  ;;  %v8809_v59 = vshrl.u32 %v22824_v45, 16  ;;  %v8814_v31 = vshll.u32 %v22832_v56, 16  ;;  %v8817_v5 = vshrl.u32 %v22832_v56, 16 }
 0x3d6   : > { %v8800_v54 = vsel %vm19258_vm10, %v8793_v30, %v8798_v27  ;;  %v8822_v6 = vshll.u32 %v22854_v34, 16  ;;  %v8808_v42 = vsel %vm19258_vm10, %v8801_v50, %v8806_v52  ;;  %v8826_v0 = vshrl.u32 %v8322_v7, 16  ;;  %v22958_v7 = vpop.f32.mrb[2].mxu0 }
 0x3d7   : > { %v8831_v16 = vshll.u32 %v8329_v23, 16  ;;  %v8834_v17 = vshrl.u32 %v8329_v23, 16  ;;  %v8816_v15 = vsel %vm19258_vm10, %v8809_v59, %v8814_v31  ;;  %v8839_v24 = vshll.u32 %v8330_v35, 16  ;;  %v22967_v23 = vpop.f32.mrb[3].mxu0 }
 0x3d8   : > { %v8824_v45 = vsel %vm19258_vm10, %v8817_v5, %v8822_v6  ;;  %v8842_v10 = vshrl.u32 %v8330_v35, 16  ;;  %v8847_v56 = vshll.u32 %v8331_v47, 16  ;;  %v8850_v25 = vshrl.u32 %v8331_v47, 16  ;;  %v22976_v21 = vpop.f32.mrb[4].mxu0 }
 0x3d9   : > { %v8833_v19 = vsel %vm19258_vm10, %v8826_v0, %v8831_v16  ;;  %v8855_v34 = vshll.u32 %v22828_v1, 16  ;;  %v8841_v4 = vsel %vm19258_vm10, %v8834_v17, %v8839_v24  ;;  %v8858_v32 = vshrl.u32 %v22828_v1, 16  ;;  %v22960_v1 = vpop.f32.mrb[2].mxu1  ;;  %v22986_v11 = vpop.f32.mrb[5].mxu0 }
 0x3da   : > { %v8863_v14 = vshll.u32 %v22835_v29, 16  ;;  %v8866_v26 = vshrl.u32 %v22835_v29, 16  ;;  %v8849_v13 = vsel %vm19258_vm10, %v8842_v10, %v8847_v56  ;;  %v8871_v3 = vshll.u32 %v22840_v63, 16  ;;  %v22969_v33 = vpop.f32.mrb[3].mxu1  ;;  %v22998_v38 = vpop.f32.mrb[6].mxu0 }
 0x3db   : > { %v8857_v60 = vsel %vm19258_vm10, %v8850_v25, %v8855_v34  ;;  %v8874_v40 = vshrl.u32 %v22840_v63, 16  ;;  %v8879_v8 = vshll.u32 %v22846_v57, 16  ;;  %v8882_v9 = vshrl.u32 %v22846_v57, 16  ;;  %v22978_v47 = vpop.f32.mrb[4].mxu1  ;;  %v23006_v50 = vpop.f32.mrb[7].mxu0 }
 0x3dc   : > { %v8865_v29 = vsel %vm19258_vm10, %v8858_v32, %v8863_v14  ;;  %v8887_v28 = vshll.u32 %v22861_v51, 16  ;;  %v8873_v63 = vsel %vm19258_vm10, %v8866_v26, %v8871_v3  ;;  %v9568_v61 = vrot.slane %v8768_v20, %v19107_v53  ;;  %v22988_v55 = vpop.f32.mrb[5].mxu1  ;;  %v23014_v31 = vpop.f32.mrb[8].mxu0 }
 0x3dd   : > { %v9582_v12 = vrot.slane %v8776_v2, %v19107_v53  ;;  %v9596_v35 = vrot.slane %v8784_v43, %v19107_v53  ;;  %v8881_v57 = vsel %vm19258_vm10, %v8874_v40, %v8879_v8  ;;  %v9610_v39 = vrot.slane %v8792_v37, %v19107_v53  ;;  %v23000_v48 = vpop.f32.mrb[6].mxu1  ;;  %v23022_v17 = vpop.f32.mrb[9].mxu0 }
 0x3de   : > { %v8889_v51 = vsel %vm19258_vm10, %v8882_v9, %v8887_v28  ;;  %v9624_v22 = vrot.slane %v8800_v54, %v19107_v53  ;;  %v22991_v18 = vrot.slane %v9568_v61, %v19107_v53  ;;  %v9638_v49 = vrot.slane %v8808_v42, %v19107_v53  ;;  %v23008_v43 = vpop.f32.mrb[7].mxu1  ;;  %v23032_v56 = vpop.f32.mrb[10].mxu0 }
 0x3df   : > { %v9589_v36 = vrot.slane %v9582_v12, %v19107_v53  ;;  %v22995_v20 = vrot.slane %v9596_v35, %v19107_v53  ;;  %v9617_v41 = vrot.slane %v9610_v39, %v19107_v53  ;;  %v9652_v30 = vrot.slane %v8816_v15, %v19107_v53  ;;  %v23016_v5 = vpop.f32.mrb[8].mxu1  ;;  %v23040_v26 = vpop.f32.mrb[11].mxu0 }
 0x3e0   : > { %v9631_v2 = vrot.slane %v9624_v22, %v19107_v53  ;;  %v9666_v27 = vrot.slane %v8824_v45, %v19107_v53  ;;  %v9645_v37 = vrot.slane %v9638_v49, %v19107_v53  ;;  %v9680_v52 = vrot.slane %v8833_v19, %v19107_v53  ;;  %v23024_v15 = vpop.f32.mrb[9].mxu1  ;;  %v23047_v8 = vpop.f32.mrb[12].mxu0 }
 0x3e1   : > { %v9694_v59 = vrot.slane %v8841_v4, %v19107_v53  ;;  %v9708_v54 = vrot.slane %v8849_v13, %v19107_v53  ;;  %v9659_v6 = vrot.slane %v9652_v30, %v19107_v53  ;;  %v9722_v0 = vrot.slane %v8857_v60, %v19107_v53  ;;  %v23034_v25 = vpop.f32.mrb[10].mxu1  ;;  %v23053_v35 = vpop.f32.mrb[13].mxu0 }
 0x3e2   : > { %v9673_v42 = vrot.slane %v9666_v27, %v19107_v53  ;;  %v9736_v16 = vrot.slane %v8865_v29, %v19107_v53  ;;  %v23027_v45 = vrot.slane %v9680_v52, %v19107_v53  ;;  %v9750_v19 = vrot.slane %v8873_v63, %v19107_v53  ;;  %v23042_v13 = vpop.f32.mrb[11].mxu1 }
 0x3e3   : > { %v9701_v24 = vrot.slane %v9694_v59, %v19107_v53  ;;  %v9715_v10 = vrot.slane %v9708_v54, %v19107_v53  ;;  %v9729_v34 = vrot.slane %v9722_v0, %v19107_v53  ;;  %v9764_v32 = vrot.slane %v8881_v57, %v19107_v53  ;;  %v23049_v9 = vpop.f32.mrb[12].mxu1 }
 0x3e4   : > { %v9743_v4 = vrot.slane %v9736_v16, %v19107_v53  ;;  %v9778_v14 = vrot.slane %v8889_v51, %v19107_v53  ;;  %v9757_v60 = vrot.slane %v9750_v19, %v19107_v53  ;;  %v9834_v3 = vunpack.c.l.b16 %v22991_v18  ;;  %v23055_v57 = vpop.f32.mrb[13].mxu1 }
 0x3e5   : > { %v9835_v40 = vunpack.c.l.b16 %v9589_v36  ;;  %v9836_v29 = vunpack.c.l.b16 %v22995_v20  ;;  %v9771_v28 = vrot.slane %v9764_v32, %v19107_v53  ;;  %v9837_v61 = vunpack.c.l.b16 %v9617_v41  ;;  %23587 = vst [vmem:[#allocation23_spill] sm:$0xff] %v23055_v57  ;;  %v23058_v36 = vpop.f32.mrb[14].mxu0  ;;  %v23060_v20 = vpop.f32.mrb[14].mxu1 }
 0x3e6   : > { %v9785_v63 = vrot.slane %v9778_v14, %v19107_v53  ;;  %v9838_v12 = vunpack.c.l.b16 %v9631_v2  ;;  %v9839_v51 = vunpack.c.l.b16 %v9645_v37  ;;  %v9840_v39 = vunpack.c.l.b16 %v9659_v6  ;;  %23588 = vst [vmem:[#allocation21_spill] sm:$0xff] %v23058_v36  ;;  %23589 = vst [vmem:[#allocation22_spill] sm:$0xff] %v23060_v20  ;;  %v23062_v59 = vpop.f32.mrb[15].mxu0  ;;  %v23064_v41 = vpop.f32.mrb[15].mxu1 }
 0x3e7   : > { %v9841_v22 = vunpack.c.l.b16 %v9673_v42  ;;  %v9842_v18 = vunpack.c.l.b16 %v23027_v45  ;;  %v9843_v49 = vunpack.c.l.b16 %v9701_v24  ;;  %v9844_v30 = vunpack.c.l.b16 %v9715_v10  ;;  %23590 = vst [vmem:[#allocation24_spill] sm:$0xff] %v23062_v59  ;;  %23591 = vst [vmem:[#allocation25_spill] sm:$0xff] %v23064_v41  ;;  %v18379_v6 = vld.sshfl [vmem:[#allocation2 + $0x78] sm:$0x32 pattern:$0x75316420] }
 0x3e8   : > { %v9845_v27 = vunpack.c.l.b16 %v9729_v34  ;;  %v9846_v52 = vunpack.c.l.b16 %v9743_v4  ;;  %v9847_v2 = vunpack.c.l.b16 %v9757_v60  ;;  %v9848_v54 = vunpack.c.l.b16 %v9771_v28  ;;  %v23066_v42 = vpop.f32.mrb[16].mxu0  ;;  %v23068_v16 = vpop.f32.mrb[16].mxu1  ;;  %v18380_v10 = vld.sshfl [vmem:[#allocation2 + $0x7c] sm:$0x33 pattern:$0x75316420] }
 0x3e9   : > { %v9849_v0 = vunpack.c.l.b16 %v9785_v63  ;;  %v9934_v37 = vrot.slane %v9835_v40, 7  ;;  %23592 = vst [vmem:[#allocation20_spill] sm:$0xff] %v23066_v42  ;;  %23593 = vst [vmem:[#allocation6_spill] sm:$0xff] %v23068_v16  ;;  %v9936_v45 = vrot.slane %v9836_v29, 6  ;;  %v9938_v19 = vrot.slane %v9837_v61, 5  ;;  %v23070_v34 = vpop.f32.mrb[17].mxu0 }
 0x3ea   : > { %v9940_v32 = vrot.slane %v9838_v12, 4  ;;  %v9942_v24 = vrot.slane %v9839_v51, 3  ;;  %23594 = vst [vmem:[#allocation26_spill] sm:$0xff] %v23070_v34  ;;  %v23072_v4 = vpop.f32.mrb[17].mxu1  ;;  %v9944_v60 = vrot.slane %v9840_v39, 2  ;;  %v9946_v28 = vrot.slane %v9841_v22, 1 }
 0x3eb   : > { %23595 = vst [vmem:[#allocation16_spill] sm:$0xff] %v23072_v4  ;;  %v9935_v14 = vsel %vm2407_vm8, %v9934_v37, %v9834_v3  ;;  %v9948_v63 = vrot.slane %v9843_v49, 7  ;;  %v23075_v40 = vpop.f32.mrb[18].mxu0  ;;  %v23077_v41 = vpop.f32.mrb[18].mxu1  ;;  %v9950_v29 = vrot.slane %v9844_v30, 6  ;;  %v9952_v61 = vrot.slane %v9845_v27, 5 }
 0x3ec   : > { %23596 = vst [vmem:[#allocation19_spill] sm:$0xff] %v23075_v40  ;;  %23597 = vst [vmem:[#allocation8_spill] sm:$0xff] %v23077_v41  ;;  %v9937_v16 = vsel %vm2410_vm11, %v9936_v45, %v9935_v14  ;;  %v9954_v12 = vrot.slane %v9846_v52, 4  ;;  %v23080_v51 = vpop.f32.mrb[19].mxu0  ;;  %v23082_v42 = vpop.f32.mrb[19].mxu1  ;;  %v9956_v39 = vrot.slane %v9847_v2, 3  ;;  %v15554_v45 = vcombine.high %v18379_v6, %v18379_v6 }
 0x3ed   : > { %23598 = vst [vmem:[#allocation9_spill] sm:$0xff] %v23080_v51  ;;  %23599 = vst [vmem:[#allocation11_spill] sm:$0xff] %v23082_v42  ;;  %v9939_v4 = vsel %vm2413_vm12, %v9938_v19, %v9937_v16  ;;  %v9949_v3 = vsel %vm2407_vm8, %v9948_v63, %v9842_v18  ;;  %v9958_v22 = vrot.slane %v9848_v54, 2  ;;  %v23086_v49 = vpop.f32.mrb[20].mxu0  ;;  %v23088_v37 = vpop.f32.mrb[20].mxu1  ;;  %v9960_v27 = vrot.slane %v9849_v0, 1 }
 0x3ee   : > { %23600 = vst [vmem:[#allocation12_spill] sm:$0xff] %v23086_v49  ;;  %23601 = vst [vmem:[#allocation13_spill] sm:$0xff] %v23088_v37  ;;  %v9941_v41 = vsel %vm2416_vm13, %v9940_v32, %v9939_v4  ;;  %v9951_v30 = vsel %vm2410_vm11, %v9950_v29, %v9949_v3  ;;  %v18382_v52 = vld.sshfl [vmem:[#allocation2 + $0x90] sm:$0x32 pattern:$0x75316420]  ;;  %v15561_v54 = vrot.slane %v18379_v6, %v19107_v53 }
 0x3ef   : > { %v23092_v14 = vpop.f32.mrb[21].mxu0  ;;  %v23094_v42 = vpop.f32.mrb[21].mxu1  ;;  %v9943_v16 = vsel %vm2419_vm0, %v9942_v24, %v9941_v41  ;;  %v9953_v18 = vsel %vm2413_vm12, %v9952_v61, %v9951_v30  ;;  %v18381_v2 = vld.sshfl [vmem:[#allocation2 + $0x80] sm:$0x1 pattern:$0x75316420]  ;;  %v15578_v19 = vcombine.high %v18380_v10, %v18380_v10  ;;  %v15568_v3 = vrot.slane %v15554_v45, %v19107_v53 }
 0x3f0   : > { %23602 = vst [vmem:[#allocation14_spill] sm:$0xff] %v23092_v14  ;;  %23603 = vst [vmem:[#allocation15_spill] sm:$0xff] %v23094_v42  ;;  %v23099_v63 = vpop.f32.mrb[22].mxu0  ;;  %v23101_v32 = vpop.f32.mrb[22].mxu1  ;;  %v9945_v0 = vsel %vm2422_vm2, %v9944_v60, %v9943_v16  ;;  %v9955_v4 = vsel %vm2416_vm13, %v9954_v12, %v9953_v18  ;;  %v15585_v42 = vrot.slane %v18380_v10, %v19107_v53 }
 0x3f1   : > { %23604 = vst [vmem:[#allocation4_spill] sm:$0xff] %v23099_v63  ;;  %23605 = vst [vmem:[#allocation5_spill] sm:$0xff] %v23101_v32  ;;  %v18383_v29 = vld.sshfl [vmem:[#allocation2 + $0x94] sm:$0x33 pattern:$0x75316420]  ;;  %v9947_v6 = vsel %vm2425_vm4, %v9946_v28, %v9945_v0  ;;  %v9957_v61 = vsel %vm2419_vm0, %v9956_v39, %v9955_v4  ;;  %v15569_v37 = vcombine.high %v15561_v54, %v15561_v54 }
 0x3f2   : > { %v23107_v41 = vpop.f32.mrb[23].mxu0  ;;  %v23109_v24 = vpop.f32.mrb[23].mxu1  ;;  %v18384_v30 = vld.sshfl [vmem:[#allocation2 + $0x98] sm:$0x1 pattern:$0x75316420]  ;;  %v15592_v32 = vrot.slane %v15578_v19, %v19107_v53  ;;  %v9959_v60 = vsel %vm2422_vm2, %v9958_v22, %v9957_v61  ;;  %v15570_v12 = vcombine.high %v15568_v3, %v15568_v3  ;;  %v15593_v16 = vcombine.high %v15585_v42, %v15585_v42 }
 0x3f3   : > { %23606 = vst [vmem:[#allocation7_spill] sm:$0xff] %v23107_v41  ;;  %23607 = vst [vmem:[#allocation10_spill] sm:$0xff] %v23109_v24  ;;  %v15608_v45 = vrot.slane %v18381_v2, %v19107_v53  ;;  %v9961_v10 = vsel %vm2425_vm4, %v9960_v27, %v9959_v60  ;;  %v15616_v41 = vcombine.high %v18382_v52, %v18382_v52 }
 0x3f4   : > { %v15594_v18 = vcombine.high %v15592_v32, %v15592_v32  ;;  %v15623_v24 = vrot.slane %v18382_v52, %v19107_v53  ;;  %v9965_v63 = vpack.c.b16 %v9961_v10, %v9947_v6  ;;  %v15640_v28 = vcombine.high %v18383_v29, %v18383_v29 }
 0x3f5   : > { %v15647_v39 = vrot.slane %v18383_v29, %v19107_v53  ;;  %v15670_v54 = vrot.slane %v18384_v30, %v19107_v53  ;;  %v15630_v19 = vrot.slane %v15616_v41, %v19107_v53  ;;  %v16249_v22 = vrot.slane %v15568_v3, %v19107_v53 }
 0x3f6   : > { %v15631_v0 = vcombine.high %v15623_v24, %v15623_v24  ;;  %v16263_v4 = vrot.slane %v15569_v37, %v19107_v53  ;;  %17678 = vmatmul.mubr.bf16.gmra.mrb[28].mxu0 %v9965_v63  ;;  %v15654_v27 = vrot.slane %v15640_v28, %v19107_v53  ;;  %v16277_v61 = vrot.slane %v15570_v12, %v19107_v53 }
 0x3f7   : > { %v15655_v2 = vcombine.high %v15647_v39, %v15647_v39  ;;  %v16291_v52 = vrot.slane %v15585_v42, %v19107_v53  ;;  %v15632_v6 = vcombine.high %v15630_v19, %v15630_v19  ;;  %v16256_v29 = vrot.slane %v16249_v22, %v19107_v53 }
 0x3f8   : > { %v16270_v30 = vrot.slane %v16263_v4, %v19107_v53  ;;  %v16305_v41 = vrot.slane %v15592_v32, %v19107_v53  ;;  %v15656_v24 = vcombine.high %v15654_v27, %v15654_v27  ;;  %v16284_v3 = vrot.slane %v16277_v61, %v19107_v53 }
 0x3f9   : > { %v16298_v37 = vrot.slane %v16291_v52, %v19107_v53  ;;  %v16319_v63 = vrot.slane %v15593_v16, %v19107_v53  ;;  %v16333_v12 = vrot.slane %v15594_v18, %v19107_v53  ;;  %v16347_v42 = vrot.slane %v15608_v45, %v19107_v53 }
 0x3fa   : > { %v16312_v60 = vrot.slane %v16305_v41, %v19107_v53  ;;  %v16361_v10 = vrot.slane %v15630_v19, %v19107_v53  ;;  %v16375_v22 = vrot.slane %v15631_v0, %v19107_v53  ;;  %v16389_v32 = vrot.slane %v15632_v6, %v19107_v53 }
 0x3fb   : > { %v16326_v28 = vrot.slane %v16319_v63, %v19107_v53  ;;  %v16403_v4 = vrot.slane %v15647_v39, %v19107_v53  ;;  %v16340_v61 = vrot.slane %v16333_v12, %v19107_v53  ;;  %v16354_v16 = vrot.slane %v16347_v42, %v19107_v53 }
 0x3fc   : > { %v16368_v52 = vrot.slane %v16361_v10, %v19107_v53  ;;  %v16417_v18 = vrot.slane %v15654_v27, %v19107_v53  ;;  %v16382_v45 = vrot.slane %v16375_v22, %v19107_v53  ;;  %v16396_v19 = vrot.slane %v16389_v32, %v19107_v53 }
 0x3fd   : > { %v16410_v41 = vrot.slane %v16403_v4, %v19107_v53  ;;  %v16431_v0 = vrot.slane %v15655_v2, %v19107_v53  ;;  %v16445_v39 = vrot.slane %v15656_v24, %v19107_v53  ;;  %v16459_v63 = vrot.slane %v15670_v54, %v19107_v53 }
 0x3fe   : > { %v16424_v6 = vrot.slane %v16417_v18, %v19107_v53  ;;  %v16723_v12 = vunpack.c.l.b16 %v16256_v29  ;;  %v16724_v10 = vunpack.c.l.b16 %v16270_v30  ;;  %v16725_v14 = vunpack.c.l.b16 %v16284_v3  ;;  %v18385_v3 = vld.sshfl [vmem:[#allocation2 + $0xa8] sm:$0x32 pattern:$0x75316420] }
 0x3ff   : > { %v16438_v42 = vrot.slane %v16431_v0, %v19107_v53  ;;  %v16726_v27 = vunpack.c.l.b16 %v16298_v37  ;;  %v16452_v22 = vrot.slane %v16445_v39, %v19107_v53  ;;  %v16466_v32 = vrot.slane %v16459_v63, %v19107_v53  ;;  %v18386_v63 = vld.sshfl [vmem:[#allocation2 + $0xac] sm:$0x33 pattern:$0x75316420] }
 0x400   : > { %v16727_v49 = vunpack.c.l.b16 %v16312_v60  ;;  %v16728_v4 = vunpack.c.l.b16 %v16326_v28  ;;  %v16729_v51 = vunpack.c.l.b16 %v16340_v61  ;;  %v16730_v2 = vunpack.c.l.b16 %v16354_v16 }
 0x401   : > { %v16731_v40 = vunpack.c.l.b16 %v16368_v52  ;;  %v16732_v18 = vunpack.c.l.b16 %v16382_v45  ;;  %v16733_v34 = vunpack.c.l.b16 %v16396_v19  ;;  %v16734_v24 = vunpack.c.l.b16 %v16410_v41 }
 0x402   : > { %v16735_v20 = vunpack.c.l.b16 %v16424_v6  ;;  %v16736_v54 = vunpack.c.l.b16 %v16438_v42  ;;  %v16737_v29 = vunpack.c.l.b16 %v16452_v22  ;;  %v16738_v59 = vunpack.c.l.b16 %v16466_v32 }
 0x403   : > { %v16811_v0 = vrot.slane %v16724_v10, 7  ;;  %v16813_v30 = vrot.slane %v16725_v14, 6  ;;  %v16815_v37 = vrot.slane %v16726_v27, 5  ;;  %v16817_v36 = vrot.slane %v16727_v49, 4 }
 0x404   : > { %v16819_v39 = vrot.slane %v16728_v4, 3  ;;  %v16821_v57 = vrot.slane %v16729_v51, 2  ;;  %v16823_v28 = vrot.slane %v16730_v2, 1  ;;  %v16825_v61 = vrot.slane %v16732_v18, 7 }
 0x405   : > { %v16812_v60 = vsel %vm2407_vm8, %v16811_v0, %v16723_v12  ;;  %v16827_v16 = vrot.slane %v16733_v34, 6  ;;  %v16829_v45 = vrot.slane %v16734_v24, 5  ;;  %v16831_v19 = vrot.slane %v16735_v20, 4 }
 0x406   : > { %v16814_v52 = vsel %vm2410_vm11, %v16813_v30, %v16812_v60  ;;  %v16833_v41 = vrot.slane %v16736_v54, 3  ;;  %v16826_v14 = vsel %vm2407_vm8, %v16825_v61, %v16731_v40  ;;  %v16835_v42 = vrot.slane %v16737_v29, 2  ;;  %v18387_v27 = vld.sshfl [vmem:[#allocation2 + $0xb0] sm:$0x1 pattern:$0x75316420] }
 0x407   : > { %v16816_v6 = vsel %vm2413_vm12, %v16815_v37, %v16814_v52  ;;  %v16837_v10 = vrot.slane %v16738_v59, 1  ;;  %v16828_v51 = vsel %vm2410_vm11, %v16827_v16, %v16826_v14  ;;  %v15678_v12 = vcombine.high %v18385_v3, %v18385_v3  ;;  %v18388_v20 = vld.sshfl [vmem:[#allocation2 + $0xc0] sm:$0x32 pattern:$0x75316420] }
 0x408   : > { %v16818_v49 = vsel %vm2416_vm13, %v16817_v36, %v16816_v6  ;;  %v15685_v22 = vrot.slane %v18385_v3, %v19107_v53  ;;  %v16830_v32 = vsel %vm2413_vm12, %v16829_v45, %v16828_v51  ;;  %v15702_v4 = vcombine.high %v18386_v63, %v18386_v63  ;;  %v18389_v18 = vld.sshfl [vmem:[#allocation2 + $0xc4] sm:$0x33 pattern:$0x75316420] }
 0x409   : > { %v16820_v34 = vsel %vm2419_vm0, %v16819_v39, %v16818_v49  ;;  %v15709_v2 = vrot.slane %v18386_v63, %v19107_v53  ;;  %v16832_v59 = vsel %vm2416_vm13, %v16831_v19, %v16830_v32  ;;  %v15692_v36 = vrot.slane %v15678_v12, %v19107_v53  ;;  %v18390_v0 = vld.sshfl [vmem:[#allocation2 + $0xc8] sm:$0x1 pattern:$0x75316420] }
 0x40a   : > { %v16822_v40 = vsel %vm2422_vm2, %v16821_v57, %v16820_v34  ;;  %v15693_v24 = vcombine.high %v15685_v22, %v15685_v22  ;;  %v16834_v29 = vsel %vm2419_vm0, %v16833_v41, %v16832_v59  ;;  %v15716_v30 = vrot.slane %v15702_v4, %v19107_v53 }
 0x40b   : > { %v16824_v54 = vsel %vm2425_vm4, %v16823_v28, %v16822_v40  ;;  %v15717_v3 = vcombine.high %v15709_v2, %v15709_v2  ;;  %v16836_v37 = vsel %vm2422_vm2, %v16835_v42, %v16834_v29  ;;  %v15694_v39 = vcombine.high %v15692_v36, %v15692_v36 }
 0x40c   : > { %v15732_v63 = vrot.slane %v18387_v27, %v19107_v53  ;;  %v15740_v57 = vcombine.high %v18388_v20, %v18388_v20  ;;  %v16838_v60 = vsel %vm2425_vm4, %v16837_v10, %v16836_v37  ;;  %v15718_v61 = vcombine.high %v15716_v30, %v15716_v30 }
 0x40d   : > { %v15747_v16 = vrot.slane %v18388_v20, %v19107_v53  ;;  %v15764_v52 = vcombine.high %v18389_v18, %v18389_v18  ;;  %v16869_v45 = vpack.c.b16 %v16838_v60, %v16824_v54  ;;  %v15771_v19 = vrot.slane %v18389_v18, %v19107_v53 }
 0x40e   : > { %v15754_v28 = vrot.slane %v15740_v57, %v19107_v53  ;;  %v15794_v41 = vrot.slane %v18390_v0, %v19107_v53  ;;  %v16473_v42 = vrot.slane %v15692_v36, %v19107_v53  ;;  %v16487_v49 = vrot.slane %v15693_v24, %v19107_v53 }
 0x40f   : > { %v15755_v6 = vcombine.high %v15747_v16, %v15747_v16  ;;  %v15778_v14 = vrot.slane %v15764_v52, %v19107_v53  ;;  %18809 = vmatprep.mubr.bf16.mxu1 %v16869_v45  ;;  %v15779_v51 = vcombine.high %v15771_v19, %v15771_v19  ;;  %v16501_v27 = vrot.slane %v15694_v39, %v19107_v53 }
 0x410   : > { %v15756_v10 = vcombine.high %v15754_v28, %v15754_v28  ;;  %v16515_v12 = vrot.slane %v15709_v2, %v19107_v53  ;;  %v16480_v34 = vrot.slane %v16473_v42, %v19107_v53  ;;  %v16494_v32 = vrot.slane %v16487_v49, %v19107_v53 }
 0x411   : > { %v15780_v22 = vcombine.high %v15778_v14, %v15778_v14  ;;  %v16529_v20 = vrot.slane %v15716_v30, %v19107_v53  ;;  %v16508_v4 = vrot.slane %v16501_v27, %v19107_v53  ;;  %v16543_v59 = vrot.slane %v15717_v3, %v19107_v53 }
 0x412   : > { %v16522_v40 = vrot.slane %v16515_v12, %v19107_v53  ;;  %v16557_v18 = vrot.slane %v15718_v61, %v19107_v53  ;;  %v16571_v24 = vrot.slane %v15732_v63, %v19107_v53  ;;  %v16585_v2 = vrot.slane %v15754_v28, %v19107_v53 }
 0x413   : > { %v16536_v36 = vrot.slane %v16529_v20, %v19107_v53  ;;  %v16599_v54 = vrot.slane %v15755_v6, %v19107_v53  ;;  %v16550_v29 = vrot.slane %v16543_v59, %v19107_v53  ;;  %v16613_v30 = vrot.slane %v15756_v10, %v19107_v53 }
 0x414   : > { %v16564_v0 = vrot.slane %v16557_v18, %v19107_v53  ;;  %v16627_v37 = vrot.slane %v15771_v19, %v19107_v53  ;;  %v16578_v3 = vrot.slane %v16571_v24, %v19107_v53  ;;  %v16592_v39 = vrot.slane %v16585_v2, %v19107_v53  ;;  %v23201_v60 = vpop.f32.mrb[24].mxu1 }
 0x415   : > { %v16606_v57 = vrot.slane %v16599_v54, %v19107_v53  ;;  %v16641_v63 = vrot.slane %v15778_v14, %v19107_v53  ;;  %23608 = vst [vmem:[#allocation17_spill] sm:$0xff] %v23201_v60  ;;  %v16620_v61 = vrot.slane %v16613_v30, %v19107_v53  ;;  %v16655_v52 = vrot.slane %v15779_v51, %v19107_v53  ;;  %v23207_v28 = vpop.f32.mrb[25].mxu1 }
 0x416   : > { %v16634_v16 = vrot.slane %v16627_v37, %v19107_v53  ;;  %v16669_v45 = vrot.slane %v15780_v22, %v19107_v53  ;;  %23609 = vst [vmem:[#allocation18_spill] sm:$0xff] %v23207_v28  ;;  %v16683_v6 = vrot.slane %v15794_v41, %v19107_v53  ;;  %v16739_v42 = vunpack.c.l.b16 %v16480_v34  ;;  %v23211_v10 = vpop.f32.mrb[26].mxu1  ;;  %v18368_v28 = vld.sshfl [vmem:[#allocation2 + $0x1c] sm:$0x33 pattern:$0x75316420] }
 0x417   : > { %v16648_v19 = vrot.slane %v16641_v63, %v19107_v53  ;;  %v16740_v49 = vunpack.c.l.b16 %v16494_v32  ;;  %23610 = vst [vmem:[#allocation27_spill] sm:$0xff] %v23211_v10  ;;  %v16662_v14 = vrot.slane %v16655_v52, %v19107_v53  ;;  %v16741_v12 = vunpack.c.l.b16 %v16508_v4  ;;  %v23215_v59 = vpop.f32.mrb[27].mxu1  ;;  %v18367_v52 = vld.sshfl [vmem:[#allocation2 + $0x18] sm:$0x32 pattern:$0x75316420] }
 0x418   : > { %v16676_v27 = vrot.slane %v16669_v45, %v19107_v53  ;;  %v16742_v20 = vunpack.c.l.b16 %v16522_v40  ;;  %23611 = vst [vmem:[#allocation28_spill] sm:$0xff] %v23215_v59  ;;  %v16690_v51 = vrot.slane %v16683_v6, %v19107_v53  ;;  %v16743_v22 = vunpack.c.l.b16 %v16536_v36 }
 0x419   : > { %v16744_v18 = vunpack.c.l.b16 %v16550_v29  ;;  %v16745_v24 = vunpack.c.l.b16 %v16564_v0  ;;  %v16746_v2 = vunpack.c.l.b16 %v16578_v3  ;;  %v16747_v54 = vunpack.c.l.b16 %v16592_v39 }
 0x41a   : > { %v16748_v41 = vunpack.c.l.b16 %v16606_v57  ;;  %v16749_v34 = vunpack.c.l.b16 %v16620_v61  ;;  %v16750_v32 = vunpack.c.l.b16 %v16634_v16  ;;  %v16751_v30 = vunpack.c.l.b16 %v16648_v19 }
 0x41b   : > { %v16752_v37 = vunpack.c.l.b16 %v16662_v14  ;;  %v16753_v63 = vunpack.c.l.b16 %v16676_v27  ;;  %v16754_v10 = vunpack.c.l.b16 %v16690_v51  ;;  %v16839_v45 = vrot.slane %v16740_v49, 7 }
 0x41c   : > { %v16841_v4 = vrot.slane %v16741_v12, 6  ;;  %v16843_v40 = vrot.slane %v16742_v20, 5  ;;  %v16845_v59 = vrot.slane %v16743_v22, 4  ;;  %v16847_v60 = vrot.slane %v16744_v18, 3 }
 0x41d   : > { %v16849_v6 = vrot.slane %v16745_v24, 2  ;;  %v16851_v36 = vrot.slane %v16746_v2, 1  ;;  %v16840_v29 = vsel %vm2407_vm8, %v16839_v45, %v16739_v42  ;;  %v16853_v0 = vrot.slane %v16748_v41, 7 }
 0x41e   : > { %v16855_v3 = vrot.slane %v16749_v34, 6  ;;  %v16857_v39 = vrot.slane %v16750_v32, 5  ;;  %v16842_v57 = vsel %vm2410_vm11, %v16841_v4, %v16840_v29  ;;  %v16859_v61 = vrot.slane %v16751_v30, 4 }
 0x41f   : > { %v16861_v16 = vrot.slane %v16752_v37, 3  ;;  %v16863_v19 = vrot.slane %v16753_v63, 2  ;;  %v16844_v14 = vsel %vm2413_vm12, %v16843_v40, %v16842_v57  ;;  %v16854_v49 = vsel %vm2407_vm8, %v16853_v0, %v16747_v54  ;;  %v18370_v22 = vld.sshfl [vmem:[#allocation2 + $0x30] sm:$0x32 pattern:$0x75316420] }
 0x420   : > { %v16865_v27 = vrot.slane %v16754_v10, 1  ;;  %v15306_v12 = vcombine.high %v18367_v52, %v18367_v52  ;;  %v16846_v20 = vsel %vm2416_vm13, %v16845_v59, %v16844_v14  ;;  %v16856_v51 = vsel %vm2410_vm11, %v16855_v3, %v16854_v49  ;;  %v18369_v41 = vld.sshfl [vmem:[#allocation2 + $0x20] sm:$0x1 pattern:$0x75316420] }
 0x421   : > { %v15313_v42 = vrot.slane %v18367_v52, %v19107_v53  ;;  %v15330_v18 = vcombine.high %v18368_v28, %v18368_v28  ;;  %v16848_v24 = vsel %vm2419_vm0, %v16847_v60, %v16846_v20  ;;  %v16858_v2 = vsel %vm2413_vm12, %v16857_v39, %v16856_v51  ;;  %v18371_v59 = vld.sshfl [vmem:[#allocation2 + $0x34] sm:$0x33 pattern:$0x75316420] }
 0x422   : > { %v15320_v34 = vrot.slane %v15306_v12, %v19107_v53  ;;  %v15337_v32 = vrot.slane %v18368_v28, %v19107_v53  ;;  %v16850_v10 = vsel %vm2422_vm2, %v16849_v6, %v16848_v24  ;;  %v16860_v54 = vsel %vm2416_vm13, %v16859_v61, %v16858_v2  ;;  %v18372_v60 = vld.sshfl [vmem:[#allocation2 + $0x38] sm:$0x1 pattern:$0x75316420] }
 0x423   : > { %v15321_v30 = vcombine.high %v15313_v42, %v15313_v42  ;;  %v15344_v37 = vrot.slane %v15330_v18, %v19107_v53  ;;  %v16852_v63 = vsel %vm2425_vm4, %v16851_v36, %v16850_v10  ;;  %v16862_v52 = vsel %vm2419_vm0, %v16861_v16, %v16860_v54 }
 0x424   : > { %v15322_v45 = vcombine.high %v15320_v34, %v15320_v34  ;;  %v15345_v4 = vcombine.high %v15337_v32, %v15337_v32  ;;  %v16864_v40 = vsel %vm2422_vm2, %v16863_v19, %v16862_v52  ;;  %v15360_v28 = vrot.slane %v18369_v41, %v19107_v53 }
 0x425   : > { %v15346_v29 = vcombine.high %v15344_v37, %v15344_v37  ;;  %v15368_v0 = vcombine.high %v18370_v22, %v18370_v22  ;;  %v16866_v6 = vsel %vm2425_vm4, %v16865_v27, %v16864_v40  ;;  %v15375_v3 = vrot.slane %v18370_v22, %v19107_v53 }
 0x426   : > { %v15392_v39 = vcombine.high %v18371_v59, %v18371_v59  ;;  %v15399_v57 = vrot.slane %v18371_v59, %v19107_v53  ;;  %v16870_v61 = vpack.c.b16 %v16866_v6, %v16852_v63  ;;  %v15422_v16 = vrot.slane %v18372_v60, %v19107_v53 }
 0x427   : > { %v15382_v36 = vrot.slane %v15368_v0, %v19107_v53  ;;  %v15801_v14 = vrot.slane %v15320_v34, %v19107_v53  ;;  %v15383_v49 = vcombine.high %v15375_v3, %v15375_v3  ;;  %v15815_v20 = vrot.slane %v15321_v30, %v19107_v53 }
 0x428   : > { %v15406_v19 = vrot.slane %v15392_v39, %v19107_v53  ;;  %v15407_v12 = vcombine.high %v15399_v57, %v15399_v57  ;;  %18810 = vmatmul.mubr.bf16.vlgmr.msra.gmra.mrb[32].mxu1 %v16870_v61  ;;  %v15829_v22 = vrot.slane %v15322_v45, %v19107_v53  ;;  %v15843_v42 = vrot.slane %v15337_v32, %v19107_v53 }
 0x429   : > { %v15384_v27 = vcombine.high %v15382_v36, %v15382_v36  ;;  %v15808_v51 = vrot.slane %v15801_v14, %v19107_v53  ;;  %v15822_v24 = vrot.slane %v15815_v20, %v19107_v53  ;;  %v15857_v2 = vrot.slane %v15344_v37, %v19107_v53 }
 0x42a   : > { %v15408_v18 = vcombine.high %v15406_v19, %v15406_v19  ;;  %v15871_v41 = vrot.slane %v15345_v4, %v19107_v53  ;;  %v15836_v34 = vrot.slane %v15829_v22, %v19107_v53  ;;  %v15850_v10 = vrot.slane %v15843_v42, %v19107_v53 }
 0x42b   : > { %v15885_v54 = vrot.slane %v15346_v29, %v19107_v53  ;;  %v15899_v59 = vrot.slane %v15360_v28, %v19107_v53  ;;  %v15864_v30 = vrot.slane %v15857_v2, %v19107_v53  ;;  %v15913_v32 = vrot.slane %v15382_v36, %v19107_v53 }
 0x42c   : > { %v15878_v63 = vrot.slane %v15871_v41, %v19107_v53  ;;  %v15927_v52 = vrot.slane %v15383_v49, %v19107_v53  ;;  %v15941_v45 = vrot.slane %v15384_v27, %v19107_v53  ;;  %v15955_v4 = vrot.slane %v15399_v57, %v19107_v53 }
 0x42d   : > { %v15892_v37 = vrot.slane %v15885_v54, %v19107_v53  ;;  %v15906_v60 = vrot.slane %v15899_v59, %v19107_v53  ;;  %v15920_v40 = vrot.slane %v15913_v32, %v19107_v53  ;;  %v15969_v28 = vrot.slane %v15406_v19, %v19107_v53 }
 0x42e   : > { %v15934_v29 = vrot.slane %v15927_v52, %v19107_v53  ;;  %v15983_v0 = vrot.slane %v15407_v12, %v19107_v53  ;;  %v15948_v6 = vrot.slane %v15941_v45, %v19107_v53  ;;  %v15962_v3 = vrot.slane %v15955_v4, %v19107_v53 }
 0x42f   : > { %v15997_v39 = vrot.slane %v15408_v18, %v19107_v53  ;;  %v16011_v61 = vrot.slane %v15422_v16, %v19107_v53  ;;  %v15976_v36 = vrot.slane %v15969_v28, %v19107_v53  ;;  %v16691_v14 = vunpack.c.l.b16 %v15808_v51  ;;  %v18373_v51 = vld.sshfl [vmem:[#allocation2 + $0x48] sm:$0x32 pattern:$0x75316420] }
 0x430   : > { %v15990_v57 = vrot.slane %v15983_v0, %v19107_v53  ;;  %v16692_v49 = vunpack.c.l.b16 %v15822_v24  ;;  %v16693_v27 = vunpack.c.l.b16 %v15836_v34  ;;  %v16694_v12 = vunpack.c.l.b16 %v15850_v10 }
 0x431   : > { %v16004_v20 = vrot.slane %v15997_v39, %v19107_v53  ;;  %v16018_v19 = vrot.slane %v16011_v61, %v19107_v53  ;;  %v16695_v22 = vunpack.c.l.b16 %v15864_v30  ;;  %v16696_v42 = vunpack.c.l.b16 %v15878_v63  ;;  %v18374_v61 = vld.sshfl [vmem:[#allocation2 + $0x4c] sm:$0x33 pattern:$0x75316420] }
 0x432   : > { %v16697_v2 = vunpack.c.l.b16 %v15892_v37  ;;  %v16698_v41 = vunpack.c.l.b16 %v15906_v60  ;;  %v16699_v54 = vunpack.c.l.b16 %v15920_v40  ;;  %v16700_v18 = vunpack.c.l.b16 %v15934_v29 }
 0x433   : > { %v16701_v59 = vunpack.c.l.b16 %v15948_v6  ;;  %v16702_v16 = vunpack.c.l.b16 %v15962_v3  ;;  %v16703_v32 = vunpack.c.l.b16 %v15976_v36  ;;  %v16704_v52 = vunpack.c.l.b16 %v15990_v57 }
 0x434   : > { %v16705_v45 = vunpack.c.l.b16 %v16004_v20  ;;  %v16706_v4 = vunpack.c.l.b16 %v16018_v19  ;;  %v16755_v24 = vrot.slane %v16692_v49, 7  ;;  %v16757_v28 = vrot.slane %v16693_v27, 6 }
 0x435   : > { %v16759_v0 = vrot.slane %v16694_v12, 5  ;;  %v16761_v39 = vrot.slane %v16695_v22, 4  ;;  %v16763_v34 = vrot.slane %v16696_v42, 3  ;;  %v16765_v10 = vrot.slane %v16697_v2, 2 }
 0x436   : > { %v16767_v30 = vrot.slane %v16698_v41, 1  ;;  %v16769_v63 = vrot.slane %v16700_v18, 7  ;;  %v16756_v37 = vsel %vm2407_vm8, %v16755_v24, %v16691_v14  ;;  %v16771_v60 = vrot.slane %v16701_v59, 6 }
 0x437   : > { %v16773_v40 = vrot.slane %v16702_v16, 5  ;;  %v16775_v29 = vrot.slane %v16703_v32, 4  ;;  %v16758_v6 = vsel %vm2410_vm11, %v16757_v28, %v16756_v37  ;;  %v16777_v36 = vrot.slane %v16704_v52, 3 }
 0x438   : > { %v16770_v3 = vsel %vm2407_vm8, %v16769_v63, %v16699_v54  ;;  %v16779_v57 = vrot.slane %v16705_v45, 2  ;;  %v16760_v49 = vsel %vm2413_vm12, %v16759_v0, %v16758_v6  ;;  %v16781_v19 = vrot.slane %v16706_v4, 1  ;;  %v18376_v14 = vld.sshfl [vmem:[#allocation2 + $0x60] sm:$0x32 pattern:$0x75316420] }
 0x439   : > { %v16772_v20 = vsel %vm2410_vm11, %v16771_v60, %v16770_v3  ;;  %v15430_v27 = vcombine.high %v18373_v51, %v18373_v51  ;;  %v16762_v12 = vsel %vm2416_vm13, %v16761_v39, %v16760_v49  ;;  %v15437_v42 = vrot.slane %v18373_v51, %v19107_v53  ;;  %v18375_v18 = vld.sshfl [vmem:[#allocation2 + $0x50] sm:$0x1 pattern:$0x75316420] }
 0x43a   : > { %v16774_v22 = vsel %vm2413_vm12, %v16773_v40, %v16772_v20  ;;  %v15454_v2 = vcombine.high %v18374_v61, %v18374_v61  ;;  %v16764_v41 = vsel %vm2419_vm0, %v16763_v34, %v16762_v12  ;;  %v15461_v16 = vrot.slane %v18374_v61, %v19107_v53  ;;  %v18377_v45 = vld.sshfl [vmem:[#allocation2 + $0x64] sm:$0x33 pattern:$0x75316420] }
 0x43b   : > { %v16776_v54 = vsel %vm2416_vm13, %v16775_v29, %v16774_v22  ;;  %v15444_v59 = vrot.slane %v15430_v27, %v19107_v53  ;;  %v16766_v32 = vsel %vm2422_vm2, %v16765_v10, %v16764_v41  ;;  %v15445_v4 = vcombine.high %v15437_v42, %v15437_v42  ;;  %v18378_v0 = vld.sshfl [vmem:[#allocation2 + $0x68] sm:$0x1 pattern:$0x75316420] }
 0x43c   : > { %v16778_v52 = vsel %vm2419_vm0, %v16777_v36, %v16776_v54  ;;  %v15468_v24 = vrot.slane %v15454_v2, %v19107_v53  ;;  %v16768_v51 = vsel %vm2425_vm4, %v16767_v30, %v16766_v32  ;;  %v15469_v34 = vcombine.high %v15461_v16, %v15461_v16 }
 0x43d   : > { %v16780_v28 = vsel %vm2422_vm2, %v16779_v57, %v16778_v52  ;;  %v15446_v39 = vcombine.high %v15444_v59, %v15444_v59  ;;  %v15484_v61 = vrot.slane %v18375_v18, %v19107_v53  ;;  %v15492_v60 = vcombine.high %v18376_v14, %v18376_v14 }
 0x43e   : > { %v16782_v63 = vsel %vm2425_vm4, %v16781_v19, %v16780_v28  ;;  %v15470_v37 = vcombine.high %v15468_v24, %v15468_v24  ;;  %v15499_v40 = vrot.slane %v18376_v14, %v19107_v53  ;;  %v15516_v29 = vcombine.high %v18377_v45, %v18377_v45 }
 0x43f   : > { %v16867_v10 = vpack.c.b16 %v16782_v63, %v16768_v51  ;;  %v15523_v6 = vrot.slane %v18377_v45, %v19107_v53  ;;  %v15506_v3 = vrot.slane %v15492_v60, %v19107_v53  ;;  %v15546_v30 = vrot.slane %v18378_v0, %v19107_v53 }
 0x440   : > { %v16025_v36 = vrot.slane %v15444_v59, %v19107_v53  ;;  %v16039_v57 = vrot.slane %v15445_v4, %v19107_v53  ;;  %v15507_v49 = vcombine.high %v15499_v40, %v15499_v40  ;;  %v15530_v20 = vrot.slane %v15516_v29, %v19107_v53 }
 0x441   : > { %18805 = vmatprep.mubr.bf16.mxu0 %v16867_v10  ;;  %v15531_v19 = vcombine.high %v15523_v6, %v15523_v6  ;;  %v16053_v27 = vrot.slane %v15446_v39, %v19107_v53  ;;  %v15508_v12 = vcombine.high %v15506_v3, %v15506_v3  ;;  %v16067_v42 = vrot.slane %v15461_v16, %v19107_v53 }
 0x442   : > { %v16032_v22 = vrot.slane %v16025_v36, %v19107_v53  ;;  %v16046_v14 = vrot.slane %v16039_v57, %v19107_v53  ;;  %v15532_v2 = vcombine.high %v15530_v20, %v15530_v20  ;;  %v16081_v54 = vrot.slane %v15468_v24, %v19107_v53 }
 0x443   : > { %v16060_v41 = vrot.slane %v16053_v27, %v19107_v53  ;;  %v16095_v18 = vrot.slane %v15469_v34, %v19107_v53  ;;  %v16074_v59 = vrot.slane %v16067_v42, %v19107_v53  ;;  %v16109_v32 = vrot.slane %v15470_v37, %v19107_v53 }
 0x444   : > { %v16123_v52 = vrot.slane %v15484_v61, %v19107_v53  ;;  %v16137_v45 = vrot.slane %v15506_v3, %v19107_v53  ;;  %v16088_v4 = vrot.slane %v16081_v54, %v19107_v53  ;;  %v16151_v16 = vrot.slane %v15507_v49, %v19107_v53 }
 0x445   : > { %v16102_v51 = vrot.slane %v16095_v18, %v19107_v53  ;;  %v16165_v28 = vrot.slane %v15508_v12, %v19107_v53  ;;  %v16116_v24 = vrot.slane %v16109_v32, %v19107_v53  ;;  %v16179_v34 = vrot.slane %v15523_v6, %v19107_v53 }
 0x446   : > { %v16130_v0 = vrot.slane %v16123_v52, %v19107_v53  ;;  %v16144_v39 = vrot.slane %v16137_v45, %v19107_v53  ;;  %v16158_v63 = vrot.slane %v16151_v16, %v19107_v53  ;;  %v16193_v61 = vrot.slane %v15530_v20, %v19107_v53 }
 0x447   : > { %v16172_v37 = vrot.slane %v16165_v28, %v19107_v53  ;;  %v16207_v60 = vrot.slane %v15531_v19, %v19107_v53  ;;  %v16186_v10 = vrot.slane %v16179_v34, %v19107_v53  ;;  %v16221_v40 = vrot.slane %v15532_v2, %v19107_v53 }
 0x448   : > { %v16235_v29 = vrot.slane %v15546_v30, %v19107_v53  ;;  %v16707_v3 = vunpack.c.l.b16 %v16032_v22  ;;  %v16200_v36 = vrot.slane %v16193_v61, %v19107_v53  ;;  %v16708_v6 = vunpack.c.l.b16 %v16046_v14 }
 0x449   : > { %v16214_v57 = vrot.slane %v16207_v60, %v19107_v53  ;;  %v16709_v49 = vunpack.c.l.b16 %v16060_v41  ;;  %v16228_v27 = vrot.slane %v16221_v40, %v19107_v53  ;;  %v16710_v20 = vunpack.c.l.b16 %v16074_v59 }
 0x44a   : > { %v16242_v12 = vrot.slane %v16235_v29, %v19107_v53  ;;  %v16711_v42 = vunpack.c.l.b16 %v16088_v4  ;;  %v16712_v19 = vunpack.c.l.b16 %v16102_v51  ;;  %v16713_v54 = vunpack.c.l.b16 %v16116_v24 }
 0x44b   : > { %v16714_v18 = vunpack.c.l.b16 %v16130_v0  ;;  %v16715_v32 = vunpack.c.l.b16 %v16144_v39  ;;  %v16716_v2 = vunpack.c.l.b16 %v16158_v63  ;;  %v16717_v52 = vunpack.c.l.b16 %v16172_v37 }
 0x44c   : > { %v16718_v30 = vunpack.c.l.b16 %v16186_v10  ;;  %v16719_v22 = vunpack.c.l.b16 %v16200_v36  ;;  %v16720_v45 = vunpack.c.l.b16 %v16214_v57  ;;  %v16721_v16 = vunpack.c.l.b16 %v16228_v27 }
 0x44d   : > { %v16722_v28 = vunpack.c.l.b16 %v16242_v12  ;;  %v16783_v34 = vrot.slane %v16708_v6, 7  ;;  %v16785_v14 = vrot.slane %v16709_v49, 6  ;;  %v16787_v41 = vrot.slane %v16710_v20, 5 }
 0x44e   : > { %v16789_v61 = vrot.slane %v16711_v42, 4  ;;  %v16791_v60 = vrot.slane %v16712_v19, 3  ;;  %v16793_v59 = vrot.slane %v16713_v54, 2  ;;  %v16795_v4 = vrot.slane %v16714_v18, 1 }
 0x44f   : > { %v16784_v53 = vsel %vm2407_vm8, %v16783_v34, %v16707_v3  ;;  %v16797_v51 = vrot.slane %v16716_v2, 7  ;;  %v16799_v0 = vrot.slane %v16717_v52, 6  ;;  %v16801_v39 = vrot.slane %v16718_v30, 5  ;;  %v18725_v36 = vpop.f32.mrb[24].mxu0  ;;  %v23613_v34 = vld [vmem:[#allocation21_spill] sm:$0xff] }
 0x450   : > { %v16786_v24 = vsel %vm2410_vm11, %v16785_v14, %v16784_v53  ;;  %v16803_v63 = vrot.slane %v16719_v22, 4  ;;  %v16805_v40 = vrot.slane %v16720_v45, 3  ;;  %v16807_v29 = vrot.slane %v16721_v16, 2  ;;  %v18726_v27 = vpop.f32.mrb[25].mxu0  ;;  %v23616_v14 = vld [vmem:[#allocation25_spill] sm:$0xff] }
 0x451   : > { %v16788_v37 = vsel %vm2413_vm12, %v16787_v41, %v16786_v24  ;;  %v16798_v10 = vsel %vm2407_vm8, %v16797_v51, %v16715_v32  ;;  %v16809_v3 = vrot.slane %v16722_v28, 1  ;;  %v18635_v49 = vadd.f32 %v22948_v58, %v22939_v62  ;;  %v18728_v54 = vpop.f32.mrb[26].mxu0  ;;  %v23625_v24 = vld [vmem:[#allocation12_spill] sm:$0xff] }
 0x452   : > { %v16790_v57 = vsel %vm2416_vm13, %v16789_v61, %v16788_v37  ;;  %v16800_v6 = vsel %vm2410_vm11, %v16799_v0, %v16798_v10  ;;  %v18675_v42 = vadd.f32 %v22950_v46, %v22941_v44  ;;  %v18638_v19 = vadd.f32 %v22967_v23, %v22958_v7  ;;  %v18729_v58 = vpop.f32.mrb[27].mxu0  ;;  %v23617_v61 = vld [vmem:[#allocation20_spill] sm:$0xff]  ;;  %v23626_v0 = vld [vmem:[#allocation14_spill] sm:$0xff] }
 0x453   : > { %v16792_v12 = vsel %vm2419_vm0, %v16791_v60, %v16790_v57  ;;  %v16802_v20 = vsel %vm2413_vm12, %v16801_v39, %v16800_v6  ;;  %v18678_v2 = vadd.f32 %v22969_v33, %v22960_v1  ;;  %v18641_v62 = vadd.f32 %v22986_v11, %v22976_v21  ;;  %v23619_v60 = vld [vmem:[#allocation19_spill] sm:$0xff] }
 0x454   : > { %v16794_v18 = vsel %vm2422_vm2, %v16793_v59, %v16792_v12  ;;  %v16804_v32 = vsel %vm2416_vm13, %v16803_v63, %v16802_v20  ;;  %v17591_v44 = vadd.f32 %v18675_v42, %v18635_v49  ;;  %v18681_v46 = vadd.f32 %v22988_v55, %v22978_v47  ;;  %v23621_v59 = vld [vmem:[#allocation6_spill] sm:$0xff]  ;;  %v23630_v49 = vld [vmem:[#allocation15_spill] sm:$0xff]  ;;  %v23631_v20 = vld [vmem:[#allocation5_spill] sm:$0xff] }
 0x455   : > { %v16796_v52 = vsel %vm2425_vm4, %v16795_v4, %v16794_v18  ;;  %v16806_v30 = vsel %vm2419_vm0, %v16805_v40, %v16804_v32  ;;  %v17594_v23 = vadd.f32 %v18678_v2, %v18638_v19  ;;  %v18644_v22 = vadd.f32 %v23006_v50, %v22998_v38  ;;  %v23623_v4 = vld [vmem:[#allocation8_spill] sm:$0xff]  ;;  %v23632_v42 = vld [vmem:[#allocation10_spill] sm:$0xff] }
 0x456   : > { %v16808_v7 = vsel %vm2422_vm2, %v16807_v29, %v16806_v30  ;;  %v18684_v1 = vadd.f32 %v23008_v43, %v23000_v48  ;;  %v17599_v21 = vadd.f32 %v18681_v46, %v18641_v62  ;;  %v18647_v11 = vadd.f32 %v23022_v17, %v23014_v31  ;;  %v23612_v43 = vld [vmem:[#allocation23_spill] sm:$0xff]  ;;  %v23614_v31 = vld [vmem:[#allocation24_spill] sm:$0xff]  ;;  %v23633_v62 = vld [vmem:[#allocation17_spill] sm:$0xff] }
 0x457   : > { %v16810_v33 = vsel %vm2425_vm4, %v16809_v3, %v16808_v7  ;;  %v18687_v45 = vadd.f32 %v23024_v15, %v23016_v5  ;;  %v18650_v55 = vadd.f32 %v23040_v26, %v23032_v56  ;;  %v18690_v38 = vadd.f32 %v23042_v13, %v23034_v25  ;;  %v23615_v15 = vld [vmem:[#allocation22_spill] sm:$0xff]  ;;  %v23620_v25 = vld [vmem:[#allocation9_spill] sm:$0xff]  ;;  %v23627_v40 = vld [vmem:[#allocation4_spill] sm:$0xff] }
 0x458   : > { %v16868_v16 = vpack.c.b16 %v16810_v33, %v16796_v52  ;;  %v17602_v47 = vadd.f32 %v18684_v1, %v18644_v22  ;;  %v18653_v48 = vadd.f32 %v23053_v35, %v23047_v8  ;;  %v18693_v28 = vadd.f32 %v23612_v43, %v23049_v9  ;;  %v23618_v56 = vld [vmem:[#allocation26_spill] sm:$0xff]  ;;  %v23622_v8 = vld [vmem:[#allocation16_spill] sm:$0xff]  ;;  %v23624_v9 = vld [vmem:[#allocation11_spill] sm:$0xff] }
 0x459   : > { %v17607_v50 = vadd.f32 %v18687_v45, %v18647_v11  ;;  %v18656_v17 = vadd.f32 %v23614_v31, %v23613_v34  ;;  %v17610_v5 = vadd.f32 %v18690_v38, %v18650_v55  ;;  %v18696_v41 = vadd.f32 %v23616_v14, %v23615_v15  ;;  %v23628_v29 = vld [vmem:[#allocation7_spill] sm:$0xff]  ;;  %v23629_v3 = vld [vmem:[#allocation13_spill] sm:$0xff]  ;;  %v23634_v52 = vld [vmem:[#allocation18_spill] sm:$0xff] }
 0x45a   : > { %18806 = vmatmul.mubr.bf16.vlgmr.msra.gmra.mrb[32].mxu0 %v16868_v16  ;;  %v18715_v26 = vadd.f32 %v23618_v56, %v23617_v61  ;;  %v18718_v13 = vadd.f32 %v23620_v25, %v23619_v60  ;;  %v17615_v53 = vadd.f32 %v18693_v28, %v18653_v48  ;;  %v18755_v35 = vadd.f32 %v23622_v8, %v23621_v59  ;;  %v23635_v46 = vld [vmem:[#allocation27_spill] sm:$0xff]  ;;  %v23636_v7 = vld [vmem:[#allocation28_spill] sm:$0xff] }
 0x45b   : > { %v18758_v51 = vadd.f32 %v23624_v9, %v23623_v4  ;;  %v18721_v39 = vadd.f32 %v23626_v0, %v23625_v24  ;;  %v17618_v63 = vadd.f32 %v18696_v41, %v18656_v17  ;;  %v18724_v57 = vadd.f32 %v23628_v29, %v23627_v40 }
 0x45c   : > { %v17656_v37 = vadd.f32 %v18715_v26, %v17591_v44  ;;  %v17659_v10 = vadd.f32 %v18718_v13, %v17594_v23  ;;  %v18761_v12 = vadd.f32 %v23630_v49, %v23629_v3  ;;  %v18764_v19 = vadd.f32 %v23632_v42, %v23631_v20 }
 0x45d   : > { %v17664_v6 = vadd.f32 %v18721_v39, %v17599_v21  ;;  %v18727_v18 = vadd.f32 %v18726_v27, %v18725_v36  ;;  %v17667_v32 = vadd.f32 %v18724_v57, %v17602_v47  ;;  %v18730_v2 = vadd.f32 %v18729_v58, %v18728_v54 }
 0x45e   : > { %v18767_v30 = vadd.f32 %v23634_v52, %v23633_v62  ;;  %v18770_v44 = vadd.f32 %v23636_v7, %v23635_v46  ;;  %v17721_v36 = vadd.f32 %v18755_v35, %v17656_v37  ;;  %v17724_v27 = vadd.f32 %v18758_v51, %v17659_v10 }
 0x45f   : > { %v17672_v23 = vadd.f32 %v18727_v18, %v17607_v50  ;;  %v17675_v22 = vadd.f32 %v18730_v2, %v17610_v5  ;;  %v17729_v21 = vadd.f32 %v18761_v12, %v17664_v6  ;;  %v17732_v54 = vadd.f32 %v18764_v19, %v17667_v32 }
 0x461   : > { %v17737_v1 = vadd.f32 %v18767_v30, %v17672_v23  ;;  %v17740_v33 = vadd.f32 %v18770_v44, %v17675_v22 }
 0x48d   : > { %v18771_v11 = vpop.f32.mrb[28].mxu1 }
 0x48e   : > { %v18772_v45 = vpop.f32.mrb[29].mxu1 }
 0x48f   : > { %v18773_v16 = vadd.f32 %v18772_v45, %v18771_v11  ;;  %v18774_v55 = vpop.f32.mrb[30].mxu1 }
 0x490   : > { %v18775_v38 = vpop.f32.mrb[31].mxu1 }
 0x491   : > { %v18776_v48 = vadd.f32 %v18775_v38, %v18774_v55 }
 0x4c9   : > { %v18731_v58 = vpop.f32.mrb[28].mxu0 }
 0x4ca   : > { %v18732_v47 = vpop.f32.mrb[29].mxu0 }
 0x4cb   : > { %v18733_v43 = vadd.f32 %v18732_v47, %v18731_v58  ;;  %v18734_v28 = vpop.f32.mrb[30].mxu0 }
 0x4cc   : > { %v18735_v34 = vpop.f32.mrb[31].mxu0 }
 0x4cd   : > { %v17680_v50 = vadd.f32 %v18733_v43, %v17615_v53  ;;  %v18736_v31 = vadd.f32 %v18735_v34, %v18734_v28 }
 0x4cf   : > { %v17683_v17 = vadd.f32 %v18736_v31, %v17618_v63  ;;  %v17745_v5 = vadd.f32 %v18773_v16, %v17680_v50  ;;  %v17864_v50 = vld [vmem:[%s23421_s6] sm:$0x1] }
 0x4d1   : > { %v17748_v15 = vadd.f32 %v18776_v48, %v17683_v17 }
 0x4fb   : > { %v18811_v14 = vpop.f32.mrb[32].mxu1 }
 0x4fc   : > { %v17810_v41 = vadd.f32 %v18811_v14, %v17745_v5  ;;  %v17801_v61 = vpop.f32.mrb[33].mxu1  ;;  %v17880_v5 = vld [vmem:[%s23421_s6 + $0x1] sm:$0x1] }
 0x4fd   : > { %v17802_v56 = vadd.f32 %v17801_v61, %v17737_v1  ;;  %v18812_v26 = vpop.f32.mrb[34].mxu1 }
 0x4fe   : > { %v17813_v60 = vadd.f32 %v18812_v26, %v17748_v15  ;;  %v17804_v25 = vpop.f32.mrb[35].mxu1 }
 0x4ff   : > { %v17805_v13 = vadd.f32 %v17804_v25, %v17740_v33 }
 0x500   : > { %v17819_v59 = vpack.c.bf16 %v17813_v60, %v17810_v41 }
 0x501   : > { %v17818_v8 = vpack.c.bf16 %v17805_v13, %v17802_v56 }
 0x502   : > { %18616 = vst [vmem:[%s18977_s7 + $0x18] sm:$0xff] %v17819_v59   ;;  %v17862_v52 = vunpack.c.l.bf16 %v17819_v59  ;;  %v17863_v44 = vunpack.c.h.bf16 %v17819_v59 }
 0x503   : > { %18615 = vst [vmem:[%s18977_s7 + $0x10] sm:$0xff] %v17818_v8   ;;  %v17860_v12 = vunpack.c.l.bf16 %v17818_v8  ;;  %v17861_v18 = vunpack.c.h.bf16 %v17818_v8 }
 0x504   : > { %v17887_v33 = vmul.f32 %v17862_v52, %v17862_v52  ;;  %v17888_v45 = vmul.f32 %v17863_v44, %v17863_v44 }
 0x505   : > { %v17885_v30 = vmul.f32 %v17860_v12, %v17860_v12  ;;  %v17886_v23 = vmul.f32 %v17861_v18, %v17861_v18 }
 0x52d   : > { %v18807_v53 = vpop.f32.mrb[32].mxu0 }
 0x52e   : > { %v17794_v35 = vadd.f32 %v18807_v53, %v17729_v21  ;;  %v17785_v4 = vpop.f32.mrb[33].mxu0 }
 0x52f   : > { %v17786_v9 = vadd.f32 %v17785_v4, %v17721_v36  ;;  %v18808_v51 = vpop.f32.mrb[34].mxu0 }
 0x530   : > { %v17797_v24 = vadd.f32 %v18808_v51, %v17732_v54  ;;  %v17788_v0 = vpop.f32.mrb[35].mxu0 }
 0x531   : > { %v17789_v39 = vadd.f32 %v17788_v0, %v17724_v27 }
 0x532   : > { %v17817_v63 = vpack.c.bf16 %v17797_v24, %v17794_v35 }
 0x533   : > { %v17816_v37 = vpack.c.bf16 %v17789_v39, %v17786_v9 }
 0x534   : > { %18614 = vst [vmem:[%s18977_s7 + $0x8] sm:$0xff] %v17817_v63   ;;  %v17858_v10 = vunpack.c.l.bf16 %v17817_v63  ;;  %v17859_v57 = vunpack.c.h.bf16 %v17817_v63 }
 0x535   : > { %18583 = vst [vmem:[%s18977_s7] sm:$0xff] %v17816_v37   ;;  %v17856_v40 = vunpack.c.l.bf16 %v17816_v37  ;;  %v17857_v29 = vunpack.c.h.bf16 %v17816_v37 }
 0x536   : > { %v17883_v20 = vmul.f32 %v17858_v10, %v17858_v10  ;;  %v17884_v32 = vmul.f32 %v17859_v57, %v17859_v57 }
 0x537   : > { %v17865_v6 = vadd.f32 %v17857_v29, %v17856_v40  ;;  %v17881_v3 = vmul.f32 %v17856_v40, %v17856_v40  ;;  %v17882_v49 = vmul.f32 %v17857_v29, %v17857_v29 }
 0x539   : > { %v17866_v42 = vadd.f32 %v17865_v6, %v17858_v10  ;;  %v17889_v19 = vadd.f32 %v17882_v49, %v17881_v3 }
 0x53b   : > { %v17867_v2 = vadd.f32 %v17866_v42, %v17859_v57  ;;  %v17890_v62 = vadd.f32 %v17889_v19, %v17883_v20 }
 0x53d   : > { %v17868_v46 = vadd.f32 %v17867_v2, %v17860_v12  ;;  %v17891_v7 = vadd.f32 %v17890_v62, %v17884_v32 }
 0x53f   : > { %v17869_v22 = vadd.f32 %v17868_v46, %v17861_v18  ;;  %v17892_v1 = vadd.f32 %v17891_v7, %v17885_v30 }
 0x541   : > { %v17870_v21 = vadd.f32 %v17869_v22, %v17862_v52  ;;  %v17893_v11 = vadd.f32 %v17892_v1, %v17886_v23 }
 0x543   : > { %v17871_v16 = vadd.f32 %v17870_v21, %v17863_v44  ;;  %v17894_v55 = vadd.f32 %v17893_v11, %v17887_v33 }
 0x545   : > { %v17872_v38 = vrot.slane %v17871_v16, 4  ;;  %v17895_v48 = vadd.f32 %v17894_v55, %v17888_v45 }
 0x547   : > { %v17873_v36 = vadd.f32 %v17872_v38, %v17871_v16  ;;  %v17896_v27 = vrot.slane %v17895_v48, 4 }
 0x549   : > { %v17874_v54 = vrot.slane %v17873_v36, 2  ;;  %v17897_v58 = vadd.f32 %v17896_v27, %v17895_v48 }
 0x54b   : > { %v17875_v47 = vadd.f32 %v17874_v54, %v17873_v36  ;;  %v17898_v43 = vrot.slane %v17897_v58, 2 }
 0x54d   : > { %v17876_v28 = vrot.slane %v17875_v47, 1  ;;  %v17899_v34 = vadd.f32 %v17898_v43, %v17897_v58 }
 0x54f   : > { %v17877_v31 = vadd.f32 %v17876_v28, %v17875_v47  ;;  %v17900_v17 = vrot.slane %v17899_v34, 1 }
 0x551   : > { %v17878_v15 = vadd.f32 %v17877_v31, %v17864_v50  ;;  %v17901_v14 = vadd.f32 %v17900_v17, %v17899_v34 }
 0x553   : > { %17879 = vst [vmem:[%s23421_s6] sm:$0x1] %v17878_v15  ;;  %v17902_v41 = vadd.f32 %v17901_v14, %v17880_v5 }
 0x555   : > { %17903 = vst [vmem:[%s23421_s6 + $0x1] sm:$0x1] %v17902_v41 }
 0x556 PF: > { %s17_s21 = sadd.s32 1, %s18921_s21  }
 0x557   : > { %p14_p5 = scmp.ge.s32.totalorder %s17_s21, 4  }
 0x559   :  { %16 = sbr.rel (!%p14_p5) target bundleno = 1 (0x1), region = 84 }

</bundles_post_ra>
